<compile_context>
chip_gen: v7x
topology: tpu7x:2x2x1
jax: 0.10.0
libtpu: 0.0.40
codegen_flags: <defaults>
</compile_context>

<pallas_src>
import functools
import math

import jax
import jax.numpy as jnp
from jax.experimental import pallas as pl
from jax.experimental.pallas import tpu as pltpu

# ----------------------------- configuration --------------------------------
B = 2                 # batch
N_IN = 16             # input feature channels
T_LEN = 16            # sequence length
N_EMBD = 32           # total embedding dim (vis + graph)
N_HEAD = 4
N_EMBD_KS = 3
MAX_LEN = 64
ARCH = (2, 2, 2)      # (#embd convs, #stem blocks, #branch blocks)
SCALE_FACTOR = 2
NUM_NODE = 8
NUM_CLASSES = 10

GRAPH_EMBD = N_EMBD // 8          # 4
VIS_EMBD = N_EMBD - GRAPH_EMBD    # 28  (use_gcn=True path)
LN_EPS = 1e-5
NEG_INF = -1e30                   # finite stand-in for -inf (no NaN on fully-masked rows)

F32 = jnp.float32
BF16 = jnp.bfloat16


# ---------------------------- in-kernel helpers ------------------------------

def _layer_norm(z, g, b):
    # ActionFormer channel LayerNorm (over last dim, biased variance).
    mu = jnp.mean(z, axis=-1, keepdims=True)
    zc = z - mu
    var = jnp.mean(zc * zc, axis=-1, keepdims=True)
    return zc / jnp.sqrt(var + LN_EPS) * g + b


def _gelu_exact(x):
    # erf-based GELU; erf via Abramowitz-Stegun 7.1.26 (abs err ~1.5e-7) on VPU/EUP ops.
    z = x * 0.7071067811865476
    a = jnp.abs(z)
    t = 1.0 / (1.0 + 0.3275911 * a)
    poly = t * (0.254829592 + t * (-0.284496736 + t * (1.421413741
                + t * (-1.453152027 + t * 1.061405429))))
    erf_a = 1.0 - poly * jnp.exp(-a * a)
    erf = jnp.where(z >= 0.0, erf_a, -erf_a)
    return 0.5 * x * (1.0 + erf)


def _shift_prev(z, fill):
    # r[i] = z[i-1], r[0] = fill  (sublane roll on the XLU + boundary mask).
    r = pltpu.roll(z, shift=1, axis=0)
    row = jax.lax.broadcasted_iota(jnp.int32, z.shape, 0)
    return jnp.where(row >= 1, r, fill)


def _shift_next(z, fill):
    # r[i] = z[i+1], r[T-1] = fill.
    t = z.shape[0]
    r = pltpu.roll(z, shift=t - 1, axis=0)
    row = jax.lax.broadcasted_iota(jnp.int32, z.shape, 0)
    return jnp.where(row <= t - 2, r, fill)


def _deinterleave_matrix(t, to, bo):
    # (3*bo, t) selection matrix, blocks start at sublane-aligned offsets 0 / bo / 2*bo:
    #   rows [0, to)        pick x[2i]        (even rows)
    #   rows [bo, bo+to)    pick x[2i+1]      (odd rows)
    #   rows [2bo, 2bo+to)  pick x[2i-1]      (odd rows shifted; row 2bo selects nothing -> 0)
    r = jax.lax.broadcasted_iota(jnp.int32, (3 * bo, t), 0)
    c = jax.lax.broadcasted_iota(jnp.int32, (3 * bo, t), 1)
    even = (r < to) & (c == 2 * r)
    odd = (r >= bo) & (r < bo + to) & (c == 2 * (r - bo) + 1)
    prevodd = (r >= 2 * bo + 1) & (r < 2 * bo + to) & (c == 2 * (r - 2 * bo) - 1)
    return (even | odd | prevodd).astype(F32)


def _mha(q, k, v, m_row, n_head, hs):
    # Masked multi-head attention using per-head lane masks (no unaligned lane slicing).
    to, c = q.shape
    scale = 1.0 / math.sqrt(hs)
    lane = jax.lax.broadcasted_iota(jnp.int32, (1, c), 1)
    qs = q * scale
    masks = [((lane >= h * hs) & (lane < (h + 1) * hs)).astype(F32) for h in range(n_head)]

    def softmax_masked(s):
        s = jnp.where(m_row > 0.0, s, NEG_INF)
        p = jnp.exp(s - jnp.max(s, axis=-1, keepdims=True))
        p = p * pl.reciprocal(jnp.sum(p, axis=-1, keepdims=True), approx=True)
        return p * m_row                               # == masking V rows by kv_mask

    if to % 8 == 0:
        # Batch all heads: stack masked queries along sublanes -> 2 MXU pushes total.
        q_stack = jnp.concatenate([qs * mh for mh in masks], axis=0)       # (H*To, C)
        s = jax.lax.dot_general(q_stack.astype(BF16), k.astype(BF16),
                                (((1,), (1,)), ((), ())),
                                preferred_element_type=F32)                # (H*To, To)
        p = softmax_masked(s)
        o = jnp.dot(p.astype(BF16), v.astype(BF16), preferred_element_type=F32)
        att_in = jnp.zeros((to, c), F32)
        for h in range(n_head):
            att_in = att_in + o[h * to:(h + 1) * to] * masks[h]
    else:
        # Tiny (To < 8) fallback: per-head loop, still mask-based (no lane slicing).
        att_in = jnp.zeros((to, c), F32)
        for h in range(n_head):
            s = jax.lax.dot_general((qs * masks[h]).astype(BF16), k.astype(BF16),
                                    (((1,), (1,)), ((), ())),
                                    preferred_element_type=F32)
            p = softmax_masked(s)
            att_in = att_in + jnp.dot(p.astype(BF16), v.astype(BF16),
                                      preferred_element_type=F32) * masks[h]
    return att_in


def _tblock(x, m_col, m_row, vecs, cw, wq, wk, wv, wo, fc1w, fc1b, fc2w, *, n_head, stride):
    # One TransformerBlock: LN1 -> depthwise q/k/v conv (k=3, stride) -> per-path LN ->
    # 1x1 q/k/v proj -> masked MHA -> out-proj -> (max-pool | identity) skip -> LN2 -> MLP.
    t, c = x.shape
    to = t // stride
    hs = c // n_head

    # hoist all per-channel parameter rows once
    g1, b1 = vecs[0:1], vecs[1:2]
    gq, bq = vecs[2:3], vecs[3:4]
    gk, bk = vecs[4:5], vecs[5:6]
    gv, bv = vecs[6:7], vecs[7:8]
    pbq, pbk, pbv, pbo = vecs[8:9], vecs[9:10], vecs[10:11], vecs[11:12]
    g2, b2 = vecs[12:13], vecs[13:14]
    fc2b = vecs[14:15]

    if stride == 1:
        xln = _layer_norm(x, g1, b1)
        prev, cur, nxt = _shift_prev(xln, 0.0), xln, _shift_next(xln, 0.0)
        skip = x
    else:
        # One de-interleave matmul yields even / odd / odd-shifted rows; everything
        # downstream (LN, convs, attention, MLP) then runs at output resolution To.
        bo = max(to, 8)
        de = _deinterleave_matrix(t, to, bo)
        xd = jnp.dot(de, x, preferred_element_type=F32)          # (3*bo, C)
        x_even = xd[0:to]
        x_odd = xd[bo:bo + to]
        x_prevodd = xd[2 * bo:2 * bo + to]
        row_o = jax.lax.broadcasted_iota(jnp.int32, (to, c), 0)
        cur = _layer_norm(x_even, g1, b1)                         # ln1(x)[2i]
        nxt = _layer_norm(x_odd, g1, b1)                          # ln1(x)[2i+1]
        prev = jnp.where(row_o >= 1, _layer_norm(x_prevodd, g1, b1), 0.0)   # ln1(x)[2i-1]
        # MaxPool1d(kernel=3, stride=2, padding=1) skip on raw x
        skip = jnp.maximum(jnp.maximum(jnp.where(row_o >= 1, x_prevodd, NEG_INF),
                                       x_even), x_odd)

    def qkv_path(path, g, b, pb, w):
        taps = cw[path]                                           # (3, C) depthwise taps
        z = prev * taps[0:1] + cur * taps[1:2] + nxt * taps[2:3]
        z = z * m_col                                             # MaskedConv1D output mask
        z = _layer_norm(z, g, b)
        return jnp.dot(z.astype(BF16), w, preferred_element_type=F32) + pb

    q = qkv_path(0, gq, bq, pbq, wq)
    k = qkv_path(1, gk, bk, pbk, wk)
    v = qkv_path(2, gv, bv, pbv, wv)

    att_in = _mha(q, k, v, m_row, n_head, hs)
    att = (jnp.dot(att_in.astype(BF16), wo, preferred_element_type=F32) + pbo) * m_col

    out = skip * m_col + att

    h = _layer_norm(out, g2, b2)
    h = jnp.dot(h.astype(BF16), fc1w, preferred_element_type=F32) + fc1b
    h = _gelu_exact(h)
    h = jnp.dot(h.astype(BF16), fc2w, preferred_element_type=F32) + fc2b
    return out + h * m_col


# =============================== Pallas kernels ==============================

def _stem_kernel(x_ref, mc_ref, mr_ref, ew0_ref, eb0_ref, ew1_ref, eb1_ref,
                 vecs_ref, convs_ref, mats_ref, fc1w_ref, fc1b_ref, fc2w_ref,
                 o_ref, *, n_head):
    x = x_ref[0]                                   # (T, Cin)
    mc = mc_ref[0]                                 # (T, 1)
    mr = mr_ref[0]                                 # (1, T)

    # -------- embedding stem: two dense MaskedConv1D(k=3, "same", bias) + ReLU --------
    h = x
    for w_ref, b_ref in ((ew0_ref, eb0_ref), (ew1_ref, eb1_ref)):
        prev = _shift_prev(h, 0.0).astype(BF16)
        nxt = _shift_next(h, 0.0).astype(BF16)
        acc = (jnp.dot(prev, w_ref[0], preferred_element_type=F32)
               + jnp.dot(h.astype(BF16), w_ref[1], preferred_element_type=F32)
               + jnp.dot(nxt, w_ref[2], preferred_element_type=F32)
               + b_ref[...])
        h = jnp.maximum(acc * mc, 0.0)             # MaskedConv1D (mask output) + ReLU

    # -------- stem transformer blocks (stride 1, full attention) --------
    for bi in range(vecs_ref.shape[0]):
        h = _tblock(h, mc, mr, vecs_ref[bi], convs_ref[bi],
                    mats_ref[bi, 0], mats_ref[bi, 1], mats_ref[bi, 2], mats_ref[bi, 3],
                    fc1w_ref[bi], fc1b_ref[bi], fc2w_ref[bi],
                    n_head=n_head, stride=1)

    # write into a zero-padded (T, N_EMBD) slab so the branch kernel can simply ADD the
    # lane-placed GCN features (== channel concat) without any in-kernel concatenation.
    o_ref[...] = jnp.zeros(o_ref.shape, o_ref.dtype)
    o_ref[0, :, :h.shape[1]] = h


def _branch_kernel(xvis_ref, bbox_ref, cls_ref, adj_ref,
                   m1c_ref, m1r_ref, m2c_ref, m2r_ref,
                   nodew_ref, nodeb_ref, gcnw_ref,
                   vecs_ref, convs_ref, mats_ref, fc1w_ref, fc1b_ref, fc2w_ref,
                   o0_ref, o1_ref, o2_ref, *, n_head, num_node):
    t = xvis_ref.shape[1]
    tn = bbox_ref.shape[1]

    # -------- GCN fused with the channel concat --------
    # TODO(synk): GCNBlock source was not shipped with the backbone; this is a representative
    # fused 1-layer GCN (bbox linear + class embedding -> block-diag adjacency aggregation ->
    # linear -> ReLU -> per-frame node mean pool) feeding the graph channels.
    node = (jnp.dot(bbox_ref[0], nodew_ref[...], preferred_element_type=F32)
            + nodeb_ref[...] + cls_ref[0])                                   # (T*N, D)
    agg = jnp.dot(adj_ref[0], node.astype(BF16), preferred_element_type=F32)  # (T*N, D)
    hg = jnp.maximum(jnp.dot(agg, gcnw_ref[...], preferred_element_type=F32), 0.0)  # (T*N, C)
    pr = jax.lax.broadcasted_iota(jnp.int32, (t, tn), 0)
    pc = jax.lax.broadcasted_iota(jnp.int32, (t, tn), 1)
    pool = jnp.where((pc >= pr * num_node) & (pc < (pr + 1) * num_node),
                     1.0 / num_node, 0.0)                                    # (T, T*N)
    # gcn weights are lane-placed in [VIS_EMBD:N_EMBD]; vis lanes of xvis already hold the
    # stem output and its graph lanes are zero -> the add IS the channel concat.
    x = xvis_ref[0] + jnp.dot(pool, hg, preferred_element_type=F32)          # (T, N_EMBD)
    o0_ref[...] = x[None]

    # -------- FPN branch transformer blocks (stride = scale_factor) --------
    mcols = (m1c_ref, m2c_ref)
    mrows = (m1r_ref, m2r_ref)
    orefs = (o1_ref, o2_ref)
    for bi in range(vecs_ref.shape[0]):
        x = _tblock(x, mcols[bi][0], mrows[bi][0], vecs_ref[bi], convs_ref[bi],
                    mats_ref[bi, 0], mats_ref[bi, 1], mats_ref[bi, 2], mats_ref[bi, 3],
                    fc1w_ref[bi], fc1b_ref[bi], fc2w_ref[bi],
                    n_head=n_head, stride=SCALE_FACTOR)
        orefs[bi][...] = x[None]


# ============================ Pallas call wrappers ===========================

def pallas_stem(x, m_col, m_row, params):
    Bn, T, Cin = x.shape
    C = VIS_EMBD
    e0, e1 = params['embd']
    s = params['stem']
    nb = s['vecs'].shape[0]
    kern = functools.partial(_stem_kernel, n_head=N_HEAD)
    return pl.pallas_call(
        kern,
        out_shape=jax.ShapeDtypeStruct((Bn, T, N_EMBD), jnp.float32),
        grid=(Bn,),
        in_specs=[
            pl.BlockSpec((1, T, Cin), lambda i: (i, 0, 0)),
            pl.BlockSpec((1, T, 1), lambda i: (i, 0, 0)),
            pl.BlockSpec((1, 1, T), lambda i: (i, 0, 0)),
            pl.BlockSpec((3, Cin, C), lambda i: (0, 0, 0)),
            pl.BlockSpec((1, C), lambda i: (0, 0)),
            pl.BlockSpec((3, C, C), lambda i: (0, 0, 0)),
            pl.BlockSpec((1, C), lambda i: (0, 0)),
            pl.BlockSpec((nb, 15, C), lambda i: (0, 0, 0)),
            pl.BlockSpec((nb, 3, 3, C), lambda i: (0, 0, 0, 0)),
            pl.BlockSpec((nb, 4, C, C), lambda i: (0, 0, 0, 0)),
            pl.BlockSpec((nb, C, 4 * C), lambda i: (0, 0, 0)),
            pl.BlockSpec((nb, 1, 4 * C), lambda i: (0, 0, 0)),
            pl.BlockSpec((nb, 4 * C, C), lambda i: (0, 0, 0)),
        ],
        out_specs=pl.BlockSpec((1, T, N_EMBD), lambda i: (i, 0, 0)),
        compiler_params=pltpu.CompilerParams(dimension_semantics=("parallel",)),
    )(x, m_col, m_row, e0['w'], e0['b'], e1['w'], e1['b'],
      s['vecs'], s['convs'], s['mats'], s['fc1_w'], s['fc1_b'], s['fc2_w'])


def pallas_branch(xvis, bbox_flat, cls_flat, adj_bd, m1c, m1r, m2c, m2r,
                  gcn_p, gcn_w_wide, blk_p):
    Bn, T, C = xvis.shape
    TN = bbox_flat.shape[1]
    D = GRAPH_EMBD
    T1, T2 = T // SCALE_FACTOR, T // (SCALE_FACTOR * SCALE_FACTOR)
    nb = blk_p['vecs'].shape[0]
    kern = functools.partial(_branch_kernel, n_head=N_HEAD, num_node=NUM_NODE)
    return pl.pallas_call(
        kern,
        out_shape=(jax.ShapeDtypeStruct((Bn, T, C), jnp.float32),
                   jax.ShapeDtypeStruct((Bn, T1, C), jnp.float32),
                   jax.ShapeDtypeStruct((Bn, T2, C), jnp.float32)),
        grid=(Bn,),
        in_specs=[
            pl.BlockSpec((1, T, C), lambda i: (i, 0, 0)),
            pl.BlockSpec((1, TN, 4), lambda i: (i, 0, 0)),
            pl.BlockSpec((1, TN, D), lambda i: (i, 0, 0)),
            pl.BlockSpec((1, TN, TN), lambda i: (i, 0, 0)),
            pl.BlockSpec((1, T1, 1), lambda i: (i, 0, 0)),
            pl.BlockSpec((1, 1, T1), lambda i: (i, 0, 0)),
            pl.BlockSpec((1, T2, 1), lambda i: (i, 0, 0)),
            pl.BlockSpec((1, 1, T2), lambda i: (i, 0, 0)),
            pl.BlockSpec((4, D), lambda i: (0, 0)),
            pl.BlockSpec((1, D), lambda i: (0, 0)),
            pl.BlockSpec((D, C), lambda i: (0, 0)),
            pl.BlockSpec((nb, 15, C), lambda i: (0, 0, 0)),
            pl.BlockSpec((nb, 3, 3, C), lambda i: (0, 0, 0, 0)),
            pl.BlockSpec((nb, 4, C, C), lambda i: (0, 0, 0, 0)),
            pl.BlockSpec((nb, C, 4 * C), lambda i: (0, 0, 0)),
            pl.BlockSpec((nb, 1, 4 * C), lambda i: (0, 0, 0)),
            pl.BlockSpec((nb, 4 * C, C), lambda i: (0, 0, 0)),
        ],
        out_specs=(pl.BlockSpec((1, T, C), lambda i: (i, 0, 0)),
                   pl.BlockSpec((1, T1, C), lambda i: (i, 0, 0)),
                   pl.BlockSpec((1, T2, C), lambda i: (i, 0, 0))),
        compiler_params=pltpu.CompilerParams(dimension_semantics=("parallel",)),
    )(xvis, bbox_flat, cls_flat, adj_bd, m1c, m1r, m2c, m2r,
      gcn_p['node_w'], gcn_p['node_b'], gcn_w_wide,
      blk_p['vecs'], blk_p['convs'], blk_p['mats'],
      blk_p['fc1_w'], blk_p['fc1_b'], blk_p['fc2_w'])


# ================================ model glue =================================

def backbone_forward(params, bbox, bbox_class, edge_map, x, mask):
    # x: (B, C, T) float32, mask: (B, 1, T) bool  (PyTorch NCT convention)
    Bn, _, T = x.shape
    xt = jnp.transpose(x, (0, 2, 1)).astype(jnp.float32)           # (B, T, Cin)
    m_col = mask[:, 0, :, None].astype(jnp.float32)                # (B, T, 1)
    m_row = mask.astype(jnp.float32)                               # (B, 1, T)

    # kernel 1: embedding stem + stem transformer blocks (use_abs_pe=False -> no PE branch)
    xvis = pallas_stem(xt, m_col, m_row, params)                   # (B, T, N_EMBD), graph lanes 0

    # GCN glue (one-time XLA prep): class-embed gather, node flatten, block-diag adjacency,
    # gcn output weight lane-placed into [VIS_EMBD:N_EMBD] so the in-kernel add == concat.
    gp = params['gcn']
    cls_flat = gp['class_emb'][bbox_class].reshape(Bn, T * NUM_NODE, GRAPH_EMBD)
    bbox_flat = bbox.reshape(Bn, T * NUM_NODE, 4)
    eye_t = jnp.eye(T, dtype=jnp.float32)
    adj_bd = (edge_map[:, :, :, None, :] * eye_t[None, :, None, :, None]
              ).reshape(Bn, T * NUM_NODE, T * NUM_NODE).astype(jnp.bfloat16)
    gcn_w_wide = jnp.zeros((GRAPH_EMBD, N_EMBD), jnp.float32).at[:, VIS_EMBD:].set(gp['gcn_w'])

    # F.interpolate(mask, T//s, mode='nearest') == take every `stride`-th position.
    m1c, m2c = m_col[:, ::SCALE_FACTOR], m_col[:, ::SCALE_FACTOR ** 2]
    m1r, m2r = m_row[:, :, ::SCALE_FACTOR], m_row[:, :, ::SCALE_FACTOR ** 2]

    # kernel 2: GCN + concat + both FPN branch blocks -> all three pyramid levels
    f0, f1, f2 = pallas_branch(xvis, bbox_flat, cls_flat, adj_bd,
                               m1c, m1r, m2c, m2r, gp, gcn_w_wide, params['branch'])

    out_feats = tuple(jnp.transpose(f, (0, 2, 1)) for f in (f0, f1, f2))
    out_masks = (mask, mask[:, :, ::SCALE_FACTOR], mask[:, :, ::SCALE_FACTOR ** 2])
    return out_feats, out_masks


# ============================ deterministic params ===========================

def init_params(key):
    keys = iter(jax.random.split(key, 128))

    def w(shape, scale=0.1):
        return scale * jax.random.normal(next(keys), shape, dtype=jnp.float32)

    def mk_blocks(n_blocks, dim):
        ones = jnp.ones((dim,), jnp.float32)
        zeros = jnp.zeros((dim,), jnp.float32)
        # packed vecs rows: 0/1 ln1 g,b | 2/3 q-ln | 4/5 k-ln | 6/7 v-ln |
        #                   8/9/10 q/k/v 1x1 bias | 11 out-proj bias | 12/13 ln2 | 14 fc2 bias
        vec1 = jnp.stack([ones, zeros, ones, zeros, ones, zeros, ones, zeros,
                          zeros, zeros, zeros, zeros, ones, zeros, zeros])
        return {
            'vecs': jnp.stack([vec1] * n_blocks),
            'convs': jnp.stack([jnp.stack([w((3, dim)) for _ in range(3)])
                                for _ in range(n_blocks)]),                     # (n,3,3,C)
            'mats': jnp.stack([jnp.stack([w((dim, dim)) for _ in range(4)])
                               for _ in range(n_blocks)]).astype(jnp.bfloat16), # q/k/v/out
            'fc1_w': jnp.stack([w((dim, 4 * dim)) for _ in range(n_blocks)]).astype(jnp.bfloat16),
            'fc1_b': jnp.zeros((n_blocks, 1, 4 * dim), jnp.float32),
            'fc2_w': jnp.stack([w((4 * dim, dim)) for _ in range(n_blocks)]).astype(jnp.bfloat16),
        }

    assert ARCH[0] == 2, "stem kernel is specialized for two embedding conv layers"
    params = {
        'embd': [{'w': w((N_EMBD_KS, N_IN, VIS_EMBD)).astype(jnp.bfloat16),
                  'b': jnp.zeros((1, VIS_EMBD), jnp.float32)},
                 {'w': w((N_EMBD_KS, VIS_EMBD, VIS_EMBD)).astype(jnp.bfloat16),
                  'b': jnp.zeros((1, VIS_EMBD), jnp.float32)}],
        'stem': mk_blocks(ARCH[1], VIS_EMBD),
        'branch': mk_blocks(ARCH[2], N_EMBD),
        'gcn': {
            'node_w': w((4, GRAPH_EMBD)),
            'node_b': jnp.zeros((1, GRAPH_EMBD), jnp.float32),
            'class_emb': w((NUM_CLASSES, GRAPH_EMBD)),
            'gcn_w': w((GRAPH_EMBD, GRAPH_EMBD)),
        },
    }
    return params


# ==================================== main ===================================

if __name__ == "__main__":
    key = jax.random.PRNGKey(0)
    kp, kx, kb, kc, ke = jax.random.split(key, 5)
    params = init_params(kp)

    x = jax.random.normal(kx, (B, N_IN, T_LEN), jnp.float32)
    lengths = jnp.array([T_LEN, 12])
    mask = (jnp.arange(T_LEN)[None, :] < lengths[:, None])[:, None, :]   # (B,1,T) bool
    bbox = jax.random.uniform(kb, (B, T_LEN, NUM_NODE, 4), jnp.float32)
    bbox_class = jax.random.randint(kc, (B, T_LEN, NUM_NODE), 0, NUM_CLASSES)
    edge_map = jax.random.uniform(ke, (B, T_LEN, NUM_NODE, NUM_NODE), jnp.float32)

    fwd = jax.jit(backbone_forward)
    feats, masks = fwd(params, bbox, bbox_class, edge_map, x, mask)
    jax.block_until_ready(feats)
    jax.block_until_ready(masks)

    expected_T = [T_LEN // (SCALE_FACTOR ** i) for i in range(1 + ARCH[2])]
    assert len(feats) == 1 + ARCH[2] and len(masks) == 1 + ARCH[2]
    for f, mm, t in zip(feats, masks, expected_T):
        assert f.shape == (B, N_EMBD, t), f.shape
        assert mm.shape == (B, 1, t) and mm.dtype == jnp.bool_, (mm.shape, mm.dtype)
        assert bool(jnp.all(jnp.isfinite(f)))

    print("KERNEL_OK")
</pallas_src>

<mosaic_0001>
module attributes {stable_mosaic.version = 11 : i64} {
  func.func @_stem_kernel(%arg0: i32, %arg1: memref<1x16x16xf32, #tpu.memory_space<vmem>>, %arg2: memref<1x16x1xf32, #tpu.memory_space<vmem>>, %arg3: memref<1x1x16xf32, #tpu.memory_space<vmem>>, %arg4: memref<3x16x28xbf16, #tpu.memory_space<vmem>>, %arg5: memref<1x28xf32, #tpu.memory_space<vmem>>, %arg6: memref<3x28x28xbf16, #tpu.memory_space<vmem>>, %arg7: memref<1x28xf32, #tpu.memory_space<vmem>>, %arg8: memref<2x15x28xf32, #tpu.memory_space<vmem>>, %arg9: memref<2x3x3x28xf32, #tpu.memory_space<vmem>>, %arg10: memref<2x4x28x28xbf16, #tpu.memory_space<vmem>>, %arg11: memref<2x28x112xbf16, #tpu.memory_space<vmem>>, %arg12: memref<2x1x112xf32, #tpu.memory_space<vmem>>, %arg13: memref<2x112x28xbf16, #tpu.memory_space<vmem>>, %arg14: memref<1x16x32xf32, #tpu.memory_space<vmem>>) attributes {dimension_semantics = [#tpu.dimension_semantics<parallel>], iteration_bounds = array<i64: 2>, scalar_prefetch = 0 : i64, scratch_operands = 0 : i64, tpu.core_type = #tpu.core_type<tc>, window_params = [{transform_indices = @transform_0, window_bounds = array<i64: 1, 16, 16>}, {transform_indices = @transform_1, window_bounds = array<i64: 1, 16, 1>}, {transform_indices = @transform_2, window_bounds = array<i64: 1, 1, 16>}, {pipeline_mode = #tpu.pipeline_mode<synchronous>, transform_indices = @transform_3, window_bounds = array<i64: 3, 16, 28>}, {pipeline_mode = #tpu.pipeline_mode<synchronous>, transform_indices = @transform_4, window_bounds = array<i64: 1, 28>}, {pipeline_mode = #tpu.pipeline_mode<synchronous>, transform_indices = @transform_5, window_bounds = array<i64: 3, 28, 28>}, {pipeline_mode = #tpu.pipeline_mode<synchronous>, transform_indices = @transform_6, window_bounds = array<i64: 1, 28>}, {pipeline_mode = #tpu.pipeline_mode<synchronous>, transform_indices = @transform_7, window_bounds = array<i64: 2, 15, 28>}, {pipeline_mode = #tpu.pipeline_mode<synchronous>, transform_indices = @transform_8, window_bounds = array<i64: 2, 3, 3, 28>}, {pipeline_mode = #tpu.pipeline_mode<synchronous>, transform_indices = @transform_9, window_bounds = array<i64: 2, 4, 28, 28>}, {pipeline_mode = #tpu.pipeline_mode<synchronous>, transform_indices = @transform_10, window_bounds = array<i64: 2, 28, 112>}, {pipeline_mode = #tpu.pipeline_mode<synchronous>, transform_indices = @transform_11, window_bounds = array<i64: 2, 1, 112>}, {pipeline_mode = #tpu.pipeline_mode<synchronous>, transform_indices = @transform_12, window_bounds = array<i64: 2, 112, 28>}, {transform_indices = @transform_13, window_bounds = array<i64: 1, 16, 32>}]} {
    %c0 = arith.constant 0 : index
    %c0_0 = arith.constant 0 : index
    %c0_1 = arith.constant 0 : index
    %0 = vector.load %arg1[%c0, %c0_0, %c0_1] : memref<1x16x16xf32, #tpu.memory_space<vmem>>, vector<1x16x16xf32>
    %1 = vector.shape_cast %0 : vector<1x16x16xf32> to vector<16x16xf32>
    %c0_2 = arith.constant 0 : index
    %c0_3 = arith.constant 0 : index
    %c0_4 = arith.constant 0 : index
    %2 = vector.load %arg2[%c0_2, %c0_3, %c0_4] : memref<1x16x1xf32, #tpu.memory_space<vmem>>, vector<1x16x1xf32>
    %3 = vector.shape_cast %2 : vector<1x16x1xf32> to vector<16x1xf32>
    %c0_5 = arith.constant 0 : index
    %c0_6 = arith.constant 0 : index
    %c0_7 = arith.constant 0 : index
    %4 = vector.load %arg3[%c0_5, %c0_6, %c0_7] : memref<1x1x16xf32, #tpu.memory_space<vmem>>, vector<1x1x16xf32>
    %5 = vector.shape_cast %4 : vector<1x1x16xf32> to vector<1x16xf32>
    %c1_i32 = arith.constant 1 : i32
    %6 = tpu.dynamic_rotate %1 by %c1_i32 dim 0 : vector<16x16xf32>, i32 -> vector<16x16xf32>
    %7 = tpu.iota {dimensions = array<i32: 0>} : vector<16x16xi32>
    %c1_i32_8 = arith.constant 1 : i32
    %8 = vector.broadcast %c1_i32_8 : i32 to vector<16x16xi32>
    %9 = arith.cmpi sge, %7, %8 : vector<16x16xi32>
    %cst = arith.constant 0.000000e+00 : f32
    %10 = vector.broadcast %cst : f32 to vector<16x16xf32>
    %11 = arith.select %9, %6, %10 : vector<16x16xi1>, vector<16x16xf32>
    %12 = arith.truncf %11 : vector<16x16xf32> to vector<16x16xbf16>
    %c15_i32 = arith.constant 15 : i32
    %13 = tpu.dynamic_rotate %1 by %c15_i32 dim 0 : vector<16x16xf32>, i32 -> vector<16x16xf32>
    %14 = tpu.iota {dimensions = array<i32: 0>} : vector<16x16xi32>
    %c14_i32 = arith.constant 14 : i32
    %15 = vector.broadcast %c14_i32 : i32 to vector<16x16xi32>
    %16 = arith.cmpi sle, %14, %15 : vector<16x16xi32>
    %cst_9 = arith.constant 0.000000e+00 : f32
    %17 = vector.broadcast %cst_9 : f32 to vector<16x16xf32>
    %18 = arith.select %16, %13, %17 : vector<16x16xi1>, vector<16x16xf32>
    %19 = arith.truncf %18 : vector<16x16xf32> to vector<16x16xbf16>
    %c0_10 = arith.constant 0 : index
    %c0_11 = arith.constant 0 : index
    %c0_12 = arith.constant 0 : index
    %20 = vector.load %arg4[%c0_10, %c0_11, %c0_12] : memref<3x16x28xbf16, #tpu.memory_space<vmem>>, vector<1x16x28xbf16>
    %21 = vector.shape_cast %20 : vector<1x16x28xbf16> to vector<16x28xbf16>
    %cst_13 = arith.constant dense<0.000000e+00> : vector<16x28xf32>
    %22 = tpu.matmul %12, %21, %cst_13 {dimension_numbers = #tpu.dot_dimension_numbers<[1], [0], [0], [1], [0, 0, 1, 1], [], []>} : vector<16x16xbf16>, vector<16x28xbf16>, vector<16x28xf32> -> vector<16x28xf32>
    %23 = arith.truncf %1 : vector<16x16xf32> to vector<16x16xbf16>
    %c1 = arith.constant 1 : index
    %c0_14 = arith.constant 0 : index
    %c0_15 = arith.constant 0 : index
    %24 = vector.load %arg4[%c1, %c0_14, %c0_15] : memref<3x16x28xbf16, #tpu.memory_space<vmem>>, vector<1x16x28xbf16>
    %25 = vector.shape_cast %24 : vector<1x16x28xbf16> to vector<16x28xbf16>
    %cst_16 = arith.constant dense<0.000000e+00> : vector<16x28xf32>
    %26 = tpu.matmul %23, %25, %cst_16 {dimension_numbers = #tpu.dot_dimension_numbers<[1], [0], [0], [1], [0, 0, 1, 1], [], []>} : vector<16x16xbf16>, vector<16x28xbf16>, vector<16x28xf32> -> vector<16x28xf32>
    %27 = arith.addf %22, %26 : vector<16x28xf32>
    %c2 = arith.constant 2 : index
    %c0_17 = arith.constant 0 : index
    %c0_18 = arith.constant 0 : index
    %28 = vector.load %arg4[%c2, %c0_17, %c0_18] : memref<3x16x28xbf16, #tpu.memory_space<vmem>>, vector<1x16x28xbf16>
    %29 = vector.shape_cast %28 : vector<1x16x28xbf16> to vector<16x28xbf16>
    %cst_19 = arith.constant dense<0.000000e+00> : vector<16x28xf32>
    %30 = tpu.matmul %19, %29, %cst_19 {dimension_numbers = #tpu.dot_dimension_numbers<[1], [0], [0], [1], [0, 0, 1, 1], [], []>} : vector<16x16xbf16>, vector<16x28xbf16>, vector<16x28xf32> -> vector<16x28xf32>
    %31 = arith.addf %27, %30 : vector<16x28xf32>
    %c0_20 = arith.constant 0 : index
    %c0_21 = arith.constant 0 : index
    %32 = vector.load %arg5[%c0_20, %c0_21] : memref<1x28xf32, #tpu.memory_space<vmem>>, vector<1x28xf32>
    %33 = vector.broadcast %32 : vector<1x28xf32> to vector<16x28xf32>
    %34 = arith.addf %31, %33 : vector<16x28xf32>
    %35 = vector.broadcast %3 : vector<16x1xf32> to vector<16x28xf32>
    %36 = arith.mulf %34, %35 : vector<16x28xf32>
    %cst_22 = arith.constant 0.000000e+00 : f32
    %37 = vector.broadcast %cst_22 : f32 to vector<16x28xf32>
    %38 = arith.maximumf %36, %37 : vector<16x28xf32>
    %c1_i32_23 = arith.constant 1 : i32
    %39 = tpu.dynamic_rotate %38 by %c1_i32_23 dim 0 : vector<16x28xf32>, i32 -> vector<16x28xf32>
    %40 = tpu.iota {dimensions = array<i32: 0>} : vector<16x28xi32>
    %c1_i32_24 = arith.constant 1 : i32
    %41 = vector.broadcast %c1_i32_24 : i32 to vector<16x28xi32>
    %42 = arith.cmpi sge, %40, %41 : vector<16x28xi32>
    %cst_25 = arith.constant 0.000000e+00 : f32
    %43 = vector.broadcast %cst_25 : f32 to vector<16x28xf32>
    %44 = arith.select %42, %39, %43 : vector<16x28xi1>, vector<16x28xf32>
    %45 = arith.truncf %44 : vector<16x28xf32> to vector<16x28xbf16>
    %c15_i32_26 = arith.constant 15 : i32
    %46 = tpu.dynamic_rotate %38 by %c15_i32_26 dim 0 : vector<16x28xf32>, i32 -> vector<16x28xf32>
    %47 = tpu.iota {dimensions = array<i32: 0>} : vector<16x28xi32>
    %c14_i32_27 = arith.constant 14 : i32
    %48 = vector.broadcast %c14_i32_27 : i32 to vector<16x28xi32>
    %49 = arith.cmpi sle, %47, %48 : vector<16x28xi32>
    %cst_28 = arith.constant 0.000000e+00 : f32
    %50 = vector.broadcast %cst_28 : f32 to vector<16x28xf32>
    %51 = arith.select %49, %46, %50 : vector<16x28xi1>, vector<16x28xf32>
    %52 = arith.truncf %51 : vector<16x28xf32> to vector<16x28xbf16>
    %c0_29 = arith.constant 0 : index
    %c0_30 = arith.constant 0 : index
    %c0_31 = arith.constant 0 : index
    %53 = vector.load %arg6[%c0_29, %c0_30, %c0_31] : memref<3x28x28xbf16, #tpu.memory_space<vmem>>, vector<1x28x28xbf16>
    %54 = vector.shape_cast %53 : vector<1x28x28xbf16> to vector<28x28xbf16>
    %cst_32 = arith.constant dense<0.000000e+00> : vector<16x28xf32>
    %55 = tpu.matmul %45, %54, %cst_32 {dimension_numbers = #tpu.dot_dimension_numbers<[1], [0], [0], [1], [0, 0, 1, 1], [], []>} : vector<16x28xbf16>, vector<28x28xbf16>, vector<16x28xf32> -> vector<16x28xf32>
    %56 = arith.truncf %38 : vector<16x28xf32> to vector<16x28xbf16>
    %c1_33 = arith.constant 1 : index
    %c0_34 = arith.constant 0 : index
    %c0_35 = arith.constant 0 : index
    %57 = vector.load %arg6[%c1_33, %c0_34, %c0_35] : memref<3x28x28xbf16, #tpu.memory_space<vmem>>, vector<1x28x28xbf16>
    %58 = vector.shape_cast %57 : vector<1x28x28xbf16> to vector<28x28xbf16>
    %cst_36 = arith.constant dense<0.000000e+00> : vector<16x28xf32>
    %59 = tpu.matmul %56, %58, %cst_36 {dimension_numbers = #tpu.dot_dimension_numbers<[1], [0], [0], [1], [0, 0, 1, 1], [], []>} : vector<16x28xbf16>, vector<28x28xbf16>, vector<16x28xf32> -> vector<16x28xf32>
    %60 = arith.addf %55, %59 : vector<16x28xf32>
    %c2_37 = arith.constant 2 : index
    %c0_38 = arith.constant 0 : index
    %c0_39 = arith.constant 0 : index
    %61 = vector.load %arg6[%c2_37, %c0_38, %c0_39] : memref<3x28x28xbf16, #tpu.memory_space<vmem>>, vector<1x28x28xbf16>
    %62 = vector.shape_cast %61 : vector<1x28x28xbf16> to vector<28x28xbf16>
    %cst_40 = arith.constant dense<0.000000e+00> : vector<16x28xf32>
    %63 = tpu.matmul %52, %62, %cst_40 {dimension_numbers = #tpu.dot_dimension_numbers<[1], [0], [0], [1], [0, 0, 1, 1], [], []>} : vector<16x28xbf16>, vector<28x28xbf16>, vector<16x28xf32> -> vector<16x28xf32>
    %64 = arith.addf %60, %63 : vector<16x28xf32>
    %c0_41 = arith.constant 0 : index
    %c0_42 = arith.constant 0 : index
    %65 = vector.load %arg7[%c0_41, %c0_42] : memref<1x28xf32, #tpu.memory_space<vmem>>, vector<1x28xf32>
    %66 = vector.broadcast %65 : vector<1x28xf32> to vector<16x28xf32>
    %67 = arith.addf %64, %66 : vector<16x28xf32>
    %68 = vector.broadcast %3 : vector<16x1xf32> to vector<16x28xf32>
    %69 = arith.mulf %67, %68 : vector<16x28xf32>
    %cst_43 = arith.constant 0.000000e+00 : f32
    %70 = vector.broadcast %cst_43 : f32 to vector<16x28xf32>
    %71 = arith.maximumf %69, %70 : vector<16x28xf32>
    %c0_44 = arith.constant 0 : index
    %c0_45 = arith.constant 0 : index
    %c0_46 = arith.constant 0 : index
    %72 = vector.load %arg8[%c0_44, %c0_45, %c0_46] : memref<2x15x28xf32, #tpu.memory_space<vmem>>, vector<1x15x28xf32>
    %73 = vector.shape_cast %72 : vector<1x15x28xf32> to vector<15x28xf32>
    %c0_47 = arith.constant 0 : index
    %c0_48 = arith.constant 0 : index
    %c0_49 = arith.constant 0 : index
    %c0_50 = arith.constant 0 : index
    %74 = vector.load %arg9[%c0_47, %c0_48, %c0_49, %c0_50] : memref<2x3x3x28xf32, #tpu.memory_space<vmem>>, vector<1x3x3x28xf32>
    %75 = vector.shape_cast %74 : vector<1x3x3x28xf32> to vector<3x3x28xf32>
    %c0_51 = arith.constant 0 : index
    %c0_52 = arith.constant 0 : index
    %c0_53 = arith.constant 0 : index
    %c0_54 = arith.constant 0 : index
    %76 = vector.load %arg10[%c0_51, %c0_52, %c0_53, %c0_54] : memref<2x4x28x28xbf16, #tpu.memory_space<vmem>>, vector<1x1x28x28xbf16>
    %77 = vector.shape_cast %76 : vector<1x1x28x28xbf16> to vector<28x28xbf16>
    %c0_55 = arith.constant 0 : index
    %c1_56 = arith.constant 1 : index
    %c0_57 = arith.constant 0 : index
    %c0_58 = arith.constant 0 : index
    %78 = vector.load %arg10[%c0_55, %c1_56, %c0_57, %c0_58] : memref<2x4x28x28xbf16, #tpu.memory_space<vmem>>, vector<1x1x28x28xbf16>
    %79 = vector.shape_cast %78 : vector<1x1x28x28xbf16> to vector<28x28xbf16>
    %c0_59 = arith.constant 0 : index
    %c2_60 = arith.constant 2 : index
    %c0_61 = arith.constant 0 : index
    %c0_62 = arith.constant 0 : index
    %80 = vector.load %arg10[%c0_59, %c2_60, %c0_61, %c0_62] : memref<2x4x28x28xbf16, #tpu.memory_space<vmem>>, vector<1x1x28x28xbf16>
    %81 = vector.shape_cast %80 : vector<1x1x28x28xbf16> to vector<28x28xbf16>
    %c0_63 = arith.constant 0 : index
    %c3 = arith.constant 3 : index
    %c0_64 = arith.constant 0 : index
    %c0_65 = arith.constant 0 : index
    %82 = vector.load %arg10[%c0_63, %c3, %c0_64, %c0_65] : memref<2x4x28x28xbf16, #tpu.memory_space<vmem>>, vector<1x1x28x28xbf16>
    %83 = vector.shape_cast %82 : vector<1x1x28x28xbf16> to vector<28x28xbf16>
    %c0_66 = arith.constant 0 : index
    %c0_67 = arith.constant 0 : index
    %c0_68 = arith.constant 0 : index
    %84 = vector.load %arg11[%c0_66, %c0_67, %c0_68] : memref<2x28x112xbf16, #tpu.memory_space<vmem>>, vector<1x28x112xbf16>
    %85 = vector.shape_cast %84 : vector<1x28x112xbf16> to vector<28x112xbf16>
    %c0_69 = arith.constant 0 : index
    %c0_70 = arith.constant 0 : index
    %c0_71 = arith.constant 0 : index
    %86 = vector.load %arg12[%c0_69, %c0_70, %c0_71] : memref<2x1x112xf32, #tpu.memory_space<vmem>>, vector<1x1x112xf32>
    %87 = vector.shape_cast %86 : vector<1x1x112xf32> to vector<1x112xf32>
    %c0_72 = arith.constant 0 : index
    %c0_73 = arith.constant 0 : index
    %c0_74 = arith.constant 0 : index
    %88 = vector.load %arg13[%c0_72, %c0_73, %c0_74] : memref<2x112x28xbf16, #tpu.memory_space<vmem>>, vector<1x112x28xbf16>
    %89 = vector.shape_cast %88 : vector<1x112x28xbf16> to vector<112x28xbf16>
    %90 = vector.extract_strided_slice %73 {offsets = [0, 0], sizes = [1, 28], strides = [1, 1]} : vector<15x28xf32> to vector<1x28xf32>
    %91 = vector.extract_strided_slice %73 {offsets = [1, 0], sizes = [1, 28], strides = [1, 1]} : vector<15x28xf32> to vector<1x28xf32>
    %92 = vector.extract_strided_slice %73 {offsets = [2, 0], sizes = [1, 28], strides = [1, 1]} : vector<15x28xf32> to vector<1x28xf32>
    %93 = vector.extract_strided_slice %73 {offsets = [3, 0], sizes = [1, 28], strides = [1, 1]} : vector<15x28xf32> to vector<1x28xf32>
    %94 = vector.extract_strided_slice %73 {offsets = [4, 0], sizes = [1, 28], strides = [1, 1]} : vector<15x28xf32> to vector<1x28xf32>
    %95 = vector.extract_strided_slice %73 {offsets = [5, 0], sizes = [1, 28], strides = [1, 1]} : vector<15x28xf32> to vector<1x28xf32>
    %96 = vector.extract_strided_slice %73 {offsets = [6, 0], sizes = [1, 28], strides = [1, 1]} : vector<15x28xf32> to vector<1x28xf32>
    %97 = vector.extract_strided_slice %73 {offsets = [7, 0], sizes = [1, 28], strides = [1, 1]} : vector<15x28xf32> to vector<1x28xf32>
    %98 = vector.extract_strided_slice %73 {offsets = [8, 0], sizes = [1, 28], strides = [1, 1]} : vector<15x28xf32> to vector<1x28xf32>
    %99 = vector.extract_strided_slice %73 {offsets = [9, 0], sizes = [1, 28], strides = [1, 1]} : vector<15x28xf32> to vector<1x28xf32>
    %100 = vector.extract_strided_slice %73 {offsets = [10, 0], sizes = [1, 28], strides = [1, 1]} : vector<15x28xf32> to vector<1x28xf32>
    %101 = vector.extract_strided_slice %73 {offsets = [11, 0], sizes = [1, 28], strides = [1, 1]} : vector<15x28xf32> to vector<1x28xf32>
    %102 = vector.extract_strided_slice %73 {offsets = [12, 0], sizes = [1, 28], strides = [1, 1]} : vector<15x28xf32> to vector<1x28xf32>
    %103 = vector.extract_strided_slice %73 {offsets = [13, 0], sizes = [1, 28], strides = [1, 1]} : vector<15x28xf32> to vector<1x28xf32>
    %104 = vector.extract_strided_slice %73 {offsets = [14, 0], sizes = [1, 28], strides = [1, 1]} : vector<15x28xf32> to vector<1x28xf32>
    %cst_75 = arith.constant dense<0.000000e+00> : vector<16xf32>
    %105 = vector.multi_reduction <add>, %71, %cst_75 [1] : vector<16x28xf32> to vector<16xf32>
    %106 = vector.shape_cast %105 : vector<16xf32> to vector<16x1xf32>
    %cst_76 = arith.constant 2.800000e+01 : f32
    %107 = vector.broadcast %cst_76 : f32 to vector<16x1xf32>
    %108 = arith.divf %106, %107 : vector<16x1xf32>
    %109 = vector.broadcast %108 : vector<16x1xf32> to vector<16x28xf32>
    %110 = arith.subf %71, %109 : vector<16x28xf32>
    %111 = arith.mulf %110, %110 : vector<16x28xf32>
    %cst_77 = arith.constant dense<0.000000e+00> : vector<16xf32>
    %112 = vector.multi_reduction <add>, %111, %cst_77 [1] : vector<16x28xf32> to vector<16xf32>
    %113 = vector.shape_cast %112 : vector<16xf32> to vector<16x1xf32>
    %cst_78 = arith.constant 2.800000e+01 : f32
    %114 = vector.broadcast %cst_78 : f32 to vector<16x1xf32>
    %115 = arith.divf %113, %114 : vector<16x1xf32>
    %cst_79 = arith.constant 9.99999974E-6 : f32
    %116 = vector.broadcast %cst_79 : f32 to vector<16x1xf32>
    %117 = arith.addf %115, %116 : vector<16x1xf32>
    %118 = math.sqrt %117 : vector<16x1xf32>
    %119 = vector.broadcast %118 : vector<16x1xf32> to vector<16x28xf32>
    %120 = arith.divf %110, %119 : vector<16x28xf32>
    %121 = vector.broadcast %90 : vector<1x28xf32> to vector<16x28xf32>
    %122 = arith.mulf %120, %121 : vector<16x28xf32>
    %123 = vector.broadcast %91 : vector<1x28xf32> to vector<16x28xf32>
    %124 = arith.addf %122, %123 : vector<16x28xf32>
    %c1_i32_80 = arith.constant 1 : i32
    %125 = tpu.dynamic_rotate %124 by %c1_i32_80 dim 0 : vector<16x28xf32>, i32 -> vector<16x28xf32>
    %126 = tpu.iota {dimensions = array<i32: 0>} : vector<16x28xi32>
    %c1_i32_81 = arith.constant 1 : i32
    %127 = vector.broadcast %c1_i32_81 : i32 to vector<16x28xi32>
    %128 = arith.cmpi sge, %126, %127 : vector<16x28xi32>
    %cst_82 = arith.constant 0.000000e+00 : f32
    %129 = vector.broadcast %cst_82 : f32 to vector<16x28xf32>
    %130 = arith.select %128, %125, %129 : vector<16x28xi1>, vector<16x28xf32>
    %c15_i32_83 = arith.constant 15 : i32
    %131 = tpu.dynamic_rotate %124 by %c15_i32_83 dim 0 : vector<16x28xf32>, i32 -> vector<16x28xf32>
    %132 = tpu.iota {dimensions = array<i32: 0>} : vector<16x28xi32>
    %c14_i32_84 = arith.constant 14 : i32
    %133 = vector.broadcast %c14_i32_84 : i32 to vector<16x28xi32>
    %134 = arith.cmpi sle, %132, %133 : vector<16x28xi32>
    %cst_85 = arith.constant 0.000000e+00 : f32
    %135 = vector.broadcast %cst_85 : f32 to vector<16x28xf32>
    %136 = arith.select %134, %131, %135 : vector<16x28xi1>, vector<16x28xf32>
    %137 = vector.extract_strided_slice %75 {offsets = [0, 0, 0], sizes = [1, 3, 28], strides = [1, 1, 1]} : vector<3x3x28xf32> to vector<1x3x28xf32>
    %138 = vector.shape_cast %137 : vector<1x3x28xf32> to vector<3x28xf32>
    %139 = vector.extract_strided_slice %138 {offsets = [0, 0], sizes = [1, 28], strides = [1, 1]} : vector<3x28xf32> to vector<1x28xf32>
    %140 = vector.broadcast %139 : vector<1x28xf32> to vector<16x28xf32>
    %141 = arith.mulf %130, %140 : vector<16x28xf32>
    %142 = vector.extract_strided_slice %138 {offsets = [1, 0], sizes = [1, 28], strides = [1, 1]} : vector<3x28xf32> to vector<1x28xf32>
    %143 = vector.broadcast %142 : vector<1x28xf32> to vector<16x28xf32>
    %144 = arith.mulf %124, %143 : vector<16x28xf32>
    %145 = arith.addf %141, %144 : vector<16x28xf32>
    %146 = vector.extract_strided_slice %138 {offsets = [2, 0], sizes = [1, 28], strides = [1, 1]} : vector<3x28xf32> to vector<1x28xf32>
    %147 = vector.broadcast %146 : vector<1x28xf32> to vector<16x28xf32>
    %148 = arith.mulf %136, %147 : vector<16x28xf32>
    %149 = arith.addf %145, %148 : vector<16x28xf32>
    %150 = vector.broadcast %3 : vector<16x1xf32> to vector<16x28xf32>
    %151 = arith.mulf %149, %150 : vector<16x28xf32>
    %cst_86 = arith.constant dense<0.000000e+00> : vector<16xf32>
    %152 = vector.multi_reduction <add>, %151, %cst_86 [1] : vector<16x28xf32> to vector<16xf32>
    %153 = vector.shape_cast %152 : vector<16xf32> to vector<16x1xf32>
    %cst_87 = arith.constant 2.800000e+01 : f32
    %154 = vector.broadcast %cst_87 : f32 to vector<16x1xf32>
    %155 = arith.divf %153, %154 : vector<16x1xf32>
    %156 = vector.broadcast %155 : vector<16x1xf32> to vector<16x28xf32>
    %157 = arith.subf %151, %156 : vector<16x28xf32>
    %158 = arith.mulf %157, %157 : vector<16x28xf32>
    %cst_88 = arith.constant dense<0.000000e+00> : vector<16xf32>
    %159 = vector.multi_reduction <add>, %158, %cst_88 [1] : vector<16x28xf32> to vector<16xf32>
    %160 = vector.shape_cast %159 : vector<16xf32> to vector<16x1xf32>
    %cst_89 = arith.constant 2.800000e+01 : f32
    %161 = vector.broadcast %cst_89 : f32 to vector<16x1xf32>
    %162 = arith.divf %160, %161 : vector<16x1xf32>
    %cst_90 = arith.constant 9.99999974E-6 : f32
    %163 = vector.broadcast %cst_90 : f32 to vector<16x1xf32>
    %164 = arith.addf %162, %163 : vector<16x1xf32>
    %165 = math.sqrt %164 : vector<16x1xf32>
    %166 = vector.broadcast %165 : vector<16x1xf32> to vector<16x28xf32>
    %167 = arith.divf %157, %166 : vector<16x28xf32>
    %168 = vector.broadcast %92 : vector<1x28xf32> to vector<16x28xf32>
    %169 = arith.mulf %167, %168 : vector<16x28xf32>
    %170 = vector.broadcast %93 : vector<1x28xf32> to vector<16x28xf32>
    %171 = arith.addf %169, %170 : vector<16x28xf32>
    %172 = arith.truncf %171 : vector<16x28xf32> to vector<16x28xbf16>
    %cst_91 = arith.constant dense<0.000000e+00> : vector<16x28xf32>
    %173 = tpu.matmul %172, %77, %cst_91 {dimension_numbers = #tpu.dot_dimension_numbers<[1], [0], [0], [1], [0, 0, 1, 1], [], []>} : vector<16x28xbf16>, vector<28x28xbf16>, vector<16x28xf32> -> vector<16x28xf32>
    %174 = vector.broadcast %98 : vector<1x28xf32> to vector<16x28xf32>
    %175 = arith.addf %173, %174 : vector<16x28xf32>
    %176 = vector.extract_strided_slice %75 {offsets = [1, 0, 0], sizes = [1, 3, 28], strides = [1, 1, 1]} : vector<3x3x28xf32> to vector<1x3x28xf32>
    %177 = vector.shape_cast %176 : vector<1x3x28xf32> to vector<3x28xf32>
    %178 = vector.extract_strided_slice %177 {offsets = [0, 0], sizes = [1, 28], strides = [1, 1]} : vector<3x28xf32> to vector<1x28xf32>
    %179 = vector.broadcast %178 : vector<1x28xf32> to vector<16x28xf32>
    %180 = arith.mulf %130, %179 : vector<16x28xf32>
    %181 = vector.extract_strided_slice %177 {offsets = [1, 0], sizes = [1, 28], strides = [1, 1]} : vector<3x28xf32> to vector<1x28xf32>
    %182 = vector.broadcast %181 : vector<1x28xf32> to vector<16x28xf32>
    %183 = arith.mulf %124, %182 : vector<16x28xf32>
    %184 = arith.addf %180, %183 : vector<16x28xf32>
    %185 = vector.extract_strided_slice %177 {offsets = [2, 0], sizes = [1, 28], strides = [1, 1]} : vector<3x28xf32> to vector<1x28xf32>
    %186 = vector.broadcast %185 : vector<1x28xf32> to vector<16x28xf32>
    %187 = arith.mulf %136, %186 : vector<16x28xf32>
    %188 = arith.addf %184, %187 : vector<16x28xf32>
    %189 = vector.broadcast %3 : vector<16x1xf32> to vector<16x28xf32>
    %190 = arith.mulf %188, %189 : vector<16x28xf32>
    %cst_92 = arith.constant dense<0.000000e+00> : vector<16xf32>
    %191 = vector.multi_reduction <add>, %190, %cst_92 [1] : vector<16x28xf32> to vector<16xf32>
    %192 = vector.shape_cast %191 : vector<16xf32> to vector<16x1xf32>
    %cst_93 = arith.constant 2.800000e+01 : f32
    %193 = vector.broadcast %cst_93 : f32 to vector<16x1xf32>
    %194 = arith.divf %192, %193 : vector<16x1xf32>
    %195 = vector.broadcast %194 : vector<16x1xf32> to vector<16x28xf32>
    %196 = arith.subf %190, %195 : vector<16x28xf32>
    %197 = arith.mulf %196, %196 : vector<16x28xf32>
    %cst_94 = arith.constant dense<0.000000e+00> : vector<16xf32>
    %198 = vector.multi_reduction <add>, %197, %cst_94 [1] : vector<16x28xf32> to vector<16xf32>
    %199 = vector.shape_cast %198 : vector<16xf32> to vector<16x1xf32>
    %cst_95 = arith.constant 2.800000e+01 : f32
    %200 = vector.broadcast %cst_95 : f32 to vector<16x1xf32>
    %201 = arith.divf %199, %200 : vector<16x1xf32>
    %cst_96 = arith.constant 9.99999974E-6 : f32
    %202 = vector.broadcast %cst_96 : f32 to vector<16x1xf32>
    %203 = arith.addf %201, %202 : vector<16x1xf32>
    %204 = math.sqrt %203 : vector<16x1xf32>
    %205 = vector.broadcast %204 : vector<16x1xf32> to vector<16x28xf32>
    %206 = arith.divf %196, %205 : vector<16x28xf32>
    %207 = vector.broadcast %94 : vector<1x28xf32> to vector<16x28xf32>
    %208 = arith.mulf %206, %207 : vector<16x28xf32>
    %209 = vector.broadcast %95 : vector<1x28xf32> to vector<16x28xf32>
    %210 = arith.addf %208, %209 : vector<16x28xf32>
    %211 = arith.truncf %210 : vector<16x28xf32> to vector<16x28xbf16>
    %cst_97 = arith.constant dense<0.000000e+00> : vector<16x28xf32>
    %212 = tpu.matmul %211, %79, %cst_97 {dimension_numbers = #tpu.dot_dimension_numbers<[1], [0], [0], [1], [0, 0, 1, 1], [], []>} : vector<16x28xbf16>, vector<28x28xbf16>, vector<16x28xf32> -> vector<16x28xf32>
    %213 = vector.broadcast %99 : vector<1x28xf32> to vector<16x28xf32>
    %214 = arith.addf %212, %213 : vector<16x28xf32>
    %215 = vector.extract_strided_slice %75 {offsets = [2, 0, 0], sizes = [1, 3, 28], strides = [1, 1, 1]} : vector<3x3x28xf32> to vector<1x3x28xf32>
    %216 = vector.shape_cast %215 : vector<1x3x28xf32> to vector<3x28xf32>
    %217 = vector.extract_strided_slice %216 {offsets = [0, 0], sizes = [1, 28], strides = [1, 1]} : vector<3x28xf32> to vector<1x28xf32>
    %218 = vector.broadcast %217 : vector<1x28xf32> to vector<16x28xf32>
    %219 = arith.mulf %130, %218 : vector<16x28xf32>
    %220 = vector.extract_strided_slice %216 {offsets = [1, 0], sizes = [1, 28], strides = [1, 1]} : vector<3x28xf32> to vector<1x28xf32>
    %221 = vector.broadcast %220 : vector<1x28xf32> to vector<16x28xf32>
    %222 = arith.mulf %124, %221 : vector<16x28xf32>
    %223 = arith.addf %219, %222 : vector<16x28xf32>
    %224 = vector.extract_strided_slice %216 {offsets = [2, 0], sizes = [1, 28], strides = [1, 1]} : vector<3x28xf32> to vector<1x28xf32>
    %225 = vector.broadcast %224 : vector<1x28xf32> to vector<16x28xf32>
    %226 = arith.mulf %136, %225 : vector<16x28xf32>
    %227 = arith.addf %223, %226 : vector<16x28xf32>
    %228 = vector.broadcast %3 : vector<16x1xf32> to vector<16x28xf32>
    %229 = arith.mulf %227, %228 : vector<16x28xf32>
    %cst_98 = arith.constant dense<0.000000e+00> : vector<16xf32>
    %230 = vector.multi_reduction <add>, %229, %cst_98 [1] : vector<16x28xf32> to vector<16xf32>
    %231 = vector.shape_cast %230 : vector<16xf32> to vector<16x1xf32>
    %cst_99 = arith.constant 2.800000e+01 : f32
    %232 = vector.broadcast %cst_99 : f32 to vector<16x1xf32>
    %233 = arith.divf %231, %232 : vector<16x1xf32>
    %234 = vector.broadcast %233 : vector<16x1xf32> to vector<16x28xf32>
    %235 = arith.subf %229, %234 : vector<16x28xf32>
    %236 = arith.mulf %235, %235 : vector<16x28xf32>
    %cst_100 = arith.constant dense<0.000000e+00> : vector<16xf32>
    %237 = vector.multi_reduction <add>, %236, %cst_100 [1] : vector<16x28xf32> to vector<16xf32>
    %238 = vector.shape_cast %237 : vector<16xf32> to vector<16x1xf32>
    %cst_101 = arith.constant 2.800000e+01 : f32
    %239 = vector.broadcast %cst_101 : f32 to vector<16x1xf32>
    %240 = arith.divf %238, %239 : vector<16x1xf32>
    %cst_102 = arith.constant 9.99999974E-6 : f32
    %241 = vector.broadcast %cst_102 : f32 to vector<16x1xf32>
    %242 = arith.addf %240, %241 : vector<16x1xf32>
    %243 = math.sqrt %242 : vector<16x1xf32>
    %244 = vector.broadcast %243 : vector<16x1xf32> to vector<16x28xf32>
    %245 = arith.divf %235, %244 : vector<16x28xf32>
    %246 = vector.broadcast %96 : vector<1x28xf32> to vector<16x28xf32>
    %247 = arith.mulf %245, %246 : vector<16x28xf32>
    %248 = vector.broadcast %97 : vector<1x28xf32> to vector<16x28xf32>
    %249 = arith.addf %247, %248 : vector<16x28xf32>
    %250 = arith.truncf %249 : vector<16x28xf32> to vector<16x28xbf16>
    %cst_103 = arith.constant dense<0.000000e+00> : vector<16x28xf32>
    %251 = tpu.matmul %250, %81, %cst_103 {dimension_numbers = #tpu.dot_dimension_numbers<[1], [0], [0], [1], [0, 0, 1, 1], [], []>} : vector<16x28xbf16>, vector<28x28xbf16>, vector<16x28xf32> -> vector<16x28xf32>
    %252 = vector.broadcast %100 : vector<1x28xf32> to vector<16x28xf32>
    %253 = arith.addf %251, %252 : vector<16x28xf32>
    %254 = tpu.iota {dimensions = array<i32: 1>} : vector<1x28xi32>
    %cst_104 = arith.constant 0.377964467 : f32
    %255 = vector.broadcast %cst_104 : f32 to vector<16x28xf32>
    %256 = arith.mulf %175, %255 : vector<16x28xf32>
    %c0_i32 = arith.constant 0 : i32
    %257 = vector.broadcast %c0_i32 : i32 to vector<1x28xi32>
    %258 = arith.cmpi sge, %254, %257 : vector<1x28xi32>
    %c7_i32 = arith.constant 7 : i32
    %259 = vector.broadcast %c7_i32 : i32 to vector<1x28xi32>
    %260 = arith.cmpi slt, %254, %259 : vector<1x28xi32>
    %261 = arith.andi %258, %260 : vector<1x28xi1>
    %262 = arith.extui %261 : vector<1x28xi1> to vector<1x28xi32>
    %263 = arith.sitofp %262 : vector<1x28xi32> to vector<1x28xf32>
    %c7_i32_105 = arith.constant 7 : i32
    %264 = vector.broadcast %c7_i32_105 : i32 to vector<1x28xi32>
    %265 = arith.cmpi sge, %254, %264 : vector<1x28xi32>
    %c14_i32_106 = arith.constant 14 : i32
    %266 = vector.broadcast %c14_i32_106 : i32 to vector<1x28xi32>
    %267 = arith.cmpi slt, %254, %266 : vector<1x28xi32>
    %268 = arith.andi %265, %267 : vector<1x28xi1>
    %269 = arith.extui %268 : vector<1x28xi1> to vector<1x28xi32>
    %270 = arith.sitofp %269 : vector<1x28xi32> to vector<1x28xf32>
    %c14_i32_107 = arith.constant 14 : i32
    %271 = vector.broadcast %c14_i32_107 : i32 to vector<1x28xi32>
    %272 = arith.cmpi sge, %254, %271 : vector<1x28xi32>
    %c21_i32 = arith.constant 21 : i32
    %273 = vector.broadcast %c21_i32 : i32 to vector<1x28xi32>
    %274 = arith.cmpi slt, %254, %273 : vector<1x28xi32>
    %275 = arith.andi %272, %274 : vector<1x28xi1>
    %276 = arith.extui %275 : vector<1x28xi1> to vector<1x28xi32>
    %277 = arith.sitofp %276 : vector<1x28xi32> to vector<1x28xf32>
    %c21_i32_108 = arith.constant 21 : i32
    %278 = vector.broadcast %c21_i32_108 : i32 to vector<1x28xi32>
    %279 = arith.cmpi sge, %254, %278 : vector<1x28xi32>
    %c28_i32 = arith.constant 28 : i32
    %280 = vector.broadcast %c28_i32 : i32 to vector<1x28xi32>
    %281 = arith.cmpi slt, %254, %280 : vector<1x28xi32>
    %282 = arith.andi %279, %281 : vector<1x28xi1>
    %283 = arith.extui %282 : vector<1x28xi1> to vector<1x28xi32>
    %284 = arith.sitofp %283 : vector<1x28xi32> to vector<1x28xf32>
    %285 = vector.broadcast %263 : vector<1x28xf32> to vector<16x28xf32>
    %286 = arith.mulf %256, %285 : vector<16x28xf32>
    %287 = vector.broadcast %270 : vector<1x28xf32> to vector<16x28xf32>
    %288 = arith.mulf %256, %287 : vector<16x28xf32>
    %289 = vector.broadcast %277 : vector<1x28xf32> to vector<16x28xf32>
    %290 = arith.mulf %256, %289 : vector<16x28xf32>
    %291 = vector.broadcast %284 : vector<1x28xf32> to vector<16x28xf32>
    %292 = arith.mulf %256, %291 : vector<16x28xf32>
    %293 = tpu.concatenate %286, %288, %290, %292 in 0 : vector<16x28xf32>, vector<16x28xf32>, vector<16x28xf32>, vector<16x28xf32> -> vector<64x28xf32>
    %294 = arith.truncf %293 : vector<64x28xf32> to vector<64x28xbf16>
    %295 = arith.truncf %214 : vector<16x28xf32> to vector<16x28xbf16>
    %cst_109 = arith.constant dense<0.000000e+00> : vector<64x16xf32>
    %296 = tpu.matmul %294, %295, %cst_109 {dimension_numbers = #tpu.dot_dimension_numbers<[1], [1], [0], [0], [0, 0, 1, 0], [], []>} : vector<64x28xbf16>, vector<16x28xbf16>, vector<64x16xf32> -> vector<64x16xf32>
    %cst_110 = arith.constant 0.000000e+00 : f32
    %297 = vector.broadcast %cst_110 : f32 to vector<1x16xf32>
    %298 = arith.cmpf ogt, %5, %297 : vector<1x16xf32>
    %cst_111 = arith.constant -1.000000e+30 : f32
    %299 = vector.shape_cast %298 : vector<1x16xi1> to vector<1x16xi1>
    %300 = vector.broadcast %299 : vector<1x16xi1> to vector<64x16xi1>
    %301 = vector.broadcast %cst_111 : f32 to vector<64x16xf32>
    %302 = arith.select %300, %296, %301 : vector<64x16xi1>, vector<64x16xf32>
    %cst_112 = arith.constant dense<0xFF800000> : vector<64xf32>
    %303 = vector.multi_reduction <maximumf>, %302, %cst_112 [1] : vector<64x16xf32> to vector<64xf32>
    %304 = vector.shape_cast %303 : vector<64xf32> to vector<64x1xf32>
    %305 = vector.broadcast %304 : vector<64x1xf32> to vector<64x16xf32>
    %306 = arith.subf %302, %305 : vector<64x16xf32>
    %307 = math.exp %306 : vector<64x16xf32>
    %cst_113 = arith.constant dense<0.000000e+00> : vector<64xf32>
    %308 = vector.multi_reduction <add>, %307, %cst_113 [1] : vector<64x16xf32> to vector<64xf32>
    %309 = vector.shape_cast %308 : vector<64xf32> to vector<64x1xf32>
    %310 = tpu.reciprocal %309 {approx = true} : vector<64x1xf32> -> vector<64x1xf32>
    %311 = vector.broadcast %310 : vector<64x1xf32> to vector<64x16xf32>
    %312 = arith.mulf %307, %311 : vector<64x16xf32>
    %313 = vector.broadcast %5 : vector<1x16xf32> to vector<64x16xf32>
    %314 = arith.mulf %312, %313 : vector<64x16xf32>
    %315 = arith.truncf %314 : vector<64x16xf32> to vector<64x16xbf16>
    %316 = arith.truncf %253 : vector<16x28xf32> to vector<16x28xbf16>
    %cst_114 = arith.constant dense<0.000000e+00> : vector<64x28xf32>
    %317 = tpu.matmul %315, %316, %cst_114 {dimension_numbers = #tpu.dot_dimension_numbers<[1], [0], [0], [1], [0, 0, 1, 1], [], []>} : vector<64x16xbf16>, vector<16x28xbf16>, vector<64x28xf32> -> vector<64x28xf32>
    %cst_115 = arith.constant 0.000000e+00 : f32
    %318 = vector.broadcast %cst_115 : f32 to vector<16x28xf32>
    %319 = vector.extract_strided_slice %317 {offsets = [0, 0], sizes = [16, 28], strides = [1, 1]} : vector<64x28xf32> to vector<16x28xf32>
    %320 = vector.broadcast %263 : vector<1x28xf32> to vector<16x28xf32>
    %321 = arith.mulf %319, %320 : vector<16x28xf32>
    %322 = arith.addf %318, %321 : vector<16x28xf32>
    %323 = vector.extract_strided_slice %317 {offsets = [16, 0], sizes = [16, 28], strides = [1, 1]} : vector<64x28xf32> to vector<16x28xf32>
    %324 = vector.broadcast %270 : vector<1x28xf32> to vector<16x28xf32>
    %325 = arith.mulf %323, %324 : vector<16x28xf32>
    %326 = arith.addf %322, %325 : vector<16x28xf32>
    %327 = vector.extract_strided_slice %317 {offsets = [32, 0], sizes = [16, 28], strides = [1, 1]} : vector<64x28xf32> to vector<16x28xf32>
    %328 = vector.broadcast %277 : vector<1x28xf32> to vector<16x28xf32>
    %329 = arith.mulf %327, %328 : vector<16x28xf32>
    %330 = arith.addf %326, %329 : vector<16x28xf32>
    %331 = vector.extract_strided_slice %317 {offsets = [48, 0], sizes = [16, 28], strides = [1, 1]} : vector<64x28xf32> to vector<16x28xf32>
    %332 = vector.broadcast %284 : vector<1x28xf32> to vector<16x28xf32>
    %333 = arith.mulf %331, %332 : vector<16x28xf32>
    %334 = arith.addf %330, %333 : vector<16x28xf32>
    %335 = arith.truncf %334 : vector<16x28xf32> to vector<16x28xbf16>
    %cst_116 = arith.constant dense<0.000000e+00> : vector<16x28xf32>
    %336 = tpu.matmul %335, %83, %cst_116 {dimension_numbers = #tpu.dot_dimension_numbers<[1], [0], [0], [1], [0, 0, 1, 1], [], []>} : vector<16x28xbf16>, vector<28x28xbf16>, vector<16x28xf32> -> vector<16x28xf32>
    %337 = vector.broadcast %101 : vector<1x28xf32> to vector<16x28xf32>
    %338 = arith.addf %336, %337 : vector<16x28xf32>
    %339 = vector.broadcast %3 : vector<16x1xf32> to vector<16x28xf32>
    %340 = arith.mulf %338, %339 : vector<16x28xf32>
    %341 = vector.broadcast %3 : vector<16x1xf32> to vector<16x28xf32>
    %342 = arith.mulf %71, %341 : vector<16x28xf32>
    %343 = arith.addf %342, %340 : vector<16x28xf32>
    %cst_117 = arith.constant dense<0.000000e+00> : vector<16xf32>
    %344 = vector.multi_reduction <add>, %343, %cst_117 [1] : vector<16x28xf32> to vector<16xf32>
    %345 = vector.shape_cast %344 : vector<16xf32> to vector<16x1xf32>
    %cst_118 = arith.constant 2.800000e+01 : f32
    %346 = vector.broadcast %cst_118 : f32 to vector<16x1xf32>
    %347 = arith.divf %345, %346 : vector<16x1xf32>
    %348 = vector.broadcast %347 : vector<16x1xf32> to vector<16x28xf32>
    %349 = arith.subf %343, %348 : vector<16x28xf32>
    %350 = arith.mulf %349, %349 : vector<16x28xf32>
    %cst_119 = arith.constant dense<0.000000e+00> : vector<16xf32>
    %351 = vector.multi_reduction <add>, %350, %cst_119 [1] : vector<16x28xf32> to vector<16xf32>
    %352 = vector.shape_cast %351 : vector<16xf32> to vector<16x1xf32>
    %cst_120 = arith.constant 2.800000e+01 : f32
    %353 = vector.broadcast %cst_120 : f32 to vector<16x1xf32>
    %354 = arith.divf %352, %353 : vector<16x1xf32>
    %cst_121 = arith.constant 9.99999974E-6 : f32
    %355 = vector.broadcast %cst_121 : f32 to vector<16x1xf32>
    %356 = arith.addf %354, %355 : vector<16x1xf32>
    %357 = math.sqrt %356 : vector<16x1xf32>
    %358 = vector.broadcast %357 : vector<16x1xf32> to vector<16x28xf32>
    %359 = arith.divf %349, %358 : vector<16x28xf32>
    %360 = vector.broadcast %102 : vector<1x28xf32> to vector<16x28xf32>
    %361 = arith.mulf %359, %360 : vector<16x28xf32>
    %362 = vector.broadcast %103 : vector<1x28xf32> to vector<16x28xf32>
    %363 = arith.addf %361, %362 : vector<16x28xf32>
    %364 = arith.truncf %363 : vector<16x28xf32> to vector<16x28xbf16>
    %cst_122 = arith.constant dense<0.000000e+00> : vector<16x112xf32>
    %365 = tpu.matmul %364, %85, %cst_122 {dimension_numbers = #tpu.dot_dimension_numbers<[1], [0], [0], [1], [0, 0, 1, 1], [], []>} : vector<16x28xbf16>, vector<28x112xbf16>, vector<16x112xf32> -> vector<16x112xf32>
    %366 = vector.broadcast %87 : vector<1x112xf32> to vector<16x112xf32>
    %367 = arith.addf %365, %366 : vector<16x112xf32>
    %cst_123 = arith.constant 0.707106769 : f32
    %368 = vector.broadcast %cst_123 : f32 to vector<16x112xf32>
    %369 = arith.mulf %367, %368 : vector<16x112xf32>
    %370 = math.absf %369 : vector<16x112xf32>
    %cst_124 = arith.constant 0.327591091 : f32
    %371 = vector.broadcast %cst_124 : f32 to vector<16x112xf32>
    %372 = arith.mulf %371, %370 : vector<16x112xf32>
    %cst_125 = arith.constant 1.000000e+00 : f32
    %373 = vector.broadcast %cst_125 : f32 to vector<16x112xf32>
    %374 = arith.addf %373, %372 : vector<16x112xf32>
    %cst_126 = arith.constant 1.000000e+00 : f32
    %375 = vector.broadcast %cst_126 : f32 to vector<16x112xf32>
    %376 = arith.divf %375, %374 : vector<16x112xf32>
    %cst_127 = arith.constant 1.06140542 : f32
    %377 = vector.broadcast %cst_127 : f32 to vector<16x112xf32>
    %378 = arith.mulf %376, %377 : vector<16x112xf32>
    %cst_128 = arith.constant -1.45315206 : f32
    %379 = vector.broadcast %cst_128 : f32 to vector<16x112xf32>
    %380 = arith.addf %379, %378 : vector<16x112xf32>
    %381 = arith.mulf %376, %380 : vector<16x112xf32>
    %cst_129 = arith.constant 1.42141378 : f32
    %382 = vector.broadcast %cst_129 : f32 to vector<16x112xf32>
    %383 = arith.addf %382, %381 : vector<16x112xf32>
    %384 = arith.mulf %376, %383 : vector<16x112xf32>
    %cst_130 = arith.constant -0.284496725 : f32
    %385 = vector.broadcast %cst_130 : f32 to vector<16x112xf32>
    %386 = arith.addf %385, %384 : vector<16x112xf32>
    %387 = arith.mulf %376, %386 : vector<16x112xf32>
    %cst_131 = arith.constant 0.254829586 : f32
    %388 = vector.broadcast %cst_131 : f32 to vector<16x112xf32>
    %389 = arith.addf %388, %387 : vector<16x112xf32>
    %390 = arith.mulf %376, %389 : vector<16x112xf32>
    %cst_132 = arith.constant 0.000000e+00 : f32
    %391 = vector.broadcast %cst_132 : f32 to vector<16x112xf32>
    %392 = arith.subf %391, %370 : vector<16x112xf32>
    %393 = arith.mulf %392, %370 : vector<16x112xf32>
    %394 = math.exp %393 : vector<16x112xf32>
    %395 = arith.mulf %390, %394 : vector<16x112xf32>
    %cst_133 = arith.constant 1.000000e+00 : f32
    %396 = vector.broadcast %cst_133 : f32 to vector<16x112xf32>
    %397 = arith.subf %396, %395 : vector<16x112xf32>
    %cst_134 = arith.constant 0.000000e+00 : f32
    %398 = vector.broadcast %cst_134 : f32 to vector<16x112xf32>
    %399 = arith.cmpf oge, %369, %398 : vector<16x112xf32>
    %cst_135 = arith.constant 0.000000e+00 : f32
    %400 = vector.broadcast %cst_135 : f32 to vector<16x112xf32>
    %401 = arith.subf %400, %397 : vector<16x112xf32>
    %402 = arith.select %399, %397, %401 : vector<16x112xi1>, vector<16x112xf32>
    %cst_136 = arith.constant 5.000000e-01 : f32
    %403 = vector.broadcast %cst_136 : f32 to vector<16x112xf32>
    %404 = arith.mulf %403, %367 : vector<16x112xf32>
    %cst_137 = arith.constant 1.000000e+00 : f32
    %405 = vector.broadcast %cst_137 : f32 to vector<16x112xf32>
    %406 = arith.addf %405, %402 : vector<16x112xf32>
    %407 = arith.mulf %404, %406 : vector<16x112xf32>
    %408 = arith.truncf %407 : vector<16x112xf32> to vector<16x112xbf16>
    %cst_138 = arith.constant dense<0.000000e+00> : vector<16x28xf32>
    %409 = tpu.matmul %408, %89, %cst_138 {dimension_numbers = #tpu.dot_dimension_numbers<[1], [0], [0], [1], [0, 0, 1, 1], [], []>} : vector<16x112xbf16>, vector<112x28xbf16>, vector<16x28xf32> -> vector<16x28xf32>
    %410 = vector.broadcast %104 : vector<1x28xf32> to vector<16x28xf32>
    %411 = arith.addf %409, %410 : vector<16x28xf32>
    %412 = vector.broadcast %3 : vector<16x1xf32> to vector<16x28xf32>
    %413 = arith.mulf %411, %412 : vector<16x28xf32>
    %414 = arith.addf %343, %413 : vector<16x28xf32>
    %c1_139 = arith.constant 1 : index
    %c0_140 = arith.constant 0 : index
    %c0_141 = arith.constant 0 : index
    %415 = vector.load %arg8[%c1_139, %c0_140, %c0_141] : memref<2x15x28xf32, #tpu.memory_space<vmem>>, vector<1x15x28xf32>
    %416 = vector.shape_cast %415 : vector<1x15x28xf32> to vector<15x28xf32>
    %c1_142 = arith.constant 1 : index
    %c0_143 = arith.constant 0 : index
    %c0_144 = arith.constant 0 : index
    %c0_145 = arith.constant 0 : index
    %417 = vector.load %arg9[%c1_142, %c0_143, %c0_144, %c0_145] : memref<2x3x3x28xf32, #tpu.memory_space<vmem>>, vector<1x3x3x28xf32>
    %418 = vector.shape_cast %417 : vector<1x3x3x28xf32> to vector<3x3x28xf32>
    %c1_146 = arith.constant 1 : index
    %c0_147 = arith.constant 0 : index
    %c0_148 = arith.constant 0 : index
    %c0_149 = arith.constant 0 : index
    %419 = vector.load %arg10[%c1_146, %c0_147, %c0_148, %c0_149] : memref<2x4x28x28xbf16, #tpu.memory_space<vmem>>, vector<1x1x28x28xbf16>
    %420 = vector.shape_cast %419 : vector<1x1x28x28xbf16> to vector<28x28xbf16>
    %c1_150 = arith.constant 1 : index
    %c1_151 = arith.constant 1 : index
    %c0_152 = arith.constant 0 : index
    %c0_153 = arith.constant 0 : index
    %421 = vector.load %arg10[%c1_150, %c1_151, %c0_152, %c0_153] : memref<2x4x28x28xbf16, #tpu.memory_space<vmem>>, vector<1x1x28x28xbf16>
    %422 = vector.shape_cast %421 : vector<1x1x28x28xbf16> to vector<28x28xbf16>
    %c1_154 = arith.constant 1 : index
    %c2_155 = arith.constant 2 : index
    %c0_156 = arith.constant 0 : index
    %c0_157 = arith.constant 0 : index
    %423 = vector.load %arg10[%c1_154, %c2_155, %c0_156, %c0_157] : memref<2x4x28x28xbf16, #tpu.memory_space<vmem>>, vector<1x1x28x28xbf16>
    %424 = vector.shape_cast %423 : vector<1x1x28x28xbf16> to vector<28x28xbf16>
    %c1_158 = arith.constant 1 : index
    %c3_159 = arith.constant 3 : index
    %c0_160 = arith.constant 0 : index
    %c0_161 = arith.constant 0 : index
    %425 = vector.load %arg10[%c1_158, %c3_159, %c0_160, %c0_161] : memref<2x4x28x28xbf16, #tpu.memory_space<vmem>>, vector<1x1x28x28xbf16>
    %426 = vector.shape_cast %425 : vector<1x1x28x28xbf16> to vector<28x28xbf16>
    %c1_162 = arith.constant 1 : index
    %c0_163 = arith.constant 0 : index
    %c0_164 = arith.constant 0 : index
    %427 = vector.load %arg11[%c1_162, %c0_163, %c0_164] : memref<2x28x112xbf16, #tpu.memory_space<vmem>>, vector<1x28x112xbf16>
    %428 = vector.shape_cast %427 : vector<1x28x112xbf16> to vector<28x112xbf16>
    %c1_165 = arith.constant 1 : index
    %c0_166 = arith.constant 0 : index
    %c0_167 = arith.constant 0 : index
    %429 = vector.load %arg12[%c1_165, %c0_166, %c0_167] : memref<2x1x112xf32, #tpu.memory_space<vmem>>, vector<1x1x112xf32>
    %430 = vector.shape_cast %429 : vector<1x1x112xf32> to vector<1x112xf32>
    %c1_168 = arith.constant 1 : index
    %c0_169 = arith.constant 0 : index
    %c0_170 = arith.constant 0 : index
    %431 = vector.load %arg13[%c1_168, %c0_169, %c0_170] : memref<2x112x28xbf16, #tpu.memory_space<vmem>>, vector<1x112x28xbf16>
    %432 = vector.shape_cast %431 : vector<1x112x28xbf16> to vector<112x28xbf16>
    %433 = vector.extract_strided_slice %416 {offsets = [0, 0], sizes = [1, 28], strides = [1, 1]} : vector<15x28xf32> to vector<1x28xf32>
    %434 = vector.extract_strided_slice %416 {offsets = [1, 0], sizes = [1, 28], strides = [1, 1]} : vector<15x28xf32> to vector<1x28xf32>
    %435 = vector.extract_strided_slice %416 {offsets = [2, 0], sizes = [1, 28], strides = [1, 1]} : vector<15x28xf32> to vector<1x28xf32>
    %436 = vector.extract_strided_slice %416 {offsets = [3, 0], sizes = [1, 28], strides = [1, 1]} : vector<15x28xf32> to vector<1x28xf32>
    %437 = vector.extract_strided_slice %416 {offsets = [4, 0], sizes = [1, 28], strides = [1, 1]} : vector<15x28xf32> to vector<1x28xf32>
    %438 = vector.extract_strided_slice %416 {offsets = [5, 0], sizes = [1, 28], strides = [1, 1]} : vector<15x28xf32> to vector<1x28xf32>
    %439 = vector.extract_strided_slice %416 {offsets = [6, 0], sizes = [1, 28], strides = [1, 1]} : vector<15x28xf32> to vector<1x28xf32>
    %440 = vector.extract_strided_slice %416 {offsets = [7, 0], sizes = [1, 28], strides = [1, 1]} : vector<15x28xf32> to vector<1x28xf32>
    %441 = vector.extract_strided_slice %416 {offsets = [8, 0], sizes = [1, 28], strides = [1, 1]} : vector<15x28xf32> to vector<1x28xf32>
    %442 = vector.extract_strided_slice %416 {offsets = [9, 0], sizes = [1, 28], strides = [1, 1]} : vector<15x28xf32> to vector<1x28xf32>
    %443 = vector.extract_strided_slice %416 {offsets = [10, 0], sizes = [1, 28], strides = [1, 1]} : vector<15x28xf32> to vector<1x28xf32>
    %444 = vector.extract_strided_slice %416 {offsets = [11, 0], sizes = [1, 28], strides = [1, 1]} : vector<15x28xf32> to vector<1x28xf32>
    %445 = vector.extract_strided_slice %416 {offsets = [12, 0], sizes = [1, 28], strides = [1, 1]} : vector<15x28xf32> to vector<1x28xf32>
    %446 = vector.extract_strided_slice %416 {offsets = [13, 0], sizes = [1, 28], strides = [1, 1]} : vector<15x28xf32> to vector<1x28xf32>
    %447 = vector.extract_strided_slice %416 {offsets = [14, 0], sizes = [1, 28], strides = [1, 1]} : vector<15x28xf32> to vector<1x28xf32>
    %cst_171 = arith.constant dense<0.000000e+00> : vector<16xf32>
    %448 = vector.multi_reduction <add>, %414, %cst_171 [1] : vector<16x28xf32> to vector<16xf32>
    %449 = vector.shape_cast %448 : vector<16xf32> to vector<16x1xf32>
    %cst_172 = arith.constant 2.800000e+01 : f32
    %450 = vector.broadcast %cst_172 : f32 to vector<16x1xf32>
    %451 = arith.divf %449, %450 : vector<16x1xf32>
    %452 = vector.broadcast %451 : vector<16x1xf32> to vector<16x28xf32>
    %453 = arith.subf %414, %452 : vector<16x28xf32>
    %454 = arith.mulf %453, %453 : vector<16x28xf32>
    %cst_173 = arith.constant dense<0.000000e+00> : vector<16xf32>
    %455 = vector.multi_reduction <add>, %454, %cst_173 [1] : vector<16x28xf32> to vector<16xf32>
    %456 = vector.shape_cast %455 : vector<16xf32> to vector<16x1xf32>
    %cst_174 = arith.constant 2.800000e+01 : f32
    %457 = vector.broadcast %cst_174 : f32 to vector<16x1xf32>
    %458 = arith.divf %456, %457 : vector<16x1xf32>
    %cst_175 = arith.constant 9.99999974E-6 : f32
    %459 = vector.broadcast %cst_175 : f32 to vector<16x1xf32>
    %460 = arith.addf %458, %459 : vector<16x1xf32>
    %461 = math.sqrt %460 : vector<16x1xf32>
    %462 = vector.broadcast %461 : vector<16x1xf32> to vector<16x28xf32>
    %463 = arith.divf %453, %462 : vector<16x28xf32>
    %464 = vector.broadcast %433 : vector<1x28xf32> to vector<16x28xf32>
    %465 = arith.mulf %463, %464 : vector<16x28xf32>
    %466 = vector.broadcast %434 : vector<1x28xf32> to vector<16x28xf32>
    %467 = arith.addf %465, %466 : vector<16x28xf32>
    %c1_i32_176 = arith.constant 1 : i32
    %468 = tpu.dynamic_rotate %467 by %c1_i32_176 dim 0 : vector<16x28xf32>, i32 -> vector<16x28xf32>
    %469 = tpu.iota {dimensions = array<i32: 0>} : vector<16x28xi32>
    %c1_i32_177 = arith.constant 1 : i32
    %470 = vector.broadcast %c1_i32_177 : i32 to vector<16x28xi32>
    %471 = arith.cmpi sge, %469, %470 : vector<16x28xi32>
    %cst_178 = arith.constant 0.000000e+00 : f32
    %472 = vector.broadcast %cst_178 : f32 to vector<16x28xf32>
    %473 = arith.select %471, %468, %472 : vector<16x28xi1>, vector<16x28xf32>
    %c15_i32_179 = arith.constant 15 : i32
    %474 = tpu.dynamic_rotate %467 by %c15_i32_179 dim 0 : vector<16x28xf32>, i32 -> vector<16x28xf32>
    %475 = tpu.iota {dimensions = array<i32: 0>} : vector<16x28xi32>
    %c14_i32_180 = arith.constant 14 : i32
    %476 = vector.broadcast %c14_i32_180 : i32 to vector<16x28xi32>
    %477 = arith.cmpi sle, %475, %476 : vector<16x28xi32>
    %cst_181 = arith.constant 0.000000e+00 : f32
    %478 = vector.broadcast %cst_181 : f32 to vector<16x28xf32>
    %479 = arith.select %477, %474, %478 : vector<16x28xi1>, vector<16x28xf32>
    %480 = vector.extract_strided_slice %418 {offsets = [0, 0, 0], sizes = [1, 3, 28], strides = [1, 1, 1]} : vector<3x3x28xf32> to vector<1x3x28xf32>
    %481 = vector.shape_cast %480 : vector<1x3x28xf32> to vector<3x28xf32>
    %482 = vector.extract_strided_slice %481 {offsets = [0, 0], sizes = [1, 28], strides = [1, 1]} : vector<3x28xf32> to vector<1x28xf32>
    %483 = vector.broadcast %482 : vector<1x28xf32> to vector<16x28xf32>
    %484 = arith.mulf %473, %483 : vector<16x28xf32>
    %485 = vector.extract_strided_slice %481 {offsets = [1, 0], sizes = [1, 28], strides = [1, 1]} : vector<3x28xf32> to vector<1x28xf32>
    %486 = vector.broadcast %485 : vector<1x28xf32> to vector<16x28xf32>
    %487 = arith.mulf %467, %486 : vector<16x28xf32>
    %488 = arith.addf %484, %487 : vector<16x28xf32>
    %489 = vector.extract_strided_slice %481 {offsets = [2, 0], sizes = [1, 28], strides = [1, 1]} : vector<3x28xf32> to vector<1x28xf32>
    %490 = vector.broadcast %489 : vector<1x28xf32> to vector<16x28xf32>
    %491 = arith.mulf %479, %490 : vector<16x28xf32>
    %492 = arith.addf %488, %491 : vector<16x28xf32>
    %493 = vector.broadcast %3 : vector<16x1xf32> to vector<16x28xf32>
    %494 = arith.mulf %492, %493 : vector<16x28xf32>
    %cst_182 = arith.constant dense<0.000000e+00> : vector<16xf32>
    %495 = vector.multi_reduction <add>, %494, %cst_182 [1] : vector<16x28xf32> to vector<16xf32>
    %496 = vector.shape_cast %495 : vector<16xf32> to vector<16x1xf32>
    %cst_183 = arith.constant 2.800000e+01 : f32
    %497 = vector.broadcast %cst_183 : f32 to vector<16x1xf32>
    %498 = arith.divf %496, %497 : vector<16x1xf32>
    %499 = vector.broadcast %498 : vector<16x1xf32> to vector<16x28xf32>
    %500 = arith.subf %494, %499 : vector<16x28xf32>
    %501 = arith.mulf %500, %500 : vector<16x28xf32>
    %cst_184 = arith.constant dense<0.000000e+00> : vector<16xf32>
    %502 = vector.multi_reduction <add>, %501, %cst_184 [1] : vector<16x28xf32> to vector<16xf32>
    %503 = vector.shape_cast %502 : vector<16xf32> to vector<16x1xf32>
    %cst_185 = arith.constant 2.800000e+01 : f32
    %504 = vector.broadcast %cst_185 : f32 to vector<16x1xf32>
    %505 = arith.divf %503, %504 : vector<16x1xf32>
    %cst_186 = arith.constant 9.99999974E-6 : f32
    %506 = vector.broadcast %cst_186 : f32 to vector<16x1xf32>
    %507 = arith.addf %505, %506 : vector<16x1xf32>
    %508 = math.sqrt %507 : vector<16x1xf32>
    %509 = vector.broadcast %508 : vector<16x1xf32> to vector<16x28xf32>
    %510 = arith.divf %500, %509 : vector<16x28xf32>
    %511 = vector.broadcast %435 : vector<1x28xf32> to vector<16x28xf32>
    %512 = arith.mulf %510, %511 : vector<16x28xf32>
    %513 = vector.broadcast %436 : vector<1x28xf32> to vector<16x28xf32>
    %514 = arith.addf %512, %513 : vector<16x28xf32>
    %515 = arith.truncf %514 : vector<16x28xf32> to vector<16x28xbf16>
    %cst_187 = arith.constant dense<0.000000e+00> : vector<16x28xf32>
    %516 = tpu.matmul %515, %420, %cst_187 {dimension_numbers = #tpu.dot_dimension_numbers<[1], [0], [0], [1], [0, 0, 1, 1], [], []>} : vector<16x28xbf16>, vector<28x28xbf16>, vector<16x28xf32> -> vector<16x28xf32>
    %517 = vector.broadcast %441 : vector<1x28xf32> to vector<16x28xf32>
    %518 = arith.addf %516, %517 : vector<16x28xf32>
    %519 = vector.extract_strided_slice %418 {offsets = [1, 0, 0], sizes = [1, 3, 28], strides = [1, 1, 1]} : vector<3x3x28xf32> to vector<1x3x28xf32>
    %520 = vector.shape_cast %519 : vector<1x3x28xf32> to vector<3x28xf32>
    %521 = vector.extract_strided_slice %520 {offsets = [0, 0], sizes = [1, 28], strides = [1, 1]} : vector<3x28xf32> to vector<1x28xf32>
    %522 = vector.broadcast %521 : vector<1x28xf32> to vector<16x28xf32>
    %523 = arith.mulf %473, %522 : vector<16x28xf32>
    %524 = vector.extract_strided_slice %520 {offsets = [1, 0], sizes = [1, 28], strides = [1, 1]} : vector<3x28xf32> to vector<1x28xf32>
    %525 = vector.broadcast %524 : vector<1x28xf32> to vector<16x28xf32>
    %526 = arith.mulf %467, %525 : vector<16x28xf32>
    %527 = arith.addf %523, %526 : vector<16x28xf32>
    %528 = vector.extract_strided_slice %520 {offsets = [2, 0], sizes = [1, 28], strides = [1, 1]} : vector<3x28xf32> to vector<1x28xf32>
    %529 = vector.broadcast %528 : vector<1x28xf32> to vector<16x28xf32>
    %530 = arith.mulf %479, %529 : vector<16x28xf32>
    %531 = arith.addf %527, %530 : vector<16x28xf32>
    %532 = vector.broadcast %3 : vector<16x1xf32> to vector<16x28xf32>
    %533 = arith.mulf %531, %532 : vector<16x28xf32>
    %cst_188 = arith.constant dense<0.000000e+00> : vector<16xf32>
    %534 = vector.multi_reduction <add>, %533, %cst_188 [1] : vector<16x28xf32> to vector<16xf32>
    %535 = vector.shape_cast %534 : vector<16xf32> to vector<16x1xf32>
    %cst_189 = arith.constant 2.800000e+01 : f32
    %536 = vector.broadcast %cst_189 : f32 to vector<16x1xf32>
    %537 = arith.divf %535, %536 : vector<16x1xf32>
    %538 = vector.broadcast %537 : vector<16x1xf32> to vector<16x28xf32>
    %539 = arith.subf %533, %538 : vector<16x28xf32>
    %540 = arith.mulf %539, %539 : vector<16x28xf32>
    %cst_190 = arith.constant dense<0.000000e+00> : vector<16xf32>
    %541 = vector.multi_reduction <add>, %540, %cst_190 [1] : vector<16x28xf32> to vector<16xf32>
    %542 = vector.shape_cast %541 : vector<16xf32> to vector<16x1xf32>
    %cst_191 = arith.constant 2.800000e+01 : f32
    %543 = vector.broadcast %cst_191 : f32 to vector<16x1xf32>
    %544 = arith.divf %542, %543 : vector<16x1xf32>
    %cst_192 = arith.constant 9.99999974E-6 : f32
    %545 = vector.broadcast %cst_192 : f32 to vector<16x1xf32>
    %546 = arith.addf %544, %545 : vector<16x1xf32>
    %547 = math.sqrt %546 : vector<16x1xf32>
    %548 = vector.broadcast %547 : vector<16x1xf32> to vector<16x28xf32>
    %549 = arith.divf %539, %548 : vector<16x28xf32>
    %550 = vector.broadcast %437 : vector<1x28xf32> to vector<16x28xf32>
    %551 = arith.mulf %549, %550 : vector<16x28xf32>
    %552 = vector.broadcast %438 : vector<1x28xf32> to vector<16x28xf32>
    %553 = arith.addf %551, %552 : vector<16x28xf32>
    %554 = arith.truncf %553 : vector<16x28xf32> to vector<16x28xbf16>
    %cst_193 = arith.constant dense<0.000000e+00> : vector<16x28xf32>
    %555 = tpu.matmul %554, %422, %cst_193 {dimension_numbers = #tpu.dot_dimension_numbers<[1], [0], [0], [1], [0, 0, 1, 1], [], []>} : vector<16x28xbf16>, vector<28x28xbf16>, vector<16x28xf32> -> vector<16x28xf32>
    %556 = vector.broadcast %442 : vector<1x28xf32> to vector<16x28xf32>
    %557 = arith.addf %555, %556 : vector<16x28xf32>
    %558 = vector.extract_strided_slice %418 {offsets = [2, 0, 0], sizes = [1, 3, 28], strides = [1, 1, 1]} : vector<3x3x28xf32> to vector<1x3x28xf32>
    %559 = vector.shape_cast %558 : vector<1x3x28xf32> to vector<3x28xf32>
    %560 = vector.extract_strided_slice %559 {offsets = [0, 0], sizes = [1, 28], strides = [1, 1]} : vector<3x28xf32> to vector<1x28xf32>
    %561 = vector.broadcast %560 : vector<1x28xf32> to vector<16x28xf32>
    %562 = arith.mulf %473, %561 : vector<16x28xf32>
    %563 = vector.extract_strided_slice %559 {offsets = [1, 0], sizes = [1, 28], strides = [1, 1]} : vector<3x28xf32> to vector<1x28xf32>
    %564 = vector.broadcast %563 : vector<1x28xf32> to vector<16x28xf32>
    %565 = arith.mulf %467, %564 : vector<16x28xf32>
    %566 = arith.addf %562, %565 : vector<16x28xf32>
    %567 = vector.extract_strided_slice %559 {offsets = [2, 0], sizes = [1, 28], strides = [1, 1]} : vector<3x28xf32> to vector<1x28xf32>
    %568 = vector.broadcast %567 : vector<1x28xf32> to vector<16x28xf32>
    %569 = arith.mulf %479, %568 : vector<16x28xf32>
    %570 = arith.addf %566, %569 : vector<16x28xf32>
    %571 = vector.broadcast %3 : vector<16x1xf32> to vector<16x28xf32>
    %572 = arith.mulf %570, %571 : vector<16x28xf32>
    %cst_194 = arith.constant dense<0.000000e+00> : vector<16xf32>
    %573 = vector.multi_reduction <add>, %572, %cst_194 [1] : vector<16x28xf32> to vector<16xf32>
    %574 = vector.shape_cast %573 : vector<16xf32> to vector<16x1xf32>
    %cst_195 = arith.constant 2.800000e+01 : f32
    %575 = vector.broadcast %cst_195 : f32 to vector<16x1xf32>
    %576 = arith.divf %574, %575 : vector<16x1xf32>
    %577 = vector.broadcast %576 : vector<16x1xf32> to vector<16x28xf32>
    %578 = arith.subf %572, %577 : vector<16x28xf32>
    %579 = arith.mulf %578, %578 : vector<16x28xf32>
    %cst_196 = arith.constant dense<0.000000e+00> : vector<16xf32>
    %580 = vector.multi_reduction <add>, %579, %cst_196 [1] : vector<16x28xf32> to vector<16xf32>
    %581 = vector.shape_cast %580 : vector<16xf32> to vector<16x1xf32>
    %cst_197 = arith.constant 2.800000e+01 : f32
    %582 = vector.broadcast %cst_197 : f32 to vector<16x1xf32>
    %583 = arith.divf %581, %582 : vector<16x1xf32>
    %cst_198 = arith.constant 9.99999974E-6 : f32
    %584 = vector.broadcast %cst_198 : f32 to vector<16x1xf32>
    %585 = arith.addf %583, %584 : vector<16x1xf32>
    %586 = math.sqrt %585 : vector<16x1xf32>
    %587 = vector.broadcast %586 : vector<16x1xf32> to vector<16x28xf32>
    %588 = arith.divf %578, %587 : vector<16x28xf32>
    %589 = vector.broadcast %439 : vector<1x28xf32> to vector<16x28xf32>
    %590 = arith.mulf %588, %589 : vector<16x28xf32>
    %591 = vector.broadcast %440 : vector<1x28xf32> to vector<16x28xf32>
    %592 = arith.addf %590, %591 : vector<16x28xf32>
    %593 = arith.truncf %592 : vector<16x28xf32> to vector<16x28xbf16>
    %cst_199 = arith.constant dense<0.000000e+00> : vector<16x28xf32>
    %594 = tpu.matmul %593, %424, %cst_199 {dimension_numbers = #tpu.dot_dimension_numbers<[1], [0], [0], [1], [0, 0, 1, 1], [], []>} : vector<16x28xbf16>, vector<28x28xbf16>, vector<16x28xf32> -> vector<16x28xf32>
    %595 = vector.broadcast %443 : vector<1x28xf32> to vector<16x28xf32>
    %596 = arith.addf %594, %595 : vector<16x28xf32>
    %597 = tpu.iota {dimensions = array<i32: 1>} : vector<1x28xi32>
    %cst_200 = arith.constant 0.377964467 : f32
    %598 = vector.broadcast %cst_200 : f32 to vector<16x28xf32>
    %599 = arith.mulf %518, %598 : vector<16x28xf32>
    %c0_i32_201 = arith.constant 0 : i32
    %600 = vector.broadcast %c0_i32_201 : i32 to vector<1x28xi32>
    %601 = arith.cmpi sge, %597, %600 : vector<1x28xi32>
    %c7_i32_202 = arith.constant 7 : i32
    %602 = vector.broadcast %c7_i32_202 : i32 to vector<1x28xi32>
    %603 = arith.cmpi slt, %597, %602 : vector<1x28xi32>
    %604 = arith.andi %601, %603 : vector<1x28xi1>
    %605 = arith.extui %604 : vector<1x28xi1> to vector<1x28xi32>
    %606 = arith.sitofp %605 : vector<1x28xi32> to vector<1x28xf32>
    %c7_i32_203 = arith.constant 7 : i32
    %607 = vector.broadcast %c7_i32_203 : i32 to vector<1x28xi32>
    %608 = arith.cmpi sge, %597, %607 : vector<1x28xi32>
    %c14_i32_204 = arith.constant 14 : i32
    %609 = vector.broadcast %c14_i32_204 : i32 to vector<1x28xi32>
    %610 = arith.cmpi slt, %597, %609 : vector<1x28xi32>
    %611 = arith.andi %608, %610 : vector<1x28xi1>
    %612 = arith.extui %611 : vector<1x28xi1> to vector<1x28xi32>
    %613 = arith.sitofp %612 : vector<1x28xi32> to vector<1x28xf32>
    %c14_i32_205 = arith.constant 14 : i32
    %614 = vector.broadcast %c14_i32_205 : i32 to vector<1x28xi32>
    %615 = arith.cmpi sge, %597, %614 : vector<1x28xi32>
    %c21_i32_206 = arith.constant 21 : i32
    %616 = vector.broadcast %c21_i32_206 : i32 to vector<1x28xi32>
    %617 = arith.cmpi slt, %597, %616 : vector<1x28xi32>
    %618 = arith.andi %615, %617 : vector<1x28xi1>
    %619 = arith.extui %618 : vector<1x28xi1> to vector<1x28xi32>
    %620 = arith.sitofp %619 : vector<1x28xi32> to vector<1x28xf32>
    %c21_i32_207 = arith.constant 21 : i32
    %621 = vector.broadcast %c21_i32_207 : i32 to vector<1x28xi32>
    %622 = arith.cmpi sge, %597, %621 : vector<1x28xi32>
    %c28_i32_208 = arith.constant 28 : i32
    %623 = vector.broadcast %c28_i32_208 : i32 to vector<1x28xi32>
    %624 = arith.cmpi slt, %597, %623 : vector<1x28xi32>
    %625 = arith.andi %622, %624 : vector<1x28xi1>
    %626 = arith.extui %625 : vector<1x28xi1> to vector<1x28xi32>
    %627 = arith.sitofp %626 : vector<1x28xi32> to vector<1x28xf32>
    %628 = vector.broadcast %606 : vector<1x28xf32> to vector<16x28xf32>
    %629 = arith.mulf %599, %628 : vector<16x28xf32>
    %630 = vector.broadcast %613 : vector<1x28xf32> to vector<16x28xf32>
    %631 = arith.mulf %599, %630 : vector<16x28xf32>
    %632 = vector.broadcast %620 : vector<1x28xf32> to vector<16x28xf32>
    %633 = arith.mulf %599, %632 : vector<16x28xf32>
    %634 = vector.broadcast %627 : vector<1x28xf32> to vector<16x28xf32>
    %635 = arith.mulf %599, %634 : vector<16x28xf32>
    %636 = tpu.concatenate %629, %631, %633, %635 in 0 : vector<16x28xf32>, vector<16x28xf32>, vector<16x28xf32>, vector<16x28xf32> -> vector<64x28xf32>
    %637 = arith.truncf %636 : vector<64x28xf32> to vector<64x28xbf16>
    %638 = arith.truncf %557 : vector<16x28xf32> to vector<16x28xbf16>
    %cst_209 = arith.constant dense<0.000000e+00> : vector<64x16xf32>
    %639 = tpu.matmul %637, %638, %cst_209 {dimension_numbers = #tpu.dot_dimension_numbers<[1], [1], [0], [0], [0, 0, 1, 0], [], []>} : vector<64x28xbf16>, vector<16x28xbf16>, vector<64x16xf32> -> vector<64x16xf32>
    %cst_210 = arith.constant 0.000000e+00 : f32
    %640 = vector.broadcast %cst_210 : f32 to vector<1x16xf32>
    %641 = arith.cmpf ogt, %5, %640 : vector<1x16xf32>
    %cst_211 = arith.constant -1.000000e+30 : f32
    %642 = vector.shape_cast %641 : vector<1x16xi1> to vector<1x16xi1>
    %643 = vector.broadcast %642 : vector<1x16xi1> to vector<64x16xi1>
    %644 = vector.broadcast %cst_211 : f32 to vector<64x16xf32>
    %645 = arith.select %643, %639, %644 : vector<64x16xi1>, vector<64x16xf32>
    %cst_212 = arith.constant dense<0xFF800000> : vector<64xf32>
    %646 = vector.multi_reduction <maximumf>, %645, %cst_212 [1] : vector<64x16xf32> to vector<64xf32>
    %647 = vector.shape_cast %646 : vector<64xf32> to vector<64x1xf32>
    %648 = vector.broadcast %647 : vector<64x1xf32> to vector<64x16xf32>
    %649 = arith.subf %645, %648 : vector<64x16xf32>
    %650 = math.exp %649 : vector<64x16xf32>
    %cst_213 = arith.constant dense<0.000000e+00> : vector<64xf32>
    %651 = vector.multi_reduction <add>, %650, %cst_213 [1] : vector<64x16xf32> to vector<64xf32>
    %652 = vector.shape_cast %651 : vector<64xf32> to vector<64x1xf32>
    %653 = tpu.reciprocal %652 {approx = true} : vector<64x1xf32> -> vector<64x1xf32>
    %654 = vector.broadcast %653 : vector<64x1xf32> to vector<64x16xf32>
    %655 = arith.mulf %650, %654 : vector<64x16xf32>
    %656 = vector.broadcast %5 : vector<1x16xf32> to vector<64x16xf32>
    %657 = arith.mulf %655, %656 : vector<64x16xf32>
    %658 = arith.truncf %657 : vector<64x16xf32> to vector<64x16xbf16>
    %659 = arith.truncf %596 : vector<16x28xf32> to vector<16x28xbf16>
    %cst_214 = arith.constant dense<0.000000e+00> : vector<64x28xf32>
    %660 = tpu.matmul %658, %659, %cst_214 {dimension_numbers = #tpu.dot_dimension_numbers<[1], [0], [0], [1], [0, 0, 1, 1], [], []>} : vector<64x16xbf16>, vector<16x28xbf16>, vector<64x28xf32> -> vector<64x28xf32>
    %cst_215 = arith.constant 0.000000e+00 : f32
    %661 = vector.broadcast %cst_215 : f32 to vector<16x28xf32>
    %662 = vector.extract_strided_slice %660 {offsets = [0, 0], sizes = [16, 28], strides = [1, 1]} : vector<64x28xf32> to vector<16x28xf32>
    %663 = vector.broadcast %606 : vector<1x28xf32> to vector<16x28xf32>
    %664 = arith.mulf %662, %663 : vector<16x28xf32>
    %665 = arith.addf %661, %664 : vector<16x28xf32>
    %666 = vector.extract_strided_slice %660 {offsets = [16, 0], sizes = [16, 28], strides = [1, 1]} : vector<64x28xf32> to vector<16x28xf32>
    %667 = vector.broadcast %613 : vector<1x28xf32> to vector<16x28xf32>
    %668 = arith.mulf %666, %667 : vector<16x28xf32>
    %669 = arith.addf %665, %668 : vector<16x28xf32>
    %670 = vector.extract_strided_slice %660 {offsets = [32, 0], sizes = [16, 28], strides = [1, 1]} : vector<64x28xf32> to vector<16x28xf32>
    %671 = vector.broadcast %620 : vector<1x28xf32> to vector<16x28xf32>
    %672 = arith.mulf %670, %671 : vector<16x28xf32>
    %673 = arith.addf %669, %672 : vector<16x28xf32>
    %674 = vector.extract_strided_slice %660 {offsets = [48, 0], sizes = [16, 28], strides = [1, 1]} : vector<64x28xf32> to vector<16x28xf32>
    %675 = vector.broadcast %627 : vector<1x28xf32> to vector<16x28xf32>
    %676 = arith.mulf %674, %675 : vector<16x28xf32>
    %677 = arith.addf %673, %676 : vector<16x28xf32>
    %678 = arith.truncf %677 : vector<16x28xf32> to vector<16x28xbf16>
    %cst_216 = arith.constant dense<0.000000e+00> : vector<16x28xf32>
    %679 = tpu.matmul %678, %426, %cst_216 {dimension_numbers = #tpu.dot_dimension_numbers<[1], [0], [0], [1], [0, 0, 1, 1], [], []>} : vector<16x28xbf16>, vector<28x28xbf16>, vector<16x28xf32> -> vector<16x28xf32>
    %680 = vector.broadcast %444 : vector<1x28xf32> to vector<16x28xf32>
    %681 = arith.addf %679, %680 : vector<16x28xf32>
    %682 = vector.broadcast %3 : vector<16x1xf32> to vector<16x28xf32>
    %683 = arith.mulf %681, %682 : vector<16x28xf32>
    %684 = vector.broadcast %3 : vector<16x1xf32> to vector<16x28xf32>
    %685 = arith.mulf %414, %684 : vector<16x28xf32>
    %686 = arith.addf %685, %683 : vector<16x28xf32>
    %cst_217 = arith.constant dense<0.000000e+00> : vector<16xf32>
    %687 = vector.multi_reduction <add>, %686, %cst_217 [1] : vector<16x28xf32> to vector<16xf32>
    %688 = vector.shape_cast %687 : vector<16xf32> to vector<16x1xf32>
    %cst_218 = arith.constant 2.800000e+01 : f32
    %689 = vector.broadcast %cst_218 : f32 to vector<16x1xf32>
    %690 = arith.divf %688, %689 : vector<16x1xf32>
    %691 = vector.broadcast %690 : vector<16x1xf32> to vector<16x28xf32>
    %692 = arith.subf %686, %691 : vector<16x28xf32>
    %693 = arith.mulf %692, %692 : vector<16x28xf32>
    %cst_219 = arith.constant dense<0.000000e+00> : vector<16xf32>
    %694 = vector.multi_reduction <add>, %693, %cst_219 [1] : vector<16x28xf32> to vector<16xf32>
    %695 = vector.shape_cast %694 : vector<16xf32> to vector<16x1xf32>
    %cst_220 = arith.constant 2.800000e+01 : f32
    %696 = vector.broadcast %cst_220 : f32 to vector<16x1xf32>
    %697 = arith.divf %695, %696 : vector<16x1xf32>
    %cst_221 = arith.constant 9.99999974E-6 : f32
    %698 = vector.broadcast %cst_221 : f32 to vector<16x1xf32>
    %699 = arith.addf %697, %698 : vector<16x1xf32>
    %700 = math.sqrt %699 : vector<16x1xf32>
    %701 = vector.broadcast %700 : vector<16x1xf32> to vector<16x28xf32>
    %702 = arith.divf %692, %701 : vector<16x28xf32>
    %703 = vector.broadcast %445 : vector<1x28xf32> to vector<16x28xf32>
    %704 = arith.mulf %702, %703 : vector<16x28xf32>
    %705 = vector.broadcast %446 : vector<1x28xf32> to vector<16x28xf32>
    %706 = arith.addf %704, %705 : vector<16x28xf32>
    %707 = arith.truncf %706 : vector<16x28xf32> to vector<16x28xbf16>
    %cst_222 = arith.constant dense<0.000000e+00> : vector<16x112xf32>
    %708 = tpu.matmul %707, %428, %cst_222 {dimension_numbers = #tpu.dot_dimension_numbers<[1], [0], [0], [1], [0, 0, 1, 1], [], []>} : vector<16x28xbf16>, vector<28x112xbf16>, vector<16x112xf32> -> vector<16x112xf32>
    %709 = vector.broadcast %430 : vector<1x112xf32> to vector<16x112xf32>
    %710 = arith.addf %708, %709 : vector<16x112xf32>
    %cst_223 = arith.constant 0.707106769 : f32
    %711 = vector.broadcast %cst_223 : f32 to vector<16x112xf32>
    %712 = arith.mulf %710, %711 : vector<16x112xf32>
    %713 = math.absf %712 : vector<16x112xf32>
    %cst_224 = arith.constant 0.327591091 : f32
    %714 = vector.broadcast %cst_224 : f32 to vector<16x112xf32>
    %715 = arith.mulf %714, %713 : vector<16x112xf32>
    %cst_225 = arith.constant 1.000000e+00 : f32
    %716 = vector.broadcast %cst_225 : f32 to vector<16x112xf32>
    %717 = arith.addf %716, %715 : vector<16x112xf32>
    %cst_226 = arith.constant 1.000000e+00 : f32
    %718 = vector.broadcast %cst_226 : f32 to vector<16x112xf32>
    %719 = arith.divf %718, %717 : vector<16x112xf32>
    %cst_227 = arith.constant 1.06140542 : f32
    %720 = vector.broadcast %cst_227 : f32 to vector<16x112xf32>
    %721 = arith.mulf %719, %720 : vector<16x112xf32>
    %cst_228 = arith.constant -1.45315206 : f32
    %722 = vector.broadcast %cst_228 : f32 to vector<16x112xf32>
    %723 = arith.addf %722, %721 : vector<16x112xf32>
    %724 = arith.mulf %719, %723 : vector<16x112xf32>
    %cst_229 = arith.constant 1.42141378 : f32
    %725 = vector.broadcast %cst_229 : f32 to vector<16x112xf32>
    %726 = arith.addf %725, %724 : vector<16x112xf32>
    %727 = arith.mulf %719, %726 : vector<16x112xf32>
    %cst_230 = arith.constant -0.284496725 : f32
    %728 = vector.broadcast %cst_230 : f32 to vector<16x112xf32>
    %729 = arith.addf %728, %727 : vector<16x112xf32>
    %730 = arith.mulf %719, %729 : vector<16x112xf32>
    %cst_231 = arith.constant 0.254829586 : f32
    %731 = vector.broadcast %cst_231 : f32 to vector<16x112xf32>
    %732 = arith.addf %731, %730 : vector<16x112xf32>
    %733 = arith.mulf %719, %732 : vector<16x112xf32>
    %cst_232 = arith.constant 0.000000e+00 : f32
    %734 = vector.broadcast %cst_232 : f32 to vector<16x112xf32>
    %735 = arith.subf %734, %713 : vector<16x112xf32>
    %736 = arith.mulf %735, %713 : vector<16x112xf32>
    %737 = math.exp %736 : vector<16x112xf32>
    %738 = arith.mulf %733, %737 : vector<16x112xf32>
    %cst_233 = arith.constant 1.000000e+00 : f32
    %739 = vector.broadcast %cst_233 : f32 to vector<16x112xf32>
    %740 = arith.subf %739, %738 : vector<16x112xf32>
    %cst_234 = arith.constant 0.000000e+00 : f32
    %741 = vector.broadcast %cst_234 : f32 to vector<16x112xf32>
    %742 = arith.cmpf oge, %712, %741 : vector<16x112xf32>
    %cst_235 = arith.constant 0.000000e+00 : f32
    %743 = vector.broadcast %cst_235 : f32 to vector<16x112xf32>
    %744 = arith.subf %743, %740 : vector<16x112xf32>
    %745 = arith.select %742, %740, %744 : vector<16x112xi1>, vector<16x112xf32>
    %cst_236 = arith.constant 5.000000e-01 : f32
    %746 = vector.broadcast %cst_236 : f32 to vector<16x112xf32>
    %747 = arith.mulf %746, %710 : vector<16x112xf32>
    %cst_237 = arith.constant 1.000000e+00 : f32
    %748 = vector.broadcast %cst_237 : f32 to vector<16x112xf32>
    %749 = arith.addf %748, %745 : vector<16x112xf32>
    %750 = arith.mulf %747, %749 : vector<16x112xf32>
    %751 = arith.truncf %750 : vector<16x112xf32> to vector<16x112xbf16>
    %cst_238 = arith.constant dense<0.000000e+00> : vector<16x28xf32>
    %752 = tpu.matmul %751, %432, %cst_238 {dimension_numbers = #tpu.dot_dimension_numbers<[1], [0], [0], [1], [0, 0, 1, 1], [], []>} : vector<16x112xbf16>, vector<112x28xbf16>, vector<16x28xf32> -> vector<16x28xf32>
    %753 = vector.broadcast %447 : vector<1x28xf32> to vector<16x28xf32>
    %754 = arith.addf %752, %753 : vector<16x28xf32>
    %755 = vector.broadcast %3 : vector<16x1xf32> to vector<16x28xf32>
    %756 = arith.mulf %754, %755 : vector<16x28xf32>
    %757 = arith.addf %686, %756 : vector<16x28xf32>
    %cst_239 = arith.constant 0.000000e+00 : f32
    %758 = vector.broadcast %cst_239 : f32 to vector<1x16x32xf32>
    %c0_240 = arith.constant 0 : index
    %c0_241 = arith.constant 0 : index
    %c0_242 = arith.constant 0 : index
    %759 = vector.load %arg14[%c0_240, %c0_241, %c0_242] : memref<1x16x32xf32, #tpu.memory_space<vmem>>, vector<1x16x32xf32>
    tpu.vector_store %arg14[%c0_240, %c0_241, %c0_242], %758 {strides = array<i32>} : memref<1x16x32xf32, #tpu.memory_space<vmem>>, vector<1x16x32xf32>,
    %c0_243 = arith.constant 0 : index
    %c0_244 = arith.constant 0 : index
    %c0_245 = arith.constant 0 : index
    %760 = vector.load %arg14[%c0_243, %c0_244, %c0_245] : memref<1x16x32xf32, #tpu.memory_space<vmem>>, vector<1x16x28xf32>
    %761 = vector.shape_cast %760 : vector<1x16x28xf32> to vector<16x28xf32>
    %762 = vector.shape_cast %757 : vector<16x28xf32> to vector<1x16x28xf32>
    tpu.vector_store %arg14[%c0_243, %c0_244, %c0_245], %762 {strides = array<i32>} : memref<1x16x32xf32, #tpu.memory_space<vmem>>, vector<1x16x28xf32>,
    return
  }
  func.func @transform_0(%arg0: i32) -> (i32, i32, i32) {
    %c0_i32 = arith.constant 0 : i32
    %c0_i32_0 = arith.constant 0 : i32
    %c0_i32_1 = arith.constant 0 : i32
    return %arg0, %c0_i32, %c0_i32_0 : i32, i32, i32
  }
  func.func @transform_1(%arg0: i32) -> (i32, i32, i32) {
    %c0_i32 = arith.constant 0 : i32
    %c0_i32_0 = arith.constant 0 : i32
    %c0_i32_1 = arith.constant 0 : i32
    return %arg0, %c0_i32, %c0_i32_0 : i32, i32, i32
  }
  func.func @transform_2(%arg0: i32) -> (i32, i32, i32) {
    %c0_i32 = arith.constant 0 : i32
    %c0_i32_0 = arith.constant 0 : i32
    %c0_i32_1 = arith.constant 0 : i32
    return %arg0, %c0_i32, %c0_i32_0 : i32, i32, i32
  }
  func.func @transform_3(%arg0: i32) -> (i32, i32, i32) {
    %c0_i32 = arith.constant 0 : i32
    %c0_i32_0 = arith.constant 0 : i32
    %c0_i32_1 = arith.constant 0 : i32
    %c0_i32_2 = arith.constant 0 : i32
    return %c0_i32, %c0_i32_0, %c0_i32_1 : i32, i32, i32
  }
  func.func @transform_4(%arg0: i32) -> (i32, i32) {
    %c0_i32 = arith.constant 0 : i32
    %c0_i32_0 = arith.constant 0 : i32
    %c0_i32_1 = arith.constant 0 : i32
    return %c0_i32, %c0_i32_0 : i32, i32
  }
  func.func @transform_5(%arg0: i32) -> (i32, i32, i32) {
    %c0_i32 = arith.constant 0 : i32
    %c0_i32_0 = arith.constant 0 : i32
    %c0_i32_1 = arith.constant 0 : i32
    %c0_i32_2 = arith.constant 0 : i32
    return %c0_i32, %c0_i32_0, %c0_i32_1 : i32, i32, i32
  }
  func.func @transform_6(%arg0: i32) -> (i32, i32) {
    %c0_i32 = arith.constant 0 : i32
    %c0_i32_0 = arith.constant 0 : i32
    %c0_i32_1 = arith.constant 0 : i32
    return %c0_i32, %c0_i32_0 : i32, i32
  }
  func.func @transform_7(%arg0: i32) -> (i32, i32, i32) {
    %c0_i32 = arith.constant 0 : i32
    %c0_i32_0 = arith.constant 0 : i32
    %c0_i32_1 = arith.constant 0 : i32
    %c0_i32_2 = arith.constant 0 : i32
    return %c0_i32, %c0_i32_0, %c0_i32_1 : i32, i32, i32
  }
  func.func @transform_8(%arg0: i32) -> (i32, i32, i32, i32) {
    %c0_i32 = arith.constant 0 : i32
    %c0_i32_0 = arith.constant 0 : i32
    %c0_i32_1 = arith.constant 0 : i32
    %c0_i32_2 = arith.constant 0 : i32
    %c0_i32_3 = arith.constant 0 : i32
    return %c0_i32, %c0_i32_0, %c0_i32_1, %c0_i32_2 : i32, i32, i32, i32
  }
  func.func @transform_9(%arg0: i32) -> (i32, i32, i32, i32) {
    %c0_i32 = arith.constant 0 : i32
    %c0_i32_0 = arith.constant 0 : i32
    %c0_i32_1 = arith.constant 0 : i32
    %c0_i32_2 = arith.constant 0 : i32
    %c0_i32_3 = arith.constant 0 : i32
    return %c0_i32, %c0_i32_0, %c0_i32_1, %c0_i32_2 : i32, i32, i32, i32
  }
  func.func @transform_10(%arg0: i32) -> (i32, i32, i32) {
    %c0_i32 = arith.constant 0 : i32
    %c0_i32_0 = arith.constant 0 : i32
    %c0_i32_1 = arith.constant 0 : i32
    %c0_i32_2 = arith.constant 0 : i32
    return %c0_i32, %c0_i32_0, %c0_i32_1 : i32, i32, i32
  }
  func.func @transform_11(%arg0: i32) -> (i32, i32, i32) {
    %c0_i32 = arith.constant 0 : i32
    %c0_i32_0 = arith.constant 0 : i32
    %c0_i32_1 = arith.constant 0 : i32
    %c0_i32_2 = arith.constant 0 : i32
    return %c0_i32, %c0_i32_0, %c0_i32_1 : i32, i32, i32
  }
  func.func @transform_12(%arg0: i32) -> (i32, i32, i32) {
    %c0_i32 = arith.constant 0 : i32
    %c0_i32_0 = arith.constant 0 : i32
    %c0_i32_1 = arith.constant 0 : i32
    %c0_i32_2 = arith.constant 0 : i32
    return %c0_i32, %c0_i32_0, %c0_i32_1 : i32, i32, i32
  }
  func.func @transform_13(%arg0: i32) -> (i32, i32, i32) {
    %c0_i32 = arith.constant 0 : i32
    %c0_i32_0 = arith.constant 0 : i32
    %c0_i32_1 = arith.constant 0 : i32
    return %arg0, %c0_i32, %c0_i32_0 : i32, i32, i32
  }
}

module attributes {stable_mosaic.version = 11 : i64} {
  func.func @_branch_kernel(%arg0: i32, %arg1: memref<1x16x32xf32, #tpu.memory_space<vmem>>, %arg2: memref<1x128x4xf32, #tpu.memory_space<vmem>>, %arg3: memref<1x128x4xf32, #tpu.memory_space<vmem>>, %arg4: memref<1x128x128xbf16, #tpu.memory_space<vmem>>, %arg5: memref<1x8x1xf32, #tpu.memory_space<vmem>>, %arg6: memref<1x1x8xf32, #tpu.memory_space<vmem>>, %arg7: memref<1x4x1xf32, #tpu.memory_space<vmem>>, %arg8: memref<1x1x4xf32, #tpu.memory_space<vmem>>, %arg9: memref<4x4xf32, #tpu.memory_space<vmem>>, %arg10: memref<1x4xf32, #tpu.memory_space<vmem>>, %arg11: memref<4x32xf32, #tpu.memory_space<vmem>>, %arg12: memref<2x15x32xf32, #tpu.memory_space<vmem>>, %arg13: memref<2x3x3x32xf32, #tpu.memory_space<vmem>>, %arg14: memref<2x4x32x32xbf16, #tpu.memory_space<vmem>>, %arg15: memref<2x32x128xbf16, #tpu.memory_space<vmem>>, %arg16: memref<2x1x128xf32, #tpu.memory_space<vmem>>, %arg17: memref<2x128x32xbf16, #tpu.memory_space<vmem>>, %arg18: memref<1x16x32xf32, #tpu.memory_space<vmem>>, %arg19: memref<1x8x32xf32, #tpu.memory_space<vmem>>, %arg20: memref<1x4x32xf32, #tpu.memory_space<vmem>>) attributes {dimension_semantics = [#tpu.dimension_semantics<parallel>], iteration_bounds = array<i64: 2>, scalar_prefetch = 0 : i64, scratch_operands = 0 : i64, tpu.core_type = #tpu.core_type<tc>, window_params = [{transform_indices = @transform_0, window_bounds = array<i64: 1, 16, 32>}, {transform_indices = @transform_1, window_bounds = array<i64: 1, 128, 4>}, {transform_indices = @transform_2, window_bounds = array<i64: 1, 128, 4>}, {transform_indices = @transform_3, window_bounds = array<i64: 1, 128, 128>}, {transform_indices = @transform_4, window_bounds = array<i64: 1, 8, 1>}, {transform_indices = @transform_5, window_bounds = array<i64: 1, 1, 8>}, {transform_indices = @transform_6, window_bounds = array<i64: 1, 4, 1>}, {transform_indices = @transform_7, window_bounds = array<i64: 1, 1, 4>}, {pipeline_mode = #tpu.pipeline_mode<synchronous>, transform_indices = @transform_8, window_bounds = array<i64: 4, 4>}, {pipeline_mode = #tpu.pipeline_mode<synchronous>, transform_indices = @transform_9, window_bounds = array<i64: 1, 4>}, {pipeline_mode = #tpu.pipeline_mode<synchronous>, transform_indices = @transform_10, window_bounds = array<i64: 4, 32>}, {pipeline_mode = #tpu.pipeline_mode<synchronous>, transform_indices = @transform_11, window_bounds = array<i64: 2, 15, 32>}, {pipeline_mode = #tpu.pipeline_mode<synchronous>, transform_indices = @transform_12, window_bounds = array<i64: 2, 3, 3, 32>}, {pipeline_mode = #tpu.pipeline_mode<synchronous>, transform_indices = @transform_13, window_bounds = array<i64: 2, 4, 32, 32>}, {pipeline_mode = #tpu.pipeline_mode<synchronous>, transform_indices = @transform_14, window_bounds = array<i64: 2, 32, 128>}, {pipeline_mode = #tpu.pipeline_mode<synchronous>, transform_indices = @transform_15, window_bounds = array<i64: 2, 1, 128>}, {pipeline_mode = #tpu.pipeline_mode<synchronous>, transform_indices = @transform_16, window_bounds = array<i64: 2, 128, 32>}, {transform_indices = @transform_17, window_bounds = array<i64: 1, 16, 32>}, {transform_indices = @transform_18, window_bounds = array<i64: 1, 8, 32>}, {transform_indices = @transform_19, window_bounds = array<i64: 1, 4, 32>}]} {
    %c0 = arith.constant 0 : index
    %c0_0 = arith.constant 0 : index
    %c0_1 = arith.constant 0 : index
    %0 = vector.load %arg2[%c0, %c0_0, %c0_1] : memref<1x128x4xf32, #tpu.memory_space<vmem>>, vector<1x128x4xf32>
    %1 = vector.shape_cast %0 : vector<1x128x4xf32> to vector<128x4xf32>
    %c0_2 = arith.constant 0 : index
    %c0_3 = arith.constant 0 : index
    %2 = vector.load %arg9[%c0_2, %c0_3] : memref<4x4xf32, #tpu.memory_space<vmem>>, vector<4x4xf32>
    %cst = arith.constant dense<0.000000e+00> : vector<128x4xf32>
    %3 = tpu.matmul %1, %2, %cst {dimension_numbers = #tpu.dot_dimension_numbers<[1], [0], [0], [1], [0, 0, 1, 1], [], []>} : vector<128x4xf32>, vector<4x4xf32>, vector<128x4xf32> -> vector<128x4xf32>
    %c0_4 = arith.constant 0 : index
    %c0_5 = arith.constant 0 : index
    %4 = vector.load %arg10[%c0_4, %c0_5] : memref<1x4xf32, #tpu.memory_space<vmem>>, vector<1x4xf32>
    %5 = vector.broadcast %4 : vector<1x4xf32> to vector<128x4xf32>
    %6 = arith.addf %3, %5 : vector<128x4xf32>
    %c0_6 = arith.constant 0 : index
    %c0_7 = arith.constant 0 : index
    %c0_8 = arith.constant 0 : index
    %7 = vector.load %arg3[%c0_6, %c0_7, %c0_8] : memref<1x128x4xf32, #tpu.memory_space<vmem>>, vector<1x128x4xf32>
    %8 = vector.shape_cast %7 : vector<1x128x4xf32> to vector<128x4xf32>
    %9 = arith.addf %6, %8 : vector<128x4xf32>
    %c0_9 = arith.constant 0 : index
    %c0_10 = arith.constant 0 : index
    %c0_11 = arith.constant 0 : index
    %10 = vector.load %arg4[%c0_9, %c0_10, %c0_11] : memref<1x128x128xbf16, #tpu.memory_space<vmem>>, vector<1x128x128xbf16>
    %11 = vector.shape_cast %10 : vector<1x128x128xbf16> to vector<128x128xbf16>
    %12 = arith.truncf %9 : vector<128x4xf32> to vector<128x4xbf16>
    %cst_12 = arith.constant dense<0.000000e+00> : vector<128x4xf32>
    %13 = tpu.matmul %11, %12, %cst_12 {dimension_numbers = #tpu.dot_dimension_numbers<[1], [0], [0], [1], [0, 0, 1, 1], [], []>} : vector<128x128xbf16>, vector<128x4xbf16>, vector<128x4xf32> -> vector<128x4xf32>
    %c0_13 = arith.constant 0 : index
    %c0_14 = arith.constant 0 : index
    %14 = vector.load %arg11[%c0_13, %c0_14] : memref<4x32xf32, #tpu.memory_space<vmem>>, vector<4x32xf32>
    %cst_15 = arith.constant dense<0.000000e+00> : vector<128x32xf32>
    %15 = tpu.matmul %13, %14, %cst_15 {dimension_numbers = #tpu.dot_dimension_numbers<[1], [0], [0], [1], [0, 0, 1, 1], [], []>} : vector<128x4xf32>, vector<4x32xf32>, vector<128x32xf32> -> vector<128x32xf32>
    %cst_16 = arith.constant 0.000000e+00 : f32
    %16 = vector.broadcast %cst_16 : f32 to vector<128x32xf32>
    %17 = arith.maximumf %15, %16 : vector<128x32xf32>
    %18 = tpu.iota {dimensions = array<i32: 0>} : vector<16x128xi32>
    %19 = tpu.iota {dimensions = array<i32: 1>} : vector<16x128xi32>
    %c8_i32 = arith.constant 8 : i32
    %20 = vector.broadcast %c8_i32 : i32 to vector<16x128xi32>
    %21 = arith.muli %18, %20 : vector<16x128xi32>
    %22 = arith.cmpi sge, %19, %21 : vector<16x128xi32>
    %c1_i32 = arith.constant 1 : i32
    %23 = vector.broadcast %c1_i32 : i32 to vector<16x128xi32>
    %24 = arith.addi %18, %23 : vector<16x128xi32>
    %c8_i32_17 = arith.constant 8 : i32
    %25 = vector.broadcast %c8_i32_17 : i32 to vector<16x128xi32>
    %26 = arith.muli %24, %25 : vector<16x128xi32>
    %27 = arith.cmpi slt, %19, %26 : vector<16x128xi32>
    %28 = arith.andi %22, %27 : vector<16x128xi1>
    %cst_18 = arith.constant 1.250000e-01 : f32
    %cst_19 = arith.constant 0.000000e+00 : f32
    %29 = vector.broadcast %cst_18 : f32 to vector<16x128xf32>
    %30 = vector.broadcast %cst_19 : f32 to vector<16x128xf32>
    %31 = arith.select %28, %29, %30 : vector<16x128xi1>, vector<16x128xf32>
    %c0_20 = arith.constant 0 : index
    %c0_21 = arith.constant 0 : index
    %c0_22 = arith.constant 0 : index
    %32 = vector.load %arg1[%c0_20, %c0_21, %c0_22] : memref<1x16x32xf32, #tpu.memory_space<vmem>>, vector<1x16x32xf32>
    %33 = vector.shape_cast %32 : vector<1x16x32xf32> to vector<16x32xf32>
    %cst_23 = arith.constant dense<0.000000e+00> : vector<16x32xf32>
    %34 = tpu.matmul %31, %17, %cst_23 {dimension_numbers = #tpu.dot_dimension_numbers<[1], [0], [0], [1], [0, 0, 1, 1], [], []>} : vector<16x128xf32>, vector<128x32xf32>, vector<16x32xf32> -> vector<16x32xf32>
    %35 = arith.addf %33, %34 : vector<16x32xf32>
    %36 = vector.shape_cast %35 : vector<16x32xf32> to vector<1x16x32xf32>
    %c0_24 = arith.constant 0 : index
    %c0_25 = arith.constant 0 : index
    %c0_26 = arith.constant 0 : index
    %37 = vector.load %arg18[%c0_24, %c0_25, %c0_26] : memref<1x16x32xf32, #tpu.memory_space<vmem>>, vector<1x16x32xf32>
    tpu.vector_store %arg18[%c0_24, %c0_25, %c0_26], %36 {strides = array<i32>} : memref<1x16x32xf32, #tpu.memory_space<vmem>>, vector<1x16x32xf32>,
    %c0_27 = arith.constant 0 : index
    %c0_28 = arith.constant 0 : index
    %c0_29 = arith.constant 0 : index
    %38 = vector.load %arg5[%c0_27, %c0_28, %c0_29] : memref<1x8x1xf32, #tpu.memory_space<vmem>>, vector<1x8x1xf32>
    %39 = vector.shape_cast %38 : vector<1x8x1xf32> to vector<8x1xf32>
    %c0_30 = arith.constant 0 : index
    %c0_31 = arith.constant 0 : index
    %c0_32 = arith.constant 0 : index
    %40 = vector.load %arg6[%c0_30, %c0_31, %c0_32] : memref<1x1x8xf32, #tpu.memory_space<vmem>>, vector<1x1x8xf32>
    %41 = vector.shape_cast %40 : vector<1x1x8xf32> to vector<1x8xf32>
    %c0_33 = arith.constant 0 : index
    %c0_34 = arith.constant 0 : index
    %c0_35 = arith.constant 0 : index
    %42 = vector.load %arg12[%c0_33, %c0_34, %c0_35] : memref<2x15x32xf32, #tpu.memory_space<vmem>>, vector<1x15x32xf32>
    %43 = vector.shape_cast %42 : vector<1x15x32xf32> to vector<15x32xf32>
    %c0_36 = arith.constant 0 : index
    %c0_37 = arith.constant 0 : index
    %c0_38 = arith.constant 0 : index
    %c0_39 = arith.constant 0 : index
    %44 = vector.load %arg13[%c0_36, %c0_37, %c0_38, %c0_39] : memref<2x3x3x32xf32, #tpu.memory_space<vmem>>, vector<1x3x3x32xf32>
    %45 = vector.shape_cast %44 : vector<1x3x3x32xf32> to vector<3x3x32xf32>
    %c0_40 = arith.constant 0 : index
    %c0_41 = arith.constant 0 : index
    %c0_42 = arith.constant 0 : index
    %c0_43 = arith.constant 0 : index
    %46 = vector.load %arg14[%c0_40, %c0_41, %c0_42, %c0_43] : memref<2x4x32x32xbf16, #tpu.memory_space<vmem>>, vector<1x1x32x32xbf16>
    %47 = vector.shape_cast %46 : vector<1x1x32x32xbf16> to vector<32x32xbf16>
    %c0_44 = arith.constant 0 : index
    %c1 = arith.constant 1 : index
    %c0_45 = arith.constant 0 : index
    %c0_46 = arith.constant 0 : index
    %48 = vector.load %arg14[%c0_44, %c1, %c0_45, %c0_46] : memref<2x4x32x32xbf16, #tpu.memory_space<vmem>>, vector<1x1x32x32xbf16>
    %49 = vector.shape_cast %48 : vector<1x1x32x32xbf16> to vector<32x32xbf16>
    %c0_47 = arith.constant 0 : index
    %c2 = arith.constant 2 : index
    %c0_48 = arith.constant 0 : index
    %c0_49 = arith.constant 0 : index
    %50 = vector.load %arg14[%c0_47, %c2, %c0_48, %c0_49] : memref<2x4x32x32xbf16, #tpu.memory_space<vmem>>, vector<1x1x32x32xbf16>
    %51 = vector.shape_cast %50 : vector<1x1x32x32xbf16> to vector<32x32xbf16>
    %c0_50 = arith.constant 0 : index
    %c3 = arith.constant 3 : index
    %c0_51 = arith.constant 0 : index
    %c0_52 = arith.constant 0 : index
    %52 = vector.load %arg14[%c0_50, %c3, %c0_51, %c0_52] : memref<2x4x32x32xbf16, #tpu.memory_space<vmem>>, vector<1x1x32x32xbf16>
    %53 = vector.shape_cast %52 : vector<1x1x32x32xbf16> to vector<32x32xbf16>
    %c0_53 = arith.constant 0 : index
    %c0_54 = arith.constant 0 : index
    %c0_55 = arith.constant 0 : index
    %54 = vector.load %arg15[%c0_53, %c0_54, %c0_55] : memref<2x32x128xbf16, #tpu.memory_space<vmem>>, vector<1x32x128xbf16>
    %55 = vector.shape_cast %54 : vector<1x32x128xbf16> to vector<32x128xbf16>
    %c0_56 = arith.constant 0 : index
    %c0_57 = arith.constant 0 : index
    %c0_58 = arith.constant 0 : index
    %56 = vector.load %arg16[%c0_56, %c0_57, %c0_58] : memref<2x1x128xf32, #tpu.memory_space<vmem>>, vector<1x1x128xf32>
    %57 = vector.shape_cast %56 : vector<1x1x128xf32> to vector<1x128xf32>
    %c0_59 = arith.constant 0 : index
    %c0_60 = arith.constant 0 : index
    %c0_61 = arith.constant 0 : index
    %58 = vector.load %arg17[%c0_59, %c0_60, %c0_61] : memref<2x128x32xbf16, #tpu.memory_space<vmem>>, vector<1x128x32xbf16>
    %59 = vector.shape_cast %58 : vector<1x128x32xbf16> to vector<128x32xbf16>
    %60 = vector.extract_strided_slice %43 {offsets = [0, 0], sizes = [1, 32], strides = [1, 1]} : vector<15x32xf32> to vector<1x32xf32>
    %61 = vector.extract_strided_slice %43 {offsets = [1, 0], sizes = [1, 32], strides = [1, 1]} : vector<15x32xf32> to vector<1x32xf32>
    %62 = vector.extract_strided_slice %43 {offsets = [2, 0], sizes = [1, 32], strides = [1, 1]} : vector<15x32xf32> to vector<1x32xf32>
    %63 = vector.extract_strided_slice %43 {offsets = [3, 0], sizes = [1, 32], strides = [1, 1]} : vector<15x32xf32> to vector<1x32xf32>
    %64 = vector.extract_strided_slice %43 {offsets = [4, 0], sizes = [1, 32], strides = [1, 1]} : vector<15x32xf32> to vector<1x32xf32>
    %65 = vector.extract_strided_slice %43 {offsets = [5, 0], sizes = [1, 32], strides = [1, 1]} : vector<15x32xf32> to vector<1x32xf32>
    %66 = vector.extract_strided_slice %43 {offsets = [6, 0], sizes = [1, 32], strides = [1, 1]} : vector<15x32xf32> to vector<1x32xf32>
    %67 = vector.extract_strided_slice %43 {offsets = [7, 0], sizes = [1, 32], strides = [1, 1]} : vector<15x32xf32> to vector<1x32xf32>
    %68 = vector.extract_strided_slice %43 {offsets = [8, 0], sizes = [1, 32], strides = [1, 1]} : vector<15x32xf32> to vector<1x32xf32>
    %69 = vector.extract_strided_slice %43 {offsets = [9, 0], sizes = [1, 32], strides = [1, 1]} : vector<15x32xf32> to vector<1x32xf32>
    %70 = vector.extract_strided_slice %43 {offsets = [10, 0], sizes = [1, 32], strides = [1, 1]} : vector<15x32xf32> to vector<1x32xf32>
    %71 = vector.extract_strided_slice %43 {offsets = [11, 0], sizes = [1, 32], strides = [1, 1]} : vector<15x32xf32> to vector<1x32xf32>
    %72 = vector.extract_strided_slice %43 {offsets = [12, 0], sizes = [1, 32], strides = [1, 1]} : vector<15x32xf32> to vector<1x32xf32>
    %73 = vector.extract_strided_slice %43 {offsets = [13, 0], sizes = [1, 32], strides = [1, 1]} : vector<15x32xf32> to vector<1x32xf32>
    %74 = vector.extract_strided_slice %43 {offsets = [14, 0], sizes = [1, 32], strides = [1, 1]} : vector<15x32xf32> to vector<1x32xf32>
    %75 = tpu.iota {dimensions = array<i32: 0>} : vector<24x16xi32>
    %76 = tpu.iota {dimensions = array<i32: 1>} : vector<24x16xi32>
    %c8_i32_62 = arith.constant 8 : i32
    %77 = vector.broadcast %c8_i32_62 : i32 to vector<24x16xi32>
    %78 = arith.cmpi slt, %75, %77 : vector<24x16xi32>
    %c2_i32 = arith.constant 2 : i32
    %79 = vector.broadcast %c2_i32 : i32 to vector<24x16xi32>
    %80 = arith.muli %79, %75 : vector<24x16xi32>
    %81 = arith.cmpi eq, %76, %80 : vector<24x16xi32>
    %82 = arith.andi %78, %81 : vector<24x16xi1>
    %c8_i32_63 = arith.constant 8 : i32
    %83 = vector.broadcast %c8_i32_63 : i32 to vector<24x16xi32>
    %84 = arith.cmpi sge, %75, %83 : vector<24x16xi32>
    %c16_i32 = arith.constant 16 : i32
    %85 = vector.broadcast %c16_i32 : i32 to vector<24x16xi32>
    %86 = arith.cmpi slt, %75, %85 : vector<24x16xi32>
    %87 = arith.andi %84, %86 : vector<24x16xi1>
    %c8_i32_64 = arith.constant 8 : i32
    %88 = vector.broadcast %c8_i32_64 : i32 to vector<24x16xi32>
    %89 = arith.subi %75, %88 : vector<24x16xi32>
    %c2_i32_65 = arith.constant 2 : i32
    %90 = vector.broadcast %c2_i32_65 : i32 to vector<24x16xi32>
    %91 = arith.muli %90, %89 : vector<24x16xi32>
    %c1_i32_66 = arith.constant 1 : i32
    %92 = vector.broadcast %c1_i32_66 : i32 to vector<24x16xi32>
    %93 = arith.addi %91, %92 : vector<24x16xi32>
    %94 = arith.cmpi eq, %76, %93 : vector<24x16xi32>
    %95 = arith.andi %87, %94 : vector<24x16xi1>
    %c17_i32 = arith.constant 17 : i32
    %96 = vector.broadcast %c17_i32 : i32 to vector<24x16xi32>
    %97 = arith.cmpi sge, %75, %96 : vector<24x16xi32>
    %c24_i32 = arith.constant 24 : i32
    %98 = vector.broadcast %c24_i32 : i32 to vector<24x16xi32>
    %99 = arith.cmpi slt, %75, %98 : vector<24x16xi32>
    %100 = arith.andi %97, %99 : vector<24x16xi1>
    %c16_i32_67 = arith.constant 16 : i32
    %101 = vector.broadcast %c16_i32_67 : i32 to vector<24x16xi32>
    %102 = arith.subi %75, %101 : vector<24x16xi32>
    %c2_i32_68 = arith.constant 2 : i32
    %103 = vector.broadcast %c2_i32_68 : i32 to vector<24x16xi32>
    %104 = arith.muli %103, %102 : vector<24x16xi32>
    %c1_i32_69 = arith.constant 1 : i32
    %105 = vector.broadcast %c1_i32_69 : i32 to vector<24x16xi32>
    %106 = arith.subi %104, %105 : vector<24x16xi32>
    %107 = arith.cmpi eq, %76, %106 : vector<24x16xi32>
    %108 = arith.andi %100, %107 : vector<24x16xi1>
    %109 = arith.ori %82, %95 : vector<24x16xi1>
    %110 = arith.ori %109, %108 : vector<24x16xi1>
    %111 = arith.extui %110 : vector<24x16xi1> to vector<24x16xi32>
    %112 = arith.sitofp %111 : vector<24x16xi32> to vector<24x16xf32>
    %cst_70 = arith.constant dense<0.000000e+00> : vector<24x32xf32>
    %113 = tpu.matmul %112, %35, %cst_70 {dimension_numbers = #tpu.dot_dimension_numbers<[1], [0], [0], [1], [0, 0, 1, 1], [], []>} : vector<24x16xf32>, vector<16x32xf32>, vector<24x32xf32> -> vector<24x32xf32>
    %114 = vector.extract_strided_slice %113 {offsets = [0, 0], sizes = [8, 32], strides = [1, 1]} : vector<24x32xf32> to vector<8x32xf32>
    %115 = vector.extract_strided_slice %113 {offsets = [8, 0], sizes = [8, 32], strides = [1, 1]} : vector<24x32xf32> to vector<8x32xf32>
    %116 = vector.extract_strided_slice %113 {offsets = [16, 0], sizes = [8, 32], strides = [1, 1]} : vector<24x32xf32> to vector<8x32xf32>
    %117 = tpu.iota {dimensions = array<i32: 0>} : vector<8x32xi32>
    %cst_71 = arith.constant dense<0.000000e+00> : vector<8xf32>
    %118 = vector.multi_reduction <add>, %114, %cst_71 [1] : vector<8x32xf32> to vector<8xf32>
    %119 = vector.shape_cast %118 : vector<8xf32> to vector<8x1xf32>
    %cst_72 = arith.constant 3.200000e+01 : f32
    %120 = vector.broadcast %cst_72 : f32 to vector<8x1xf32>
    %121 = arith.divf %119, %120 : vector<8x1xf32>
    %122 = vector.broadcast %121 : vector<8x1xf32> to vector<8x32xf32>
    %123 = arith.subf %114, %122 : vector<8x32xf32>
    %124 = arith.mulf %123, %123 : vector<8x32xf32>
    %cst_73 = arith.constant dense<0.000000e+00> : vector<8xf32>
    %125 = vector.multi_reduction <add>, %124, %cst_73 [1] : vector<8x32xf32> to vector<8xf32>
    %126 = vector.shape_cast %125 : vector<8xf32> to vector<8x1xf32>
    %cst_74 = arith.constant 3.200000e+01 : f32
    %127 = vector.broadcast %cst_74 : f32 to vector<8x1xf32>
    %128 = arith.divf %126, %127 : vector<8x1xf32>
    %cst_75 = arith.constant 9.99999974E-6 : f32
    %129 = vector.broadcast %cst_75 : f32 to vector<8x1xf32>
    %130 = arith.addf %128, %129 : vector<8x1xf32>
    %131 = math.sqrt %130 : vector<8x1xf32>
    %132 = vector.broadcast %131 : vector<8x1xf32> to vector<8x32xf32>
    %133 = arith.divf %123, %132 : vector<8x32xf32>
    %134 = vector.broadcast %60 : vector<1x32xf32> to vector<8x32xf32>
    %135 = arith.mulf %133, %134 : vector<8x32xf32>
    %136 = vector.broadcast %61 : vector<1x32xf32> to vector<8x32xf32>
    %137 = arith.addf %135, %136 : vector<8x32xf32>
    %cst_76 = arith.constant dense<0.000000e+00> : vector<8xf32>
    %138 = vector.multi_reduction <add>, %115, %cst_76 [1] : vector<8x32xf32> to vector<8xf32>
    %139 = vector.shape_cast %138 : vector<8xf32> to vector<8x1xf32>
    %cst_77 = arith.constant 3.200000e+01 : f32
    %140 = vector.broadcast %cst_77 : f32 to vector<8x1xf32>
    %141 = arith.divf %139, %140 : vector<8x1xf32>
    %142 = vector.broadcast %141 : vector<8x1xf32> to vector<8x32xf32>
    %143 = arith.subf %115, %142 : vector<8x32xf32>
    %144 = arith.mulf %143, %143 : vector<8x32xf32>
    %cst_78 = arith.constant dense<0.000000e+00> : vector<8xf32>
    %145 = vector.multi_reduction <add>, %144, %cst_78 [1] : vector<8x32xf32> to vector<8xf32>
    %146 = vector.shape_cast %145 : vector<8xf32> to vector<8x1xf32>
    %cst_79 = arith.constant 3.200000e+01 : f32
    %147 = vector.broadcast %cst_79 : f32 to vector<8x1xf32>
    %148 = arith.divf %146, %147 : vector<8x1xf32>
    %cst_80 = arith.constant 9.99999974E-6 : f32
    %149 = vector.broadcast %cst_80 : f32 to vector<8x1xf32>
    %150 = arith.addf %148, %149 : vector<8x1xf32>
    %151 = math.sqrt %150 : vector<8x1xf32>
    %152 = vector.broadcast %151 : vector<8x1xf32> to vector<8x32xf32>
    %153 = arith.divf %143, %152 : vector<8x32xf32>
    %154 = vector.broadcast %60 : vector<1x32xf32> to vector<8x32xf32>
    %155 = arith.mulf %153, %154 : vector<8x32xf32>
    %156 = vector.broadcast %61 : vector<1x32xf32> to vector<8x32xf32>
    %157 = arith.addf %155, %156 : vector<8x32xf32>
    %c1_i32_81 = arith.constant 1 : i32
    %158 = vector.broadcast %c1_i32_81 : i32 to vector<8x32xi32>
    %159 = arith.cmpi sge, %117, %158 : vector<8x32xi32>
    %cst_82 = arith.constant dense<0.000000e+00> : vector<8xf32>
    %160 = vector.multi_reduction <add>, %116, %cst_82 [1] : vector<8x32xf32> to vector<8xf32>
    %161 = vector.shape_cast %160 : vector<8xf32> to vector<8x1xf32>
    %cst_83 = arith.constant 3.200000e+01 : f32
    %162 = vector.broadcast %cst_83 : f32 to vector<8x1xf32>
    %163 = arith.divf %161, %162 : vector<8x1xf32>
    %164 = vector.broadcast %163 : vector<8x1xf32> to vector<8x32xf32>
    %165 = arith.subf %116, %164 : vector<8x32xf32>
    %166 = arith.mulf %165, %165 : vector<8x32xf32>
    %cst_84 = arith.constant dense<0.000000e+00> : vector<8xf32>
    %167 = vector.multi_reduction <add>, %166, %cst_84 [1] : vector<8x32xf32> to vector<8xf32>
    %168 = vector.shape_cast %167 : vector<8xf32> to vector<8x1xf32>
    %cst_85 = arith.constant 3.200000e+01 : f32
    %169 = vector.broadcast %cst_85 : f32 to vector<8x1xf32>
    %170 = arith.divf %168, %169 : vector<8x1xf32>
    %cst_86 = arith.constant 9.99999974E-6 : f32
    %171 = vector.broadcast %cst_86 : f32 to vector<8x1xf32>
    %172 = arith.addf %170, %171 : vector<8x1xf32>
    %173 = math.sqrt %172 : vector<8x1xf32>
    %174 = vector.broadcast %173 : vector<8x1xf32> to vector<8x32xf32>
    %175 = arith.divf %165, %174 : vector<8x32xf32>
    %176 = vector.broadcast %60 : vector<1x32xf32> to vector<8x32xf32>
    %177 = arith.mulf %175, %176 : vector<8x32xf32>
    %178 = vector.broadcast %61 : vector<1x32xf32> to vector<8x32xf32>
    %179 = arith.addf %177, %178 : vector<8x32xf32>
    %cst_87 = arith.constant 0.000000e+00 : f32
    %180 = vector.broadcast %cst_87 : f32 to vector<8x32xf32>
    %181 = arith.select %159, %179, %180 : vector<8x32xi1>, vector<8x32xf32>
    %c1_i32_88 = arith.constant 1 : i32
    %182 = vector.broadcast %c1_i32_88 : i32 to vector<8x32xi32>
    %183 = arith.cmpi sge, %117, %182 : vector<8x32xi32>
    %cst_89 = arith.constant -1.000000e+30 : f32
    %184 = vector.broadcast %cst_89 : f32 to vector<8x32xf32>
    %185 = arith.select %183, %116, %184 : vector<8x32xi1>, vector<8x32xf32>
    %186 = arith.maximumf %185, %114 : vector<8x32xf32>
    %187 = arith.maximumf %186, %115 : vector<8x32xf32>
    %188 = vector.extract_strided_slice %45 {offsets = [0, 0, 0], sizes = [1, 3, 32], strides = [1, 1, 1]} : vector<3x3x32xf32> to vector<1x3x32xf32>
    %189 = vector.shape_cast %188 : vector<1x3x32xf32> to vector<3x32xf32>
    %190 = vector.extract_strided_slice %189 {offsets = [0, 0], sizes = [1, 32], strides = [1, 1]} : vector<3x32xf32> to vector<1x32xf32>
    %191 = vector.broadcast %190 : vector<1x32xf32> to vector<8x32xf32>
    %192 = arith.mulf %181, %191 : vector<8x32xf32>
    %193 = vector.extract_strided_slice %189 {offsets = [1, 0], sizes = [1, 32], strides = [1, 1]} : vector<3x32xf32> to vector<1x32xf32>
    %194 = vector.broadcast %193 : vector<1x32xf32> to vector<8x32xf32>
    %195 = arith.mulf %137, %194 : vector<8x32xf32>
    %196 = arith.addf %192, %195 : vector<8x32xf32>
    %197 = vector.extract_strided_slice %189 {offsets = [2, 0], sizes = [1, 32], strides = [1, 1]} : vector<3x32xf32> to vector<1x32xf32>
    %198 = vector.broadcast %197 : vector<1x32xf32> to vector<8x32xf32>
    %199 = arith.mulf %157, %198 : vector<8x32xf32>
    %200 = arith.addf %196, %199 : vector<8x32xf32>
    %201 = vector.broadcast %39 : vector<8x1xf32> to vector<8x32xf32>
    %202 = arith.mulf %200, %201 : vector<8x32xf32>
    %cst_90 = arith.constant dense<0.000000e+00> : vector<8xf32>
    %203 = vector.multi_reduction <add>, %202, %cst_90 [1] : vector<8x32xf32> to vector<8xf32>
    %204 = vector.shape_cast %203 : vector<8xf32> to vector<8x1xf32>
    %cst_91 = arith.constant 3.200000e+01 : f32
    %205 = vector.broadcast %cst_91 : f32 to vector<8x1xf32>
    %206 = arith.divf %204, %205 : vector<8x1xf32>
    %207 = vector.broadcast %206 : vector<8x1xf32> to vector<8x32xf32>
    %208 = arith.subf %202, %207 : vector<8x32xf32>
    %209 = arith.mulf %208, %208 : vector<8x32xf32>
    %cst_92 = arith.constant dense<0.000000e+00> : vector<8xf32>
    %210 = vector.multi_reduction <add>, %209, %cst_92 [1] : vector<8x32xf32> to vector<8xf32>
    %211 = vector.shape_cast %210 : vector<8xf32> to vector<8x1xf32>
    %cst_93 = arith.constant 3.200000e+01 : f32
    %212 = vector.broadcast %cst_93 : f32 to vector<8x1xf32>
    %213 = arith.divf %211, %212 : vector<8x1xf32>
    %cst_94 = arith.constant 9.99999974E-6 : f32
    %214 = vector.broadcast %cst_94 : f32 to vector<8x1xf32>
    %215 = arith.addf %213, %214 : vector<8x1xf32>
    %216 = math.sqrt %215 : vector<8x1xf32>
    %217 = vector.broadcast %216 : vector<8x1xf32> to vector<8x32xf32>
    %218 = arith.divf %208, %217 : vector<8x32xf32>
    %219 = vector.broadcast %62 : vector<1x32xf32> to vector<8x32xf32>
    %220 = arith.mulf %218, %219 : vector<8x32xf32>
    %221 = vector.broadcast %63 : vector<1x32xf32> to vector<8x32xf32>
    %222 = arith.addf %220, %221 : vector<8x32xf32>
    %223 = arith.truncf %222 : vector<8x32xf32> to vector<8x32xbf16>
    %cst_95 = arith.constant dense<0.000000e+00> : vector<8x32xf32>
    %224 = tpu.matmul %223, %47, %cst_95 {dimension_numbers = #tpu.dot_dimension_numbers<[1], [0], [0], [1], [0, 0, 1, 1], [], []>} : vector<8x32xbf16>, vector<32x32xbf16>, vector<8x32xf32> -> vector<8x32xf32>
    %225 = vector.broadcast %68 : vector<1x32xf32> to vector<8x32xf32>
    %226 = arith.addf %224, %225 : vector<8x32xf32>
    %227 = vector.extract_strided_slice %45 {offsets = [1, 0, 0], sizes = [1, 3, 32], strides = [1, 1, 1]} : vector<3x3x32xf32> to vector<1x3x32xf32>
    %228 = vector.shape_cast %227 : vector<1x3x32xf32> to vector<3x32xf32>
    %229 = vector.extract_strided_slice %228 {offsets = [0, 0], sizes = [1, 32], strides = [1, 1]} : vector<3x32xf32> to vector<1x32xf32>
    %230 = vector.broadcast %229 : vector<1x32xf32> to vector<8x32xf32>
    %231 = arith.mulf %181, %230 : vector<8x32xf32>
    %232 = vector.extract_strided_slice %228 {offsets = [1, 0], sizes = [1, 32], strides = [1, 1]} : vector<3x32xf32> to vector<1x32xf32>
    %233 = vector.broadcast %232 : vector<1x32xf32> to vector<8x32xf32>
    %234 = arith.mulf %137, %233 : vector<8x32xf32>
    %235 = arith.addf %231, %234 : vector<8x32xf32>
    %236 = vector.extract_strided_slice %228 {offsets = [2, 0], sizes = [1, 32], strides = [1, 1]} : vector<3x32xf32> to vector<1x32xf32>
    %237 = vector.broadcast %236 : vector<1x32xf32> to vector<8x32xf32>
    %238 = arith.mulf %157, %237 : vector<8x32xf32>
    %239 = arith.addf %235, %238 : vector<8x32xf32>
    %240 = vector.broadcast %39 : vector<8x1xf32> to vector<8x32xf32>
    %241 = arith.mulf %239, %240 : vector<8x32xf32>
    %cst_96 = arith.constant dense<0.000000e+00> : vector<8xf32>
    %242 = vector.multi_reduction <add>, %241, %cst_96 [1] : vector<8x32xf32> to vector<8xf32>
    %243 = vector.shape_cast %242 : vector<8xf32> to vector<8x1xf32>
    %cst_97 = arith.constant 3.200000e+01 : f32
    %244 = vector.broadcast %cst_97 : f32 to vector<8x1xf32>
    %245 = arith.divf %243, %244 : vector<8x1xf32>
    %246 = vector.broadcast %245 : vector<8x1xf32> to vector<8x32xf32>
    %247 = arith.subf %241, %246 : vector<8x32xf32>
    %248 = arith.mulf %247, %247 : vector<8x32xf32>
    %cst_98 = arith.constant dense<0.000000e+00> : vector<8xf32>
    %249 = vector.multi_reduction <add>, %248, %cst_98 [1] : vector<8x32xf32> to vector<8xf32>
    %250 = vector.shape_cast %249 : vector<8xf32> to vector<8x1xf32>
    %cst_99 = arith.constant 3.200000e+01 : f32
    %251 = vector.broadcast %cst_99 : f32 to vector<8x1xf32>
    %252 = arith.divf %250, %251 : vector<8x1xf32>
    %cst_100 = arith.constant 9.99999974E-6 : f32
    %253 = vector.broadcast %cst_100 : f32 to vector<8x1xf32>
    %254 = arith.addf %252, %253 : vector<8x1xf32>
    %255 = math.sqrt %254 : vector<8x1xf32>
    %256 = vector.broadcast %255 : vector<8x1xf32> to vector<8x32xf32>
    %257 = arith.divf %247, %256 : vector<8x32xf32>
    %258 = vector.broadcast %64 : vector<1x32xf32> to vector<8x32xf32>
    %259 = arith.mulf %257, %258 : vector<8x32xf32>
    %260 = vector.broadcast %65 : vector<1x32xf32> to vector<8x32xf32>
    %261 = arith.addf %259, %260 : vector<8x32xf32>
    %262 = arith.truncf %261 : vector<8x32xf32> to vector<8x32xbf16>
    %cst_101 = arith.constant dense<0.000000e+00> : vector<8x32xf32>
    %263 = tpu.matmul %262, %49, %cst_101 {dimension_numbers = #tpu.dot_dimension_numbers<[1], [0], [0], [1], [0, 0, 1, 1], [], []>} : vector<8x32xbf16>, vector<32x32xbf16>, vector<8x32xf32> -> vector<8x32xf32>
    %264 = vector.broadcast %69 : vector<1x32xf32> to vector<8x32xf32>
    %265 = arith.addf %263, %264 : vector<8x32xf32>
    %266 = vector.extract_strided_slice %45 {offsets = [2, 0, 0], sizes = [1, 3, 32], strides = [1, 1, 1]} : vector<3x3x32xf32> to vector<1x3x32xf32>
    %267 = vector.shape_cast %266 : vector<1x3x32xf32> to vector<3x32xf32>
    %268 = vector.extract_strided_slice %267 {offsets = [0, 0], sizes = [1, 32], strides = [1, 1]} : vector<3x32xf32> to vector<1x32xf32>
    %269 = vector.broadcast %268 : vector<1x32xf32> to vector<8x32xf32>
    %270 = arith.mulf %181, %269 : vector<8x32xf32>
    %271 = vector.extract_strided_slice %267 {offsets = [1, 0], sizes = [1, 32], strides = [1, 1]} : vector<3x32xf32> to vector<1x32xf32>
    %272 = vector.broadcast %271 : vector<1x32xf32> to vector<8x32xf32>
    %273 = arith.mulf %137, %272 : vector<8x32xf32>
    %274 = arith.addf %270, %273 : vector<8x32xf32>
    %275 = vector.extract_strided_slice %267 {offsets = [2, 0], sizes = [1, 32], strides = [1, 1]} : vector<3x32xf32> to vector<1x32xf32>
    %276 = vector.broadcast %275 : vector<1x32xf32> to vector<8x32xf32>
    %277 = arith.mulf %157, %276 : vector<8x32xf32>
    %278 = arith.addf %274, %277 : vector<8x32xf32>
    %279 = vector.broadcast %39 : vector<8x1xf32> to vector<8x32xf32>
    %280 = arith.mulf %278, %279 : vector<8x32xf32>
    %cst_102 = arith.constant dense<0.000000e+00> : vector<8xf32>
    %281 = vector.multi_reduction <add>, %280, %cst_102 [1] : vector<8x32xf32> to vector<8xf32>
    %282 = vector.shape_cast %281 : vector<8xf32> to vector<8x1xf32>
    %cst_103 = arith.constant 3.200000e+01 : f32
    %283 = vector.broadcast %cst_103 : f32 to vector<8x1xf32>
    %284 = arith.divf %282, %283 : vector<8x1xf32>
    %285 = vector.broadcast %284 : vector<8x1xf32> to vector<8x32xf32>
    %286 = arith.subf %280, %285 : vector<8x32xf32>
    %287 = arith.mulf %286, %286 : vector<8x32xf32>
    %cst_104 = arith.constant dense<0.000000e+00> : vector<8xf32>
    %288 = vector.multi_reduction <add>, %287, %cst_104 [1] : vector<8x32xf32> to vector<8xf32>
    %289 = vector.shape_cast %288 : vector<8xf32> to vector<8x1xf32>
    %cst_105 = arith.constant 3.200000e+01 : f32
    %290 = vector.broadcast %cst_105 : f32 to vector<8x1xf32>
    %291 = arith.divf %289, %290 : vector<8x1xf32>
    %cst_106 = arith.constant 9.99999974E-6 : f32
    %292 = vector.broadcast %cst_106 : f32 to vector<8x1xf32>
    %293 = arith.addf %291, %292 : vector<8x1xf32>
    %294 = math.sqrt %293 : vector<8x1xf32>
    %295 = vector.broadcast %294 : vector<8x1xf32> to vector<8x32xf32>
    %296 = arith.divf %286, %295 : vector<8x32xf32>
    %297 = vector.broadcast %66 : vector<1x32xf32> to vector<8x32xf32>
    %298 = arith.mulf %296, %297 : vector<8x32xf32>
    %299 = vector.broadcast %67 : vector<1x32xf32> to vector<8x32xf32>
    %300 = arith.addf %298, %299 : vector<8x32xf32>
    %301 = arith.truncf %300 : vector<8x32xf32> to vector<8x32xbf16>
    %cst_107 = arith.constant dense<0.000000e+00> : vector<8x32xf32>
    %302 = tpu.matmul %301, %51, %cst_107 {dimension_numbers = #tpu.dot_dimension_numbers<[1], [0], [0], [1], [0, 0, 1, 1], [], []>} : vector<8x32xbf16>, vector<32x32xbf16>, vector<8x32xf32> -> vector<8x32xf32>
    %303 = vector.broadcast %70 : vector<1x32xf32> to vector<8x32xf32>
    %304 = arith.addf %302, %303 : vector<8x32xf32>
    %305 = tpu.iota {dimensions = array<i32: 1>} : vector<1x32xi32>
    %cst_108 = arith.constant 0.353553385 : f32
    %306 = vector.broadcast %cst_108 : f32 to vector<8x32xf32>
    %307 = arith.mulf %226, %306 : vector<8x32xf32>
    %c0_i32 = arith.constant 0 : i32
    %308 = vector.broadcast %c0_i32 : i32 to vector<1x32xi32>
    %309 = arith.cmpi sge, %305, %308 : vector<1x32xi32>
    %c8_i32_109 = arith.constant 8 : i32
    %310 = vector.broadcast %c8_i32_109 : i32 to vector<1x32xi32>
    %311 = arith.cmpi slt, %305, %310 : vector<1x32xi32>
    %312 = arith.andi %309, %311 : vector<1x32xi1>
    %313 = arith.extui %312 : vector<1x32xi1> to vector<1x32xi32>
    %314 = arith.sitofp %313 : vector<1x32xi32> to vector<1x32xf32>
    %c8_i32_110 = arith.constant 8 : i32
    %315 = vector.broadcast %c8_i32_110 : i32 to vector<1x32xi32>
    %316 = arith.cmpi sge, %305, %315 : vector<1x32xi32>
    %c16_i32_111 = arith.constant 16 : i32
    %317 = vector.broadcast %c16_i32_111 : i32 to vector<1x32xi32>
    %318 = arith.cmpi slt, %305, %317 : vector<1x32xi32>
    %319 = arith.andi %316, %318 : vector<1x32xi1>
    %320 = arith.extui %319 : vector<1x32xi1> to vector<1x32xi32>
    %321 = arith.sitofp %320 : vector<1x32xi32> to vector<1x32xf32>
    %c16_i32_112 = arith.constant 16 : i32
    %322 = vector.broadcast %c16_i32_112 : i32 to vector<1x32xi32>
    %323 = arith.cmpi sge, %305, %322 : vector<1x32xi32>
    %c24_i32_113 = arith.constant 24 : i32
    %324 = vector.broadcast %c24_i32_113 : i32 to vector<1x32xi32>
    %325 = arith.cmpi slt, %305, %324 : vector<1x32xi32>
    %326 = arith.andi %323, %325 : vector<1x32xi1>
    %327 = arith.extui %326 : vector<1x32xi1> to vector<1x32xi32>
    %328 = arith.sitofp %327 : vector<1x32xi32> to vector<1x32xf32>
    %c24_i32_114 = arith.constant 24 : i32
    %329 = vector.broadcast %c24_i32_114 : i32 to vector<1x32xi32>
    %330 = arith.cmpi sge, %305, %329 : vector<1x32xi32>
    %c32_i32 = arith.constant 32 : i32
    %331 = vector.broadcast %c32_i32 : i32 to vector<1x32xi32>
    %332 = arith.cmpi slt, %305, %331 : vector<1x32xi32>
    %333 = arith.andi %330, %332 : vector<1x32xi1>
    %334 = arith.extui %333 : vector<1x32xi1> to vector<1x32xi32>
    %335 = arith.sitofp %334 : vector<1x32xi32> to vector<1x32xf32>
    %336 = vector.broadcast %314 : vector<1x32xf32> to vector<8x32xf32>
    %337 = arith.mulf %307, %336 : vector<8x32xf32>
    %338 = vector.broadcast %321 : vector<1x32xf32> to vector<8x32xf32>
    %339 = arith.mulf %307, %338 : vector<8x32xf32>
    %340 = vector.broadcast %328 : vector<1x32xf32> to vector<8x32xf32>
    %341 = arith.mulf %307, %340 : vector<8x32xf32>
    %342 = vector.broadcast %335 : vector<1x32xf32> to vector<8x32xf32>
    %343 = arith.mulf %307, %342 : vector<8x32xf32>
    %344 = tpu.concatenate %337, %339, %341, %343 in 0 : vector<8x32xf32>, vector<8x32xf32>, vector<8x32xf32>, vector<8x32xf32> -> vector<32x32xf32>
    %345 = arith.truncf %344 : vector<32x32xf32> to vector<32x32xbf16>
    %346 = arith.truncf %265 : vector<8x32xf32> to vector<8x32xbf16>
    %cst_115 = arith.constant dense<0.000000e+00> : vector<32x8xf32>
    %347 = tpu.matmul %345, %346, %cst_115 {dimension_numbers = #tpu.dot_dimension_numbers<[1], [1], [0], [0], [0, 0, 1, 0], [], []>} : vector<32x32xbf16>, vector<8x32xbf16>, vector<32x8xf32> -> vector<32x8xf32>
    %cst_116 = arith.constant 0.000000e+00 : f32
    %348 = vector.broadcast %cst_116 : f32 to vector<1x8xf32>
    %349 = arith.cmpf ogt, %41, %348 : vector<1x8xf32>
    %cst_117 = arith.constant -1.000000e+30 : f32
    %350 = vector.shape_cast %349 : vector<1x8xi1> to vector<1x8xi1>
    %351 = vector.broadcast %350 : vector<1x8xi1> to vector<32x8xi1>
    %352 = vector.broadcast %cst_117 : f32 to vector<32x8xf32>
    %353 = arith.select %351, %347, %352 : vector<32x8xi1>, vector<32x8xf32>
    %cst_118 = arith.constant dense<0xFF800000> : vector<32xf32>
    %354 = vector.multi_reduction <maximumf>, %353, %cst_118 [1] : vector<32x8xf32> to vector<32xf32>
    %355 = vector.shape_cast %354 : vector<32xf32> to vector<32x1xf32>
    %356 = vector.broadcast %355 : vector<32x1xf32> to vector<32x8xf32>
    %357 = arith.subf %353, %356 : vector<32x8xf32>
    %358 = math.exp %357 : vector<32x8xf32>
    %cst_119 = arith.constant dense<0.000000e+00> : vector<32xf32>
    %359 = vector.multi_reduction <add>, %358, %cst_119 [1] : vector<32x8xf32> to vector<32xf32>
    %360 = vector.shape_cast %359 : vector<32xf32> to vector<32x1xf32>
    %361 = tpu.reciprocal %360 {approx = true} : vector<32x1xf32> -> vector<32x1xf32>
    %362 = vector.broadcast %361 : vector<32x1xf32> to vector<32x8xf32>
    %363 = arith.mulf %358, %362 : vector<32x8xf32>
    %364 = vector.broadcast %41 : vector<1x8xf32> to vector<32x8xf32>
    %365 = arith.mulf %363, %364 : vector<32x8xf32>
    %366 = arith.truncf %365 : vector<32x8xf32> to vector<32x8xbf16>
    %367 = arith.truncf %304 : vector<8x32xf32> to vector<8x32xbf16>
    %cst_120 = arith.constant dense<0.000000e+00> : vector<32x32xf32>
    %368 = tpu.matmul %366, %367, %cst_120 {dimension_numbers = #tpu.dot_dimension_numbers<[1], [0], [0], [1], [0, 0, 1, 1], [], []>} : vector<32x8xbf16>, vector<8x32xbf16>, vector<32x32xf32> -> vector<32x32xf32>
    %cst_121 = arith.constant 0.000000e+00 : f32
    %369 = vector.broadcast %cst_121 : f32 to vector<8x32xf32>
    %370 = vector.extract_strided_slice %368 {offsets = [0, 0], sizes = [8, 32], strides = [1, 1]} : vector<32x32xf32> to vector<8x32xf32>
    %371 = vector.broadcast %314 : vector<1x32xf32> to vector<8x32xf32>
    %372 = arith.mulf %370, %371 : vector<8x32xf32>
    %373 = arith.addf %369, %372 : vector<8x32xf32>
    %374 = vector.extract_strided_slice %368 {offsets = [8, 0], sizes = [8, 32], strides = [1, 1]} : vector<32x32xf32> to vector<8x32xf32>
    %375 = vector.broadcast %321 : vector<1x32xf32> to vector<8x32xf32>
    %376 = arith.mulf %374, %375 : vector<8x32xf32>
    %377 = arith.addf %373, %376 : vector<8x32xf32>
    %378 = vector.extract_strided_slice %368 {offsets = [16, 0], sizes = [8, 32], strides = [1, 1]} : vector<32x32xf32> to vector<8x32xf32>
    %379 = vector.broadcast %328 : vector<1x32xf32> to vector<8x32xf32>
    %380 = arith.mulf %378, %379 : vector<8x32xf32>
    %381 = arith.addf %377, %380 : vector<8x32xf32>
    %382 = vector.extract_strided_slice %368 {offsets = [24, 0], sizes = [8, 32], strides = [1, 1]} : vector<32x32xf32> to vector<8x32xf32>
    %383 = vector.broadcast %335 : vector<1x32xf32> to vector<8x32xf32>
    %384 = arith.mulf %382, %383 : vector<8x32xf32>
    %385 = arith.addf %381, %384 : vector<8x32xf32>
    %386 = arith.truncf %385 : vector<8x32xf32> to vector<8x32xbf16>
    %cst_122 = arith.constant dense<0.000000e+00> : vector<8x32xf32>
    %387 = tpu.matmul %386, %53, %cst_122 {dimension_numbers = #tpu.dot_dimension_numbers<[1], [0], [0], [1], [0, 0, 1, 1], [], []>} : vector<8x32xbf16>, vector<32x32xbf16>, vector<8x32xf32> -> vector<8x32xf32>
    %388 = vector.broadcast %71 : vector<1x32xf32> to vector<8x32xf32>
    %389 = arith.addf %387, %388 : vector<8x32xf32>
    %390 = vector.broadcast %39 : vector<8x1xf32> to vector<8x32xf32>
    %391 = arith.mulf %389, %390 : vector<8x32xf32>
    %392 = vector.broadcast %39 : vector<8x1xf32> to vector<8x32xf32>
    %393 = arith.mulf %187, %392 : vector<8x32xf32>
    %394 = arith.addf %393, %391 : vector<8x32xf32>
    %cst_123 = arith.constant dense<0.000000e+00> : vector<8xf32>
    %395 = vector.multi_reduction <add>, %394, %cst_123 [1] : vector<8x32xf32> to vector<8xf32>
    %396 = vector.shape_cast %395 : vector<8xf32> to vector<8x1xf32>
    %cst_124 = arith.constant 3.200000e+01 : f32
    %397 = vector.broadcast %cst_124 : f32 to vector<8x1xf32>
    %398 = arith.divf %396, %397 : vector<8x1xf32>
    %399 = vector.broadcast %398 : vector<8x1xf32> to vector<8x32xf32>
    %400 = arith.subf %394, %399 : vector<8x32xf32>
    %401 = arith.mulf %400, %400 : vector<8x32xf32>
    %cst_125 = arith.constant dense<0.000000e+00> : vector<8xf32>
    %402 = vector.multi_reduction <add>, %401, %cst_125 [1] : vector<8x32xf32> to vector<8xf32>
    %403 = vector.shape_cast %402 : vector<8xf32> to vector<8x1xf32>
    %cst_126 = arith.constant 3.200000e+01 : f32
    %404 = vector.broadcast %cst_126 : f32 to vector<8x1xf32>
    %405 = arith.divf %403, %404 : vector<8x1xf32>
    %cst_127 = arith.constant 9.99999974E-6 : f32
    %406 = vector.broadcast %cst_127 : f32 to vector<8x1xf32>
    %407 = arith.addf %405, %406 : vector<8x1xf32>
    %408 = math.sqrt %407 : vector<8x1xf32>
    %409 = vector.broadcast %408 : vector<8x1xf32> to vector<8x32xf32>
    %410 = arith.divf %400, %409 : vector<8x32xf32>
    %411 = vector.broadcast %72 : vector<1x32xf32> to vector<8x32xf32>
    %412 = arith.mulf %410, %411 : vector<8x32xf32>
    %413 = vector.broadcast %73 : vector<1x32xf32> to vector<8x32xf32>
    %414 = arith.addf %412, %413 : vector<8x32xf32>
    %415 = arith.truncf %414 : vector<8x32xf32> to vector<8x32xbf16>
    %cst_128 = arith.constant dense<0.000000e+00> : vector<8x128xf32>
    %416 = tpu.matmul %415, %55, %cst_128 {dimension_numbers = #tpu.dot_dimension_numbers<[1], [0], [0], [1], [0, 0, 1, 1], [], []>} : vector<8x32xbf16>, vector<32x128xbf16>, vector<8x128xf32> -> vector<8x128xf32>
    %417 = vector.broadcast %57 : vector<1x128xf32> to vector<8x128xf32>
    %418 = arith.addf %416, %417 : vector<8x128xf32>
    %cst_129 = arith.constant 0.707106769 : f32
    %419 = vector.broadcast %cst_129 : f32 to vector<8x128xf32>
    %420 = arith.mulf %418, %419 : vector<8x128xf32>
    %421 = math.absf %420 : vector<8x128xf32>
    %cst_130 = arith.constant 0.327591091 : f32
    %422 = vector.broadcast %cst_130 : f32 to vector<8x128xf32>
    %423 = arith.mulf %422, %421 : vector<8x128xf32>
    %cst_131 = arith.constant 1.000000e+00 : f32
    %424 = vector.broadcast %cst_131 : f32 to vector<8x128xf32>
    %425 = arith.addf %424, %423 : vector<8x128xf32>
    %cst_132 = arith.constant 1.000000e+00 : f32
    %426 = vector.broadcast %cst_132 : f32 to vector<8x128xf32>
    %427 = arith.divf %426, %425 : vector<8x128xf32>
    %cst_133 = arith.constant 1.06140542 : f32
    %428 = vector.broadcast %cst_133 : f32 to vector<8x128xf32>
    %429 = arith.mulf %427, %428 : vector<8x128xf32>
    %cst_134 = arith.constant -1.45315206 : f32
    %430 = vector.broadcast %cst_134 : f32 to vector<8x128xf32>
    %431 = arith.addf %430, %429 : vector<8x128xf32>
    %432 = arith.mulf %427, %431 : vector<8x128xf32>
    %cst_135 = arith.constant 1.42141378 : f32
    %433 = vector.broadcast %cst_135 : f32 to vector<8x128xf32>
    %434 = arith.addf %433, %432 : vector<8x128xf32>
    %435 = arith.mulf %427, %434 : vector<8x128xf32>
    %cst_136 = arith.constant -0.284496725 : f32
    %436 = vector.broadcast %cst_136 : f32 to vector<8x128xf32>
    %437 = arith.addf %436, %435 : vector<8x128xf32>
    %438 = arith.mulf %427, %437 : vector<8x128xf32>
    %cst_137 = arith.constant 0.254829586 : f32
    %439 = vector.broadcast %cst_137 : f32 to vector<8x128xf32>
    %440 = arith.addf %439, %438 : vector<8x128xf32>
    %441 = arith.mulf %427, %440 : vector<8x128xf32>
    %cst_138 = arith.constant 0.000000e+00 : f32
    %442 = vector.broadcast %cst_138 : f32 to vector<8x128xf32>
    %443 = arith.subf %442, %421 : vector<8x128xf32>
    %444 = arith.mulf %443, %421 : vector<8x128xf32>
    %445 = math.exp %444 : vector<8x128xf32>
    %446 = arith.mulf %441, %445 : vector<8x128xf32>
    %cst_139 = arith.constant 1.000000e+00 : f32
    %447 = vector.broadcast %cst_139 : f32 to vector<8x128xf32>
    %448 = arith.subf %447, %446 : vector<8x128xf32>
    %cst_140 = arith.constant 0.000000e+00 : f32
    %449 = vector.broadcast %cst_140 : f32 to vector<8x128xf32>
    %450 = arith.cmpf oge, %420, %449 : vector<8x128xf32>
    %cst_141 = arith.constant 0.000000e+00 : f32
    %451 = vector.broadcast %cst_141 : f32 to vector<8x128xf32>
    %452 = arith.subf %451, %448 : vector<8x128xf32>
    %453 = arith.select %450, %448, %452 : vector<8x128xi1>, vector<8x128xf32>
    %cst_142 = arith.constant 5.000000e-01 : f32
    %454 = vector.broadcast %cst_142 : f32 to vector<8x128xf32>
    %455 = arith.mulf %454, %418 : vector<8x128xf32>
    %cst_143 = arith.constant 1.000000e+00 : f32
    %456 = vector.broadcast %cst_143 : f32 to vector<8x128xf32>
    %457 = arith.addf %456, %453 : vector<8x128xf32>
    %458 = arith.mulf %455, %457 : vector<8x128xf32>
    %459 = arith.truncf %458 : vector<8x128xf32> to vector<8x128xbf16>
    %cst_144 = arith.constant dense<0.000000e+00> : vector<8x32xf32>
    %460 = tpu.matmul %459, %59, %cst_144 {dimension_numbers = #tpu.dot_dimension_numbers<[1], [0], [0], [1], [0, 0, 1, 1], [], []>} : vector<8x128xbf16>, vector<128x32xbf16>, vector<8x32xf32> -> vector<8x32xf32>
    %461 = vector.broadcast %74 : vector<1x32xf32> to vector<8x32xf32>
    %462 = arith.addf %460, %461 : vector<8x32xf32>
    %463 = vector.broadcast %39 : vector<8x1xf32> to vector<8x32xf32>
    %464 = arith.mulf %462, %463 : vector<8x32xf32>
    %465 = arith.addf %394, %464 : vector<8x32xf32>
    %466 = vector.shape_cast %465 : vector<8x32xf32> to vector<1x8x32xf32>
    %c0_145 = arith.constant 0 : index
    %c0_146 = arith.constant 0 : index
    %c0_147 = arith.constant 0 : index
    %467 = vector.load %arg19[%c0_145, %c0_146, %c0_147] : memref<1x8x32xf32, #tpu.memory_space<vmem>>, vector<1x8x32xf32>
    tpu.vector_store %arg19[%c0_145, %c0_146, %c0_147], %466 {strides = array<i32>} : memref<1x8x32xf32, #tpu.memory_space<vmem>>, vector<1x8x32xf32>,
    %c0_148 = arith.constant 0 : index
    %c0_149 = arith.constant 0 : index
    %c0_150 = arith.constant 0 : index
    %468 = vector.load %arg7[%c0_148, %c0_149, %c0_150] : memref<1x4x1xf32, #tpu.memory_space<vmem>>, vector<1x4x1xf32>
    %469 = vector.shape_cast %468 : vector<1x4x1xf32> to vector<4x1xf32>
    %c0_151 = arith.constant 0 : index
    %c0_152 = arith.constant 0 : index
    %c0_153 = arith.constant 0 : index
    %470 = vector.load %arg8[%c0_151, %c0_152, %c0_153] : memref<1x1x4xf32, #tpu.memory_space<vmem>>, vector<1x1x4xf32>
    %471 = vector.shape_cast %470 : vector<1x1x4xf32> to vector<1x4xf32>
    %c1_154 = arith.constant 1 : index
    %c0_155 = arith.constant 0 : index
    %c0_156 = arith.constant 0 : index
    %472 = vector.load %arg12[%c1_154, %c0_155, %c0_156] : memref<2x15x32xf32, #tpu.memory_space<vmem>>, vector<1x15x32xf32>
    %473 = vector.shape_cast %472 : vector<1x15x32xf32> to vector<15x32xf32>
    %c1_157 = arith.constant 1 : index
    %c0_158 = arith.constant 0 : index
    %c0_159 = arith.constant 0 : index
    %c0_160 = arith.constant 0 : index
    %474 = vector.load %arg13[%c1_157, %c0_158, %c0_159, %c0_160] : memref<2x3x3x32xf32, #tpu.memory_space<vmem>>, vector<1x3x3x32xf32>
    %475 = vector.shape_cast %474 : vector<1x3x3x32xf32> to vector<3x3x32xf32>
    %c1_161 = arith.constant 1 : index
    %c0_162 = arith.constant 0 : index
    %c0_163 = arith.constant 0 : index
    %c0_164 = arith.constant 0 : index
    %476 = vector.load %arg14[%c1_161, %c0_162, %c0_163, %c0_164] : memref<2x4x32x32xbf16, #tpu.memory_space<vmem>>, vector<1x1x32x32xbf16>
    %477 = vector.shape_cast %476 : vector<1x1x32x32xbf16> to vector<32x32xbf16>
    %c1_165 = arith.constant 1 : index
    %c1_166 = arith.constant 1 : index
    %c0_167 = arith.constant 0 : index
    %c0_168 = arith.constant 0 : index
    %478 = vector.load %arg14[%c1_165, %c1_166, %c0_167, %c0_168] : memref<2x4x32x32xbf16, #tpu.memory_space<vmem>>, vector<1x1x32x32xbf16>
    %479 = vector.shape_cast %478 : vector<1x1x32x32xbf16> to vector<32x32xbf16>
    %c1_169 = arith.constant 1 : index
    %c2_170 = arith.constant 2 : index
    %c0_171 = arith.constant 0 : index
    %c0_172 = arith.constant 0 : index
    %480 = vector.load %arg14[%c1_169, %c2_170, %c0_171, %c0_172] : memref<2x4x32x32xbf16, #tpu.memory_space<vmem>>, vector<1x1x32x32xbf16>
    %481 = vector.shape_cast %480 : vector<1x1x32x32xbf16> to vector<32x32xbf16>
    %c1_173 = arith.constant 1 : index
    %c3_174 = arith.constant 3 : index
    %c0_175 = arith.constant 0 : index
    %c0_176 = arith.constant 0 : index
    %482 = vector.load %arg14[%c1_173, %c3_174, %c0_175, %c0_176] : memref<2x4x32x32xbf16, #tpu.memory_space<vmem>>, vector<1x1x32x32xbf16>
    %483 = vector.shape_cast %482 : vector<1x1x32x32xbf16> to vector<32x32xbf16>
    %c1_177 = arith.constant 1 : index
    %c0_178 = arith.constant 0 : index
    %c0_179 = arith.constant 0 : index
    %484 = vector.load %arg15[%c1_177, %c0_178, %c0_179] : memref<2x32x128xbf16, #tpu.memory_space<vmem>>, vector<1x32x128xbf16>
    %485 = vector.shape_cast %484 : vector<1x32x128xbf16> to vector<32x128xbf16>
    %c1_180 = arith.constant 1 : index
    %c0_181 = arith.constant 0 : index
    %c0_182 = arith.constant 0 : index
    %486 = vector.load %arg16[%c1_180, %c0_181, %c0_182] : memref<2x1x128xf32, #tpu.memory_space<vmem>>, vector<1x1x128xf32>
    %487 = vector.shape_cast %486 : vector<1x1x128xf32> to vector<1x128xf32>
    %c1_183 = arith.constant 1 : index
    %c0_184 = arith.constant 0 : index
    %c0_185 = arith.constant 0 : index
    %488 = vector.load %arg17[%c1_183, %c0_184, %c0_185] : memref<2x128x32xbf16, #tpu.memory_space<vmem>>, vector<1x128x32xbf16>
    %489 = vector.shape_cast %488 : vector<1x128x32xbf16> to vector<128x32xbf16>
    %490 = vector.extract_strided_slice %473 {offsets = [0, 0], sizes = [1, 32], strides = [1, 1]} : vector<15x32xf32> to vector<1x32xf32>
    %491 = vector.extract_strided_slice %473 {offsets = [1, 0], sizes = [1, 32], strides = [1, 1]} : vector<15x32xf32> to vector<1x32xf32>
    %492 = vector.extract_strided_slice %473 {offsets = [2, 0], sizes = [1, 32], strides = [1, 1]} : vector<15x32xf32> to vector<1x32xf32>
    %493 = vector.extract_strided_slice %473 {offsets = [3, 0], sizes = [1, 32], strides = [1, 1]} : vector<15x32xf32> to vector<1x32xf32>
    %494 = vector.extract_strided_slice %473 {offsets = [4, 0], sizes = [1, 32], strides = [1, 1]} : vector<15x32xf32> to vector<1x32xf32>
    %495 = vector.extract_strided_slice %473 {offsets = [5, 0], sizes = [1, 32], strides = [1, 1]} : vector<15x32xf32> to vector<1x32xf32>
    %496 = vector.extract_strided_slice %473 {offsets = [6, 0], sizes = [1, 32], strides = [1, 1]} : vector<15x32xf32> to vector<1x32xf32>
    %497 = vector.extract_strided_slice %473 {offsets = [7, 0], sizes = [1, 32], strides = [1, 1]} : vector<15x32xf32> to vector<1x32xf32>
    %498 = vector.extract_strided_slice %473 {offsets = [8, 0], sizes = [1, 32], strides = [1, 1]} : vector<15x32xf32> to vector<1x32xf32>
    %499 = vector.extract_strided_slice %473 {offsets = [9, 0], sizes = [1, 32], strides = [1, 1]} : vector<15x32xf32> to vector<1x32xf32>
    %500 = vector.extract_strided_slice %473 {offsets = [10, 0], sizes = [1, 32], strides = [1, 1]} : vector<15x32xf32> to vector<1x32xf32>
    %501 = vector.extract_strided_slice %473 {offsets = [11, 0], sizes = [1, 32], strides = [1, 1]} : vector<15x32xf32> to vector<1x32xf32>
    %502 = vector.extract_strided_slice %473 {offsets = [12, 0], sizes = [1, 32], strides = [1, 1]} : vector<15x32xf32> to vector<1x32xf32>
    %503 = vector.extract_strided_slice %473 {offsets = [13, 0], sizes = [1, 32], strides = [1, 1]} : vector<15x32xf32> to vector<1x32xf32>
    %504 = vector.extract_strided_slice %473 {offsets = [14, 0], sizes = [1, 32], strides = [1, 1]} : vector<15x32xf32> to vector<1x32xf32>
    %505 = tpu.iota {dimensions = array<i32: 0>} : vector<24x8xi32>
    %506 = tpu.iota {dimensions = array<i32: 1>} : vector<24x8xi32>
    %c4_i32 = arith.constant 4 : i32
    %507 = vector.broadcast %c4_i32 : i32 to vector<24x8xi32>
    %508 = arith.cmpi slt, %505, %507 : vector<24x8xi32>
    %c2_i32_186 = arith.constant 2 : i32
    %509 = vector.broadcast %c2_i32_186 : i32 to vector<24x8xi32>
    %510 = arith.muli %509, %505 : vector<24x8xi32>
    %511 = arith.cmpi eq, %506, %510 : vector<24x8xi32>
    %512 = arith.andi %508, %511 : vector<24x8xi1>
    %c8_i32_187 = arith.constant 8 : i32
    %513 = vector.broadcast %c8_i32_187 : i32 to vector<24x8xi32>
    %514 = arith.cmpi sge, %505, %513 : vector<24x8xi32>
    %c12_i32 = arith.constant 12 : i32
    %515 = vector.broadcast %c12_i32 : i32 to vector<24x8xi32>
    %516 = arith.cmpi slt, %505, %515 : vector<24x8xi32>
    %517 = arith.andi %514, %516 : vector<24x8xi1>
    %c8_i32_188 = arith.constant 8 : i32
    %518 = vector.broadcast %c8_i32_188 : i32 to vector<24x8xi32>
    %519 = arith.subi %505, %518 : vector<24x8xi32>
    %c2_i32_189 = arith.constant 2 : i32
    %520 = vector.broadcast %c2_i32_189 : i32 to vector<24x8xi32>
    %521 = arith.muli %520, %519 : vector<24x8xi32>
    %c1_i32_190 = arith.constant 1 : i32
    %522 = vector.broadcast %c1_i32_190 : i32 to vector<24x8xi32>
    %523 = arith.addi %521, %522 : vector<24x8xi32>
    %524 = arith.cmpi eq, %506, %523 : vector<24x8xi32>
    %525 = arith.andi %517, %524 : vector<24x8xi1>
    %c17_i32_191 = arith.constant 17 : i32
    %526 = vector.broadcast %c17_i32_191 : i32 to vector<24x8xi32>
    %527 = arith.cmpi sge, %505, %526 : vector<24x8xi32>
    %c20_i32 = arith.constant 20 : i32
    %528 = vector.broadcast %c20_i32 : i32 to vector<24x8xi32>
    %529 = arith.cmpi slt, %505, %528 : vector<24x8xi32>
    %530 = arith.andi %527, %529 : vector<24x8xi1>
    %c16_i32_192 = arith.constant 16 : i32
    %531 = vector.broadcast %c16_i32_192 : i32 to vector<24x8xi32>
    %532 = arith.subi %505, %531 : vector<24x8xi32>
    %c2_i32_193 = arith.constant 2 : i32
    %533 = vector.broadcast %c2_i32_193 : i32 to vector<24x8xi32>
    %534 = arith.muli %533, %532 : vector<24x8xi32>
    %c1_i32_194 = arith.constant 1 : i32
    %535 = vector.broadcast %c1_i32_194 : i32 to vector<24x8xi32>
    %536 = arith.subi %534, %535 : vector<24x8xi32>
    %537 = arith.cmpi eq, %506, %536 : vector<24x8xi32>
    %538 = arith.andi %530, %537 : vector<24x8xi1>
    %539 = arith.ori %512, %525 : vector<24x8xi1>
    %540 = arith.ori %539, %538 : vector<24x8xi1>
    %541 = arith.extui %540 : vector<24x8xi1> to vector<24x8xi32>
    %542 = arith.sitofp %541 : vector<24x8xi32> to vector<24x8xf32>
    %cst_195 = arith.constant dense<0.000000e+00> : vector<24x32xf32>
    %543 = tpu.matmul %542, %465, %cst_195 {dimension_numbers = #tpu.dot_dimension_numbers<[1], [0], [0], [1], [0, 0, 1, 1], [], []>} : vector<24x8xf32>, vector<8x32xf32>, vector<24x32xf32> -> vector<24x32xf32>
    %544 = vector.extract_strided_slice %543 {offsets = [0, 0], sizes = [4, 32], strides = [1, 1]} : vector<24x32xf32> to vector<4x32xf32>
    %545 = vector.extract_strided_slice %543 {offsets = [8, 0], sizes = [4, 32], strides = [1, 1]} : vector<24x32xf32> to vector<4x32xf32>
    %546 = vector.extract_strided_slice %543 {offsets = [16, 0], sizes = [4, 32], strides = [1, 1]} : vector<24x32xf32> to vector<4x32xf32>
    %547 = tpu.iota {dimensions = array<i32: 0>} : vector<4x32xi32>
    %cst_196 = arith.constant dense<0.000000e+00> : vector<4xf32>
    %548 = vector.multi_reduction <add>, %544, %cst_196 [1] : vector<4x32xf32> to vector<4xf32>
    %549 = vector.shape_cast %548 : vector<4xf32> to vector<4x1xf32>
    %cst_197 = arith.constant 3.200000e+01 : f32
    %550 = vector.broadcast %cst_197 : f32 to vector<4x1xf32>
    %551 = arith.divf %549, %550 : vector<4x1xf32>
    %552 = vector.broadcast %551 : vector<4x1xf32> to vector<4x32xf32>
    %553 = arith.subf %544, %552 : vector<4x32xf32>
    %554 = arith.mulf %553, %553 : vector<4x32xf32>
    %cst_198 = arith.constant dense<0.000000e+00> : vector<4xf32>
    %555 = vector.multi_reduction <add>, %554, %cst_198 [1] : vector<4x32xf32> to vector<4xf32>
    %556 = vector.shape_cast %555 : vector<4xf32> to vector<4x1xf32>
    %cst_199 = arith.constant 3.200000e+01 : f32
    %557 = vector.broadcast %cst_199 : f32 to vector<4x1xf32>
    %558 = arith.divf %556, %557 : vector<4x1xf32>
    %cst_200 = arith.constant 9.99999974E-6 : f32
    %559 = vector.broadcast %cst_200 : f32 to vector<4x1xf32>
    %560 = arith.addf %558, %559 : vector<4x1xf32>
    %561 = math.sqrt %560 : vector<4x1xf32>
    %562 = vector.broadcast %561 : vector<4x1xf32> to vector<4x32xf32>
    %563 = arith.divf %553, %562 : vector<4x32xf32>
    %564 = vector.broadcast %490 : vector<1x32xf32> to vector<4x32xf32>
    %565 = arith.mulf %563, %564 : vector<4x32xf32>
    %566 = vector.broadcast %491 : vector<1x32xf32> to vector<4x32xf32>
    %567 = arith.addf %565, %566 : vector<4x32xf32>
    %cst_201 = arith.constant dense<0.000000e+00> : vector<4xf32>
    %568 = vector.multi_reduction <add>, %545, %cst_201 [1] : vector<4x32xf32> to vector<4xf32>
    %569 = vector.shape_cast %568 : vector<4xf32> to vector<4x1xf32>
    %cst_202 = arith.constant 3.200000e+01 : f32
    %570 = vector.broadcast %cst_202 : f32 to vector<4x1xf32>
    %571 = arith.divf %569, %570 : vector<4x1xf32>
    %572 = vector.broadcast %571 : vector<4x1xf32> to vector<4x32xf32>
    %573 = arith.subf %545, %572 : vector<4x32xf32>
    %574 = arith.mulf %573, %573 : vector<4x32xf32>
    %cst_203 = arith.constant dense<0.000000e+00> : vector<4xf32>
    %575 = vector.multi_reduction <add>, %574, %cst_203 [1] : vector<4x32xf32> to vector<4xf32>
    %576 = vector.shape_cast %575 : vector<4xf32> to vector<4x1xf32>
    %cst_204 = arith.constant 3.200000e+01 : f32
    %577 = vector.broadcast %cst_204 : f32 to vector<4x1xf32>
    %578 = arith.divf %576, %577 : vector<4x1xf32>
    %cst_205 = arith.constant 9.99999974E-6 : f32
    %579 = vector.broadcast %cst_205 : f32 to vector<4x1xf32>
    %580 = arith.addf %578, %579 : vector<4x1xf32>
    %581 = math.sqrt %580 : vector<4x1xf32>
    %582 = vector.broadcast %581 : vector<4x1xf32> to vector<4x32xf32>
    %583 = arith.divf %573, %582 : vector<4x32xf32>
    %584 = vector.broadcast %490 : vector<1x32xf32> to vector<4x32xf32>
    %585 = arith.mulf %583, %584 : vector<4x32xf32>
    %586 = vector.broadcast %491 : vector<1x32xf32> to vector<4x32xf32>
    %587 = arith.addf %585, %586 : vector<4x32xf32>
    %c1_i32_206 = arith.constant 1 : i32
    %588 = vector.broadcast %c1_i32_206 : i32 to vector<4x32xi32>
    %589 = arith.cmpi sge, %547, %588 : vector<4x32xi32>
    %cst_207 = arith.constant dense<0.000000e+00> : vector<4xf32>
    %590 = vector.multi_reduction <add>, %546, %cst_207 [1] : vector<4x32xf32> to vector<4xf32>
    %591 = vector.shape_cast %590 : vector<4xf32> to vector<4x1xf32>
    %cst_208 = arith.constant 3.200000e+01 : f32
    %592 = vector.broadcast %cst_208 : f32 to vector<4x1xf32>
    %593 = arith.divf %591, %592 : vector<4x1xf32>
    %594 = vector.broadcast %593 : vector<4x1xf32> to vector<4x32xf32>
    %595 = arith.subf %546, %594 : vector<4x32xf32>
    %596 = arith.mulf %595, %595 : vector<4x32xf32>
    %cst_209 = arith.constant dense<0.000000e+00> : vector<4xf32>
    %597 = vector.multi_reduction <add>, %596, %cst_209 [1] : vector<4x32xf32> to vector<4xf32>
    %598 = vector.shape_cast %597 : vector<4xf32> to vector<4x1xf32>
    %cst_210 = arith.constant 3.200000e+01 : f32
    %599 = vector.broadcast %cst_210 : f32 to vector<4x1xf32>
    %600 = arith.divf %598, %599 : vector<4x1xf32>
    %cst_211 = arith.constant 9.99999974E-6 : f32
    %601 = vector.broadcast %cst_211 : f32 to vector<4x1xf32>
    %602 = arith.addf %600, %601 : vector<4x1xf32>
    %603 = math.sqrt %602 : vector<4x1xf32>
    %604 = vector.broadcast %603 : vector<4x1xf32> to vector<4x32xf32>
    %605 = arith.divf %595, %604 : vector<4x32xf32>
    %606 = vector.broadcast %490 : vector<1x32xf32> to vector<4x32xf32>
    %607 = arith.mulf %605, %606 : vector<4x32xf32>
    %608 = vector.broadcast %491 : vector<1x32xf32> to vector<4x32xf32>
    %609 = arith.addf %607, %608 : vector<4x32xf32>
    %cst_212 = arith.constant 0.000000e+00 : f32
    %610 = vector.broadcast %cst_212 : f32 to vector<4x32xf32>
    %611 = arith.select %589, %609, %610 : vector<4x32xi1>, vector<4x32xf32>
    %c1_i32_213 = arith.constant 1 : i32
    %612 = vector.broadcast %c1_i32_213 : i32 to vector<4x32xi32>
    %613 = arith.cmpi sge, %547, %612 : vector<4x32xi32>
    %cst_214 = arith.constant -1.000000e+30 : f32
    %614 = vector.broadcast %cst_214 : f32 to vector<4x32xf32>
    %615 = arith.select %613, %546, %614 : vector<4x32xi1>, vector<4x32xf32>
    %616 = arith.maximumf %615, %544 : vector<4x32xf32>
    %617 = arith.maximumf %616, %545 : vector<4x32xf32>
    %618 = vector.extract_strided_slice %475 {offsets = [0, 0, 0], sizes = [1, 3, 32], strides = [1, 1, 1]} : vector<3x3x32xf32> to vector<1x3x32xf32>
    %619 = vector.shape_cast %618 : vector<1x3x32xf32> to vector<3x32xf32>
    %620 = vector.extract_strided_slice %619 {offsets = [0, 0], sizes = [1, 32], strides = [1, 1]} : vector<3x32xf32> to vector<1x32xf32>
    %621 = vector.broadcast %620 : vector<1x32xf32> to vector<4x32xf32>
    %622 = arith.mulf %611, %621 : vector<4x32xf32>
    %623 = vector.extract_strided_slice %619 {offsets = [1, 0], sizes = [1, 32], strides = [1, 1]} : vector<3x32xf32> to vector<1x32xf32>
    %624 = vector.broadcast %623 : vector<1x32xf32> to vector<4x32xf32>
    %625 = arith.mulf %567, %624 : vector<4x32xf32>
    %626 = arith.addf %622, %625 : vector<4x32xf32>
    %627 = vector.extract_strided_slice %619 {offsets = [2, 0], sizes = [1, 32], strides = [1, 1]} : vector<3x32xf32> to vector<1x32xf32>
    %628 = vector.broadcast %627 : vector<1x32xf32> to vector<4x32xf32>
    %629 = arith.mulf %587, %628 : vector<4x32xf32>
    %630 = arith.addf %626, %629 : vector<4x32xf32>
    %631 = vector.broadcast %469 : vector<4x1xf32> to vector<4x32xf32>
    %632 = arith.mulf %630, %631 : vector<4x32xf32>
    %cst_215 = arith.constant dense<0.000000e+00> : vector<4xf32>
    %633 = vector.multi_reduction <add>, %632, %cst_215 [1] : vector<4x32xf32> to vector<4xf32>
    %634 = vector.shape_cast %633 : vector<4xf32> to vector<4x1xf32>
    %cst_216 = arith.constant 3.200000e+01 : f32
    %635 = vector.broadcast %cst_216 : f32 to vector<4x1xf32>
    %636 = arith.divf %634, %635 : vector<4x1xf32>
    %637 = vector.broadcast %636 : vector<4x1xf32> to vector<4x32xf32>
    %638 = arith.subf %632, %637 : vector<4x32xf32>
    %639 = arith.mulf %638, %638 : vector<4x32xf32>
    %cst_217 = arith.constant dense<0.000000e+00> : vector<4xf32>
    %640 = vector.multi_reduction <add>, %639, %cst_217 [1] : vector<4x32xf32> to vector<4xf32>
    %641 = vector.shape_cast %640 : vector<4xf32> to vector<4x1xf32>
    %cst_218 = arith.constant 3.200000e+01 : f32
    %642 = vector.broadcast %cst_218 : f32 to vector<4x1xf32>
    %643 = arith.divf %641, %642 : vector<4x1xf32>
    %cst_219 = arith.constant 9.99999974E-6 : f32
    %644 = vector.broadcast %cst_219 : f32 to vector<4x1xf32>
    %645 = arith.addf %643, %644 : vector<4x1xf32>
    %646 = math.sqrt %645 : vector<4x1xf32>
    %647 = vector.broadcast %646 : vector<4x1xf32> to vector<4x32xf32>
    %648 = arith.divf %638, %647 : vector<4x32xf32>
    %649 = vector.broadcast %492 : vector<1x32xf32> to vector<4x32xf32>
    %650 = arith.mulf %648, %649 : vector<4x32xf32>
    %651 = vector.broadcast %493 : vector<1x32xf32> to vector<4x32xf32>
    %652 = arith.addf %650, %651 : vector<4x32xf32>
    %653 = arith.truncf %652 : vector<4x32xf32> to vector<4x32xbf16>
    %cst_220 = arith.constant dense<0.000000e+00> : vector<4x32xf32>
    %654 = tpu.matmul %653, %477, %cst_220 {dimension_numbers = #tpu.dot_dimension_numbers<[1], [0], [0], [1], [0, 0, 1, 1], [], []>} : vector<4x32xbf16>, vector<32x32xbf16>, vector<4x32xf32> -> vector<4x32xf32>
    %655 = vector.broadcast %498 : vector<1x32xf32> to vector<4x32xf32>
    %656 = arith.addf %654, %655 : vector<4x32xf32>
    %657 = vector.extract_strided_slice %475 {offsets = [1, 0, 0], sizes = [1, 3, 32], strides = [1, 1, 1]} : vector<3x3x32xf32> to vector<1x3x32xf32>
    %658 = vector.shape_cast %657 : vector<1x3x32xf32> to vector<3x32xf32>
    %659 = vector.extract_strided_slice %658 {offsets = [0, 0], sizes = [1, 32], strides = [1, 1]} : vector<3x32xf32> to vector<1x32xf32>
    %660 = vector.broadcast %659 : vector<1x32xf32> to vector<4x32xf32>
    %661 = arith.mulf %611, %660 : vector<4x32xf32>
    %662 = vector.extract_strided_slice %658 {offsets = [1, 0], sizes = [1, 32], strides = [1, 1]} : vector<3x32xf32> to vector<1x32xf32>
    %663 = vector.broadcast %662 : vector<1x32xf32> to vector<4x32xf32>
    %664 = arith.mulf %567, %663 : vector<4x32xf32>
    %665 = arith.addf %661, %664 : vector<4x32xf32>
    %666 = vector.extract_strided_slice %658 {offsets = [2, 0], sizes = [1, 32], strides = [1, 1]} : vector<3x32xf32> to vector<1x32xf32>
    %667 = vector.broadcast %666 : vector<1x32xf32> to vector<4x32xf32>
    %668 = arith.mulf %587, %667 : vector<4x32xf32>
    %669 = arith.addf %665, %668 : vector<4x32xf32>
    %670 = vector.broadcast %469 : vector<4x1xf32> to vector<4x32xf32>
    %671 = arith.mulf %669, %670 : vector<4x32xf32>
    %cst_221 = arith.constant dense<0.000000e+00> : vector<4xf32>
    %672 = vector.multi_reduction <add>, %671, %cst_221 [1] : vector<4x32xf32> to vector<4xf32>
    %673 = vector.shape_cast %672 : vector<4xf32> to vector<4x1xf32>
    %cst_222 = arith.constant 3.200000e+01 : f32
    %674 = vector.broadcast %cst_222 : f32 to vector<4x1xf32>
    %675 = arith.divf %673, %674 : vector<4x1xf32>
    %676 = vector.broadcast %675 : vector<4x1xf32> to vector<4x32xf32>
    %677 = arith.subf %671, %676 : vector<4x32xf32>
    %678 = arith.mulf %677, %677 : vector<4x32xf32>
    %cst_223 = arith.constant dense<0.000000e+00> : vector<4xf32>
    %679 = vector.multi_reduction <add>, %678, %cst_223 [1] : vector<4x32xf32> to vector<4xf32>
    %680 = vector.shape_cast %679 : vector<4xf32> to vector<4x1xf32>
    %cst_224 = arith.constant 3.200000e+01 : f32
    %681 = vector.broadcast %cst_224 : f32 to vector<4x1xf32>
    %682 = arith.divf %680, %681 : vector<4x1xf32>
    %cst_225 = arith.constant 9.99999974E-6 : f32
    %683 = vector.broadcast %cst_225 : f32 to vector<4x1xf32>
    %684 = arith.addf %682, %683 : vector<4x1xf32>
    %685 = math.sqrt %684 : vector<4x1xf32>
    %686 = vector.broadcast %685 : vector<4x1xf32> to vector<4x32xf32>
    %687 = arith.divf %677, %686 : vector<4x32xf32>
    %688 = vector.broadcast %494 : vector<1x32xf32> to vector<4x32xf32>
    %689 = arith.mulf %687, %688 : vector<4x32xf32>
    %690 = vector.broadcast %495 : vector<1x32xf32> to vector<4x32xf32>
    %691 = arith.addf %689, %690 : vector<4x32xf32>
    %692 = arith.truncf %691 : vector<4x32xf32> to vector<4x32xbf16>
    %cst_226 = arith.constant dense<0.000000e+00> : vector<4x32xf32>
    %693 = tpu.matmul %692, %479, %cst_226 {dimension_numbers = #tpu.dot_dimension_numbers<[1], [0], [0], [1], [0, 0, 1, 1], [], []>} : vector<4x32xbf16>, vector<32x32xbf16>, vector<4x32xf32> -> vector<4x32xf32>
    %694 = vector.broadcast %499 : vector<1x32xf32> to vector<4x32xf32>
    %695 = arith.addf %693, %694 : vector<4x32xf32>
    %696 = vector.extract_strided_slice %475 {offsets = [2, 0, 0], sizes = [1, 3, 32], strides = [1, 1, 1]} : vector<3x3x32xf32> to vector<1x3x32xf32>
    %697 = vector.shape_cast %696 : vector<1x3x32xf32> to vector<3x32xf32>
    %698 = vector.extract_strided_slice %697 {offsets = [0, 0], sizes = [1, 32], strides = [1, 1]} : vector<3x32xf32> to vector<1x32xf32>
    %699 = vector.broadcast %698 : vector<1x32xf32> to vector<4x32xf32>
    %700 = arith.mulf %611, %699 : vector<4x32xf32>
    %701 = vector.extract_strided_slice %697 {offsets = [1, 0], sizes = [1, 32], strides = [1, 1]} : vector<3x32xf32> to vector<1x32xf32>
    %702 = vector.broadcast %701 : vector<1x32xf32> to vector<4x32xf32>
    %703 = arith.mulf %567, %702 : vector<4x32xf32>
    %704 = arith.addf %700, %703 : vector<4x32xf32>
    %705 = vector.extract_strided_slice %697 {offsets = [2, 0], sizes = [1, 32], strides = [1, 1]} : vector<3x32xf32> to vector<1x32xf32>
    %706 = vector.broadcast %705 : vector<1x32xf32> to vector<4x32xf32>
    %707 = arith.mulf %587, %706 : vector<4x32xf32>
    %708 = arith.addf %704, %707 : vector<4x32xf32>
    %709 = vector.broadcast %469 : vector<4x1xf32> to vector<4x32xf32>
    %710 = arith.mulf %708, %709 : vector<4x32xf32>
    %cst_227 = arith.constant dense<0.000000e+00> : vector<4xf32>
    %711 = vector.multi_reduction <add>, %710, %cst_227 [1] : vector<4x32xf32> to vector<4xf32>
    %712 = vector.shape_cast %711 : vector<4xf32> to vector<4x1xf32>
    %cst_228 = arith.constant 3.200000e+01 : f32
    %713 = vector.broadcast %cst_228 : f32 to vector<4x1xf32>
    %714 = arith.divf %712, %713 : vector<4x1xf32>
    %715 = vector.broadcast %714 : vector<4x1xf32> to vector<4x32xf32>
    %716 = arith.subf %710, %715 : vector<4x32xf32>
    %717 = arith.mulf %716, %716 : vector<4x32xf32>
    %cst_229 = arith.constant dense<0.000000e+00> : vector<4xf32>
    %718 = vector.multi_reduction <add>, %717, %cst_229 [1] : vector<4x32xf32> to vector<4xf32>
    %719 = vector.shape_cast %718 : vector<4xf32> to vector<4x1xf32>
    %cst_230 = arith.constant 3.200000e+01 : f32
    %720 = vector.broadcast %cst_230 : f32 to vector<4x1xf32>
    %721 = arith.divf %719, %720 : vector<4x1xf32>
    %cst_231 = arith.constant 9.99999974E-6 : f32
    %722 = vector.broadcast %cst_231 : f32 to vector<4x1xf32>
    %723 = arith.addf %721, %722 : vector<4x1xf32>
    %724 = math.sqrt %723 : vector<4x1xf32>
    %725 = vector.broadcast %724 : vector<4x1xf32> to vector<4x32xf32>
    %726 = arith.divf %716, %725 : vector<4x32xf32>
    %727 = vector.broadcast %496 : vector<1x32xf32> to vector<4x32xf32>
    %728 = arith.mulf %726, %727 : vector<4x32xf32>
    %729 = vector.broadcast %497 : vector<1x32xf32> to vector<4x32xf32>
    %730 = arith.addf %728, %729 : vector<4x32xf32>
    %731 = arith.truncf %730 : vector<4x32xf32> to vector<4x32xbf16>
    %cst_232 = arith.constant dense<0.000000e+00> : vector<4x32xf32>
    %732 = tpu.matmul %731, %481, %cst_232 {dimension_numbers = #tpu.dot_dimension_numbers<[1], [0], [0], [1], [0, 0, 1, 1], [], []>} : vector<4x32xbf16>, vector<32x32xbf16>, vector<4x32xf32> -> vector<4x32xf32>
    %733 = vector.broadcast %500 : vector<1x32xf32> to vector<4x32xf32>
    %734 = arith.addf %732, %733 : vector<4x32xf32>
    %735 = tpu.iota {dimensions = array<i32: 1>} : vector<1x32xi32>
    %cst_233 = arith.constant 0.353553385 : f32
    %736 = vector.broadcast %cst_233 : f32 to vector<4x32xf32>
    %737 = arith.mulf %656, %736 : vector<4x32xf32>
    %c0_i32_234 = arith.constant 0 : i32
    %738 = vector.broadcast %c0_i32_234 : i32 to vector<1x32xi32>
    %739 = arith.cmpi sge, %735, %738 : vector<1x32xi32>
    %c8_i32_235 = arith.constant 8 : i32
    %740 = vector.broadcast %c8_i32_235 : i32 to vector<1x32xi32>
    %741 = arith.cmpi slt, %735, %740 : vector<1x32xi32>
    %742 = arith.andi %739, %741 : vector<1x32xi1>
    %743 = arith.extui %742 : vector<1x32xi1> to vector<1x32xi32>
    %744 = arith.sitofp %743 : vector<1x32xi32> to vector<1x32xf32>
    %c8_i32_236 = arith.constant 8 : i32
    %745 = vector.broadcast %c8_i32_236 : i32 to vector<1x32xi32>
    %746 = arith.cmpi sge, %735, %745 : vector<1x32xi32>
    %c16_i32_237 = arith.constant 16 : i32
    %747 = vector.broadcast %c16_i32_237 : i32 to vector<1x32xi32>
    %748 = arith.cmpi slt, %735, %747 : vector<1x32xi32>
    %749 = arith.andi %746, %748 : vector<1x32xi1>
    %750 = arith.extui %749 : vector<1x32xi1> to vector<1x32xi32>
    %751 = arith.sitofp %750 : vector<1x32xi32> to vector<1x32xf32>
    %c16_i32_238 = arith.constant 16 : i32
    %752 = vector.broadcast %c16_i32_238 : i32 to vector<1x32xi32>
    %753 = arith.cmpi sge, %735, %752 : vector<1x32xi32>
    %c24_i32_239 = arith.constant 24 : i32
    %754 = vector.broadcast %c24_i32_239 : i32 to vector<1x32xi32>
    %755 = arith.cmpi slt, %735, %754 : vector<1x32xi32>
    %756 = arith.andi %753, %755 : vector<1x32xi1>
    %757 = arith.extui %756 : vector<1x32xi1> to vector<1x32xi32>
    %758 = arith.sitofp %757 : vector<1x32xi32> to vector<1x32xf32>
    %c24_i32_240 = arith.constant 24 : i32
    %759 = vector.broadcast %c24_i32_240 : i32 to vector<1x32xi32>
    %760 = arith.cmpi sge, %735, %759 : vector<1x32xi32>
    %c32_i32_241 = arith.constant 32 : i32
    %761 = vector.broadcast %c32_i32_241 : i32 to vector<1x32xi32>
    %762 = arith.cmpi slt, %735, %761 : vector<1x32xi32>
    %763 = arith.andi %760, %762 : vector<1x32xi1>
    %764 = arith.extui %763 : vector<1x32xi1> to vector<1x32xi32>
    %765 = arith.sitofp %764 : vector<1x32xi32> to vector<1x32xf32>
    %cst_242 = arith.constant 0.000000e+00 : f32
    %766 = vector.broadcast %cst_242 : f32 to vector<4x32xf32>
    %767 = vector.broadcast %744 : vector<1x32xf32> to vector<4x32xf32>
    %768 = arith.mulf %737, %767 : vector<4x32xf32>
    %769 = arith.truncf %768 : vector<4x32xf32> to vector<4x32xbf16>
    %770 = arith.truncf %695 : vector<4x32xf32> to vector<4x32xbf16>
    %cst_243 = arith.constant dense<0.000000e+00> : vector<4x4xf32>
    %771 = tpu.matmul %769, %770, %cst_243 {dimension_numbers = #tpu.dot_dimension_numbers<[1], [1], [0], [0], [0, 0, 1, 0], [], []>} : vector<4x32xbf16>, vector<4x32xbf16>, vector<4x4xf32> -> vector<4x4xf32>
    %cst_244 = arith.constant 0.000000e+00 : f32
    %772 = vector.broadcast %cst_244 : f32 to vector<1x4xf32>
    %773 = arith.cmpf ogt, %471, %772 : vector<1x4xf32>
    %cst_245 = arith.constant -1.000000e+30 : f32
    %774 = vector.shape_cast %773 : vector<1x4xi1> to vector<1x4xi1>
    %775 = vector.broadcast %774 : vector<1x4xi1> to vector<4x4xi1>
    %776 = vector.broadcast %cst_245 : f32 to vector<4x4xf32>
    %777 = arith.select %775, %771, %776 : vector<4x4xi1>, vector<4x4xf32>
    %cst_246 = arith.constant dense<0xFF800000> : vector<4xf32>
    %778 = vector.multi_reduction <maximumf>, %777, %cst_246 [1] : vector<4x4xf32> to vector<4xf32>
    %779 = vector.shape_cast %778 : vector<4xf32> to vector<4x1xf32>
    %780 = vector.broadcast %779 : vector<4x1xf32> to vector<4x4xf32>
    %781 = arith.subf %777, %780 : vector<4x4xf32>
    %782 = math.exp %781 : vector<4x4xf32>
    %cst_247 = arith.constant dense<0.000000e+00> : vector<4xf32>
    %783 = vector.multi_reduction <add>, %782, %cst_247 [1] : vector<4x4xf32> to vector<4xf32>
    %784 = vector.shape_cast %783 : vector<4xf32> to vector<4x1xf32>
    %785 = tpu.reciprocal %784 {approx = true} : vector<4x1xf32> -> vector<4x1xf32>
    %786 = vector.broadcast %785 : vector<4x1xf32> to vector<4x4xf32>
    %787 = arith.mulf %782, %786 : vector<4x4xf32>
    %788 = vector.broadcast %471 : vector<1x4xf32> to vector<4x4xf32>
    %789 = arith.mulf %787, %788 : vector<4x4xf32>
    %790 = arith.truncf %789 : vector<4x4xf32> to vector<4x4xbf16>
    %791 = arith.truncf %734 : vector<4x32xf32> to vector<4x32xbf16>
    %cst_248 = arith.constant dense<0.000000e+00> : vector<4x32xf32>
    %792 = tpu.matmul %790, %791, %cst_248 {dimension_numbers = #tpu.dot_dimension_numbers<[1], [0], [0], [1], [0, 0, 1, 1], [], []>} : vector<4x4xbf16>, vector<4x32xbf16>, vector<4x32xf32> -> vector<4x32xf32>
    %793 = vector.broadcast %744 : vector<1x32xf32> to vector<4x32xf32>
    %794 = arith.mulf %792, %793 : vector<4x32xf32>
    %795 = arith.addf %766, %794 : vector<4x32xf32>
    %796 = vector.broadcast %751 : vector<1x32xf32> to vector<4x32xf32>
    %797 = arith.mulf %737, %796 : vector<4x32xf32>
    %798 = arith.truncf %797 : vector<4x32xf32> to vector<4x32xbf16>
    %799 = arith.truncf %695 : vector<4x32xf32> to vector<4x32xbf16>
    %cst_249 = arith.constant dense<0.000000e+00> : vector<4x4xf32>
    %800 = tpu.matmul %798, %799, %cst_249 {dimension_numbers = #tpu.dot_dimension_numbers<[1], [1], [0], [0], [0, 0, 1, 0], [], []>} : vector<4x32xbf16>, vector<4x32xbf16>, vector<4x4xf32> -> vector<4x4xf32>
    %cst_250 = arith.constant 0.000000e+00 : f32
    %801 = vector.broadcast %cst_250 : f32 to vector<1x4xf32>
    %802 = arith.cmpf ogt, %471, %801 : vector<1x4xf32>
    %cst_251 = arith.constant -1.000000e+30 : f32
    %803 = vector.shape_cast %802 : vector<1x4xi1> to vector<1x4xi1>
    %804 = vector.broadcast %803 : vector<1x4xi1> to vector<4x4xi1>
    %805 = vector.broadcast %cst_251 : f32 to vector<4x4xf32>
    %806 = arith.select %804, %800, %805 : vector<4x4xi1>, vector<4x4xf32>
    %cst_252 = arith.constant dense<0xFF800000> : vector<4xf32>
    %807 = vector.multi_reduction <maximumf>, %806, %cst_252 [1] : vector<4x4xf32> to vector<4xf32>
    %808 = vector.shape_cast %807 : vector<4xf32> to vector<4x1xf32>
    %809 = vector.broadcast %808 : vector<4x1xf32> to vector<4x4xf32>
    %810 = arith.subf %806, %809 : vector<4x4xf32>
    %811 = math.exp %810 : vector<4x4xf32>
    %cst_253 = arith.constant dense<0.000000e+00> : vector<4xf32>
    %812 = vector.multi_reduction <add>, %811, %cst_253 [1] : vector<4x4xf32> to vector<4xf32>
    %813 = vector.shape_cast %812 : vector<4xf32> to vector<4x1xf32>
    %814 = tpu.reciprocal %813 {approx = true} : vector<4x1xf32> -> vector<4x1xf32>
    %815 = vector.broadcast %814 : vector<4x1xf32> to vector<4x4xf32>
    %816 = arith.mulf %811, %815 : vector<4x4xf32>
    %817 = vector.broadcast %471 : vector<1x4xf32> to vector<4x4xf32>
    %818 = arith.mulf %816, %817 : vector<4x4xf32>
    %819 = arith.truncf %818 : vector<4x4xf32> to vector<4x4xbf16>
    %820 = arith.truncf %734 : vector<4x32xf32> to vector<4x32xbf16>
    %cst_254 = arith.constant dense<0.000000e+00> : vector<4x32xf32>
    %821 = tpu.matmul %819, %820, %cst_254 {dimension_numbers = #tpu.dot_dimension_numbers<[1], [0], [0], [1], [0, 0, 1, 1], [], []>} : vector<4x4xbf16>, vector<4x32xbf16>, vector<4x32xf32> -> vector<4x32xf32>
    %822 = vector.broadcast %751 : vector<1x32xf32> to vector<4x32xf32>
    %823 = arith.mulf %821, %822 : vector<4x32xf32>
    %824 = arith.addf %795, %823 : vector<4x32xf32>
    %825 = vector.broadcast %758 : vector<1x32xf32> to vector<4x32xf32>
    %826 = arith.mulf %737, %825 : vector<4x32xf32>
    %827 = arith.truncf %826 : vector<4x32xf32> to vector<4x32xbf16>
    %828 = arith.truncf %695 : vector<4x32xf32> to vector<4x32xbf16>
    %cst_255 = arith.constant dense<0.000000e+00> : vector<4x4xf32>
    %829 = tpu.matmul %827, %828, %cst_255 {dimension_numbers = #tpu.dot_dimension_numbers<[1], [1], [0], [0], [0, 0, 1, 0], [], []>} : vector<4x32xbf16>, vector<4x32xbf16>, vector<4x4xf32> -> vector<4x4xf32>
    %cst_256 = arith.constant 0.000000e+00 : f32
    %830 = vector.broadcast %cst_256 : f32 to vector<1x4xf32>
    %831 = arith.cmpf ogt, %471, %830 : vector<1x4xf32>
    %cst_257 = arith.constant -1.000000e+30 : f32
    %832 = vector.shape_cast %831 : vector<1x4xi1> to vector<1x4xi1>
    %833 = vector.broadcast %832 : vector<1x4xi1> to vector<4x4xi1>
    %834 = vector.broadcast %cst_257 : f32 to vector<4x4xf32>
    %835 = arith.select %833, %829, %834 : vector<4x4xi1>, vector<4x4xf32>
    %cst_258 = arith.constant dense<0xFF800000> : vector<4xf32>
    %836 = vector.multi_reduction <maximumf>, %835, %cst_258 [1] : vector<4x4xf32> to vector<4xf32>
    %837 = vector.shape_cast %836 : vector<4xf32> to vector<4x1xf32>
    %838 = vector.broadcast %837 : vector<4x1xf32> to vector<4x4xf32>
    %839 = arith.subf %835, %838 : vector<4x4xf32>
    %840 = math.exp %839 : vector<4x4xf32>
    %cst_259 = arith.constant dense<0.000000e+00> : vector<4xf32>
    %841 = vector.multi_reduction <add>, %840, %cst_259 [1] : vector<4x4xf32> to vector<4xf32>
    %842 = vector.shape_cast %841 : vector<4xf32> to vector<4x1xf32>
    %843 = tpu.reciprocal %842 {approx = true} : vector<4x1xf32> -> vector<4x1xf32>
    %844 = vector.broadcast %843 : vector<4x1xf32> to vector<4x4xf32>
    %845 = arith.mulf %840, %844 : vector<4x4xf32>
    %846 = vector.broadcast %471 : vector<1x4xf32> to vector<4x4xf32>
    %847 = arith.mulf %845, %846 : vector<4x4xf32>
    %848 = arith.truncf %847 : vector<4x4xf32> to vector<4x4xbf16>
    %849 = arith.truncf %734 : vector<4x32xf32> to vector<4x32xbf16>
    %cst_260 = arith.constant dense<0.000000e+00> : vector<4x32xf32>
    %850 = tpu.matmul %848, %849, %cst_260 {dimension_numbers = #tpu.dot_dimension_numbers<[1], [0], [0], [1], [0, 0, 1, 1], [], []>} : vector<4x4xbf16>, vector<4x32xbf16>, vector<4x32xf32> -> vector<4x32xf32>
    %851 = vector.broadcast %758 : vector<1x32xf32> to vector<4x32xf32>
    %852 = arith.mulf %850, %851 : vector<4x32xf32>
    %853 = arith.addf %824, %852 : vector<4x32xf32>
    %854 = vector.broadcast %765 : vector<1x32xf32> to vector<4x32xf32>
    %855 = arith.mulf %737, %854 : vector<4x32xf32>
    %856 = arith.truncf %855 : vector<4x32xf32> to vector<4x32xbf16>
    %857 = arith.truncf %695 : vector<4x32xf32> to vector<4x32xbf16>
    %cst_261 = arith.constant dense<0.000000e+00> : vector<4x4xf32>
    %858 = tpu.matmul %856, %857, %cst_261 {dimension_numbers = #tpu.dot_dimension_numbers<[1], [1], [0], [0], [0, 0, 1, 0], [], []>} : vector<4x32xbf16>, vector<4x32xbf16>, vector<4x4xf32> -> vector<4x4xf32>
    %cst_262 = arith.constant 0.000000e+00 : f32
    %859 = vector.broadcast %cst_262 : f32 to vector<1x4xf32>
    %860 = arith.cmpf ogt, %471, %859 : vector<1x4xf32>
    %cst_263 = arith.constant -1.000000e+30 : f32
    %861 = vector.shape_cast %860 : vector<1x4xi1> to vector<1x4xi1>
    %862 = vector.broadcast %861 : vector<1x4xi1> to vector<4x4xi1>
    %863 = vector.broadcast %cst_263 : f32 to vector<4x4xf32>
    %864 = arith.select %862, %858, %863 : vector<4x4xi1>, vector<4x4xf32>
    %cst_264 = arith.constant dense<0xFF800000> : vector<4xf32>
    %865 = vector.multi_reduction <maximumf>, %864, %cst_264 [1] : vector<4x4xf32> to vector<4xf32>
    %866 = vector.shape_cast %865 : vector<4xf32> to vector<4x1xf32>
    %867 = vector.broadcast %866 : vector<4x1xf32> to vector<4x4xf32>
    %868 = arith.subf %864, %867 : vector<4x4xf32>
    %869 = math.exp %868 : vector<4x4xf32>
    %cst_265 = arith.constant dense<0.000000e+00> : vector<4xf32>
    %870 = vector.multi_reduction <add>, %869, %cst_265 [1] : vector<4x4xf32> to vector<4xf32>
    %871 = vector.shape_cast %870 : vector<4xf32> to vector<4x1xf32>
    %872 = tpu.reciprocal %871 {approx = true} : vector<4x1xf32> -> vector<4x1xf32>
    %873 = vector.broadcast %872 : vector<4x1xf32> to vector<4x4xf32>
    %874 = arith.mulf %869, %873 : vector<4x4xf32>
    %875 = vector.broadcast %471 : vector<1x4xf32> to vector<4x4xf32>
    %876 = arith.mulf %874, %875 : vector<4x4xf32>
    %877 = arith.truncf %876 : vector<4x4xf32> to vector<4x4xbf16>
    %878 = arith.truncf %734 : vector<4x32xf32> to vector<4x32xbf16>
    %cst_266 = arith.constant dense<0.000000e+00> : vector<4x32xf32>
    %879 = tpu.matmul %877, %878, %cst_266 {dimension_numbers = #tpu.dot_dimension_numbers<[1], [0], [0], [1], [0, 0, 1, 1], [], []>} : vector<4x4xbf16>, vector<4x32xbf16>, vector<4x32xf32> -> vector<4x32xf32>
    %880 = vector.broadcast %765 : vector<1x32xf32> to vector<4x32xf32>
    %881 = arith.mulf %879, %880 : vector<4x32xf32>
    %882 = arith.addf %853, %881 : vector<4x32xf32>
    %883 = arith.truncf %882 : vector<4x32xf32> to vector<4x32xbf16>
    %cst_267 = arith.constant dense<0.000000e+00> : vector<4x32xf32>
    %884 = tpu.matmul %883, %483, %cst_267 {dimension_numbers = #tpu.dot_dimension_numbers<[1], [0], [0], [1], [0, 0, 1, 1], [], []>} : vector<4x32xbf16>, vector<32x32xbf16>, vector<4x32xf32> -> vector<4x32xf32>
    %885 = vector.broadcast %501 : vector<1x32xf32> to vector<4x32xf32>
    %886 = arith.addf %884, %885 : vector<4x32xf32>
    %887 = vector.broadcast %469 : vector<4x1xf32> to vector<4x32xf32>
    %888 = arith.mulf %886, %887 : vector<4x32xf32>
    %889 = vector.broadcast %469 : vector<4x1xf32> to vector<4x32xf32>
    %890 = arith.mulf %617, %889 : vector<4x32xf32>
    %891 = arith.addf %890, %888 : vector<4x32xf32>
    %cst_268 = arith.constant dense<0.000000e+00> : vector<4xf32>
    %892 = vector.multi_reduction <add>, %891, %cst_268 [1] : vector<4x32xf32> to vector<4xf32>
    %893 = vector.shape_cast %892 : vector<4xf32> to vector<4x1xf32>
    %cst_269 = arith.constant 3.200000e+01 : f32
    %894 = vector.broadcast %cst_269 : f32 to vector<4x1xf32>
    %895 = arith.divf %893, %894 : vector<4x1xf32>
    %896 = vector.broadcast %895 : vector<4x1xf32> to vector<4x32xf32>
    %897 = arith.subf %891, %896 : vector<4x32xf32>
    %898 = arith.mulf %897, %897 : vector<4x32xf32>
    %cst_270 = arith.constant dense<0.000000e+00> : vector<4xf32>
    %899 = vector.multi_reduction <add>, %898, %cst_270 [1] : vector<4x32xf32> to vector<4xf32>
    %900 = vector.shape_cast %899 : vector<4xf32> to vector<4x1xf32>
    %cst_271 = arith.constant 3.200000e+01 : f32
    %901 = vector.broadcast %cst_271 : f32 to vector<4x1xf32>
    %902 = arith.divf %900, %901 : vector<4x1xf32>
    %cst_272 = arith.constant 9.99999974E-6 : f32
    %903 = vector.broadcast %cst_272 : f32 to vector<4x1xf32>
    %904 = arith.addf %902, %903 : vector<4x1xf32>
    %905 = math.sqrt %904 : vector<4x1xf32>
    %906 = vector.broadcast %905 : vector<4x1xf32> to vector<4x32xf32>
    %907 = arith.divf %897, %906 : vector<4x32xf32>
    %908 = vector.broadcast %502 : vector<1x32xf32> to vector<4x32xf32>
    %909 = arith.mulf %907, %908 : vector<4x32xf32>
    %910 = vector.broadcast %503 : vector<1x32xf32> to vector<4x32xf32>
    %911 = arith.addf %909, %910 : vector<4x32xf32>
    %912 = arith.truncf %911 : vector<4x32xf32> to vector<4x32xbf16>
    %cst_273 = arith.constant dense<0.000000e+00> : vector<4x128xf32>
    %913 = tpu.matmul %912, %485, %cst_273 {dimension_numbers = #tpu.dot_dimension_numbers<[1], [0], [0], [1], [0, 0, 1, 1], [], []>} : vector<4x32xbf16>, vector<32x128xbf16>, vector<4x128xf32> -> vector<4x128xf32>
    %914 = vector.broadcast %487 : vector<1x128xf32> to vector<4x128xf32>
    %915 = arith.addf %913, %914 : vector<4x128xf32>
    %cst_274 = arith.constant 0.707106769 : f32
    %916 = vector.broadcast %cst_274 : f32 to vector<4x128xf32>
    %917 = arith.mulf %915, %916 : vector<4x128xf32>
    %918 = math.absf %917 : vector<4x128xf32>
    %cst_275 = arith.constant 0.327591091 : f32
    %919 = vector.broadcast %cst_275 : f32 to vector<4x128xf32>
    %920 = arith.mulf %919, %918 : vector<4x128xf32>
    %cst_276 = arith.constant 1.000000e+00 : f32
    %921 = vector.broadcast %cst_276 : f32 to vector<4x128xf32>
    %922 = arith.addf %921, %920 : vector<4x128xf32>
    %cst_277 = arith.constant 1.000000e+00 : f32
    %923 = vector.broadcast %cst_277 : f32 to vector<4x128xf32>
    %924 = arith.divf %923, %922 : vector<4x128xf32>
    %cst_278 = arith.constant 1.06140542 : f32
    %925 = vector.broadcast %cst_278 : f32 to vector<4x128xf32>
    %926 = arith.mulf %924, %925 : vector<4x128xf32>
    %cst_279 = arith.constant -1.45315206 : f32
    %927 = vector.broadcast %cst_279 : f32 to vector<4x128xf32>
    %928 = arith.addf %927, %926 : vector<4x128xf32>
    %929 = arith.mulf %924, %928 : vector<4x128xf32>
    %cst_280 = arith.constant 1.42141378 : f32
    %930 = vector.broadcast %cst_280 : f32 to vector<4x128xf32>
    %931 = arith.addf %930, %929 : vector<4x128xf32>
    %932 = arith.mulf %924, %931 : vector<4x128xf32>
    %cst_281 = arith.constant -0.284496725 : f32
    %933 = vector.broadcast %cst_281 : f32 to vector<4x128xf32>
    %934 = arith.addf %933, %932 : vector<4x128xf32>
    %935 = arith.mulf %924, %934 : vector<4x128xf32>
    %cst_282 = arith.constant 0.254829586 : f32
    %936 = vector.broadcast %cst_282 : f32 to vector<4x128xf32>
    %937 = arith.addf %936, %935 : vector<4x128xf32>
    %938 = arith.mulf %924, %937 : vector<4x128xf32>
    %cst_283 = arith.constant 0.000000e+00 : f32
    %939 = vector.broadcast %cst_283 : f32 to vector<4x128xf32>
    %940 = arith.subf %939, %918 : vector<4x128xf32>
    %941 = arith.mulf %940, %918 : vector<4x128xf32>
    %942 = math.exp %941 : vector<4x128xf32>
    %943 = arith.mulf %938, %942 : vector<4x128xf32>
    %cst_284 = arith.constant 1.000000e+00 : f32
    %944 = vector.broadcast %cst_284 : f32 to vector<4x128xf32>
    %945 = arith.subf %944, %943 : vector<4x128xf32>
    %cst_285 = arith.constant 0.000000e+00 : f32
    %946 = vector.broadcast %cst_285 : f32 to vector<4x128xf32>
    %947 = arith.cmpf oge, %917, %946 : vector<4x128xf32>
    %cst_286 = arith.constant 0.000000e+00 : f32
    %948 = vector.broadcast %cst_286 : f32 to vector<4x128xf32>
    %949 = arith.subf %948, %945 : vector<4x128xf32>
    %950 = arith.select %947, %945, %949 : vector<4x128xi1>, vector<4x128xf32>
    %cst_287 = arith.constant 5.000000e-01 : f32
    %951 = vector.broadcast %cst_287 : f32 to vector<4x128xf32>
    %952 = arith.mulf %951, %915 : vector<4x128xf32>
    %cst_288 = arith.constant 1.000000e+00 : f32
    %953 = vector.broadcast %cst_288 : f32 to vector<4x128xf32>
    %954 = arith.addf %953, %950 : vector<4x128xf32>
    %955 = arith.mulf %952, %954 : vector<4x128xf32>
    %956 = arith.truncf %955 : vector<4x128xf32> to vector<4x128xbf16>
    %cst_289 = arith.constant dense<0.000000e+00> : vector<4x32xf32>
    %957 = tpu.matmul %956, %489, %cst_289 {dimension_numbers = #tpu.dot_dimension_numbers<[1], [0], [0], [1], [0, 0, 1, 1], [], []>} : vector<4x128xbf16>, vector<128x32xbf16>, vector<4x32xf32> -> vector<4x32xf32>
    %958 = vector.broadcast %504 : vector<1x32xf32> to vector<4x32xf32>
    %959 = arith.addf %957, %958 : vector<4x32xf32>
    %960 = vector.broadcast %469 : vector<4x1xf32> to vector<4x32xf32>
    %961 = arith.mulf %959, %960 : vector<4x32xf32>
    %962 = arith.addf %891, %961 : vector<4x32xf32>
    %963 = vector.shape_cast %962 : vector<4x32xf32> to vector<1x4x32xf32>
    %c0_290 = arith.constant 0 : index
    %c0_291 = arith.constant 0 : index
    %c0_292 = arith.constant 0 : index
    %964 = vector.load %arg20[%c0_290, %c0_291, %c0_292] : memref<1x4x32xf32, #tpu.memory_space<vmem>>, vector<1x4x32xf32>
    tpu.vector_store %arg20[%c0_290, %c0_291, %c0_292], %963 {strides = array<i32>} : memref<1x4x32xf32, #tpu.memory_space<vmem>>, vector<1x4x32xf32>,
    return
  }
  func.func @transform_0(%arg0: i32) -> (i32, i32, i32) {
    %c0_i32 = arith.constant 0 : i32
    %c0_i32_0 = arith.constant 0 : i32
    %c0_i32_1 = arith.constant 0 : i32
    return %arg0, %c0_i32, %c0_i32_0 : i32, i32, i32
  }
  func.func @transform_1(%arg0: i32) -> (i32, i32, i32) {
    %c0_i32 = arith.constant 0 : i32
    %c0_i32_0 = arith.constant 0 : i32
    %c0_i32_1 = arith.constant 0 : i32
    return %arg0, %c0_i32, %c0_i32_0 : i32, i32, i32
  }
  func.func @transform_2(%arg0: i32) -> (i32, i32, i32) {
    %c0_i32 = arith.constant 0 : i32
    %c0_i32_0 = arith.constant 0 : i32
    %c0_i32_1 = arith.constant 0 : i32
    return %arg0, %c0_i32, %c0_i32_0 : i32, i32, i32
  }
  func.func @transform_3(%arg0: i32) -> (i32, i32, i32) {
    %c0_i32 = arith.constant 0 : i32
    %c0_i32_0 = arith.constant 0 : i32
    %c0_i32_1 = arith.constant 0 : i32
    return %arg0, %c0_i32, %c0_i32_0 : i32, i32, i32
  }
  func.func @transform_4(%arg0: i32) -> (i32, i32, i32) {
    %c0_i32 = arith.constant 0 : i32
    %c0_i32_0 = arith.constant 0 : i32
    %c0_i32_1 = arith.constant 0 : i32
    return %arg0, %c0_i32, %c0_i32_0 : i32, i32, i32
  }
  func.func @transform_5(%arg0: i32) -> (i32, i32, i32) {
    %c0_i32 = arith.constant 0 : i32
    %c0_i32_0 = arith.constant 0 : i32
    %c0_i32_1 = arith.constant 0 : i32
    return %arg0, %c0_i32, %c0_i32_0 : i32, i32, i32
  }
  func.func @transform_6(%arg0: i32) -> (i32, i32, i32) {
    %c0_i32 = arith.constant 0 : i32
    %c0_i32_0 = arith.constant 0 : i32
    %c0_i32_1 = arith.constant 0 : i32
    return %arg0, %c0_i32, %c0_i32_0 : i32, i32, i32
  }
  func.func @transform_7(%arg0: i32) -> (i32, i32, i32) {
    %c0_i32 = arith.constant 0 : i32
    %c0_i32_0 = arith.constant 0 : i32
    %c0_i32_1 = arith.constant 0 : i32
    return %arg0, %c0_i32, %c0_i32_0 : i32, i32, i32
  }
  func.func @transform_8(%arg0: i32) -> (i32, i32) {
    %c0_i32 = arith.constant 0 : i32
    %c0_i32_0 = arith.constant 0 : i32
    %c0_i32_1 = arith.constant 0 : i32
    return %c0_i32, %c0_i32_0 : i32, i32
  }
  func.func @transform_9(%arg0: i32) -> (i32, i32) {
    %c0_i32 = arith.constant 0 : i32
    %c0_i32_0 = arith.constant 0 : i32
    %c0_i32_1 = arith.constant 0 : i32
    return %c0_i32, %c0_i32_0 : i32, i32
  }
  func.func @transform_10(%arg0: i32) -> (i32, i32) {
    %c0_i32 = arith.constant 0 : i32
    %c0_i32_0 = arith.constant 0 : i32
    %c0_i32_1 = arith.constant 0 : i32
    return %c0_i32, %c0_i32_0 : i32, i32
  }
  func.func @transform_11(%arg0: i32) -> (i32, i32, i32) {
    %c0_i32 = arith.constant 0 : i32
    %c0_i32_0 = arith.constant 0 : i32
    %c0_i32_1 = arith.constant 0 : i32
    %c0_i32_2 = arith.constant 0 : i32
    return %c0_i32, %c0_i32_0, %c0_i32_1 : i32, i32, i32
  }
  func.func @transform_12(%arg0: i32) -> (i32, i32, i32, i32) {
    %c0_i32 = arith.constant 0 : i32
    %c0_i32_0 = arith.constant 0 : i32
    %c0_i32_1 = arith.constant 0 : i32
    %c0_i32_2 = arith.constant 0 : i32
    %c0_i32_3 = arith.constant 0 : i32
    return %c0_i32, %c0_i32_0, %c0_i32_1, %c0_i32_2 : i32, i32, i32, i32
  }
  func.func @transform_13(%arg0: i32) -> (i32, i32, i32, i32) {
    %c0_i32 = arith.constant 0 : i32
    %c0_i32_0 = arith.constant 0 : i32
    %c0_i32_1 = arith.constant 0 : i32
    %c0_i32_2 = arith.constant 0 : i32
    %c0_i32_3 = arith.constant 0 : i32
    return %c0_i32, %c0_i32_0, %c0_i32_1, %c0_i32_2 : i32, i32, i32, i32
  }
  func.func @transform_14(%arg0: i32) -> (i32, i32, i32) {
    %c0_i32 = arith.constant 0 : i32
    %c0_i32_0 = arith.constant 0 : i32
    %c0_i32_1 = arith.constant 0 : i32
    %c0_i32_2 = arith.constant 0 : i32
    return %c0_i32, %c0_i32_0, %c0_i32_1 : i32, i32, i32
  }
  func.func @transform_15(%arg0: i32) -> (i32, i32, i32) {
    %c0_i32 = arith.constant 0 : i32
    %c0_i32_0 = arith.constant 0 : i32
    %c0_i32_1 = arith.constant 0 : i32
    %c0_i32_2 = arith.constant 0 : i32
    return %c0_i32, %c0_i32_0, %c0_i32_1 : i32, i32, i32
  }
  func.func @transform_16(%arg0: i32) -> (i32, i32, i32) {
    %c0_i32 = arith.constant 0 : i32
    %c0_i32_0 = arith.constant 0 : i32
    %c0_i32_1 = arith.constant 0 : i32
    %c0_i32_2 = arith.constant 0 : i32
    return %c0_i32, %c0_i32_0, %c0_i32_1 : i32, i32, i32
  }
  func.func @transform_17(%arg0: i32) -> (i32, i32, i32) {
    %c0_i32 = arith.constant 0 : i32
    %c0_i32_0 = arith.constant 0 : i32
    %c0_i32_1 = arith.constant 0 : i32
    return %arg0, %c0_i32, %c0_i32_0 : i32, i32, i32
  }
  func.func @transform_18(%arg0: i32) -> (i32, i32, i32) {
    %c0_i32 = arith.constant 0 : i32
    %c0_i32_0 = arith.constant 0 : i32
    %c0_i32_1 = arith.constant 0 : i32
    return %arg0, %c0_i32, %c0_i32_0 : i32, i32, i32
  }
  func.func @transform_19(%arg0: i32) -> (i32, i32, i32) {
    %c0_i32 = arith.constant 0 : i32
    %c0_i32_0 = arith.constant 0 : i32
    %c0_i32_1 = arith.constant 0 : i32
    return %arg0, %c0_i32, %c0_i32_0 : i32, i32, i32
  }
}

</mosaic_0001>

<bundles_post_ra>
// kernel: backbone_forward.2
= control target key start
LH: loop header
LB: loop body
LE: loop exit
PB: predicated region body
PF: predicated region fallthrough
CT: control target
= control target key end

     0   :  { %s5348_s0 = inlined_call_operand.vmem [shape: f32[2,16,16], index: 0, kind: input, shape index: {}]   ;;  %s5349_s1 = inlined_call_operand.vmem [shape: f32[2,16,1], index: 1, kind: input, shape index: {}]   ;;  %s5350_s2 = inlined_call_operand.vmem [shape: f32[2,1,16], index: 2, kind: input, shape index: {}]   ;;  %s5351_s3 = inlined_call_operand.hbm [shape: bf16[3,16,28], index: 3, kind: input, shape index: {}]   ;;  %s5352_s4 = inlined_call_operand.hbm [shape: f32[1,28], index: 4, kind: input, shape index: {}]   ;;  %s5353_s5 = inlined_call_operand.hbm [shape: bf16[3,28,28], index: 5, kind: input, shape index: {}]   ;;  %s5354_s6 = inlined_call_operand.hbm [shape: f32[1,28], index: 6, kind: input, shape index: {}]   ;;  %s5355_s7 = inlined_call_operand.vmem [shape: f32[2,15,28], index: 7, kind: input, shape index: {}]   ;;  %s5356_s8 = inlined_call_operand.vmem [shape: f32[2,3,3,28], index: 8, kind: input, shape index: {}]   ;;  %s5357_s9 = inlined_call_operand.vmem [shape: bf16[2,4,28,28], index: 9, kind: input, shape index: {}]   ;;  %s5358_s10 = inlined_call_operand.vmem [shape: bf16[2,28,112], index: 10, kind: input, shape index: {}]   ;;  %s5359_s11 = inlined_call_operand.hbm [shape: f32[2,1,112], index: 11, kind: input, shape index: {}]   ;;  %s5360_s12 = inlined_call_operand.vmem [shape: bf16[2,112,28], index: 12, kind: input, shape index: {}]   ;;  %s5361_s13 = inlined_call_operand.vmem [shape: f32[2,16,32], index: 13, kind: output, shape index: {}]  }
   0x1   :  { %5367 = sst [smem:[#allocation14_spill]] %s5351_s3 }
   0x2   :  { %18 = vsyncpa [#allocation3], 0 }
   0x3   :  { %19 = vsyncpa [#allocation5], 0 }
   0x4   :  { %20 = vsyncpa [#allocation8], 0  ;;  %s4421_s25 = smov 0  }
   0x5 LB: > { %5368 = sst [smem:[#allocation13_spill]] %s4337_s25  ;;  %s4339_s26 = smov [#allocation4]   ;;  %s4337_s25 = sphi %s4421_s25, %s26_s25  }
   0x6   : > { %s371_s27 = sshll.u32 %s4339_s26, 4  ;;  %s4427_s28 = sadd.s32 4294967295, %s4337_s25   ;;  %s4432_s27 = int_to_ptr.vmem [resolvable:$true] %s371_s27 }
   0x7   : > { %p3466_p0 = scmp.ge.s32.totalorder %s4337_s25, 1  ;;  %p345_p1 = scmp.lt.s32.totalorder %s4337_s25, 3 }
   0x8   : > { %p5363_p2 = scmp.eq.s32.totalorder %s4427_s28, 0  ;;  %s4340_s30 = smov [#allocation7]  }
   0x9   : > { %p4434_p3 = pnand %p3466_p0, %p345_p1  ;;  %s395_s14 = sshll.u32 %s4340_s30, 4  ;;  %s4440_s14 = int_to_ptr.vmem [resolvable:$true] %s395_s14 }
   0xa   : > { %s4341_s15 = smov [#allocation2]   ;;  %s4342_s18 = smov [#allocation6]  }
   0xb   : > { %s5369_s29 = scalar_select %p4434_p3, 1, 0 }
   0xc   : > { %p3927_p4 = pneg %p4434_p3  ;;  %s357_s16 = sshll.u32 %s4341_s15, 4  ;;  %s4448_s16 = int_to_ptr.vmem [resolvable:$true] %s357_s16 }
   0xd   : > { %s4450_s19 = sshll.u32 %s4342_s18, 4  ;;  %s4179_s22 = scalar_lea.hbm %s5352_s4, 16  ;;  %s382_s19 = int_to_ptr.vmem [resolvable:$true] %s4450_s19 }
   0xe   : > { %p4444_p5 = pnand %p5363_p2, %p3927_p4  ;;  %p4180_p6 = scmp.ne.s32.totalorder %s5352_s4, %s4179_s22 }
   0xf   : > { %p4186_p10 = scmp.lt.u32.totalorder %s4179_s22, %s5352_s4 }
  0x10   : > { %p4460_p7 = pneg %p4444_p5 }
  0x12   : > { %p4182_p8 = pnand %p4460_p7, %p4180_p6 }
  0x14   : > { %p4183_p9 = pneg %p4182_p8 }
  0x16   : > { %p4188_p11 = pnand %p4186_p10, %p4183_p9 }
  0x18   : > { %4191 = shalt.err (!%p4188_p11)
}
  0x19   : > { %s4192_s18 = scalar_lea.vmem %s4432_s27, 16  ;;  %s4199_s20 = scalar_lea.vmem %s4432_s27, 32 }
  0x1a   : > { %p4193_p12 = scmp.ne.s32.totalorder %s4432_s27, %s4192_s18  ;;  %p4200_p1 = scmp.lt.s32.totalorder %s4432_s27, %s4432_s27 }
  0x1b   : > { %p4201_p4 = scmp.lt.s32.totalorder %s4199_s20, %s4192_s18 }
  0x1c   : > { %p4195_p13 = pnand %p4193_p12, %p4460_p7 }
  0x1d   : > { %p4202_p6 = por %p4201_p4, %p4200_p1 }
  0x1e   : > { %p4196_p0 = pneg %p4195_p13 }
  0x20   : > { %p4203_p8 = pnand %p4202_p6, %p4196_p0 }
  0x22   : > { %4206 = shalt.err (!%p4203_p8)
}
  0x23   : > { %3933 = dma.hbm_to_vmem [thread:$0]  (!%p4444_p5), %s5352_s4, 16, %s4432_s27, [#allocation5]  }
  0x24   : > { %s4207_s30 = scalar_lea.hbm %s5354_s6, 16 }
  0x25   : > { %p4208_p9 = scmp.ne.s32.totalorder %s5354_s6, %s4207_s30  ;;  %p4214_p12 = scmp.lt.u32.totalorder %s4207_s30, %s5354_s6 }
  0x27   : > { %p4210_p10 = pnand %p4208_p9, %p4460_p7 }
  0x29   : > { %p4211_p11 = pneg %p4210_p10 }
  0x2b   : > { %p4216_p13 = pnand %p4214_p12, %p4211_p11 }
  0x2d   : > { %4219 = shalt.err (!%p4216_p13)
}
  0x2e   : > { %s4220_s27 = scalar_lea.vmem %s4440_s14, 16  ;;  %s4227_s25 = scalar_lea.vmem %s4440_s14, 32 }
  0x2f   : > { %p4221_p0 = scmp.ne.s32.totalorder %s4440_s14, %s4220_s27  ;;  %p4228_p6 = scmp.lt.s32.totalorder %s4440_s14, %s4440_s14 }
  0x30   : > { %p4229_p8 = scmp.lt.s32.totalorder %s4227_s25, %s4220_s27 }
  0x31   : > { %p4223_p1 = pnand %p4221_p0, %p4460_p7 }
  0x32   : > { %p4230_p9 = por %p4229_p8, %p4228_p6 }
  0x33   : > { %p4224_p4 = pneg %p4223_p1 }
  0x35   : > { %p4231_p10 = pnand %p4230_p9, %p4224_p4 }
  0x37   : > { %4234 = shalt.err (!%p4231_p10)
}
  0x38   : > { %3939 = dma.hbm_to_vmem [thread:$0]  (!%p4444_p5), %s5354_s6, 16, %s4440_s14, [#allocation8]  }
  0x39   : > { %s5372_s3 = sld [smem:[#allocation14_spill]] }
  0x3f   : > { %s4235_s30 = scalar_lea.hbm %s5372_s3, 384 }
  0x40   : > { %p4236_p11 = scmp.ne.s32.totalorder %s5372_s3, %s4235_s30  ;;  %p4242_p0 = scmp.lt.u32.totalorder %s4235_s30, %s5372_s3 }
  0x42   : > { %p4238_p12 = pnand %p4236_p11, %p4460_p7 }
  0x44   : > { %p4239_p13 = pneg %p4238_p12 }
  0x46   : > { %p4244_p1 = pnand %p4242_p0, %p4239_p13 }
  0x48   : > { %4247 = shalt.err (!%p4244_p1)
}
  0x49   : > { %s4248_s14 = scalar_lea.vmem %s4448_s16, 384  ;;  %p4256_p9 = scmp.lt.s32.totalorder %s4448_s16, %s4448_s16 }
  0x4a   : > { %p4249_p4 = scmp.ne.s32.totalorder %s4448_s16, %s4248_s14  ;;  %p4257_p10 = scmp.lt.s32.totalorder %s4248_s14, %s4248_s14 }
  0x4c   : > { %p4251_p6 = pnand %p4249_p4, %p4460_p7  ;;  %p4258_p11 = por %p4257_p10, %p4256_p9 }
  0x4e   : > { %p4252_p8 = pneg %p4251_p6 }
  0x50   : > { %p4259_p12 = pnand %p4258_p11, %p4252_p8 }
  0x52   : > { %4262 = shalt.err (!%p4259_p12)
}
  0x53   : > { %s4343_s25 = smov 64   ;;  %s4344_s21 = smov 4  }
  0x54   : > { %3930 = dma.hbm_to_vmem [thread:$0]  (!%p4444_p5), %s5372_s3, 384, %s4448_s16, [#allocation3], %s4343_s25, %s4343_s25, %s4344_s21  }
  0x55   : > { %s4263_s15 = scalar_lea.hbm %s5353_s5, 768 }
  0x56   : > { %p4264_p13 = scmp.ne.s32.totalorder %s5353_s5, %s4263_s15  ;;  %p4270_p4 = scmp.lt.u32.totalorder %s4263_s15, %s5353_s5 }
  0x58   : > { %p4266_p0 = pnand %p4264_p13, %p4460_p7 }
  0x5a   : > { %p4267_p1 = pneg %p4266_p0 }
  0x5c   : > { %p4272_p6 = pnand %p4270_p4, %p4267_p1 }
  0x5e   : > { %4275 = shalt.err (!%p4272_p6)
}
  0x5f   : > { %s4276_s22 = scalar_lea.vmem %s382_s19, 768  ;;  %p4284_p11 = scmp.lt.s32.totalorder %s382_s19, %s382_s19 }
  0x60   : > { %p4277_p8 = scmp.ne.s32.totalorder %s382_s19, %s4276_s22  ;;  %p4285_p12 = scmp.lt.s32.totalorder %s4276_s22, %s4276_s22 }
  0x62   : > { %p4279_p9 = pnand %p4277_p8, %p4460_p7  ;;  %p4286_p2 = por %p4285_p12, %p4284_p11 }
  0x64   : > { %p4280_p10 = pneg %p4279_p9 }
  0x66   : > { %p4287_p3 = pnand %p4286_p2, %p4280_p10 }
  0x68   : > { %4290 = shalt.err (!%p4287_p3)
}
  0x69   : > { %3936 = dma.hbm_to_vmem [thread:$0]  (!%p4444_p5), %s5353_s5, 768, %s382_s19, [#allocation5], %s4343_s25, %s4343_s25, %s4344_s21  }
  0x6a   : > { %s4345_s24 = smov [#allocation9]   ;;  %s4291_s20 = scalar_lea.hbm %s5359_s11, 32 }
  0x6b   : > { %s417_s30 = sshll.u32 %s4345_s24, 4  ;;  %p4292_p13 = scmp.ne.s32.totalorder %s5359_s11, %s4291_s20  ;;  %s418_s30 = int_to_ptr.vmem [resolvable:$true] %s417_s30 }
  0x6c   : > { %p4298_p0 = scmp.lt.u32.totalorder %s4291_s20, %s5359_s11 }
  0x6d   : > { %p4294_p2 = pnand %p4292_p13, %p4460_p7 }
  0x6f   : > { %p4295_p3 = pneg %p4294_p2 }
  0x71   : > { %p4300_p1 = pnand %p4298_p0, %p4295_p3 }
  0x73   : > { %4303 = shalt.err (!%p4300_p1)
}
  0x74   : > { %s4304_s19 = scalar_lea.vmem %s418_s30, 32  ;;  %p4312_p9 = scmp.lt.s32.totalorder %s418_s30, %s418_s30 }
  0x75   : > { %p4305_p4 = scmp.ne.s32.totalorder %s418_s30, %s4304_s19  ;;  %p4313_p10 = scmp.lt.s32.totalorder %s4304_s19, %s4304_s19 }
  0x77   : > { %p4307_p6 = pnand %p4305_p4, %p4460_p7  ;;  %p4314_p11 = por %p4313_p10, %p4312_p9 }
  0x79   : > { %p4308_p8 = pneg %p4307_p6 }
  0x7b   : > { %p4315_p12 = pnand %p4314_p11, %p4308_p8 }
  0x7d   : > { %4318 = shalt.err (!%p4315_p12)
}
  0x7e   : > { %s4346_s25 = smov 16   ;;  %s4347_s21 = smov 1  }
  0x7f   : > { %3942 = dma.hbm_to_vmem [thread:$0]  (!%p4444_p5), %s5359_s11, 32, %s418_s30, [#allocation8], %s4346_s25, %s4346_s25, %s4347_s21  }
  0x80   : > { %p5373_p13 = scmp.ne.s32.totalorder %s5369_s29, 0 }
  0x81   : > { %p5374_p2 = scmp.eq.s32.totalorder (!%p5373_p13), %s4427_s28, 0 }
  0x82   : > { %458 = sbr.rel (%p5373_p13) target bundleno = 6037 (0x1795), region = 72 }
  0x89   : > { %4324 = dma.done.wait (%p5374_p2), [#allocation3], 384   ;;  %p5375_p7 = pmov %p5374_p2 }
  0x8a   : > { %p5376_p3 = pmov %p5374_p2 }
  0x8b   : > { %4326 = vsyncadd (%p5375_p7), [#allocation3], 4294966912 }
  0x8c   : > { %4328 = dma.done.wait (%p5376_p3), [#allocation5], 784   ;;  %p5377_p0 = pmov %p5374_p2 }
  0x8e   : > { %4330 = vsyncadd (%p5377_p0), [#allocation5], 4294966512  ;;  %p5378_p1 = pmov %p5377_p0 }
  0x8f   : > { %p5379_p5 = pmov %p5377_p0 }
  0x90   : > { %4332 = dma.done.wait (%p5378_p1), [#allocation8], 48  }
  0x91   : > { %4334 = vsyncadd (%p5379_p5), [#allocation8], 4294967248  ;;  %p526_p4 = scmp.lt.s32.totalorder %s4427_s28, 1  ;;  %v552_v0 = vlaneseq  ;;  %v4348_v1 = vmov 0.0   ;;  %vm4349_vm0 = vmmov 0   ;;  %vm3333_vm1 = vcmask 261120  }
  0x92   : > { %3707 = vmatprep.subr.bf16.mxu0 %v4348_v1  ;;  %3713 = vmatprep.subr.bf16.mxu1 %v4348_v1  ;;  %v4350_v2 = vmov 0   ;;  %vm585_vm2 = vcmask 130048   ;;  %v3974_v4 = vld [vmem:[#allocation2 + $0x8] sm:$0xff]   ;;  %v3975_v6 = vld [vmem:[#allocation2] sm:$0xff]   ;;  %v3976_v14 = vld [vmem:[#allocation2 + $0x10] sm:$0xff]   ;;  %vm797_vm8 = vcmask 1045504  }
  0x93   : > { %3709 = vmatprep.mubr.msk.bf16.mxu0 %vm4349_vm0, %v4348_v1  ;;  %s5386_s28 = smov (!%p526_p4, %s4427_s28), 1  ;;  %3715 = vmatprep.mubr.msk.bf16.mxu1 %vm4349_vm0, %v4348_v1  ;;  %v4589_v3 = vshrl.u32 %v552_v0, 7  ;;  %v3977_v27 = vld [vmem:[#allocation6 + $0x10] sm:$0xff]   ;;  %v3978_v28 = vld [vmem:[#allocation6 + $0x18] sm:$0x3f]   ;;  %v3979_v29 = vld [vmem:[#allocation6] sm:$0xff]  }
  0x94   : > { %3973 = vset.pattern.permute.xlu0 %v4350_v2  ;;  %s3623_s29 = sshll.u32 %s5386_s28, 4  ;;  %s4610_s27 = scalar_lea.vmem %s5350_s2, %s5386_s28  ;;  %3708 = vmatpush3.bf16.msra.mxu0 %v3974_v4  ;;  %v799_v30 = vsel %vm797_vm8, %v3978_v28, 0  ;;  %v3980_v31 = vld [vmem:[#allocation6 + $0x8] sm:$0x3f]   ;;  %v3491_v45 = vld [vmem:[#allocation4] ss:$0 sm:$0xff] }
  0x95   : > { %s4594_s23 = scalar_lea.vmem %s5361_s13, %s3623_s29  ;;  %s530_s15 = scalar_lea.vmem %s5348_s0, %s3623_s29  ;;  %v4604_v5 = vadd.s32 8, %v4589_v3  ;;  %vm554_vm3 = vcmp.lt.s32.totalorder %v4589_v3, 1  ;;  %vm5365_vm4 = vcmp.ge.s32.totalorder %v4589_v3, 1  ;;  %vm565_vm5 = vcmp.lt.s32.totalorder %v4589_v3, 7  ;;  %3714 = vmatpush3.bf16.msra.mxu1 %v3975_v6  ;;  %3719 = vmatprep.subr.bf16.mxu0 %v4348_v1  ;;  %v549_v15 = vld [vmem:[%s4610_s27] sm:$0x1] }
  0x96   : > { %3334 = vst.msk [vmem:[%s4594_s23] sm:$0xff] %vm3333_vm1, %v4348_v1  ;;  %3335 = vst.msk [vmem:[%s4594_s23 + $0x8] sm:$0xff] %vm3333_vm1, %v4348_v1  ;;  %s535_s19 = scalar_lea.vmem %s5349_s1, %s3623_s29  ;;  %v545_v7 = vld [vmem:[%s530_s15] sm:$0xff]  ;;  %v546_v8 = vld [vmem:[%s530_s15 + $0x8] sm:$0xff]  ;;  %3725 = vmatprep.subr.bf16.mxu1 %v4348_v1  ;;  %vm1620_vm7 = vcmp.gt.f32.partialorder %v549_v15, 0.0  ;;  %v857_v32 = vsel %vm797_vm8, %v3980_v31, 0 }
  0x97   : > { %v550_v9 = vrot.slane %v545_v7, 7  ;;  %v551_v10 = vrot.slane %v546_v8, 7  ;;  %v563_v11 = vrot.slane %v545_v7, 1  ;;  %v564_v12 = vrot.slane %v546_v8, 1  ;;  %v547_v16 = vld [vmem:[%s535_s19] sm:$0xff]  ;;  %v548_v21 = vld [vmem:[%s535_s19 + $0x8] sm:$0xff] }
  0x98   : > { %v575_v13 = vpack.c.bf16 %v546_v8, %v545_v7  ;;  %vm5366_vm6 = vcmp.le.s32.totalorder %v4604_v5, 14  ;;  %746 = vperm.xlu0 %3973, %v547_v16   ;;  %v4636_v25 = vsel %vm1620_vm7, 1, %v4350_v2  ;;  %vm793_vm9 = vcmask 228352   ;;  %v3981_v59 = vld [vmem:[#allocation6 + $0x20] sm:$0xff]   ;;  %v3982_v2 = vld [vmem:[#allocation6 + $0x28] sm:$0x3f]  }
  0x99   : > { %v555_v17 = vsel %vm554_vm3, %v550_v9, %v551_v10  ;;  %v556_v18 = vsel %vm554_vm3, %v551_v10, %v550_v9  ;;  %v567_v19 = vsel %vm565_vm5, %v564_v12, %v563_v11  ;;  %v566_v23 = vsel %vm565_vm5, %v563_v11, %v564_v12 }
  0x9a   : > { %3710 = vmatmul.mubr.msk.bf16.vlgmr.msra.gmra.mrb[0].mxu0 %vm585_vm2, %v575_v13  ;;  %v560_v20 = vsel %vm5365_vm4, %v556_v18, 0.0  ;;  %v571_v24 = vsel %vm5366_vm6, %v567_v19, 0.0  ;;  %v920_v12 = vsel %vm797_vm8, %v3982_v2, 0 }
  0x9b   : > { %v562_v22 = vpack.c.bf16 %v555_v17, %v560_v20  ;;  %3720 = vmatpush3.bf16.msra.mxu0 %v3976_v14  ;;  %3721 = vmatprep.mubr.msk.bf16.mxu0 %vm4349_vm0, %v4348_v1  ;;  %v572_v26 = vpack.c.bf16 %v571_v24, %v566_v23 }
  0x9c   : > { %3733 = vmatprep.subr.bf16.mxu0 %v4348_v1  ;;  %751 = vperm.xlu0 %3973, %v548_v21  }
  0x9d   : > { %3716 = vmatmul.mubr.msk.bf16.vlgmr.msra.gmra.mrb[0].mxu1 %vm585_vm2, %v562_v22 }
  0x9e   : > { %3729 = vmatprep.mubr.msk.bf16.mxu1 %vm4349_vm0, %v4348_v1  ;;  %3726 = vmatpush3.bf16.msra.mxu1 %v3977_v27 }
  0x9f   : > { %3727 = vmatprep.subr.bf16.mxu1 %v4348_v1 }
  0xa2   : > { %3722 = vmatmul.mubr.msk.bf16.vlgmr.msra.gmra.mrb[4].mxu0 %vm585_vm2, %v572_v26  ;;  %3728 = vmatpush3.bf16.msra.mxu1 %v799_v30  ;;  %v3501_v26 = vld [vmem:[#allocation7] ss:$0 sm:$0xff] }
  0xa3   : > { %3737 = vmatprep.mubr.msk.bf16.mxu0 %vm4349_vm0, %v4348_v1  ;;  %3734 = vmatpush3.bf16.msra.mxu0 %v3979_v29 }
  0xa4   : > { %3735 = vmatprep.subr.bf16.mxu0 %v4348_v1  ;;  %3741 = vmatprep.subr.bf16.mxu1 %v4348_v1 }
  0xa7   : > { %3736 = vmatpush3.bf16.msra.mxu0 %v857_v32 }
  0xa8   : > { %3749 = vmatprep.subr.bf16.mxu0 %v4348_v1 }
 0x117   : > { %v4651_v43 = vpop.permute.xlu0 %746 }
 0x11b   : > { %v4654_v54 = vpop.permute.xlu0 %751 }
 0x16d   : > { %v623_v33 = vpop.f32.mrb[0].mxu0 }
 0x16e   : > { %v3711_v34 = vpop.f32.mrb[1].mxu0 }
 0x16f   : > { %v626_v35 = vpop.f32.mrb[2].mxu0 }
 0x170   : > { %v673_v36 = vpop.f32.mrb[0].mxu1  ;;  %v3712_v37 = vpop.f32.mrb[3].mxu0 }
 0x171   : > { %v674_v38 = vadd.f32 %v673_v36, %v623_v33  ;;  %v3717_v39 = vpop.f32.mrb[1].mxu1 }
 0x172   : > { %v676_v40 = vpop.f32.mrb[2].mxu1 }
 0x173   : > { %v677_v41 = vadd.f32 %v676_v40, %v626_v35  ;;  %v3718_v42 = vpop.f32.mrb[3].mxu1 }
 0x175   : > { %v726_v44 = vpop.f32.mrb[4].mxu0 }
 0x176   : > { %v733_v46 = vadd.f32 %v726_v44, %v674_v38  ;;  %v3723_v47 = vpop.f32.mrb[5].mxu0 }
 0x177   : > { %v729_v48 = vpop.f32.mrb[6].mxu0 }
 0x178   : > { %v742_v49 = vadd.f32 %v3491_v45, %v733_v46  ;;  %v734_v50 = vadd.f32 %v729_v48, %v677_v41  ;;  %v3724_v51 = vpop.f32.mrb[7].mxu0 }
 0x17a   : > { %v754_v52 = vmul.f32 %v4651_v43, %v742_v49  ;;  %v743_v53 = vadd.f32 %v3491_v45, %v734_v50 }
 0x17c   : > { %v756_v55 = vmax.f32 %v754_v52, 0.0  ;;  %v755_v56 = vmul.f32 %v4654_v54, %v743_v53 }
 0x17e   : > { %v757_v57 = vmax.f32 %v755_v56, 0.0  ;;  %v758_v58 = vrot.slane %v756_v55, 7  ;;  %v765_v60 = vrot.slane %v756_v55, 1 }
 0x180   : > { %v759_v61 = vrot.slane %v757_v57, 7  ;;  %v766_v62 = vrot.slane %v757_v57, 1  ;;  %v776_v63 = vpack.c.bf16 %v757_v57, %v756_v55 }
 0x182   : > { %3730 = vmatmul.mubr.msk.bf16.vlgmr.msra.gmra.mrb[4].mxu1 %vm793_vm9, %v776_v63  ;;  %v760_v4 = vsel %vm554_vm3, %v758_v58, %v759_v61  ;;  %v761_v6 = vsel %vm554_vm3, %v759_v61, %v758_v58  ;;  %v767_v7 = vsel %vm565_vm5, %v765_v60, %v766_v62  ;;  %v768_v8 = vsel %vm565_vm5, %v766_v62, %v765_v60 }
 0x183   : > { %3742 = vmatpush3.bf16.msra.mxu1 %v3981_v59  ;;  %v762_v9 = vsel %vm5365_vm4, %v761_v6, 0.0  ;;  %3745 = vmatprep.mubr.msk.bf16.mxu1 %vm4349_vm0, %v4348_v1  ;;  %v770_v10 = vsel %vm5366_vm6, %v768_v8, 0.0  ;;  %v4696_v8 = vsub.s32 0, %v4589_v3 }
 0x184   : > { %v764_v11 = vpack.c.bf16 %v760_v4, %v762_v9  ;;  %3743 = vmatprep.subr.bf16.mxu1 %v4348_v1  ;;  %v771_v13 = vpack.c.bf16 %v770_v10, %v767_v7  ;;  %v4701_v9 = vld [vmem:[%s5355_s7] sm:$0xff] }
 0x186   : > { %3738 = vmatmul.mubr.msk.bf16.vlgmr.msra.gmra.mrb[8].mxu0 %vm793_vm9, %v764_v11  ;;  %v1065_v11 = vrot.slane %v4701_v9, %v4696_v8 }
 0x187   : > { %3744 = vmatpush3.bf16.msra.mxu1 %v920_v12  ;;  %3753 = vmatprep.mubr.msk.bf16.mxu0 %vm4349_vm0, %v4348_v1  ;;  %v4706_v12 = vsub.s32 1, %v4589_v3 }
 0x188   : > { %3757 = vmatprep.subr.bf16.mxu1 %v4348_v1 }
 0x18a   : > { %3746 = vmatmul.mubr.msk.bf16.vlgmr.msra.gmra.mrb[8].mxu1 %vm793_vm9, %v771_v13 }
 0x18b   : > { %3761 = vmatprep.mubr.msk.bf16.mxu1 %vm4349_vm0, %v4348_v1 }
 0x255   : > { %v835_v14 = vpop.f32.mrb[4].mxu1 }
 0x256   : > { %v3731_v15 = vpop.f32.mrb[5].mxu1 }
 0x257   : > { %v838_v16 = vpop.f32.mrb[6].mxu1  ;;  %v1071_v15 = vrot.slane %v4701_v9, %v4706_v12 }
 0x258   : > { %v3732_v17 = vpop.f32.mrb[7].mxu1 }
 0x259   : > { %v893_v18 = vpop.f32.mrb[8].mxu0  ;;  %v981_v17 = vld [vmem:[%s5356_s8 + $0x4] sm:$0x7] }
 0x25a   : > { %v894_v19 = vadd.f32 %v893_v18, %v835_v14  ;;  %v3739_v20 = vpop.f32.mrb[9].mxu0 }
 0x25b   : > { %v896_v21 = vpop.f32.mrb[10].mxu0  ;;  %v4717_v20 = vsub.s32 2, %v4589_v3 }
 0x25c   : > { %v897_v22 = vadd.f32 %v896_v21, %v838_v16  ;;  %v3740_v23 = vpop.f32.mrb[11].mxu0  ;;  %v982_v21 = vld [vmem:[%s5356_s8 + $0x8] sm:$0x7] }
 0x25d   : > { %v956_v24 = vpop.f32.mrb[8].mxu1 }
 0x25e   : > { %v963_v27 = vadd.f32 %v956_v24, %v894_v19  ;;  %v3747_v28 = vpop.f32.mrb[9].mxu1  ;;  %v980_v19 = vld [vmem:[%s5356_s8] sm:$0x7]  ;;  %v1234_v24 = vrot.slane %v981_v17, %v4706_v12 }
 0x25f   : > { %v959_v29 = vpop.f32.mrb[10].mxu1  ;;  %v1373_v28 = vrot.slane %v982_v21, %v4706_v12 }
 0x260   : > { %v972_v30 = vadd.f32 %v3501_v26, %v963_v27  ;;  %v964_v31 = vadd.f32 %v959_v29, %v897_v22  ;;  %v3748_v32 = vpop.f32.mrb[11].mxu1  ;;  %v1228_v29 = vrot.slane %v981_v17, %v4696_v8 }
 0x261   : > { %v1103_v32 = vrot.slane %v980_v19, %v4717_v20 }
 0x262   : > { %v974_v33 = vmul.f32 %v972_v30, %v4651_v43  ;;  %v973_v34 = vadd.f32 %v3501_v26, %v964_v31  ;;  %v1095_v26 = vrot.slane %v980_v19, %v4706_v12  ;;  %v1242_v30 = vrot.slane %v981_v17, %v4717_v20 }
 0x263   : > { %v1089_v31 = vrot.slane %v980_v19, %v4696_v8 }
 0x264   : > { %v975_v35 = vmul.f32 %v973_v34, %v4654_v54  ;;  %v4683_v36 = vmax.f32 %v974_v33, 0.0 }
 0x266   : > { %v1021_v37 = vsel %vm793_vm9, %v4683_v36, 0.0  ;;  %v4687_v38 = vmax.f32 %v975_v35, 0.0 }
 0x267   : > { %1022 = vadd.xlane.f32.xlu1 %v1021_v37 }
 0x268   : > { %v1024_v39 = vsel %vm793_vm9, %v4687_v38, 0.0 }
 0x26b   : > { %1025 = vadd.xlane.f32.xlu1 %v1024_v39 }
 0x2f4   : > { %v1023_v40 = vpop.xlane.xlu1 %1022 }
 0x2f5   : > { %v1028_v41 = vmul.f32 0.035714287, %v1023_v40 }
 0x2f7   : > { %v1030_v42 = vsub.f32 %v4683_v36, %v1028_v41  ;;  %v1367_v41 = vrot.slane %v982_v21, %v4696_v8 }
 0x2f8   : > { %v1026_v44 = vpop.xlane.xlu1 %1025 }
 0x2f9   : > { %v1029_v45 = vmul.f32 0.035714287, %v1026_v44  ;;  %v1032_v46 = vmul.f32 %v1030_v42, %v1030_v42 }
 0x2fb   : > { %v1031_v47 = vsub.f32 %v4687_v38, %v1029_v45  ;;  %v1034_v48 = vsel %vm793_vm9, %v1032_v46, 0.0 }
 0x2fc   : > { %1035 = vadd.xlane.f32.xlu0 %v1034_v48 }
 0x2fd   : > { %v1033_v49 = vmul.f32 %v1031_v47, %v1031_v47 }
 0x2ff   : > { %v1037_v50 = vsel %vm793_vm9, %v1033_v49, 0.0 }
 0x300   : > { %1038 = vadd.xlane.f32.xlu1 %v1037_v50 }
 0x389   : > { %v1036_v51 = vpop.xlane.xlu0 %1035 }
 0x38a   : > { %v1040_v52 = vmul.f32 0.035714287, %v1036_v51 }
 0x38c   : > { %v1042_v53 = vadd.f32 1e-05, %v1040_v52 }
 0x38d   : > { %v1039_v55 = vpop.xlane.xlu1 %1038 }
 0x38e   : > { %4017 = vrsqrt.f32 %v1042_v53  ;;  %v1041_v56 = vmul.f32 0.035714287, %v1039_v55  ;;  %vm1046_vm10 = vcmp.eq.f32.partialorder %v1042_v53, inf  ;;  %v1049_v60 = vand.u32 2147483648, %v1042_v53 }
 0x38f   : > { %vm1048_vm11 = vcmp.eq.f32.partialorder %v1042_v53, 0.0 }
 0x390   : > { %v1043_v57 = vadd.f32 1e-05, %v1041_v56 }
 0x392   : > { %4019 = vrsqrt.f32 %v1043_v57  ;;  %vm1053_vm12 = vcmp.eq.f32.partialorder %v1043_v57, inf  ;;  %v1056_v4 = vand.u32 2147483648, %v1043_v57  ;;  %vm1055_vm13 = vcmp.eq.f32.partialorder %v1043_v57, 0.0 }
 0x398   : > { %v4018_v58 = vpop.eup %4017 }
 0x399   : > { %v1045_v59 = vmul.f32 %v4018_v58, %v1042_v53 }
 0x39b   : > { %v1047_v61 = vsel %vm1046_vm10, %v1042_v53, %v1045_v59 }
 0x39c   : > { %v1050_v62 = vsel %vm1048_vm11, %v1049_v60, %v1047_v61  ;;  %v4020_v63 = vpop.eup %4019 }
 0x39d   : > { %4021 = vrcp.f32 %v1050_v62  ;;  %v1052_v2 = vmul.f32 %v4020_v63, %v1043_v57 }
 0x39f   : > { %v1054_v6 = vsel %vm1053_vm12, %v1043_v57, %v1052_v2 }
 0x3a0   : > { %v1057_v7 = vsel %vm1055_vm13, %v1056_v4, %v1054_v6 }
 0x3a1   : > { %4023 = vrcp.f32 %v1057_v7 }
 0x3a7   : > { %v4022_v10 = vpop.eup %4021 }
 0x3a8   : > { %v1059_v13 = vmul.f32 %v4022_v10, %v1030_v42  ;;  %v1381_v42 = vrot.slane %v982_v21, %v4717_v20 }
 0x3aa   : > { %v1066_v14 = vmul.f32 %v1065_v11, %v1059_v13 }
 0x3ab   : > { %v4024_v16 = vpop.eup %4023 }
 0x3ac   : > { %v1061_v18 = vmul.f32 %v4024_v16, %v1031_v47  ;;  %v1072_v23 = vadd.f32 %v1071_v15, %v1066_v14 }
 0x3ae   : > { %v1067_v22 = vmul.f32 %v1065_v11, %v1061_v18  ;;  %v1074_v33 = vrot.slane %v1072_v23, 7  ;;  %v1080_v35 = vrot.slane %v1072_v23, 1  ;;  %v1235_v39 = vmul.f32 %v1234_v24, %v1072_v23 }
 0x3af   : > { %v1096_v40 = vmul.f32 %v1095_v26, %v1072_v23  ;;  %v1374_v56 = vmul.f32 %v1373_v28, %v1072_v23 }
 0x3b0   : > { %v1073_v27 = vadd.f32 %v1071_v15, %v1067_v22 }
 0x3b2   : > { %v1075_v34 = vrot.slane %v1073_v27, 7  ;;  %v1081_v37 = vrot.slane %v1073_v27, 1  ;;  %v1236_v50 = vmul.f32 %v1234_v24, %v1073_v27  ;;  %v1375_v60 = vmul.f32 %v1373_v28, %v1073_v27 }
 0x3b3   : > { %v1097_v16 = vmul.f32 %v1095_v26, %v1073_v27 }
 0x3b4   : > { %v1076_v44 = vsel %vm554_vm3, %v1074_v33, %v1075_v34  ;;  %v1083_v45 = vsel %vm565_vm5, %v1081_v37, %v1080_v35  ;;  %v1077_v46 = vsel %vm554_vm3, %v1075_v34, %v1074_v33  ;;  %v1082_v47 = vsel %vm565_vm5, %v1080_v35, %v1081_v37 }
 0x3b5   : > { %v1085_v48 = vsel %vm5366_vm6, %v1083_v45, 0.0  ;;  %v1230_v49 = vmul.f32 %v1228_v29, %v1076_v44  ;;  %v1078_v51 = vsel %vm5365_vm4, %v1077_v46, 0.0  ;;  %v1243_v58 = vmul.f32 %v1242_v30, %v1082_v47 }
 0x3b6   : > { %v1244_v52 = vmul.f32 %v1242_v30, %v1085_v48  ;;  %v1229_v53 = vmul.f32 %v1228_v29, %v1078_v51  ;;  %v1090_v55 = vmul.f32 %v1089_v31, %v1078_v51  ;;  %v1368_v59 = vmul.f32 %v1367_v41, %v1078_v51 }
 0x3b7   : > { %v1238_v57 = vadd.f32 %v1236_v50, %v1230_v49  ;;  %v1091_v63 = vmul.f32 %v1089_v31, %v1076_v44  ;;  %v1369_v2 = vmul.f32 %v1367_v41, %v1076_v44  ;;  %v1382_v7 = vmul.f32 %v1381_v42, %v1082_v47 }
 0x3b8   : > { %v1237_v61 = vadd.f32 %v1235_v39, %v1229_v53  ;;  %v1098_v62 = vadd.f32 %v1096_v40, %v1090_v55  ;;  %v1376_v6 = vadd.f32 %v1374_v56, %v1368_v59  ;;  %v1383_v10 = vmul.f32 %v1381_v42, %v1085_v48 }
 0x3b9   : > { %v1246_v4 = vadd.f32 %v1244_v52, %v1238_v57  ;;  %v1377_v13 = vadd.f32 %v1375_v60, %v1369_v2  ;;  %v1104_v15 = vmul.f32 %v1103_v32, %v1082_v47  ;;  %v1105_v18 = vmul.f32 %v1103_v32, %v1085_v48  ;;  %v3983_v60 = vld [vmem:[%s5357_s9 + $0x10] sm:$0xff]   ;;  %v3986_v2 = vld [vmem:[%s5357_s9 + $0x8] sm:$0x3f]  }
 0x3ba   : > { %v1245_v11 = vadd.f32 %v1243_v58, %v1237_v61  ;;  %v1384_v17 = vadd.f32 %v1382_v7, %v1376_v6  ;;  %v1099_v24 = vadd.f32 %v1097_v16, %v1091_v63  ;;  %v3984_v61 = vld [vmem:[%s5357_s9 + $0x18] sm:$0x3f]   ;;  %3758 = vmatpush3.bf16.msra.mxu1 %v3983_v60  ;;  %v3985_v63 = vld [vmem:[%s5357_s9] sm:$0xff]  }
 0x3bb   : > { %v1248_v14 = vmul.f32 %v1246_v4, %v4654_v54  ;;  %v1385_v19 = vadd.f32 %v1383_v10, %v1377_v13  ;;  %v1106_v23 = vadd.f32 %v1104_v15, %v1098_v62  ;;  %3759 = vmatprep.subr.bf16.mxu1 %v4348_v1  ;;  %v1321_v62 = vsel %vm797_vm8, %v3984_v61, 0  ;;  %3750 = vmatpush3.bf16.msra.mxu0 %v3985_v63 }
 0x3bc   : > { %v1247_v22 = vmul.f32 %v1245_v11, %v4651_v43  ;;  %v1107_v30 = vadd.f32 %v1105_v18, %v1099_v24  ;;  %v1386_v53 = vmul.f32 %v1384_v17, %v4651_v43  ;;  %3751 = vmatprep.subr.bf16.mxu0 %v4348_v1  ;;  %v1182_v4 = vsel %vm797_vm8, %v3986_v2, 0 }
 0x3bd   : > { %v1252_v21 = vsel %vm793_vm9, %v1248_v14, 0.0  ;;  %v1108_v29 = vmul.f32 %v1106_v23, %v4651_v43  ;;  %v1387_v58 = vmul.f32 %v1385_v19, %v4654_v54 }
 0x3be   : > { %1253 = vadd.xlane.f32.xlu1 %v1252_v21  ;;  %v1249_v28 = vsel %vm793_vm9, %v1247_v22, 0.0  ;;  %v1109_v26 = vmul.f32 %v1107_v30, %v4654_v54  ;;  %v1388_v56 = vsel %vm793_vm9, %v1386_v53, 0.0  ;;  %3760 = vmatpush3.bf16.msra.mxu1 %v1321_v62 }
 0x3bf   : > { %v1110_v31 = vsel %vm793_vm9, %v1108_v29, 0.0  ;;  %v1391_v59 = vsel %vm793_vm9, %v1387_v58, 0.0  ;;  %3752 = vmatpush3.bf16.msra.mxu0 %v1182_v4  ;;  %v4809_v4 = vsub.s32 5, %v4589_v3 }
 0x3c0   : > { %v1113_v27 = vsel %vm793_vm9, %v1109_v26, 0.0  ;;  %3765 = vmatprep.subr.bf16.mxu0 %v4348_v1 }
 0x3c2   : > { %1250 = vadd.xlane.f32.xlu1 %v1249_v28 }
 0x3c6   : > { %1111 = vadd.xlane.f32.xlu1 %v1110_v31 }
 0x3ca   : > { %1114 = vadd.xlane.f32.xlu1 %v1113_v27 }
 0x44b   : > { %v1254_v32 = vpop.xlane.xlu1 %1253 }
 0x44c   : > { %v1256_v33 = vmul.f32 0.035714287, %v1254_v32 }
 0x44e   : > { %v4751_v34 = vsub.f32 %v1248_v14, %v1256_v33 }
 0x44f   : > { %v1251_v35 = vpop.xlane.xlu1 %1250 }
 0x450   : > { %v1255_v37 = vmul.f32 0.035714287, %v1251_v35  ;;  %v1260_v39 = vmul.f32 %v4751_v34, %v4751_v34 }
 0x452   : > { %v4755_v40 = vsub.f32 %v1247_v22, %v1255_v37  ;;  %v1264_v41 = vsel %vm793_vm9, %v1260_v39, 0.0 }
 0x453   : > { %v1112_v42 = vpop.xlane.xlu1 %1111  ;;  %1265 = vadd.xlane.f32.xlu1 %v1264_v41 }
 0x454   : > { %v1116_v44 = vmul.f32 0.035714287, %v1112_v42  ;;  %v1259_v45 = vmul.f32 %v4755_v40, %v4755_v40 }
 0x456   : > { %v4760_v46 = vsub.f32 %v1108_v29, %v1116_v44  ;;  %v1261_v47 = vsel %vm793_vm9, %v1259_v45, 0.0 }
 0x457   : > { %1262 = vadd.xlane.f32.xlu1 %v1261_v47  ;;  %v1115_v48 = vpop.xlane.xlu1 %1114 }
 0x458   : > { %v1117_v49 = vmul.f32 0.035714287, %v1115_v48  ;;  %v1120_v50 = vmul.f32 %v4760_v46, %v4760_v46 }
 0x45a   : > { %v4765_v51 = vsub.f32 %v1109_v26, %v1117_v49  ;;  %v1122_v52 = vsel %vm793_vm9, %v1120_v50, 0.0 }
 0x45b   : > { %1123 = vadd.xlane.f32.xlu1 %v1122_v52 }
 0x45c   : > { %v1121_v55 = vmul.f32 %v4765_v51, %v4765_v51 }
 0x45e   : > { %v1125_v57 = vsel %vm793_vm9, %v1121_v55, 0.0 }
 0x45f   : > { %1389 = vadd.xlane.f32.xlu1 %v1388_v56  ;;  %1126 = vadd.xlane.f32.xlu0 %v1125_v57  ;;  %v4803_v57 = vsub.s32 4, %v4589_v3 }
 0x461   : > { %v1292_v2 = vrot.slane %v4701_v9, %v4803_v57 }
 0x463   : > { %1392 = vadd.xlane.f32.xlu0 %v1391_v59 }
 0x4e0   : > { %v1266_v6 = vpop.xlane.xlu1 %1265 }
 0x4e1   : > { %v1268_v7 = vmul.f32 0.035714287, %v1266_v6 }
 0x4e3   : > { %v1270_v10 = vadd.f32 1e-05, %v1268_v7 }
 0x4e4   : > { %v1263_v11 = vpop.xlane.xlu1 %1262 }
 0x4e5   : > { %4025 = vrsqrt.f32 %v1270_v10  ;;  %v1267_v13 = vmul.f32 0.035714287, %v1263_v11  ;;  %vm1280_vm14 = vcmp.eq.f32.partialorder %v1270_v10, inf  ;;  %v1283_v31 = vand.u32 2147483648, %v1270_v10 }
 0x4e6   : > { %vm1282_vm15 = vcmp.eq.f32.partialorder %v1270_v10, 0.0  ;;  %v1298_v11 = vrot.slane %v4701_v9, %v4809_v4 }
 0x4e7   : > { %v1269_v14 = vadd.f32 1e-05, %v1267_v13 }
 0x4e8   : > { %v1124_v15 = vpop.xlane.xlu1 %1123 }
 0x4e9   : > { %v1128_v16 = vmul.f32 0.035714287, %v1124_v15  ;;  %4027 = vrsqrt.f32 %v1269_v14  ;;  %vm1273_vm1 = vcmp.eq.f32.partialorder %v1269_v14, inf  ;;  %v1276_v44 = vand.u32 2147483648, %v1269_v14 }
 0x4ea   : > { %vm1275_vm7 = vcmp.eq.f32.partialorder %v1269_v14, 0.0  ;;  %v1153_v15 = vrot.slane %v4701_v9, %v4717_v20 }
 0x4eb   : > { %v1130_v17 = vadd.f32 1e-05, %v1128_v16 }
 0x4ec   : > { %v1127_v18 = vpop.xlane.xlu0 %1126  ;;  %v1390_v19 = vpop.xlane.xlu1 %1389 }
 0x4ed   : > { %4029 = vrsqrt.f32 %v1130_v17  ;;  %v1129_v21 = vmul.f32 0.035714287, %v1127_v18  ;;  %v1394_v22 = vmul.f32 0.035714287, %v1390_v19  ;;  %vm1134_vm10 = vcmp.eq.f32.partialorder %v1130_v17, inf }
 0x4ee   : > { %v1137_v52 = vand.u32 2147483648, %v1130_v17  ;;  %vm1136_vm11 = vcmp.eq.f32.partialorder %v1130_v17, 0.0  ;;  %v4818_v18 = vsub.s32 3, %v4589_v3 }
 0x4ef   : > { %v4026_v23 = vpop.eup %4025  ;;  %v1131_v28 = vadd.f32 1e-05, %v1129_v21  ;;  %v4792_v29 = vsub.f32 %v1386_v53, %v1394_v22 }
 0x4f0   : > { %v1279_v24 = vmul.f32 %v4026_v23, %v1270_v10  ;;  %v1393_v30 = vpop.xlane.xlu0 %1392  ;;  %v1159_v23 = vrot.slane %v4701_v9, %v4818_v18 }
 0x4f1   : > { %v1395_v26 = vmul.f32 0.035714287, %v1393_v30  ;;  %4031 = vrsqrt.f32 %v1131_v28  ;;  %v1398_v35 = vmul.f32 %v4792_v29, %v4792_v29  ;;  %vm1141_vm12 = vcmp.eq.f32.partialorder %v1131_v28, inf }
 0x4f2   : > { %v1281_v27 = vsel %vm1280_vm14, %v1270_v10, %v1279_v24  ;;  %v1144_v60 = vand.u32 2147483648, %v1131_v28  ;;  %vm1143_vm13 = vcmp.eq.f32.partialorder %v1131_v28, 0.0 }
 0x4f3   : > { %v1284_v32 = vsel %vm1282_vm15, %v1283_v31, %v1281_v27  ;;  %v4794_v33 = vsub.f32 %v1387_v58, %v1395_v26  ;;  %v4028_v37 = vpop.eup %4027  ;;  %v1400_v41 = vsel %vm793_vm9, %v1398_v35, 0.0 }
 0x4f4   : > { %4033 = vrcp.f32 %v1284_v32  ;;  %v1272_v39 = vmul.f32 %v4028_v37, %v1269_v14  ;;  %1401 = vadd.xlane.f32.xlu1 %v1400_v41 }
 0x4f5   : > { %v1399_v42 = vmul.f32 %v4794_v33, %v4794_v33 }
 0x4f6   : > { %v1274_v47 = vsel %vm1273_vm1, %v1269_v14, %v1272_v39 }
 0x4f7   : > { %v4030_v45 = vpop.eup %4029  ;;  %v1403_v48 = vsel %vm793_vm9, %v1399_v42, 0.0  ;;  %v1277_v49 = vsel %vm1275_vm7, %v1276_v44, %v1274_v47 }
 0x4f8   : > { %v1133_v50 = vmul.f32 %v4030_v45, %v1130_v17  ;;  %1404 = vadd.xlane.f32.xlu0 %v1403_v48  ;;  %4035 = vrcp.f32 %v1277_v49 }
 0x4fa   : > { %v1135_v53 = vsel %vm1134_vm10, %v1130_v17, %v1133_v50 }
 0x4fb   : > { %v1138_v55 = vsel %vm1136_vm11, %v1137_v52, %v1135_v53  ;;  %v4032_v56 = vpop.eup %4031 }
 0x4fc   : > { %4037 = vrcp.f32 %v1138_v55  ;;  %v1140_v58 = vmul.f32 %v4032_v56, %v1131_v28  ;;  %v4836_v56 = vsub.s32 6, %v4589_v3 }
 0x4fe   : > { %v4034_v59 = vpop.eup %4033  ;;  %v1142_v61 = vsel %vm1141_vm12, %v1131_v28, %v1140_v58 }
 0x4ff   : > { %v1145_v62 = vsel %vm1143_vm13, %v1144_v60, %v1142_v61  ;;  %v1288_v63 = vmul.f32 %v4034_v59, %v4751_v34  ;;  %v1431_v59 = vrot.slane %v4701_v9, %v4836_v56  ;;  %v1436_v60 = vsub.s32 7, %v4589_v3 }
 0x500   : > { %4039 = vrcp.f32 %v1145_v62 }
 0x501   : > { %v1294_v10 = vmul.f32 %v1292_v2, %v1288_v63 }
 0x502   : > { %v4036_v6 = vpop.eup %4035 }
 0x503   : > { %v1286_v7 = vmul.f32 %v4036_v6, %v4755_v40  ;;  %v1300_v16 = vadd.f32 %v1298_v11, %v1294_v10  ;;  %v1437_v6 = vrot.slane %v4701_v9, %v1436_v60 }
 0x505   : > { %v1293_v14 = vmul.f32 %v1292_v2, %v1286_v7 }
 0x506   : > { %v4038_v13 = vpop.eup %4037 }
 0x507   : > { %v1299_v34 = vadd.f32 %v1298_v11, %v1293_v14  ;;  %v1147_v17 = vmul.f32 %v4038_v13, %v4760_v46  ;;  %v3987_v46 = vld [vmem:[%s5357_s9 + $0x20] sm:$0xff]   ;;  %v4850_v14 = vld [vmem:[%s5355_s7 + $0x8] sm:$0x7f] }
 0x509   : > { %v1301_v19 = vpack.c.bf16 %v1300_v16, %v1299_v34  ;;  %v1154_v22 = vmul.f32 %v1153_v15, %v1147_v17 }
 0x50a   : > { %v4040_v21 = vpop.eup %4039 }
 0x50b   : > { %3762 = vmatmul.mubr.msk.bf16.vlgmr.msra.gmra.mrb[12].mxu1 %vm793_vm9, %v1301_v19  ;;  %v1149_v40 = vmul.f32 %v4040_v21, %v4765_v51  ;;  %v1160_v28 = vadd.f32 %v1159_v23, %v1154_v22  ;;  %v3988_v51 = vld [vmem:[%s5357_s9 + $0x28] sm:$0x3f]  }
 0x50c   : > { %v1460_v26 = vsel %vm797_vm8, %v3988_v51, 0 }
 0x50d   : > { %v1155_v24 = vmul.f32 %v1153_v15, %v1149_v40  ;;  %v1504_v15 = vand.u32 127, %v552_v0  ;;  %v1166_v40 = vrot.slane %v4850_v14, %v4696_v8 }
 0x50f   : > { %v1161_v30 = vadd.f32 %v1159_v23, %v1155_v24  ;;  %vm1512_vm10 = vcmp.ge.s32.totalorder %v1504_v15, 7  ;;  %vm1513_vm11 = vcmp.lt.s32.totalorder %v1504_v15, 14  ;;  %vm1517_vm12 = vcmp.ge.s32.totalorder %v1504_v15, 14 }
 0x510   : > { %vm1518_vm13 = vcmp.lt.s32.totalorder %v1504_v15, 21  ;;  %vm1508_vm4 = vcmp.lt.s32.totalorder %v1504_v15, 7 }
 0x511   : > { %v1162_v31 = vpack.c.bf16 %v1161_v30, %v1160_v28  ;;  %v4861_v51 = vsel %vm1508_vm4, 1.0, %v4348_v1 }
 0x513   : > { %3754 = vmatmul.mubr.msk.bf16.vlgmr.msra.gmra.mrb[12].mxu0 %vm793_vm9, %v1162_v31 }
 0x514   : > { %3769 = vmatprep.mubr.msk.bf16.mxu0 %vm4349_vm0, %v4348_v1  ;;  %3766 = vmatpush3.bf16.msra.mxu0 %v3987_v46 }
 0x515   : > { %3767 = vmatprep.subr.bf16.mxu0 %v4348_v1 }
 0x518   : > { %3768 = vmatpush3.bf16.msra.mxu0 %v1460_v26 }
 0x581   : > { %v1402_v27 = vpop.xlane.xlu1 %1401 }
 0x582   : > { %v1406_v32 = vmul.f32 0.035714287, %v1402_v27 }
 0x584   : > { %v1408_v37 = vadd.f32 1e-05, %v1406_v32 }
 0x585   : > { %v1405_v35 = vpop.xlane.xlu0 %1404 }
 0x586   : > { %v1407_v39 = vmul.f32 0.035714287, %v1405_v35  ;;  %4041 = vrsqrt.f32 %v1408_v37  ;;  %vm1412_vm14 = vcmp.eq.f32.partialorder %v1408_v37, inf  ;;  %v1415_v45 = vand.u32 2147483648, %v1408_v37 }
 0x587   : > { %vm1414_vm15 = vcmp.eq.f32.partialorder %v1408_v37, 0.0 }
 0x588   : > { %v1409_v41 = vadd.f32 1e-05, %v1407_v39 }
 0x58a   : > { %4043 = vrsqrt.f32 %v1409_v41  ;;  %vm1419_vm1 = vcmp.eq.f32.partialorder %v1409_v41, inf  ;;  %v1422_v52 = vand.u32 2147483648, %v1409_v41  ;;  %vm1421_vm7 = vcmp.eq.f32.partialorder %v1409_v41, 0.0 }
 0x590   : > { %v4042_v42 = vpop.eup %4041 }
 0x591   : > { %v1411_v44 = vmul.f32 %v4042_v42, %v1408_v37 }
 0x593   : > { %v1413_v48 = vsel %vm1412_vm14, %v1408_v37, %v1411_v44  ;;  %vm1522_vm14 = vcmp.ge.s32.totalorder %v1504_v15, 21 }
 0x594   : > { %v4044_v47 = vpop.eup %4043  ;;  %v1416_v49 = vsel %vm1414_vm15, %v1415_v45, %v1413_v48  ;;  %vm1523_vm15 = vcmp.lt.s32.totalorder %v1504_v15, 28 }
 0x595   : > { %v1418_v50 = vmul.f32 %v4044_v47, %v1409_v41  ;;  %4045 = vrcp.f32 %v1416_v49  ;;  %vm1524_vm6 = vmand %vm1522_vm14, %vm1523_vm15  ;;  %vm2122_vm15 = vcmask 916480  }
 0x596   : > { %v4870_v32 = vsel %vm1524_vm6, 1.0, %v4348_v1 }
 0x597   : > { %v1420_v53 = vsel %vm1419_vm1, %v1409_v41, %v1418_v50  ;;  %vm1514_vm1 = vmand %vm1512_vm10, %vm1513_vm11 }
 0x598   : > { %v1423_v55 = vsel %vm1421_vm7, %v1422_v52, %v1420_v53  ;;  %vm1519_vm7 = vmand %vm1517_vm12, %vm1518_vm13  ;;  %v4864_v26 = vsel %vm1514_vm1, 1.0, %v4348_v1 }
 0x599   : > { %4047 = vrcp.f32 %v1423_v55  ;;  %v4867_v27 = vsel %vm1519_vm7, 1.0, %v4348_v1  ;;  %v1444_v55 = vrot.slane %v4850_v14, %v4717_v20 }
 0x59f   : > { %v4046_v58 = vpop.eup %4045 }
 0x5a0   : > { %v1425_v61 = vmul.f32 %v4046_v58, %v4792_v29  ;;  %v1305_v29 = vrot.slane %v4850_v14, %v4706_v12 }
 0x5a2   : > { %v1432_v2 = vmul.f32 %v1431_v59, %v1425_v61 }
 0x5a3   : > { %v4048_v62 = vpop.eup %4047 }
 0x5a4   : > { %v1427_v63 = vmul.f32 %v4048_v62, %v4794_v33  ;;  %v1438_v10 = vadd.f32 %v1437_v6, %v1432_v2 }
 0x5a6   : > { %v1433_v7 = vmul.f32 %v1431_v59, %v1427_v63 }
 0x5a8   : > { %v1439_v11 = vadd.f32 %v1437_v6, %v1433_v7  ;;  %v1625_v7 = vrot.slane %v4636_v25, %v4696_v8 }
 0x5aa   : > { %v1440_v13 = vpack.c.bf16 %v1439_v11, %v1438_v10  ;;  %vm4891_vm4 = vcmp.eq.s32.totalorder %v1625_v7, 1 }
 0x5ac   : > { %3770 = vmatmul.mubr.msk.bf16.vlgmr.msra.gmra.mrb[16].mxu0 %vm793_vm9, %v1440_v13 }
 0x5de   : > { %v1357_v33 = vpop.f32.mrb[12].mxu1 }
 0x5df   : > { %v3763_v34 = vpop.f32.mrb[13].mxu1  ;;  %v1358_v9 = vadd.f32 %v1357_v33, %v1305_v29 }
 0x5e0   : > { %v1360_v16 = vpop.f32.mrb[14].mxu1 }
 0x5e1   : > { %v1361_v17 = vadd.f32 %v1360_v16, %v1305_v29  ;;  %v3764_v19 = vpop.f32.mrb[15].mxu1 }
 0x5e3   : > { %v1539_v21 = vpack.c.bf16 %v1361_v17, %v1358_v9 }
 0x5e5   : > { %3905 = vmatprep.subr.msk.bf16.mxu1 %vm793_vm9, %v1539_v21  ;;  %v1553_v0 = vsel %vm793_vm9, %v1539_v21, 0 }
 0x5e6   : > { %v1218_v22 = vpop.f32.mrb[12].mxu0  ;;  %3774 = vmatpush3.bf16.xpose.msra.mxu1 %v1553_v0 }
 0x5e7   : > { %v1219_v23 = vadd.f32 %v1218_v22, %v1166_v40  ;;  %v3755_v24 = vpop.f32.mrb[13].mxu0  ;;  %3809 = vmatprep.subr.bf16.mxu1 %v4348_v1 }
 0x5e8   : > { %v1221_v28 = vpop.f32.mrb[14].mxu0 }
 0x5e9   : > { %v1505_v30 = vmul.f32 0.37796447, %v1219_v23  ;;  %v1222_v31 = vadd.f32 %v1221_v28, %v1166_v40  ;;  %v3756_v46 = vpop.f32.mrb[15].mxu0 }
 0x5eb   : > { %v1506_v35 = vmul.f32 0.37796447, %v1222_v31  ;;  %v1527_v37 = vmul.f32 %v4861_v51, %v1505_v30  ;;  %v1529_v39 = vmul.f32 %v4864_v26, %v1505_v30  ;;  %v1531_v41 = vmul.f32 %v4867_v27, %v1505_v30 }
 0x5ec   : > { %v1533_v42 = vmul.f32 %v4870_v32, %v1505_v30 }
 0x5ed   : > { %v1528_v44 = vmul.f32 %v4861_v51, %v1506_v35  ;;  %v1530_v45 = vmul.f32 %v4864_v26, %v1506_v35  ;;  %v1532_v47 = vmul.f32 %v4867_v27, %v1506_v35  ;;  %v1534_v48 = vmul.f32 %v4870_v32, %v1506_v35 }
 0x5ef   : > { %v1536_v49 = vpack.c.bf16 %v1530_v45, %v1529_v39  ;;  %v1535_v50 = vpack.c.bf16 %v1528_v44, %v1527_v37  ;;  %v1537_v52 = vpack.c.bf16 %v1532_v47, %v1531_v41  ;;  %v1538_v53 = vpack.c.bf16 %v1534_v48, %v1533_v42 }
 0x5f1   : > { %3775 = vmatprep.mubr.msk.bf16.mxu1 %vm793_vm9, %v1535_v50 }
 0x5f2   : > { %3776 = vmatmul.mubr.msk.bf16.vlgmr.msra.gmra.mrb[16].mxu1 %vm793_vm9, %v1536_v49 }
 0x5f3   : > { %3779 = vmatprep.mubr.msk.bf16.mxu1 %vm793_vm9, %v1537_v52 }
 0x5fa   : > { %3780 = vmatmul.mubr.msk.bf16.gmra.mrb[20].mxu1 %vm793_vm9, %v1538_v53 }
 0x5fb   : > { %3823 = vmatprep.mubr.msk.bf16.mxu1 %vm4349_vm0, %v4348_v1 }
 0x67f   : > { %v1496_v58 = vpop.f32.mrb[16].mxu0 }
 0x680   : > { %v3771_v59 = vpop.f32.mrb[17].mxu0  ;;  %v1497_v62 = vadd.f32 %v1496_v58, %v1444_v55 }
 0x681   : > { %v1499_v61 = vpop.f32.mrb[18].mxu0 }
 0x682   : > { %v1500_v63 = vadd.f32 %v1499_v61, %v1444_v55  ;;  %v3772_v2 = vpop.f32.mrb[19].mxu0 }
 0x684   : > { %v1741_v6 = vpack.c.bf16 %v1500_v63, %v1497_v62 }
 0x686   : > { %3783 = vmatprep.subr.bf16.mxu0 %v1741_v6 }
 0x687   : > { %3784 = vmatpush3.bf16.msra.mxu0 %v1741_v6 }
 0x688   : > { %3793 = vmatprep.subr.bf16.mxu0 %v4348_v1 }
 0x6c5   : > { %v3777_v11 = vpop.f32.mrb[16].mxu1 }
 0x6c6   : > { %v1589_v13 = vpop.f32.mrb[17].mxu1  ;;  %v1629_v16 = vsel %vm4891_vm4, %v3777_v11, -1e+30 }
 0x6c7   : > { %v1627_v29 = vsel %vm4891_vm4, %v1589_v13, -1e+30  ;;  %v3778_v33 = vpop.f32.mrb[18].mxu1  ;;  %v1641_v19 = vsel %vm585_vm2, %v1629_v16, -inf }
 0x6c8   : > { %v1592_v15 = vpop.f32.mrb[19].mxu1  ;;  %v1635_v34 = vsel %vm585_vm2, %v1627_v29, -inf  ;;  %v1630_v17 = vsel %vm4891_vm4, %v3778_v33, -1e+30 }
 0x6c9   : > { %v1628_v9 = vsel %vm4891_vm4, %v1592_v15, -1e+30  ;;  %1636 = vmax.xlane.f32.xlu1 %v1635_v34  ;;  %v1644_v0 = vsel %vm585_vm2, %v1630_v17, -inf }
 0x6ca   : > { %v1638_v25 = vsel %vm585_vm2, %v1628_v9, -inf }
 0x6cb   : > { %1639 = vmax.xlane.f32.xlu0 %v1638_v25 }
 0x6cd   : > { %1642 = vmax.xlane.f32.xlu1 %v1641_v19  ;;  %v3781_v21 = vpop.f32.mrb[20].mxu1 }
 0x6ce   : > { %v1605_v40 = vpop.f32.mrb[21].mxu1  ;;  %v1633_v30 = vsel %vm4891_vm4, %v3781_v21, -1e+30 }
 0x6cf   : > { %v1631_v22 = vsel %vm4891_vm4, %v1605_v40, -1e+30  ;;  %1645 = vmax.xlane.f32.xlu0 %v1644_v0  ;;  %v3782_v23 = vpop.f32.mrb[22].mxu1  ;;  %v1653_v37 = vsel %vm585_vm2, %v1633_v30, -inf }
 0x6d0   : > { %v1608_v24 = vpop.f32.mrb[23].mxu1  ;;  %v1647_v28 = vsel %vm585_vm2, %v1631_v22, -inf  ;;  %v1634_v35 = vsel %vm4891_vm4, %v3782_v23, -1e+30 }
 0x6d1   : > { %v1632_v31 = vsel %vm4891_vm4, %v1608_v24, -1e+30  ;;  %1648 = vmax.xlane.f32.xlu1 %v1647_v28  ;;  %v1656_v39 = vsel %vm585_vm2, %v1634_v35, -inf }
 0x6d2   : > { %v1650_v46 = vsel %vm585_vm2, %v1632_v31, -inf }
 0x6d3   : > { %1651 = vmax.xlane.f32.xlu0 %v1650_v46 }
 0x6d5   : > { %1654 = vmax.xlane.f32.xlu1 %v1653_v37 }
 0x6d7   : > { %1657 = vmax.xlane.f32.xlu0 %v1656_v39 }
 0x756   : > { %v1637_v41 = vpop.xlane.xlu1 %1636 }
 0x757   : > { %v1659_v42 = vsub.f32 %v1627_v29, %v1637_v41 }
 0x758   : > { %v1640_v44 = vpop.xlane.xlu0 %1639 }
 0x759   : > { %v1667_v45 = vmul.f32 1.442695, %v1659_v42  ;;  %v1660_v47 = vsub.f32 %v1628_v9, %v1640_v44 }
 0x75a   : > { %v1643_v48 = vpop.xlane.xlu1 %1642 }
 0x75b   : > { %4049 = vpow2.f32 %v1667_v45  ;;  %v1669_v49 = vmul.f32 1.442695, %v1660_v47  ;;  %v1661_v50 = vsub.f32 %v1629_v16, %v1643_v48  ;;  %v4928_v47 = vld [vmem:[%s4610_s27] ss:$0 sm:$0xff] }
 0x75c   : > { %v1646_v52 = vpop.xlane.xlu0 %1645 }
 0x75d   : > { %4051 = vpow2.f32 %v1669_v49  ;;  %v1671_v53 = vmul.f32 1.442695, %v1661_v50  ;;  %v1662_v55 = vsub.f32 %v1630_v17, %v1646_v52 }
 0x75e   : > { %v1649_v58 = vpop.xlane.xlu1 %1648 }
 0x75f   : > { %4053 = vpow2.f32 %v1671_v53  ;;  %v1673_v59 = vmul.f32 1.442695, %v1662_v55  ;;  %v1663_v61 = vsub.f32 %v1631_v22, %v1649_v58 }
 0x760   : > { %v1652_v62 = vpop.xlane.xlu0 %1651 }
 0x761   : > { %4055 = vpow2.f32 %v1673_v59  ;;  %v1675_v63 = vmul.f32 1.442695, %v1663_v61  ;;  %v1664_v2 = vsub.f32 %v1632_v31, %v1652_v62 }
 0x762   : > { %v1655_v6 = vpop.xlane.xlu1 %1654 }
 0x763   : > { %4057 = vpow2.f32 %v1675_v63  ;;  %v1677_v7 = vmul.f32 1.442695, %v1664_v2  ;;  %v1665_v11 = vsub.f32 %v1633_v30, %v1655_v6 }
 0x764   : > { %v1658_v13 = vpop.xlane.xlu0 %1657 }
 0x765   : > { %v4050_v29 = vpop.eup %4049  ;;  %4059 = vpow2.f32 %v1677_v7  ;;  %v1679_v33 = vmul.f32 1.442695, %v1665_v11  ;;  %v1666_v15 = vsub.f32 %v1634_v35, %v1658_v13 }
 0x766   : > { %v1683_v34 = vsel %vm585_vm2, %v4050_v29, 0.0 }
 0x767   : > { %v4052_v16 = vpop.eup %4051  ;;  %4061 = vpow2.f32 %v1679_v33  ;;  %v1681_v9 = vmul.f32 1.442695, %v1666_v15  ;;  %1684 = vadd.xlane.f32.xlu1 %v1683_v34 }
 0x768   : > { %v1686_v25 = vsel %vm585_vm2, %v4052_v16, 0.0 }
 0x769   : > { %v4054_v17 = vpop.eup %4053  ;;  %4063 = vpow2.f32 %v1681_v9  ;;  %1687 = vadd.xlane.f32.xlu0 %v1686_v25 }
 0x76a   : > { %v1689_v19 = vsel %vm585_vm2, %v4054_v17, 0.0 }
 0x76b   : > { %v4056_v21 = vpop.eup %4055  ;;  %1690 = vadd.xlane.f32.xlu1 %v1689_v19 }
 0x76c   : > { %v1692_v40 = vsel %vm585_vm2, %v4056_v21, 0.0 }
 0x76d   : > { %v4058_v0 = vpop.eup %4057  ;;  %1693 = vadd.xlane.f32.xlu0 %v1692_v40 }
 0x76e   : > { %v1695_v22 = vsel %vm585_vm2, %v4058_v0, 0.0 }
 0x76f   : > { %v4060_v23 = vpop.eup %4059  ;;  %1696 = vadd.xlane.f32.xlu1 %v1695_v22 }
 0x770   : > { %v1698_v24 = vsel %vm585_vm2, %v4060_v23, 0.0 }
 0x771   : > { %v4062_v28 = vpop.eup %4061  ;;  %1699 = vadd.xlane.f32.xlu0 %v1698_v24  ;;  %v3990_v24 = vld [vmem:[%s5357_s9 + $0x38] sm:$0x3f]  }
 0x772   : > { %v1701_v30 = vsel %vm585_vm2, %v4062_v28, 0.0 }
 0x773   : > { %v4064_v31 = vpop.eup %4063  ;;  %1702 = vadd.xlane.f32.xlu1 %v1701_v30 }
 0x774   : > { %v1704_v46 = vsel %vm585_vm2, %v4064_v31, 0.0 }
 0x775   : > { %1705 = vadd.xlane.f32.xlu0 %v1704_v46 }
 0x7f4   : > { %v1685_v35 = vpop.xlane.xlu1 %1684 }
 0x7f5   : > { %4065 = vrcp.f32 %v1685_v35 }
 0x7f6   : > { %v1688_v37 = vpop.xlane.xlu0 %1687 }
 0x7f7   : > { %4067 = vrcp.f32 %v1688_v37 }
 0x7f8   : > { %v1691_v39 = vpop.xlane.xlu1 %1690 }
 0x7f9   : > { %4069 = vrcp.f32 %v1691_v39 }
 0x7fa   : > { %v1694_v41 = vpop.xlane.xlu0 %1693 }
 0x7fb   : > { %4071 = vrcp.f32 %v1694_v41 }
 0x7fc   : > { %v1697_v42 = vpop.xlane.xlu1 %1696 }
 0x7fd   : > { %4073 = vrcp.f32 %v1697_v42 }
 0x7fe   : > { %v1700_v44 = vpop.xlane.xlu0 %1699 }
 0x7ff   : > { %v4066_v45 = vpop.eup %4065  ;;  %4075 = vrcp.f32 %v1700_v44 }
 0x800   : > { %v1703_v48 = vpop.xlane.xlu1 %1702  ;;  %v1715_v49 = vmul.f32 %v4066_v45, %v4050_v29 }
 0x801   : > { %v4068_v50 = vpop.eup %4067  ;;  %4077 = vrcp.f32 %v1703_v48 }
 0x802   : > { %v1706_v52 = vpop.xlane.xlu0 %1705  ;;  %v1716_v53 = vmul.f32 %v4068_v50, %v4052_v16  ;;  %v1729_v59 = vmul.f32 %v4928_v47, %v1715_v49 }
 0x803   : > { %v4070_v55 = vpop.eup %4069  ;;  %4079 = vrcp.f32 %v1706_v52 }
 0x804   : > { %v1717_v58 = vmul.f32 %v4070_v55, %v4054_v17  ;;  %v1730_v61 = vmul.f32 %v4928_v47, %v1716_v53 }
 0x805   : > { %v4072_v62 = vpop.eup %4071 }
 0x806   : > { %v1718_v63 = vmul.f32 %v4072_v62, %v4056_v21  ;;  %v1737_v2 = vpack.c.bf16 %v1730_v61, %v1729_v59  ;;  %v1731_v7 = vmul.f32 %v4928_v47, %v1717_v58 }
 0x807   : > { %v4074_v6 = vpop.eup %4073 }
 0x808   : > { %v1732_v11 = vmul.f32 %v4928_v47, %v1718_v63  ;;  %3785 = vmatprep.mubr.msk.bf16.mxu0 %vm585_vm2, %v1737_v2  ;;  %v1719_v13 = vmul.f32 %v4074_v6, %v4058_v0 }
 0x809   : > { %v4076_v29 = vpop.eup %4075 }
 0x80a   : > { %v1738_v33 = vpack.c.bf16 %v1732_v11, %v1731_v7  ;;  %v1720_v15 = vmul.f32 %v4076_v29, %v4060_v23  ;;  %v1733_v16 = vmul.f32 %v4928_v47, %v1719_v13  ;;  %v3989_v23 = vld [vmem:[%s5357_s9 + $0x30] sm:$0xff]   ;;  %v1839_v7 = vrot.slane %v4850_v14, %v4818_v18 }
 0x80b   : > { %v4078_v34 = vpop.eup %4077 }
 0x80c   : > { %3786 = vmatmul.mubr.msk.bf16.vlgmr.msra.gmra.mrb[20].mxu0 %vm585_vm2, %v1738_v33  ;;  %v1734_v9 = vmul.f32 %v4928_v47, %v1720_v15  ;;  %v1721_v25 = vmul.f32 %v4078_v34, %v4062_v28  ;;  %v1855_v28 = vsel %vm797_vm8, %v3990_v24, 0  ;;  %v1900_v34 = vmul.f32 %v4683_v36, %v4651_v43 }
 0x80d   : > { %v4080_v17 = vpop.eup %4079  ;;  %3794 = vmatpush3.bf16.msra.mxu0 %v3989_v23 }
 0x80e   : > { %v1739_v19 = vpack.c.bf16 %v1734_v9, %v1733_v16  ;;  %v1722_v21 = vmul.f32 %v4080_v17, %v4064_v31  ;;  %v1735_v40 = vmul.f32 %v4928_v47, %v1721_v25  ;;  %3795 = vmatprep.subr.bf16.mxu0 %v4348_v1 }
 0x810   : > { %3789 = vmatprep.mubr.msk.bf16.mxu0 %vm585_vm2, %v1739_v19  ;;  %v1736_v0 = vmul.f32 %v4928_v47, %v1722_v21  ;;  %v1901_v19 = vmul.f32 %v4687_v38, %v4654_v54 }
 0x811   : > { %3796 = vmatpush3.bf16.msra.mxu0 %v1855_v28 }
 0x812   : > { %v1740_v22 = vpack.c.bf16 %v1736_v0, %v1735_v40  ;;  %3801 = vmatprep.subr.bf16.mxu0 %v4348_v1 }
 0x814   : > { %3790 = vmatmul.mubr.msk.bf16.gmra.mrb[24].mxu0 %vm585_vm2, %v1740_v22 }
 0x815   : > { %3797 = vmatprep.mubr.msk.bf16.mxu0 %vm4349_vm0, %v4348_v1 }
 0x8df   : > { %v3787_v30 = vpop.f32.mrb[20].mxu0 }
 0x8e0   : > { %v1823_v31 = vmul.f32 %v3787_v30, %v4864_v26  ;;  %v1788_v46 = vpop.f32.mrb[21].mxu0 }
 0x8e1   : > { %v1819_v35 = vmul.f32 %v4861_v51, %v1788_v46  ;;  %v3788_v37 = vpop.f32.mrb[22].mxu0 }
 0x8e2   : > { %v1824_v39 = vmul.f32 %v3788_v37, %v4864_v26  ;;  %v1791_v41 = vpop.f32.mrb[23].mxu0  ;;  %v3991_v37 = vld [vmem:[%s5358_s10] sm:$0xff]  }
 0x8e3   : > { %v1825_v42 = vadd.f32 %v1823_v31, %v1819_v35  ;;  %v1820_v44 = vmul.f32 %v4861_v51, %v1791_v41 }
 0x8e5   : > { %v1826_v45 = vadd.f32 %v1824_v39, %v1820_v44  ;;  %v3992_v39 = vld [vmem:[%s5358_s10 + $0x8] sm:$0x3f]  }
 0x8e6   : > { %v1978_v41 = vsel %vm797_vm8, %v3992_v39, 0 }
 0x8e7   : > { %v3791_v48 = vpop.f32.mrb[24].mxu0 }
 0x8e8   : > { %v1804_v49 = vpop.f32.mrb[25].mxu0  ;;  %v1831_v55 = vmul.f32 %v3791_v48, %v4870_v32 }
 0x8e9   : > { %v1827_v50 = vmul.f32 %v4867_v27, %v1804_v49  ;;  %v3792_v52 = vpop.f32.mrb[26].mxu0 }
 0x8ea   : > { %v1807_v53 = vpop.f32.mrb[27].mxu0  ;;  %v1832_v62 = vmul.f32 %v3792_v52, %v4870_v32 }
 0x8eb   : > { %v1829_v58 = vadd.f32 %v1827_v50, %v1825_v42  ;;  %v1828_v59 = vmul.f32 %v4867_v27, %v1807_v53 }
 0x8ed   : > { %v1833_v61 = vadd.f32 %v1831_v55, %v1829_v58  ;;  %v1830_v63 = vadd.f32 %v1828_v59, %v1826_v45 }
 0x8ef   : > { %v1834_v2 = vadd.f32 %v1832_v62, %v1830_v63 }
 0x8f1   : > { %v1835_v6 = vpack.c.bf16 %v1834_v2, %v1833_v61 }
 0x8f3   : > { %3798 = vmatmul.mubr.msk.bf16.vlgmr.msra.gmra.mrb[28].mxu0 %vm793_vm9, %v1835_v6 }
 0x8f4   : > { %3805 = vmatprep.mubr.msk.bf16.mxu0 %vm4349_vm0, %v4348_v1  ;;  %3802 = vmatpush3.bf16.msra.mxu0 %v3991_v37 }
 0x8f5   : > { %3803 = vmatprep.subr.bf16.mxu0 %v4348_v1 }
 0x8f8   : > { %3804 = vmatpush3.bf16.msra.mxu0 %v1978_v41 }
 0x8f9   : > { %3827 = vmatprep.subr.bf16.mxu0 %v4348_v1 }
 0x9c6   : > { %v1891_v11 = vpop.f32.mrb[28].mxu0 }
 0x9c7   : > { %v1892_v13 = vadd.f32 %v1891_v11, %v1839_v7  ;;  %v3799_v29 = vpop.f32.mrb[29].mxu0  ;;  %v1947_v11 = vrot.slane %v4850_v14, %v4803_v57 }
 0x9c8   : > { %v1894_v33 = vpop.f32.mrb[30].mxu0 }
 0x9c9   : > { %v1898_v15 = vmul.f32 %v1892_v13, %v4651_v43  ;;  %v1895_v16 = vadd.f32 %v1894_v33, %v1839_v7  ;;  %v3800_v9 = vpop.f32.mrb[31].mxu0 }
 0x9cb   : > { %v4969_v25 = vadd.f32 %v1900_v34, %v1898_v15  ;;  %v1899_v17 = vmul.f32 %v1895_v16, %v4654_v54  ;;  %v1953_v34 = vrot.slane %v4850_v14, %v4809_v4 }
 0x9cd   : > { %v4974_v21 = vadd.f32 %v1901_v19, %v1899_v17  ;;  %v1904_v40 = vsel %vm793_vm9, %v4969_v25, 0.0 }
 0x9ce   : > { %1905 = vadd.xlane.f32.xlu1 %v1904_v40  ;;  %v3993_v40 = vld [vmem:[%s5360_s12] sm:$0xff]  }
 0x9cf   : > { %v1907_v0 = vsel %vm793_vm9, %v4974_v21, 0.0  ;;  %3810 = vmatpush3.bf16.msra.mxu1 %v3993_v40 }
 0x9d0   : > { %1908 = vadd.xlane.f32.xlu0 %v1907_v0  ;;  %3811 = vmatprep.subr.bf16.mxu1 %v4348_v1  ;;  %v3994_v0 = vld [vmem:[%s5360_s12 + $0x8] sm:$0xff]  }
 0x9d3   : > { %3812 = vmatpush3.bf16.msra.mxu1 %v3994_v0 }
 0x9d4   : > { %3813 = vmatprep.subr.bf16.mxu1 %v4348_v1 }
 0xa5b   : > { %v1906_v36 = vpop.xlane.xlu1 %1905 }
 0xa5c   : > { %v1910_v22 = vmul.f32 0.035714287, %v1906_v36  ;;  %v3995_v36 = vld [vmem:[%s5360_s12 + $0x10] sm:$0xff]  }
 0xa5d   : > { %v1909_v23 = vpop.xlane.xlu0 %1908  ;;  %3814 = vmatpush3.bf16.msra.mxu1 %v3995_v36 }
 0xa5e   : > { %v1912_v24 = vsub.f32 %v4969_v25, %v1910_v22  ;;  %v1911_v28 = vmul.f32 0.035714287, %v1909_v23  ;;  %3815 = vmatprep.subr.bf16.mxu1 %v4348_v1  ;;  %v3996_v22 = vld [vmem:[%s5360_s12 + $0x18] sm:$0xff]   ;;  %v3997_v23 = vld [vmem:[%s5360_s12 + $0x20] sm:$0xff]  }
 0xa60   : > { %v1913_v30 = vsub.f32 %v4974_v21, %v1911_v28  ;;  %v1914_v31 = vmul.f32 %v1912_v24, %v1912_v24  ;;  %v3999_v28 = vld [vmem:[%s5360_s12 + $0x30] sm:$0xff]  }
 0xa61   : > { %3816 = vmatpush3.bf16.msra.mxu1 %v3996_v22 }
 0xa62   : > { %v1916_v38 = vsel %vm793_vm9, %v1914_v31, 0.0  ;;  %v1915_v46 = vmul.f32 %v1913_v30, %v1913_v30  ;;  %3817 = vmatprep.subr.bf16.mxu1 %v4348_v1 }
 0xa63   : > { %1917 = vadd.xlane.f32.xlu1 %v1916_v38 }
 0xa64   : > { %v1919_v35 = vsel %vm793_vm9, %v1915_v46, 0.0 }
 0xa65   : > { %1920 = vadd.xlane.f32.xlu0 %v1919_v35  ;;  %3818 = vmatpush3.bf16.msra.mxu1 %v3997_v23 }
 0xa66   : > { %3819 = vmatprep.subr.bf16.mxu1 %v4348_v1 }
 0xaf0   : > { %v1918_v42 = vpop.xlane.xlu1 %1917 }
 0xaf1   : > { %v1922_v44 = vmul.f32 0.035714287, %v1918_v42 }
 0xaf2   : > { %v1921_v45 = vpop.xlane.xlu0 %1920 }
 0xaf3   : > { %v1924_v48 = vadd.f32 1e-05, %v1922_v44  ;;  %v1923_v49 = vmul.f32 0.035714287, %v1921_v45 }
 0xaf5   : > { %4081 = vrsqrt.f32 %v1924_v48  ;;  %v1925_v50 = vadd.f32 1e-05, %v1923_v49  ;;  %vm1928_vm6 = vcmp.eq.f32.partialorder %v1924_v48, inf  ;;  %v1931_v55 = vand.u32 2147483648, %v1924_v48 }
 0xaf6   : > { %vm1930_vm10 = vcmp.eq.f32.partialorder %v1924_v48, 0.0 }
 0xaf7   : > { %4083 = vrsqrt.f32 %v1925_v50  ;;  %vm1935_vm11 = vcmp.eq.f32.partialorder %v1925_v50, inf  ;;  %v1938_v63 = vand.u32 2147483648, %v1925_v50  ;;  %vm1937_vm12 = vcmp.eq.f32.partialorder %v1925_v50, 0.0 }
 0xaff   : > { %v4082_v52 = vpop.eup %4081 }
 0xb00   : > { %v1927_v53 = vmul.f32 %v4082_v52, %v1924_v48 }
 0xb01   : > { %v4084_v58 = vpop.eup %4083 }
 0xb02   : > { %v1929_v59 = vsel %vm1928_vm6, %v1924_v48, %v1927_v53  ;;  %v1934_v62 = vmul.f32 %v4084_v58, %v1925_v50 }
 0xb03   : > { %v1932_v61 = vsel %vm1930_vm10, %v1931_v55, %v1929_v59 }
 0xb04   : > { %4085 = vrcp.f32 %v1932_v61  ;;  %v1936_v2 = vsel %vm1935_vm11, %v1925_v50, %v1934_v62  ;;  %vm5382_vm11 = vcmp.le.s32.totalorder %v4604_v5, 14 }
 0xb05   : > { %v1939_v6 = vsel %vm1937_vm12, %v1938_v63, %v1936_v2  ;;  %vm5383_vm12 = vcmp.ge.s32.totalorder %v4589_v3, 1 }
 0xb06   : > { %4087 = vrcp.f32 %v1939_v6 }
 0xb0e   : > { %v4086_v7 = vpop.eup %4085 }
 0xb0f   : > { %v1941_v13 = vmul.f32 %v4086_v7, %v1912_v24  ;;  %v3998_v24 = vld [vmem:[%s5360_s12 + $0x28] sm:$0xff]  }
 0xb10   : > { %v4088_v29 = vpop.eup %4087  ;;  %3820 = vmatpush3.bf16.msra.mxu1 %v3998_v24 }
 0xb11   : > { %v1943_v33 = vmul.f32 %v4088_v29, %v1913_v30  ;;  %v1948_v15 = vmul.f32 %v1947_v11, %v1941_v13  ;;  %3821 = vmatprep.subr.bf16.mxu1 %v4348_v1  ;;  %v3538_v30 = vld [vmem:[#allocation9] ss:$0 sm:$0xff] }
 0xb13   : > { %v1949_v16 = vmul.f32 %v1947_v11, %v1943_v33  ;;  %v1954_v9 = vadd.f32 %v1953_v34, %v1948_v15 }
 0xb14   : > { %3822 = vmatpush3.bf16.msra.mxu1 %v3999_v28 }
 0xb15   : > { %v1955_v17 = vadd.f32 %v1953_v34, %v1949_v16 }
 0xb17   : > { %v1956_v19 = vpack.c.bf16 %v1955_v17, %v1954_v9 }
 0xb19   : > { %3806 = vmatmul.mubr.msk.bf16.vlgmr.msra.gmra.mrb[32].mxu0 %vm793_vm9, %v1956_v19 }
 0xb1a   : > { %3831 = vmatprep.mubr.msk.bf16.mxu0 %vm4349_vm0, %v4348_v1 }
 0xbec   : > { %v2014_v31 = vpop.f32.mrb[32].mxu0 }
 0xbed   : > { %v2015_v38 = vadd.f32 %v3538_v30, %v2014_v31  ;;  %v3807_v46 = vpop.f32.mrb[33].mxu0 }
 0xbee   : > { %v2017_v35 = vpop.f32.mrb[34].mxu0 }
 0xbef   : > { %v2021_v37 = vmul.f32 0.70710677, %v2015_v38  ;;  %v2018_v39 = vadd.f32 %v3538_v30, %v2017_v35  ;;  %v3808_v41 = vpop.f32.mrb[35].mxu0 }
 0xbf1   : > { %v2023_v42 = vand.u32 2147483647, %v2021_v37  ;;  %v2022_v44 = vmul.f32 0.70710677, %v2018_v39  ;;  %vm2063_vm13 = vcmp.ge.f32.partialorder %v2021_v37, 0.0 }
 0xbf3   : > { %v2025_v45 = vmul.f32 0.3275911, %v2023_v42  ;;  %v2024_v48 = vand.u32 2147483647, %v2022_v44  ;;  %v2051_v53 = vsub.f32 0.0, %v2023_v42  ;;  %vm2064_vm14 = vcmp.ge.f32.partialorder %v2022_v44, 0.0 }
 0xbf5   : > { %v2027_v49 = vadd.f32 1.0, %v2025_v45  ;;  %v2026_v50 = vmul.f32 0.3275911, %v2024_v48  ;;  %v2052_v55 = vsub.f32 0.0, %v2024_v48  ;;  %v2053_v59 = vmul.f32 %v2051_v53, %v2023_v42 }
 0xbf6   : > { %v2070_v53 = vmul.f32 0.5, %v2018_v39 }
 0xbf7   : > { %4089 = vrcp.f32 %v2027_v49  ;;  %v2028_v52 = vadd.f32 1.0, %v2026_v50  ;;  %v2054_v2 = vmul.f32 %v2052_v55, %v2024_v48  ;;  %v2055_v6 = vmul.f32 1.442695, %v2053_v59 }
 0xbf9   : > { %4091 = vrcp.f32 %v2028_v52  ;;  %v2057_v33 = vmul.f32 1.442695, %v2054_v2  ;;  %v2069_v52 = vmul.f32 0.5, %v2015_v38 }
 0xbfa   : > { %4093 = vpow2.f32 %v2055_v6 }
 0xbfb   : > { %4095 = vpow2.f32 %v2057_v33 }
 0xc01   : > { %v4090_v58 = vpop.eup %4089 }
 0xc02   : > { %v2033_v61 = vmul.f32 1.0614054, %v4090_v58 }
 0xc03   : > { %v4092_v62 = vpop.eup %4091 }
 0xc04   : > { %v2035_v63 = vadd.f32 -1.4531521, %v2033_v61  ;;  %v2034_v7 = vmul.f32 1.0614054, %v4092_v62  ;;  %v4094_v23 = vpop.eup %4093 }
 0xc05   : > { %v4096_v31 = vpop.eup %4095 }
 0xc06   : > { %v2037_v11 = vmul.f32 %v4090_v58, %v2035_v63  ;;  %v2036_v13 = vadd.f32 -1.4531521, %v2034_v7 }
 0xc08   : > { %v2039_v29 = vadd.f32 1.4214138, %v2037_v11  ;;  %v2038_v15 = vmul.f32 %v4092_v62, %v2036_v13 }
 0xc0a   : > { %v2041_v34 = vmul.f32 %v4090_v58, %v2039_v29  ;;  %v2040_v16 = vadd.f32 1.4214138, %v2038_v15 }
 0xc0c   : > { %v2043_v9 = vadd.f32 -0.28449672, %v2041_v34  ;;  %v2042_v17 = vmul.f32 %v4092_v62, %v2040_v16 }
 0xc0e   : > { %v2045_v19 = vmul.f32 %v4090_v58, %v2043_v9  ;;  %v2044_v40 = vadd.f32 -0.28449672, %v2042_v17 }
 0xc10   : > { %v2047_v0 = vadd.f32 0.2548296, %v2045_v19  ;;  %v2046_v36 = vmul.f32 %v4092_v62, %v2044_v40 }
 0xc12   : > { %v2049_v22 = vmul.f32 %v4090_v58, %v2047_v0  ;;  %v2048_v24 = vadd.f32 0.2548296, %v2046_v36 }
 0xc14   : > { %v2059_v28 = vmul.f32 %v4094_v23, %v2049_v22  ;;  %v2050_v30 = vmul.f32 %v4092_v62, %v2048_v24  ;;  %v2079_v62 = vrot.slane %v4850_v14, %v4836_v56 }
 0xc16   : > { %v2061_v46 = vsub.f32 1.0, %v2059_v28  ;;  %v2060_v35 = vmul.f32 %v4096_v31, %v2050_v30 }
 0xc18   : > { %v2065_v41 = vsub.f32 0.0, %v2061_v46  ;;  %v2062_v42 = vsub.f32 1.0, %v2060_v35 }
 0xc1a   : > { %v2067_v45 = vsel %vm2063_vm13, %v2061_v46, %v2065_v41  ;;  %v2066_v48 = vsub.f32 0.0, %v2062_v42 }
 0xc1b   : > { %v2071_v49 = vadd.f32 1.0, %v2067_v45 }
 0xc1c   : > { %v2068_v50 = vsel %vm2064_vm14, %v2062_v42, %v2066_v48 }
 0xc1d   : > { %v2072_v55 = vadd.f32 1.0, %v2068_v50  ;;  %v2073_v59 = vmul.f32 %v2071_v49, %v2069_v52  ;;  %v5049_v52 = vld [vmem:[%s5355_s7 + $0x10] sm:$0xff] }
 0xc1f   : > { %v2074_v58 = vmul.f32 %v2072_v55, %v2070_v53  ;;  %v2263_v53 = vrot.slane %v5049_v52, %v4696_v8 }
 0xc21   : > { %v2075_v61 = vpack.c.bf16 %v2074_v58, %v2073_v59  ;;  %v2269_v58 = vrot.slane %v5049_v52, %v4706_v12 }
 0xc23   : > { %3824 = vmatmul.mubr.msk.bf16.vlgmr.msra.gmra.mrb[24].mxu1 %vm2122_vm15, %v2075_v61 }
 0xcf6   : > { %v2160_v63 = vpop.f32.mrb[24].mxu1 }
 0xcf7   : > { %v2161_v37 = vadd.f32 %v2160_v63, %v2079_v62  ;;  %v3825_v2 = vpop.f32.mrb[25].mxu1 }
 0xcf8   : > { %v2163_v6 = vpop.f32.mrb[26].mxu1  ;;  %v3553_v2 = vld [vmem:[%s5356_s8 + $0x10] sm:$0x7] }
 0xcf9   : > { %v2167_v7 = vmul.f32 %v2161_v37, %v4651_v43  ;;  %v2164_v44 = vadd.f32 %v2163_v6, %v2079_v62  ;;  %v3826_v11 = vpop.f32.mrb[27].mxu1  ;;  %v3552_v62 = vld [vmem:[%s5356_s8 + $0xc] sm:$0x7]  ;;  %v3554_v6 = vld [vmem:[%s5356_s8 + $0x14] sm:$0x7] }
 0xcfa   : > { %v2293_v11 = vrot.slane %v3552_v62, %v4706_v12 }
 0xcfb   : > { %v5032_v38 = vadd.f32 %v2167_v7, %v4969_v25  ;;  %v2168_v39 = vmul.f32 %v2164_v44, %v4654_v54 }
 0xcfd   : > { %v5036_v13 = vadd.f32 %v2168_v39, %v4974_v21  ;;  %v2220_v29 = vsel %vm793_vm9, %v5032_v38, 0.0  ;;  %v2432_v39 = vrot.slane %v3553_v2, %v4706_v12 }
 0xcfe   : > { %2221 = vadd.xlane.f32.xlu1 %v2220_v29  ;;  %v2571_v29 = vrot.slane %v3554_v6, %v4706_v12 }
 0xcff   : > { %v2223_v14 = vsel %vm793_vm9, %v5036_v13, 0.0 }
 0xd00   : > { %2224 = vadd.xlane.f32.xlu0 %v2223_v14 }
 0xd8b   : > { %v2222_v33 = vpop.xlane.xlu1 %2221 }
 0xd8c   : > { %v2226_v15 = vmul.f32 0.035714287, %v2222_v33  ;;  %v2287_v33 = vrot.slane %v3552_v62, %v4696_v8 }
 0xd8d   : > { %v2225_v34 = vpop.xlane.xlu0 %2224 }
 0xd8e   : > { %v2228_v16 = vsub.f32 %v5032_v38, %v2226_v15  ;;  %v2227_v25 = vmul.f32 0.035714287, %v2225_v34  ;;  %v2301_v15 = vrot.slane %v3552_v62, %v4717_v20  ;;  %v2426_v34 = vrot.slane %v3553_v2, %v4696_v8 }
 0xd90   : > { %v2229_v9 = vsub.f32 %v5036_v13, %v2227_v25  ;;  %v2230_v17 = vmul.f32 %v2228_v16, %v2228_v16  ;;  %v2440_v25 = vrot.slane %v3553_v2, %v4717_v20 }
 0xd92   : > { %v2232_v21 = vsel %vm793_vm9, %v2230_v17, 0.0  ;;  %v2231_v19 = vmul.f32 %v2229_v9, %v2229_v9  ;;  %v2579_v17 = vrot.slane %v3554_v6, %v4717_v20 }
 0xd93   : > { %2233 = vadd.xlane.f32.xlu1 %v2232_v21 }
 0xd94   : > { %v2235_v40 = vsel %vm793_vm9, %v2231_v19, 0.0 }
 0xd95   : > { %2236 = vadd.xlane.f32.xlu0 %v2235_v40 }
 0xe20   : > { %v2234_v0 = vpop.xlane.xlu1 %2233 }
 0xe21   : > { %v2238_v36 = vmul.f32 0.035714287, %v2234_v0 }
 0xe22   : > { %v2237_v22 = vpop.xlane.xlu0 %2236 }
 0xe23   : > { %v2240_v23 = vadd.f32 1e-05, %v2238_v36  ;;  %v2239_v24 = vmul.f32 0.035714287, %v2237_v22 }
 0xe25   : > { %4097 = vrsqrt.f32 %v2240_v23  ;;  %v2241_v28 = vadd.f32 1e-05, %v2239_v24  ;;  %vm2244_vm1 = vcmp.eq.f32.partialorder %v2240_v23, inf  ;;  %v2247_v46 = vand.u32 2147483648, %v2240_v23 }
 0xe26   : > { %vm2246_vm7 = vcmp.eq.f32.partialorder %v2240_v23, 0.0 }
 0xe27   : > { %4099 = vrsqrt.f32 %v2241_v28  ;;  %vm2251_vm6 = vcmp.eq.f32.partialorder %v2241_v28, inf  ;;  %v2254_v48 = vand.u32 2147483648, %v2241_v28  ;;  %vm2253_vm10 = vcmp.eq.f32.partialorder %v2241_v28, 0.0 }
 0xe2f   : > { %v4098_v30 = vpop.eup %4097 }
 0xe30   : > { %v2243_v31 = vmul.f32 %v4098_v30, %v2240_v23 }
 0xe31   : > { %v4100_v35 = vpop.eup %4099 }
 0xe32   : > { %v2245_v41 = vsel %vm2244_vm1, %v2240_v23, %v2243_v31  ;;  %v2250_v45 = vmul.f32 %v4100_v35, %v2241_v28 }
 0xe33   : > { %v2248_v42 = vsel %vm2246_vm7, %v2247_v46, %v2245_v41 }
 0xe34   : > { %4101 = vrcp.f32 %v2248_v42  ;;  %v2252_v49 = vsel %vm2251_vm6, %v2241_v28, %v2250_v45 }
 0xe35   : > { %v2255_v50 = vsel %vm2253_vm10, %v2254_v48, %v2252_v49 }
 0xe36   : > { %4103 = vrcp.f32 %v2255_v50 }
 0xe3e   : > { %v4102_v55 = vpop.eup %4101 }
 0xe3f   : > { %v2257_v59 = vmul.f32 %v4102_v55, %v2228_v16 }
 0xe40   : > { %v4104_v61 = vpop.eup %4103 }
 0xe41   : > { %v2264_v63 = vmul.f32 %v2263_v53, %v2257_v59  ;;  %v2259_v37 = vmul.f32 %v4104_v61, %v2229_v9  ;;  %v2565_v9 = vrot.slane %v3554_v6, %v4696_v8 }
 0xe43   : > { %v2270_v7 = vadd.f32 %v2269_v58, %v2264_v63  ;;  %v2265_v44 = vmul.f32 %v2263_v53, %v2259_v37 }
 0xe45   : > { %v2271_v14 = vadd.f32 %v2269_v58, %v2265_v44  ;;  %v2272_v16 = vrot.slane %v2270_v7, 7  ;;  %v2278_v19 = vrot.slane %v2270_v7, 1  ;;  %v2294_v0 = vmul.f32 %v2293_v11, %v2270_v7 }
 0xe46   : > { %v2433_v23 = vmul.f32 %v2432_v39, %v2270_v7  ;;  %v2572_v24 = vmul.f32 %v2571_v29, %v2270_v7 }
 0xe47   : > { %v2273_v21 = vrot.slane %v2271_v14, 7  ;;  %v2279_v40 = vrot.slane %v2271_v14, 1  ;;  %v2295_v36 = vmul.f32 %v2293_v11, %v2271_v14  ;;  %v2434_v22 = vmul.f32 %v2432_v39, %v2271_v14 }
 0xe48   : > { %v2573_v45 = vmul.f32 %v2571_v29, %v2271_v14 }
 0xe49   : > { %v2274_v28 = vsel %vm554_vm3, %v2272_v16, %v2273_v21  ;;  %v2281_v30 = vsel %vm565_vm5, %v2279_v40, %v2278_v19  ;;  %v2275_v31 = vsel %vm554_vm3, %v2273_v21, %v2272_v16  ;;  %v2280_v46 = vsel %vm565_vm5, %v2278_v19, %v2279_v40 }
 0xe4a   : > { %v2283_v35 = vsel %vm5382_vm11, %v2281_v30, 0.0  ;;  %v2289_v41 = vmul.f32 %v2287_v33, %v2274_v28  ;;  %v2276_v42 = vsel %vm5383_vm12, %v2275_v31, 0.0  ;;  %v2428_v50 = vmul.f32 %v2426_v34, %v2274_v28 }
 0xe4b   : > { %v2303_v48 = vmul.f32 %v2301_v15, %v2283_v35  ;;  %v2288_v49 = vmul.f32 %v2287_v33, %v2276_v42  ;;  %v2442_v53 = vmul.f32 %v2440_v25, %v2283_v35  ;;  %v2302_v59 = vmul.f32 %v2301_v15, %v2280_v46 }
 0xe4c   : > { %v2297_v55 = vadd.f32 %v2295_v36, %v2289_v41  ;;  %v2427_v58 = vmul.f32 %v2426_v34, %v2276_v42  ;;  %v2567_v61 = vmul.f32 %v2565_v9, %v2274_v28  ;;  %v2436_v63 = vadd.f32 %v2434_v22, %v2428_v50 }
 0xe4d   : > { %v2296_v62 = vadd.f32 %v2294_v0, %v2288_v49  ;;  %v2581_v37 = vmul.f32 %v2579_v17, %v2283_v35  ;;  %v2566_v2 = vmul.f32 %v2565_v9, %v2276_v42  ;;  %v2441_v7 = vmul.f32 %v2440_v25, %v2280_v46 }
 0xe4e   : > { %v2305_v6 = vadd.f32 %v2303_v48, %v2297_v55  ;;  %v2435_v5 = vadd.f32 %v2433_v23, %v2427_v58  ;;  %v2575_v44 = vadd.f32 %v2573_v45, %v2567_v61  ;;  %v2444_v39 = vadd.f32 %v2442_v53, %v2436_v63 }
 0xe4f   : > { %v2304_v11 = vadd.f32 %v2302_v59, %v2296_v62  ;;  %v2574_v16 = vadd.f32 %v2572_v24, %v2566_v2  ;;  %v2580_v29 = vmul.f32 %v2579_v17, %v2280_v46 }
 0xe50   : > { %v2307_v14 = vmul.f32 %v2305_v6, %v4654_v54  ;;  %v2443_v33 = vadd.f32 %v2441_v7, %v2435_v5  ;;  %v2583_v21 = vadd.f32 %v2581_v37, %v2575_v44  ;;  %v2446_v40 = vmul.f32 %v2444_v39, %v4654_v54  ;;  %v4000_v6 = vld [vmem:[%s5357_s9 + $0x40] sm:$0xff]   ;;  %v4001_v5 = vld [vmem:[%s5357_s9 + $0x48] sm:$0x3f]  }
 0xe51   : > { %v2306_v15 = vmul.f32 %v2304_v11, %v4651_v43  ;;  %v2582_v34 = vadd.f32 %v2580_v29, %v2574_v16  ;;  %3828 = vmatpush3.bf16.msra.mxu0 %v4000_v6  ;;  %v2380_v7 = vsel %vm797_vm8, %v4001_v5, 0 }
 0xe52   : > { %v2311_v19 = vsel %vm793_vm9, %v2307_v14, 0.0  ;;  %v2445_v25 = vmul.f32 %v2443_v33, %v4651_v43  ;;  %v2450_v0 = vsel %vm793_vm9, %v2446_v40, 0.0  ;;  %v2585_v61 = vmul.f32 %v2583_v21, %v4654_v54  ;;  %3829 = vmatprep.subr.bf16.mxu0 %v4348_v1 }
 0xe53   : > { %2312 = vadd.xlane.f32.xlu0 %v2311_v19  ;;  %v2308_v9 = vsel %vm793_vm9, %v2306_v15, 0.0  ;;  %v2584_v63 = vmul.f32 %v2582_v34, %v4651_v43 }
 0xe54   : > { %2309 = vadd.xlane.f32.xlu1 %v2308_v9  ;;  %v2447_v17 = vsel %vm793_vm9, %v2445_v25, 0.0  ;;  %v2589_v37 = vsel %vm793_vm9, %v2585_v61, 0.0 }
 0xe55   : > { %v2586_v2 = vsel %vm793_vm9, %v2584_v63, 0.0  ;;  %3830 = vmatpush3.bf16.msra.mxu0 %v2380_v7 }
 0xe56   : > { %3835 = vmatprep.subr.bf16.mxu0 %v4348_v1 }
 0xe57   : > { %2451 = vadd.xlane.f32.xlu0 %v2450_v0 }
 0xe58   : > { %2448 = vadd.xlane.f32.xlu1 %v2447_v17 }
 0xee0   : > { %v2313_v36 = vpop.xlane.xlu0 %2312 }
 0xee1   : > { %v2315_v22 = vmul.f32 0.035714287, %v2313_v36  ;;  %v2310_v23 = vpop.xlane.xlu1 %2309 }
 0xee2   : > { %v2314_v24 = vmul.f32 0.035714287, %v2310_v23 }
 0xee3   : > { %v5093_v28 = vsub.f32 %v2307_v14, %v2315_v22 }
 0xee4   : > { %v5095_v30 = vsub.f32 %v2306_v15, %v2314_v24  ;;  %v2452_v31 = vpop.xlane.xlu0 %2451 }
 0xee5   : > { %v2454_v46 = vmul.f32 0.035714287, %v2452_v31  ;;  %v2449_v35 = vpop.xlane.xlu1 %2448  ;;  %v2319_v41 = vmul.f32 %v5093_v28, %v5093_v28 }
 0xee6   : > { %v2453_v42 = vmul.f32 0.035714287, %v2449_v35  ;;  %v2318_v45 = vmul.f32 %v5095_v30, %v5095_v30 }
 0xee7   : > { %v5101_v48 = vsub.f32 %v2446_v40, %v2454_v46  ;;  %v2323_v49 = vsel %vm793_vm9, %v2319_v41, 0.0 }
 0xee8   : > { %v5104_v50 = vsub.f32 %v2445_v25, %v2453_v42  ;;  %2324 = vadd.xlane.f32.xlu0 %v2323_v49  ;;  %v2320_v53 = vsel %vm793_vm9, %v2318_v45, 0.0 }
 0xee9   : > { %2321 = vadd.xlane.f32.xlu1 %v2320_v53  ;;  %v2458_v55 = vmul.f32 %v5101_v48, %v5101_v48 }
 0xeea   : > { %v2457_v59 = vmul.f32 %v5104_v50, %v5104_v50 }
 0xeeb   : > { %v2462_v58 = vsel %vm793_vm9, %v2458_v55, 0.0 }
 0xeec   : > { %2463 = vadd.xlane.f32.xlu0 %v2462_v58  ;;  %v2459_v62 = vsel %vm793_vm9, %v2457_v59, 0.0 }
 0xeed   : > { %2460 = vadd.xlane.f32.xlu1 %v2459_v62 }
 0xef0   : > { %2590 = vadd.xlane.f32.xlu0 %v2589_v37 }
 0xef1   : > { %2587 = vadd.xlane.f32.xlu1 %v2586_v2 }
 0xf75   : > { %v2325_v44 = vpop.xlane.xlu0 %2324 }
 0xf76   : > { %v2327_v11 = vmul.f32 0.035714287, %v2325_v44  ;;  %v2322_v39 = vpop.xlane.xlu1 %2321 }
 0xf77   : > { %v2326_v16 = vmul.f32 0.035714287, %v2322_v39 }
 0xf78   : > { %v2329_v29 = vadd.f32 1e-05, %v2327_v11 }
 0xf79   : > { %v2328_v14 = vadd.f32 1e-05, %v2326_v16  ;;  %v2464_v33 = vpop.xlane.xlu0 %2463  ;;  %v2351_v16 = vrot.slane %v5049_v52, %v4717_v20 }
 0xf7a   : > { %4105 = vrsqrt.f32 %v2329_v29  ;;  %v2461_v21 = vpop.xlane.xlu1 %2460  ;;  %v2466_v15 = vmul.f32 0.035714287, %v2464_v33  ;;  %vm2339_vm3 = vcmp.eq.f32.partialorder %v2329_v29, inf  ;;  %v2342_v41 = vand.u32 2147483648, %v2329_v29 }
 0xf7b   : > { %4107 = vrsqrt.f32 %v2328_v14  ;;  %v2465_v34 = vmul.f32 0.035714287, %v2461_v21  ;;  %vm2341_vm5 = vcmp.eq.f32.partialorder %v2329_v29, 0.0  ;;  %vm2332_vm13 = vcmp.eq.f32.partialorder %v2328_v14, inf }
 0xf7c   : > { %v2468_v40 = vadd.f32 1e-05, %v2466_v15  ;;  %v2335_v55 = vand.u32 2147483648, %v2328_v14  ;;  %vm2334_vm14 = vcmp.eq.f32.partialorder %v2328_v14, 0.0  ;;  %v2357_v21 = vrot.slane %v5049_v52, %v4818_v18 }
 0xf7d   : > { %v2591_v19 = vpop.xlane.xlu0 %2590  ;;  %v2467_v9 = vadd.f32 1e-05, %v2465_v34 }
 0xf7e   : > { %v2593_v25 = vmul.f32 0.035714287, %v2591_v19  ;;  %v2588_v0 = vpop.xlane.xlu1 %2587  ;;  %4109 = vrsqrt.f32 %v2468_v40  ;;  %vm2478_vm1 = vcmp.eq.f32.partialorder %v2468_v40, inf  ;;  %v2481_v2 = vand.u32 2147483648, %v2468_v40 }
 0xf7f   : > { %v2592_v17 = vmul.f32 0.035714287, %v2588_v0  ;;  %4111 = vrsqrt.f32 %v2467_v9  ;;  %vm2480_vm7 = vcmp.eq.f32.partialorder %v2468_v40, 0.0  ;;  %vm2471_vm6 = vcmp.eq.f32.partialorder %v2467_v9, inf }
 0xf80   : > { %v5126_v36 = vsub.f32 %v2585_v61, %v2593_v25  ;;  %v2474_v7 = vand.u32 2147483648, %v2467_v9  ;;  %vm2473_vm10 = vcmp.eq.f32.partialorder %v2467_v9, 0.0 }
 0xf81   : > { %v5128_v22 = vsub.f32 %v2584_v63, %v2592_v17 }
 0xf82   : > { %v2597_v24 = vmul.f32 %v5126_v36, %v5126_v36 }
 0xf83   : > { %v2596_v31 = vmul.f32 %v5128_v22, %v5128_v22 }
 0xf84   : > { %v4106_v23 = vpop.eup %4105  ;;  %v2601_v45 = vsel %vm793_vm9, %v2597_v24, 0.0 }
 0xf85   : > { %v4108_v46 = vpop.eup %4107  ;;  %v2338_v35 = vmul.f32 %v4106_v23, %v2329_v29  ;;  %v2598_v49 = vsel %vm793_vm9, %v2596_v31, 0.0  ;;  %2602 = vadd.xlane.f32.xlu0 %v2601_v45  ;;  %v4002_v23 = vld [vmem:[%s5357_s9 + $0x50] sm:$0xff]  }
 0xf86   : > { %v2331_v42 = vmul.f32 %v4108_v46, %v2328_v14  ;;  %2599 = vadd.xlane.f32.xlu1 %v2598_v49  ;;  %v2496_v46 = vrot.slane %v5049_v52, %v4809_v4 }
 0xf87   : > { %v2340_v53 = vsel %vm2339_vm3, %v2329_v29, %v2338_v35 }
 0xf88   : > { %v2343_v59 = vsel %vm2341_vm5, %v2342_v41, %v2340_v53  ;;  %v2333_v58 = vsel %vm2332_vm13, %v2328_v14, %v2331_v42  ;;  %v4110_v62 = vpop.eup %4109  ;;  %v4005_v53 = vld [vmem:[%s5357_s9 + $0x68] sm:$0x3f]  }
 0xf89   : > { %4113 = vrcp.f32 %v2343_v59  ;;  %v2336_v61 = vsel %vm2334_vm14, %v2335_v55, %v2333_v58  ;;  %v4112_v63 = vpop.eup %4111  ;;  %v2477_v37 = vmul.f32 %v4110_v62, %v2468_v40  ;;  %v2658_v55 = vsel %vm797_vm8, %v4005_v53, 0 }
 0xf8a   : > { %4115 = vrcp.f32 %v2336_v61  ;;  %v2470_v6 = vmul.f32 %v4112_v63, %v2467_v9 }
 0xf8b   : > { %v2479_v5 = vsel %vm2478_vm1, %v2468_v40, %v2477_v37 }
 0xf8c   : > { %v2482_v44 = vsel %vm2480_vm7, %v2481_v2, %v2479_v5  ;;  %v2472_v11 = vsel %vm2471_vm6, %v2467_v9, %v2470_v6  ;;  %v2490_v9 = vrot.slane %v5049_v52, %v4803_v57 }
 0xf8d   : > { %4117 = vrcp.f32 %v2482_v44  ;;  %v2475_v39 = vsel %vm2473_vm10, %v2474_v7, %v2472_v11 }
 0xf8e   : > { %4119 = vrcp.f32 %v2475_v39 }
 0xf93   : > { %v4114_v29 = vpop.eup %4113 }
 0xf94   : > { %v4116_v14 = vpop.eup %4115  ;;  %v2347_v33 = vmul.f32 %v4114_v29, %v5093_v28 }
 0xf95   : > { %v2345_v15 = vmul.f32 %v4116_v14, %v5095_v30  ;;  %v4003_v30 = vld [vmem:[%s5357_s9 + $0x58] sm:$0x3f]  }
 0xf96   : > { %v2353_v34 = vmul.f32 %v2351_v16, %v2347_v33  ;;  %v2629_v33 = vrot.slane %v5049_v52, %v4836_v56 }
 0xf97   : > { %v2352_v19 = vmul.f32 %v2351_v16, %v2345_v15  ;;  %v4118_v25 = vpop.eup %4117 }
 0xf98   : > { %v2359_v40 = vadd.f32 %v2357_v21, %v2353_v34  ;;  %v4120_v17 = vpop.eup %4119  ;;  %v2486_v28 = vmul.f32 %v4118_v25, %v5101_v48  ;;  %v2519_v48 = vsel %vm797_vm8, %v4003_v30, 0 }
 0xf99   : > { %v2358_v0 = vadd.f32 %v2357_v21, %v2352_v19  ;;  %v2484_v31 = vmul.f32 %v4120_v17, %v5104_v50  ;;  %v4004_v50 = vld [vmem:[%s5357_s9 + $0x60] sm:$0xff]   ;;  %v2635_v19 = vrot.slane %v5049_v52, %v1436_v60 }
 0xf9a   : > { %v2492_v35 = vmul.f32 %v2490_v9, %v2486_v28  ;;  %v5182_v28 = vld [vmem:[%s5355_s7 + $0x18] sm:$0x7f] }
 0xf9b   : > { %v2360_v24 = vpack.c.bf16 %v2359_v40, %v2358_v0  ;;  %v2491_v41 = vmul.f32 %v2490_v9, %v2484_v31 }
 0xf9c   : > { %v2498_v45 = vadd.f32 %v2496_v46, %v2492_v35  ;;  %v2503_v35 = vrot.slane %v5182_v28, %v4706_v12 }
 0xf9d   : > { %3832 = vmatmul.mubr.msk.bf16.vlgmr.msra.gmra.mrb[36].mxu0 %vm793_vm9, %v2360_v24  ;;  %v2497_v42 = vadd.f32 %v2496_v46, %v2491_v41 }
 0xf9e   : > { %3836 = vmatpush3.bf16.msra.mxu0 %v4002_v23  ;;  %3839 = vmatprep.mubr.msk.bf16.mxu0 %vm4349_vm0, %v4348_v1 }
 0xf9f   : > { %3837 = vmatprep.subr.bf16.mxu0 %v4348_v1  ;;  %v2499_v49 = vpack.c.bf16 %v2498_v45, %v2497_v42 }
 0xfa2   : > { %3838 = vmatpush3.bf16.msra.mxu0 %v2519_v48 }
 0xfa3   : > { %3843 = vmatprep.subr.bf16.mxu0 %v4348_v1 }
 0xfa5   : > { %3840 = vmatmul.mubr.msk.bf16.vlgmr.msra.gmra.mrb[40].mxu0 %vm793_vm9, %v2499_v49 }
 0xfa6   : > { %3847 = vmatprep.mubr.msk.bf16.mxu0 %vm4349_vm0, %v4348_v1  ;;  %3844 = vmatpush3.bf16.msra.mxu0 %v4004_v50 }
 0xfa7   : > { %3845 = vmatprep.subr.bf16.mxu0 %v4348_v1 }
 0xfaa   : > { %3846 = vmatpush3.bf16.msra.mxu0 %v2658_v55 }
0x1012   : > { %v2603_v59 = vpop.xlane.xlu0 %2602 }
0x1013   : > { %v2600_v58 = vpop.xlane.xlu1 %2599  ;;  %v2605_v61 = vmul.f32 0.035714287, %v2603_v59 }
0x1014   : > { %v2604_v62 = vmul.f32 0.035714287, %v2600_v58 }
0x1015   : > { %v2607_v63 = vadd.f32 1e-05, %v2605_v61 }
0x1016   : > { %v2606_v37 = vadd.f32 1e-05, %v2604_v62 }
0x1017   : > { %4121 = vrsqrt.f32 %v2607_v63  ;;  %vm2617_vm11 = vcmp.eq.f32.partialorder %v2607_v63, inf  ;;  %v2620_v7 = vand.u32 2147483648, %v2607_v63  ;;  %vm2619_vm12 = vcmp.eq.f32.partialorder %v2607_v63, 0.0 }
0x1018   : > { %4123 = vrsqrt.f32 %v2606_v37  ;;  %vm2610_vm3 = vcmp.eq.f32.partialorder %v2606_v37, inf  ;;  %v2613_v39 = vand.u32 2147483648, %v2606_v37  ;;  %vm2612_vm5 = vcmp.eq.f32.partialorder %v2606_v37, 0.0 }
0x1021   : > { %v4122_v2 = vpop.eup %4121 }
0x1022   : > { %v4124_v6 = vpop.eup %4123  ;;  %v2616_v5 = vmul.f32 %v4122_v2, %v2607_v63 }
0x1023   : > { %v2609_v44 = vmul.f32 %v4124_v6, %v2606_v37 }
0x1024   : > { %v2618_v11 = vsel %vm2617_vm11, %v2607_v63, %v2616_v5 }
0x1025   : > { %v2621_v16 = vsel %vm2619_vm12, %v2620_v7, %v2618_v11  ;;  %v2611_v29 = vsel %vm2610_vm3, %v2606_v37, %v2609_v44  ;;  %v2642_v44 = vrot.slane %v5182_v28, %v4717_v20 }
0x1026   : > { %4125 = vrcp.f32 %v2621_v16  ;;  %v2614_v14 = vsel %vm2612_vm5, %v2613_v39, %v2611_v29 }
0x1027   : > { %4127 = vrcp.f32 %v2614_v14 }
0x1030   : > { %v4126_v21 = vpop.eup %4125 }
0x1031   : > { %v4128_v15 = vpop.eup %4127  ;;  %v2625_v34 = vmul.f32 %v4126_v21, %v5126_v36  ;;  %v2364_v36 = vrot.slane %v5182_v28, %v4696_v8 }
0x1032   : > { %v2623_v40 = vmul.f32 %v4128_v15, %v5128_v22 }
0x1033   : > { %v2631_v9 = vmul.f32 %v2629_v33, %v2625_v34 }
0x1034   : > { %v2630_v25 = vmul.f32 %v2629_v33, %v2623_v40 }
0x1035   : > { %v2637_v0 = vadd.f32 %v2635_v19, %v2631_v9 }
0x1036   : > { %v2636_v17 = vadd.f32 %v2635_v19, %v2630_v25 }
0x1038   : > { %v2638_v23 = vpack.c.bf16 %v2637_v0, %v2636_v17 }
0x103a   : > { %3848 = vmatmul.mubr.msk.bf16.vlgmr.msra.gmra.mrb[44].mxu0 %vm793_vm9, %v2638_v23 }
0x1070   : > { %v2416_v3 = vpop.f32.mrb[36].mxu0 }
0x1071   : > { %v2417_v24 = vadd.f32 %v2416_v3, %v2364_v36  ;;  %v3833_v60 = vpop.f32.mrb[37].mxu0 }
0x1072   : > { %v2419_v52 = vpop.f32.mrb[38].mxu0 }
0x1073   : > { %v2701_v22 = vmul.f32 0.37796447, %v2417_v24  ;;  %v2420_v30 = vadd.f32 %v2419_v52, %v2364_v36  ;;  %v3834_v31 = vpop.f32.mrb[39].mxu0 }
0x1075   : > { %v2702_v46 = vmul.f32 0.37796447, %v2420_v30  ;;  %v2703_v41 = vmul.f32 %v4861_v51, %v2701_v22  ;;  %v2705_v48 = vmul.f32 %v4864_v26, %v2701_v22  ;;  %v2707_v42 = vmul.f32 %v4867_v27, %v2701_v22 }
0x1076   : > { %v2709_v45 = vmul.f32 %v4870_v32, %v2701_v22 }
0x1077   : > { %v2704_v8 = vmul.f32 %v4861_v51, %v2702_v46  ;;  %v2706_v49 = vmul.f32 %v4864_v26, %v2702_v46  ;;  %v2708_v50 = vmul.f32 %v4867_v27, %v2702_v46  ;;  %v2710_v53 = vmul.f32 %v4870_v32, %v2702_v46 }
0x1078   : > { %v2555_v55 = vpop.f32.mrb[40].mxu0 }
0x1079   : > { %v3841_v59 = vpop.f32.mrb[41].mxu0  ;;  %v2712_v58 = vpack.c.bf16 %v2706_v49, %v2705_v48  ;;  %v2711_v61 = vpack.c.bf16 %v2704_v8, %v2703_v41  ;;  %v2713_v62 = vpack.c.bf16 %v2708_v50, %v2707_v42  ;;  %v2714_v63 = vpack.c.bf16 %v2710_v53, %v2709_v45 }
0x107a   : > { %v2558_v12 = vpop.f32.mrb[42].mxu0  ;;  %v2556_v37 = vadd.f32 %v2555_v55, %v2503_v35 }
0x107b   : > { %v2559_v2 = vadd.f32 %v2558_v12, %v2503_v35  ;;  %v3842_v6 = vpop.f32.mrb[43].mxu0  ;;  %3853 = vmatprep.mubr.msk.bf16.mxu1 %vm793_vm9, %v2711_v61 }
0x107d   : > { %v2715_v5 = vpack.c.bf16 %v2559_v2, %v2556_v37 }
0x107f   : > { %3906 = vmatprep.subr.msk.bf16.mxu1 %vm793_vm9, %v2715_v5  ;;  %v2729_v7 = vsel %vm793_vm9, %v2715_v5, 0 }
0x1080   : > { %3852 = vmatpush3.bf16.xpose.msra.mxu1 %v2729_v7 }
0x1081   : > { %3871 = vmatprep.subr.bf16.mxu1 %v4348_v1 }
0x1087   : > { %3854 = vmatmul.mubr.msk.bf16.vlgmr.msra.gmra.mrb[28].mxu1 %vm793_vm9, %v2712_v58 }
0x1088   : > { %3857 = vmatprep.mubr.msk.bf16.mxu1 %vm793_vm9, %v2713_v62 }
0x108f   : > { %3858 = vmatmul.mubr.msk.bf16.gmra.mrb[32].mxu1 %vm793_vm9, %v2714_v63 }
0x1090   : > { %3875 = vmatprep.mubr.msk.bf16.mxu1 %vm4349_vm0, %v4348_v1 }
0x110d   : > { %v2694_v11 = vpop.f32.mrb[44].mxu0 }
0x110e   : > { %v3849_v39 = vpop.f32.mrb[45].mxu0  ;;  %v2695_v29 = vadd.f32 %v2694_v11, %v2642_v44 }
0x110f   : > { %v2697_v16 = vpop.f32.mrb[46].mxu0 }
0x1110   : > { %v2698_v14 = vadd.f32 %v2697_v16, %v2642_v44  ;;  %v3850_v33 = vpop.f32.mrb[47].mxu0 }
0x1112   : > { %v2904_v21 = vpack.c.bf16 %v2698_v14, %v2695_v29 }
0x1114   : > { %3861 = vmatprep.subr.bf16.mxu0 %v2904_v21 }
0x1115   : > { %3862 = vmatpush3.bf16.msra.mxu0 %v2904_v21 }
0x1116   : > { %3879 = vmatprep.subr.bf16.mxu0 %v4348_v1 }
0x115a   : > { %v3855_v15 = vpop.f32.mrb[28].mxu1 }
0x115b   : > { %v2765_v34 = vpop.f32.mrb[29].mxu1  ;;  %v2798_v25 = vsel %vm4891_vm4, %v3855_v15, -1e+30 }
0x115c   : > { %v2796_v19 = vsel %vm4891_vm4, %v2765_v34, -1e+30  ;;  %v3856_v40 = vpop.f32.mrb[30].mxu1  ;;  %v2810_v36 = vsel %vm585_vm2, %v2798_v25, -inf }
0x115d   : > { %v2768_v9 = vpop.f32.mrb[31].mxu1  ;;  %v2804_v20 = vsel %vm585_vm2, %v2796_v19, -inf  ;;  %v2799_v23 = vsel %vm4891_vm4, %v3856_v40, -1e+30 }
0x115e   : > { %v2797_v0 = vsel %vm4891_vm4, %v2768_v9, -1e+30  ;;  %2805 = vmax.xlane.f32.xlu1 %v2804_v20  ;;  %v2813_v60 = vsel %vm585_vm2, %v2799_v23, -inf }
0x115f   : > { %v2807_v17 = vsel %vm585_vm2, %v2797_v0, -inf }
0x1160   : > { %2808 = vmax.xlane.f32.xlu0 %v2807_v17 }
0x1162   : > { %2811 = vmax.xlane.f32.xlu1 %v2810_v36  ;;  %v3859_v3 = vpop.f32.mrb[32].mxu1 }
0x1163   : > { %v2781_v24 = vpop.f32.mrb[33].mxu1  ;;  %v2802_v46 = vsel %vm4891_vm4, %v3859_v3, -1e+30 }
0x1164   : > { %v2800_v52 = vsel %vm4891_vm4, %v2781_v24, -1e+30  ;;  %2814 = vmax.xlane.f32.xlu0 %v2813_v60  ;;  %v3860_v22 = vpop.f32.mrb[34].mxu1  ;;  %v2822_v42 = vsel %vm585_vm2, %v2802_v46, -inf }
0x1165   : > { %v2784_v30 = vpop.f32.mrb[35].mxu1  ;;  %v2816_v31 = vsel %vm585_vm2, %v2800_v52, -inf  ;;  %v2803_v48 = vsel %vm4891_vm4, %v3860_v22, -1e+30 }
0x1166   : > { %v2801_v35 = vsel %vm4891_vm4, %v2784_v30, -1e+30  ;;  %2817 = vmax.xlane.f32.xlu1 %v2816_v31  ;;  %v2825_v45 = vsel %vm585_vm2, %v2803_v48, -inf }
0x1167   : > { %v2819_v41 = vsel %vm585_vm2, %v2801_v35, -inf }
0x1168   : > { %2820 = vmax.xlane.f32.xlu0 %v2819_v41 }
0x116a   : > { %2823 = vmax.xlane.f32.xlu1 %v2822_v42 }
0x116c   : > { %2826 = vmax.xlane.f32.xlu0 %v2825_v45 }
0x11eb   : > { %v2806_v8 = vpop.xlane.xlu1 %2805 }
0x11ec   : > { %v2828_v49 = vsub.f32 %v2796_v19, %v2806_v8 }
0x11ed   : > { %v2809_v50 = vpop.xlane.xlu0 %2808 }
0x11ee   : > { %v2836_v53 = vmul.f32 1.442695, %v2828_v49  ;;  %v2829_v55 = vsub.f32 %v2797_v0, %v2809_v50 }
0x11ef   : > { %v2812_v59 = vpop.xlane.xlu1 %2811 }
0x11f0   : > { %4129 = vpow2.f32 %v2836_v53  ;;  %v2838_v58 = vmul.f32 1.442695, %v2829_v55  ;;  %v2830_v12 = vsub.f32 %v2798_v25, %v2812_v59 }
0x11f1   : > { %v2815_v61 = vpop.xlane.xlu0 %2814 }
0x11f2   : > { %4131 = vpow2.f32 %v2838_v58  ;;  %v2840_v10 = vmul.f32 1.442695, %v2830_v12  ;;  %v2831_v62 = vsub.f32 %v2799_v23, %v2815_v61 }
0x11f3   : > { %v2818_v63 = vpop.xlane.xlu1 %2817 }
0x11f4   : > { %4133 = vpow2.f32 %v2840_v10  ;;  %v2842_v37 = vmul.f32 1.442695, %v2831_v62  ;;  %v2832_v2 = vsub.f32 %v2800_v52, %v2818_v63 }
0x11f5   : > { %v2821_v6 = vpop.xlane.xlu0 %2820 }
0x11f6   : > { %4135 = vpow2.f32 %v2842_v37  ;;  %v2844_v5 = vmul.f32 1.442695, %v2832_v2  ;;  %v2833_v7 = vsub.f32 %v2801_v35, %v2821_v6 }
0x11f7   : > { %v2824_v44 = vpop.xlane.xlu1 %2823 }
0x11f8   : > { %4137 = vpow2.f32 %v2844_v5  ;;  %v2846_v11 = vmul.f32 1.442695, %v2833_v7  ;;  %v2834_v39 = vsub.f32 %v2802_v46, %v2824_v44 }
0x11f9   : > { %v2827_v16 = vpop.xlane.xlu0 %2826 }
0x11fa   : > { %v4130_v29 = vpop.eup %4129  ;;  %4139 = vpow2.f32 %v2846_v11  ;;  %v2848_v14 = vmul.f32 1.442695, %v2834_v39  ;;  %v2835_v33 = vsub.f32 %v2803_v48, %v2827_v16 }
0x11fb   : > { %v2852_v21 = vsel %vm585_vm2, %v4130_v29, 0.0 }
0x11fc   : > { %v4132_v15 = vpop.eup %4131  ;;  %4141 = vpow2.f32 %v2848_v14  ;;  %v2850_v34 = vmul.f32 1.442695, %v2835_v33  ;;  %2853 = vadd.xlane.f32.xlu1 %v2852_v21 }
0x11fd   : > { %v2855_v19 = vsel %vm585_vm2, %v4132_v15, 0.0 }
0x11fe   : > { %v4134_v40 = vpop.eup %4133  ;;  %4143 = vpow2.f32 %v2850_v34  ;;  %2856 = vadd.xlane.f32.xlu0 %v2855_v19  ;;  %v4006_v19 = vld [vmem:[%s5357_s9 + $0x70] sm:$0xff]  }
0x11ff   : > { %v2858_v9 = vsel %vm585_vm2, %v4134_v40, 0.0  ;;  %3872 = vmatpush3.bf16.msra.mxu1 %v4006_v19 }
0x1200   : > { %v4136_v20 = vpop.eup %4135  ;;  %2859 = vadd.xlane.f32.xlu1 %v2858_v9  ;;  %3873 = vmatprep.subr.bf16.mxu1 %v4348_v1 }
0x1201   : > { %v2861_v25 = vsel %vm585_vm2, %v4136_v20, 0.0 }
0x1202   : > { %v4138_v0 = vpop.eup %4137  ;;  %2862 = vadd.xlane.f32.xlu0 %v2861_v25 }
0x1203   : > { %v2864_v17 = vsel %vm585_vm2, %v4138_v0, 0.0 }
0x1204   : > { %v4140_v23 = vpop.eup %4139  ;;  %2865 = vadd.xlane.f32.xlu1 %v2864_v17 }
0x1205   : > { %v2867_v36 = vsel %vm585_vm2, %v4140_v23, 0.0 }
0x1206   : > { %v4142_v3 = vpop.eup %4141  ;;  %2868 = vadd.xlane.f32.xlu0 %v2867_v36 }
0x1207   : > { %v2870_v24 = vsel %vm585_vm2, %v4142_v3, 0.0 }
0x1208   : > { %v4144_v60 = vpop.eup %4143  ;;  %2871 = vadd.xlane.f32.xlu1 %v2870_v24 }
0x1209   : > { %v2873_v52 = vsel %vm585_vm2, %v4144_v60, 0.0 }
0x120a   : > { %2874 = vadd.xlane.f32.xlu0 %v2873_v52 }
0x1289   : > { %v2854_v22 = vpop.xlane.xlu1 %2853 }
0x128a   : > { %4145 = vrcp.f32 %v2854_v22 }
0x128b   : > { %v2857_v30 = vpop.xlane.xlu0 %2856 }
0x128c   : > { %4147 = vrcp.f32 %v2857_v30 }
0x128d   : > { %v2860_v31 = vpop.xlane.xlu1 %2859 }
0x128e   : > { %4149 = vrcp.f32 %v2860_v31 }
0x128f   : > { %v2863_v46 = vpop.xlane.xlu0 %2862 }
0x1290   : > { %4151 = vrcp.f32 %v2863_v46 }
0x1291   : > { %v2866_v35 = vpop.xlane.xlu1 %2865 }
0x1292   : > { %4153 = vrcp.f32 %v2866_v35 }
0x1293   : > { %v2869_v41 = vpop.xlane.xlu0 %2868 }
0x1294   : > { %v4146_v48 = vpop.eup %4145  ;;  %4155 = vrcp.f32 %v2869_v41 }
0x1295   : > { %v2872_v42 = vpop.xlane.xlu1 %2871  ;;  %v2884_v45 = vmul.f32 %v4146_v48, %v4130_v29 }
0x1296   : > { %v4148_v8 = vpop.eup %4147  ;;  %4157 = vrcp.f32 %v2872_v42 }
0x1297   : > { %v2875_v49 = vpop.xlane.xlu0 %2874  ;;  %v2885_v50 = vmul.f32 %v4148_v8, %v4132_v15  ;;  %v2892_v59 = vmul.f32 %v4928_v47, %v2884_v45 }
0x1298   : > { %v4150_v53 = vpop.eup %4149  ;;  %4159 = vrcp.f32 %v2875_v49 }
0x1299   : > { %v2886_v55 = vmul.f32 %v4150_v53, %v4134_v40  ;;  %v2893_v58 = vmul.f32 %v4928_v47, %v2885_v50  ;;  %v4007_v40 = vld [vmem:[%s5357_s9 + $0x78] sm:$0x3f]  }
0x129a   : > { %v4152_v12 = vpop.eup %4151  ;;  %v3018_v9 = vsel %vm797_vm8, %v4007_v40, 0 }
0x129b   : > { %v2887_v61 = vmul.f32 %v4152_v12, %v4136_v20  ;;  %v2900_v10 = vpack.c.bf16 %v2893_v58, %v2892_v59  ;;  %v2894_v63 = vmul.f32 %v4928_v47, %v2886_v55  ;;  %3874 = vmatpush3.bf16.msra.mxu1 %v3018_v9 }
0x129c   : > { %v4154_v62 = vpop.eup %4153  ;;  %3887 = vmatprep.subr.bf16.mxu1 %v4348_v1 }
0x129d   : > { %v2895_v37 = vmul.f32 %v4928_v47, %v2887_v61  ;;  %3863 = vmatprep.mubr.msk.bf16.mxu0 %vm585_vm2, %v2900_v10  ;;  %v2888_v2 = vmul.f32 %v4154_v62, %v4138_v0  ;;  %v3064_v62 = vmul.f32 %v5036_v13, %v4654_v54 }
0x129e   : > { %v4156_v6 = vpop.eup %4155 }
0x129f   : > { %v2901_v5 = vpack.c.bf16 %v2895_v37, %v2894_v63  ;;  %v2889_v7 = vmul.f32 %v4156_v6, %v4140_v23  ;;  %v2896_v11 = vmul.f32 %v4928_v47, %v2888_v2 }
0x12a0   : > { %v4158_v44 = vpop.eup %4157 }
0x12a1   : > { %3864 = vmatmul.mubr.msk.bf16.vlgmr.msra.gmra.mrb[48].mxu0 %vm585_vm2, %v2901_v5  ;;  %v2897_v39 = vmul.f32 %v4928_v47, %v2889_v7  ;;  %v2890_v16 = vmul.f32 %v4158_v44, %v4142_v3 }
0x12a2   : > { %v4160_v29 = vpop.eup %4159 }
0x12a3   : > { %v2902_v14 = vpack.c.bf16 %v2897_v39, %v2896_v11  ;;  %v2891_v33 = vmul.f32 %v4160_v29, %v4144_v60  ;;  %v2898_v21 = vmul.f32 %v4928_v47, %v2890_v16  ;;  %v4008_v29 = vld [vmem:[%s5358_s10 + $0x10] sm:$0xff]  }
0x12a4   : > { %3880 = vmatpush3.bf16.msra.mxu0 %v4008_v29 }
0x12a5   : > { %3867 = vmatprep.mubr.msk.bf16.mxu0 %vm585_vm2, %v2902_v14  ;;  %v2899_v15 = vmul.f32 %v4928_v47, %v2891_v33  ;;  %v4009_v14 = vld [vmem:[%s5358_s10 + $0x18] sm:$0x3f]   ;;  %3881 = vmatprep.subr.bf16.mxu0 %v4348_v1 }
0x12a6   : > { %v3141_v33 = vsel %vm797_vm8, %v4009_v14, 0 }
0x12a7   : > { %v2903_v34 = vpack.c.bf16 %v2899_v15, %v2898_v21 }
0x12a8   : > { %3882 = vmatpush3.bf16.msra.mxu0 %v3141_v33 }
0x12a9   : > { %3868 = vmatmul.mubr.msk.bf16.gmra.mrb[52].mxu0 %vm585_vm2, %v2903_v34 }
0x12aa   : > { %3883 = vmatprep.mubr.msk.bf16.mxu0 %vm4349_vm0, %v4348_v1 }
0x1374   : > { %v3865_v47 = vpop.f32.mrb[48].mxu0 }
0x1375   : > { %v2986_v20 = vmul.f32 %v3865_v47, %v4864_v26  ;;  %v2951_v25 = vpop.f32.mrb[49].mxu0 }
0x1376   : > { %v2982_v0 = vmul.f32 %v4861_v51, %v2951_v25  ;;  %v3866_v17 = vpop.f32.mrb[50].mxu0 }
0x1377   : > { %v2987_v23 = vmul.f32 %v3866_v17, %v4864_v26  ;;  %v2954_v36 = vpop.f32.mrb[51].mxu0 }
0x1378   : > { %v2988_v3 = vadd.f32 %v2986_v20, %v2982_v0  ;;  %v2983_v24 = vmul.f32 %v4861_v51, %v2954_v36  ;;  %v3002_v51 = vrot.slane %v5182_v28, %v4818_v18 }
0x137a   : > { %v2989_v60 = vadd.f32 %v2987_v23, %v2983_v24 }
0x137c   : > { %v3869_v52 = vpop.f32.mrb[52].mxu0 }
0x137d   : > { %v2967_v22 = vpop.f32.mrb[53].mxu0  ;;  %v2994_v35 = vmul.f32 %v3869_v52, %v4870_v32 }
0x137e   : > { %v2990_v30 = vmul.f32 %v4867_v27, %v2967_v22  ;;  %v3870_v31 = vpop.f32.mrb[54].mxu0  ;;  %v3110_v22 = vrot.slane %v5182_v28, %v4803_v57  ;;  %v4011_v57 = vld [vmem:[%s5360_s12 + $0x40] sm:$0xff]  }
0x137f   : > { %v2970_v46 = vpop.f32.mrb[55].mxu0  ;;  %v2995_v45 = vmul.f32 %v3870_v31, %v4870_v32  ;;  %v3063_v32 = vmul.f32 %v5032_v38, %v4651_v43 }
0x1380   : > { %v2992_v41 = vadd.f32 %v2990_v30, %v2988_v3  ;;  %v2991_v48 = vmul.f32 %v4867_v27, %v2970_v46 }
0x1382   : > { %v2996_v42 = vadd.f32 %v2994_v35, %v2992_v41  ;;  %v2993_v26 = vadd.f32 %v2991_v48, %v2989_v60  ;;  %v3116_v41 = vrot.slane %v5182_v28, %v4809_v4  ;;  %v4012_v4 = vld [vmem:[%s5360_s12 + $0x48] sm:$0xff]  }
0x1384   : > { %v2997_v8 = vadd.f32 %v2995_v45, %v2993_v26 }
0x1386   : > { %v2998_v49 = vpack.c.bf16 %v2997_v8, %v2996_v42  ;;  %v4010_v8 = vld [vmem:[%s5360_s12 + $0x38] sm:$0xff]  }
0x1388   : > { %3876 = vmatmul.mubr.msk.bf16.vlgmr.msra.gmra.mrb[36].mxu1 %vm793_vm9, %v2998_v49  ;;  %v4013_v49 = vld [vmem:[%s5360_s12 + $0x50] sm:$0xff]  }
0x1389   : > { %3901 = vmatprep.mubr.msk.bf16.mxu1 %vm4349_vm0, %v4348_v1  ;;  %3888 = vmatpush3.bf16.msra.mxu1 %v4010_v8 }
0x138a   : > { %3889 = vmatprep.subr.bf16.mxu1 %v4348_v1 }
0x138d   : > { %3890 = vmatpush3.bf16.msra.mxu1 %v4011_v57 }
0x138e   : > { %3891 = vmatprep.subr.bf16.mxu1 %v4348_v1 }
0x1391   : > { %3892 = vmatpush3.bf16.msra.mxu1 %v4012_v4 }
0x1392   : > { %3893 = vmatprep.subr.bf16.mxu1 %v4348_v1 }
0x1395   : > { %3894 = vmatpush3.bf16.msra.mxu1 %v4013_v49 }
0x1396   : > { %3895 = vmatprep.subr.bf16.mxu1 %v4348_v1 }
0x145b   : > { %v3054_v50 = vpop.f32.mrb[36].mxu1 }
0x145c   : > { %v3055_v53 = vadd.f32 %v3054_v50, %v3002_v51  ;;  %v3877_v55 = vpop.f32.mrb[37].mxu1  ;;  %v4015_v50 = vld [vmem:[%s5360_s12 + $0x60] sm:$0xff]  }
0x145d   : > { %v3057_v59 = vpop.f32.mrb[38].mxu1  ;;  %v3609_v55 = vld [vmem:[#allocation9 + $0x1] ss:$0 sm:$0xff] }
0x145e   : > { %v3061_v27 = vmul.f32 %v3055_v53, %v4651_v43  ;;  %v3058_v58 = vadd.f32 %v3057_v59, %v3002_v51  ;;  %v3878_v12 = vpop.f32.mrb[39].mxu1  ;;  %v4014_v51 = vld [vmem:[%s5360_s12 + $0x58] sm:$0xff]   ;;  %v4016_v53 = vld [vmem:[%s5360_s12 + $0x68] sm:$0xff]  }
0x145f   : > { %3896 = vmatpush3.bf16.msra.mxu1 %v4014_v51 }
0x1460   : > { %v5279_v61 = vadd.f32 %v3063_v32, %v3061_v27  ;;  %v3062_v10 = vmul.f32 %v3058_v58, %v4654_v54  ;;  %3897 = vmatprep.subr.bf16.mxu1 %v4348_v1 }
0x1462   : > { %v5284_v63 = vadd.f32 %v3064_v62, %v3062_v10  ;;  %v3067_v18 = vsel %vm793_vm9, %v5279_v61, 0.0 }
0x1463   : > { %3068 = vadd.xlane.f32.xlu1 %v3067_v18  ;;  %3898 = vmatpush3.bf16.msra.mxu1 %v4015_v50 }
0x1464   : > { %v3070_v37 = vsel %vm793_vm9, %v5284_v63, 0.0  ;;  %3899 = vmatprep.subr.bf16.mxu1 %v4348_v1 }
0x1465   : > { %3071 = vadd.xlane.f32.xlu0 %v3070_v37 }
0x1467   : > { %3900 = vmatpush3.bf16.msra.mxu1 %v4016_v53 }
0x14f0   : > { %v3069_v38 = vpop.xlane.xlu1 %3068 }
0x14f1   : > { %v3073_v2 = vmul.f32 0.035714287, %v3069_v38 }
0x14f2   : > { %v3072_v6 = vpop.xlane.xlu0 %3071 }
0x14f3   : > { %v3075_v5 = vsub.f32 %v5279_v61, %v3073_v2  ;;  %v3074_v7 = vmul.f32 0.035714287, %v3072_v6 }
0x14f5   : > { %v3076_v44 = vsub.f32 %v5284_v63, %v3074_v7  ;;  %v3077_v11 = vmul.f32 %v3075_v5, %v3075_v5 }
0x14f7   : > { %v3079_v13 = vsel %vm793_vm9, %v3077_v11, 0.0  ;;  %v3078_v39 = vmul.f32 %v3076_v44, %v3076_v44 }
0x14f8   : > { %3080 = vadd.xlane.f32.xlu1 %v3079_v13 }
0x14f9   : > { %v3082_v16 = vsel %vm793_vm9, %v3078_v39, 0.0 }
0x14fa   : > { %3083 = vadd.xlane.f32.xlu0 %v3082_v16 }
0x1585   : > { %v3081_v21 = vpop.xlane.xlu1 %3080 }
0x1586   : > { %v3085_v15 = vmul.f32 0.035714287, %v3081_v21 }
0x1587   : > { %v3084_v34 = vpop.xlane.xlu0 %3083 }
0x1588   : > { %v3087_v19 = vadd.f32 1e-05, %v3085_v15  ;;  %v3086_v40 = vmul.f32 0.035714287, %v3084_v34 }
0x158a   : > { %4161 = vrsqrt.f32 %v3087_v19  ;;  %v3088_v9 = vadd.f32 1e-05, %v3086_v40  ;;  %vm3091_vm0 = vcmp.eq.f32.partialorder %v3087_v19, inf  ;;  %v3094_v25 = vand.u32 2147483648, %v3087_v19 }
0x158b   : > { %vm3093_vm2 = vcmp.eq.f32.partialorder %v3087_v19, 0.0 }
0x158c   : > { %4163 = vrsqrt.f32 %v3088_v9  ;;  %vm3098_vm8 = vcmp.eq.f32.partialorder %v3088_v9, inf  ;;  %v3101_v3 = vand.u32 2147483648, %v3088_v9  ;;  %vm3100_vm4 = vcmp.eq.f32.partialorder %v3088_v9, 0.0 }
0x1594   : > { %v4162_v47 = vpop.eup %4161 }
0x1595   : > { %v3090_v20 = vmul.f32 %v4162_v47, %v3087_v19 }
0x1596   : > { %v4164_v0 = vpop.eup %4163 }
0x1597   : > { %v3092_v17 = vsel %vm3091_vm0, %v3087_v19, %v3090_v20  ;;  %v3097_v36 = vmul.f32 %v4164_v0, %v3088_v9 }
0x1598   : > { %v3095_v23 = vsel %vm3093_vm2, %v3094_v25, %v3092_v17 }
0x1599   : > { %4165 = vrcp.f32 %v3095_v23  ;;  %v3099_v24 = vsel %vm3098_vm8, %v3088_v9, %v3097_v36 }
0x159a   : > { %v3102_v60 = vsel %vm3100_vm4, %v3101_v3, %v3099_v24 }
0x159b   : > { %4167 = vrcp.f32 %v3102_v60 }
0x15a3   : > { %v4166_v52 = vpop.eup %4165 }
0x15a4   : > { %v3104_v30 = vmul.f32 %v4166_v52, %v3075_v5 }
0x15a5   : > { %v4168_v31 = vpop.eup %4167 }
0x15a6   : > { %v3106_v46 = vmul.f32 %v4168_v31, %v3076_v44  ;;  %v3111_v35 = vmul.f32 %v3110_v22, %v3104_v30 }
0x15a8   : > { %v3112_v48 = vmul.f32 %v3110_v22, %v3106_v46  ;;  %v3117_v42 = vadd.f32 %v3116_v41, %v3111_v35 }
0x15aa   : > { %v3118_v45 = vadd.f32 %v3116_v41, %v3112_v48 }
0x15ac   : > { %v3119_v26 = vpack.c.bf16 %v3118_v45, %v3117_v42 }
0x15ae   : > { %3884 = vmatmul.mubr.msk.bf16.vlgmr.msra.gmra.mrb[56].mxu0 %vm793_vm9, %v3119_v26 }
0x1681   : > { %v3177_v59 = vpop.f32.mrb[56].mxu0 }
0x1682   : > { %v3178_v27 = vadd.f32 %v3609_v55, %v3177_v59  ;;  %v3885_v32 = vpop.f32.mrb[57].mxu0 }
0x1683   : > { %v3180_v58 = vpop.f32.mrb[58].mxu0 }
0x1684   : > { %v3184_v12 = vmul.f32 0.70710677, %v3178_v27  ;;  %v3181_v10 = vadd.f32 %v3609_v55, %v3180_v58  ;;  %v3886_v62 = vpop.f32.mrb[59].mxu0  ;;  %v3232_v57 = vmul.f32 0.5, %v3178_v27  ;;  %v3242_v55 = vrot.slane %v5182_v28, %v4836_v56 }
0x1686   : > { %v3186_v18 = vand.u32 2147483647, %v3184_v12  ;;  %v3185_v37 = vmul.f32 0.70710677, %v3181_v10  ;;  %vm3226_vm13 = vcmp.ge.f32.partialorder %v3184_v12, 0.0  ;;  %v3233_v4 = vmul.f32 0.5, %v3181_v10 }
0x1688   : > { %v3188_v38 = vmul.f32 0.3275911, %v3186_v18  ;;  %v3187_v2 = vand.u32 2147483647, %v3185_v37  ;;  %v3214_v7 = vsub.f32 0.0, %v3186_v18  ;;  %vm3227_vm14 = vcmp.ge.f32.partialorder %v3185_v37, 0.0 }
0x168a   : > { %v3190_v6 = vadd.f32 1.0, %v3188_v38  ;;  %v3189_v5 = vmul.f32 0.3275911, %v3187_v2  ;;  %v3215_v44 = vsub.f32 0.0, %v3187_v2  ;;  %v3216_v13 = vmul.f32 %v3214_v7, %v3186_v18 }
0x168c   : > { %4169 = vrcp.f32 %v3190_v6  ;;  %v3191_v1 = vadd.f32 1.0, %v3189_v5  ;;  %v3217_v14 = vmul.f32 %v3215_v44, %v3187_v2  ;;  %v3218_v33 = vmul.f32 1.442695, %v3216_v13 }
0x168e   : > { %4171 = vrcp.f32 %v3191_v1  ;;  %v3220_v40 = vmul.f32 1.442695, %v3217_v14 }
0x168f   : > { %4173 = vpow2.f32 %v3218_v33 }
0x1690   : > { %4175 = vpow2.f32 %v3220_v40 }
0x1696   : > { %v4170_v11 = vpop.eup %4169 }
0x1697   : > { %v3196_v39 = vmul.f32 1.0614054, %v4170_v11 }
0x1698   : > { %v4172_v16 = vpop.eup %4171 }
0x1699   : > { %v3198_v29 = vadd.f32 -1.4531521, %v3196_v39  ;;  %v3197_v21 = vmul.f32 1.0614054, %v4172_v16  ;;  %v4174_v60 = vpop.eup %4173 }
0x169a   : > { %v4176_v31 = vpop.eup %4175 }
0x169b   : > { %v3200_v15 = vmul.f32 %v4170_v11, %v3198_v29  ;;  %v3199_v34 = vadd.f32 -1.4531521, %v3197_v21 }
0x169d   : > { %v3202_v19 = vadd.f32 1.4214138, %v3200_v15  ;;  %v3201_v9 = vmul.f32 %v4172_v16, %v3199_v34 }
0x169f   : > { %v3204_v47 = vmul.f32 %v4170_v11, %v3202_v19  ;;  %v3203_v20 = vadd.f32 1.4214138, %v3201_v9 }
0x16a1   : > { %v3206_v25 = vadd.f32 -0.28449672, %v3204_v47  ;;  %v3205_v0 = vmul.f32 %v4172_v16, %v3203_v20 }
0x16a3   : > { %v3208_v17 = vmul.f32 %v4170_v11, %v3206_v25  ;;  %v3207_v23 = vadd.f32 -0.28449672, %v3205_v0 }
0x16a5   : > { %v3210_v36 = vadd.f32 0.2548296, %v3208_v17  ;;  %v3209_v3 = vmul.f32 %v4172_v16, %v3207_v23 }
0x16a7   : > { %v3212_v24 = vmul.f32 %v4170_v11, %v3210_v36  ;;  %v3211_v52 = vadd.f32 0.2548296, %v3209_v3 }
0x16a9   : > { %v3222_v22 = vmul.f32 %v4174_v60, %v3212_v24  ;;  %v3213_v30 = vmul.f32 %v4172_v16, %v3211_v52 }
0x16ab   : > { %v3224_v46 = vsub.f32 1.0, %v3222_v22  ;;  %v3223_v35 = vmul.f32 %v4176_v31, %v3213_v30 }
0x16ad   : > { %v3228_v41 = vsub.f32 0.0, %v3224_v46  ;;  %v3225_v48 = vsub.f32 1.0, %v3223_v35 }
0x16af   : > { %v3230_v42 = vsel %vm3226_vm13, %v3224_v46, %v3228_v41  ;;  %v3229_v45 = vsub.f32 0.0, %v3225_v48 }
0x16b0   : > { %v3234_v26 = vadd.f32 1.0, %v3230_v42 }
0x16b1   : > { %v3231_v8 = vsel %vm3227_vm14, %v3225_v48, %v3229_v45 }
0x16b2   : > { %v3235_v49 = vadd.f32 1.0, %v3231_v8  ;;  %v3236_v51 = vmul.f32 %v3234_v26, %v3232_v57 }
0x16b4   : > { %v3237_v50 = vmul.f32 %v3235_v49, %v3233_v4 }
0x16b6   : > { %v3238_v53 = vpack.c.bf16 %v3237_v50, %v3236_v51 }
0x16b8   : > { %3902 = vmatmul.mubr.msk.bf16.vlgmr.msra.gmra.mrb[40].mxu1 %vm2122_vm15, %v3238_v53 }
0x178b   : > { %v3322_v59 = vpop.f32.mrb[40].mxu1 }
0x178c   : > { %v3323_v32 = vadd.f32 %v3322_v59, %v3242_v55  ;;  %v3903_v58 = vpop.f32.mrb[41].mxu1 }
0x178d   : > { %v3325_v12 = vpop.f32.mrb[42].mxu1 }
0x178e   : > { %v3329_v62 = vmul.f32 %v3323_v32, %v4651_v43  ;;  %v3326_v18 = vadd.f32 %v3325_v12, %v3242_v55  ;;  %v3904_v27 = vpop.f32.mrb[43].mxu1 }
0x1790   : > { %v3331_v10 = vadd.f32 %v3329_v62, %v5279_v61  ;;  %v3330_v37 = vmul.f32 %v3326_v18, %v4654_v54 }
0x1792   : > { %3336 = vst.msk [vmem:[%s4594_s23] sm:$0xff] %vm793_vm9, %v3331_v10  ;;  %v3332_v38 = vadd.f32 %v3330_v37, %v5284_v63 }
0x1794   : > { %3337 = vst.msk [vmem:[%s4594_s23 + $0x8] sm:$0xff] %vm793_vm9, %v3332_v38 }
0x1795 PF: > { %s5384_s3 = sld [smem:[#allocation13_spill]] }
0x179b   : > { %s26_s25 = sadd.s32 1, %s5384_s3  }
0x179c   : > { %p23_p6 = scmp.ge.s32.totalorder %s26_s25, 4  }
0x179e   :  { %25 = sbr.rel (!%p23_p6) target bundleno = 5 (0x5), region = 145 }
0x17a5   :  { %3359 = vsyncpa [#allocation3], 1 }
0x17a6   :  { %3361 = vsyncpa [#allocation3 + $0x1], 1 }
0x17a7   :  { %3362 = vsyncpa [#allocation5], 1 }
0x17a8   :  { %3363 = vsyncpa [#allocation8], 1 }

// kernel: backbone_forward.3
= control target key start
LH: loop header
LB: loop body
LE: loop exit
PB: predicated region body
PF: predicated region fallthrough
CT: control target
= control target key end

     0   :  { %s6243_s0 = inlined_call_operand.vmem [shape: f32[2,16,32], index: 0, kind: input, shape index: {}]   ;;  %s6244_s1 = inlined_call_operand.vmem [shape: f32[2,128,4], index: 1, kind: input, shape index: {}]   ;;  %s6245_s2 = inlined_call_operand.vmem [shape: f32[2,128,4], index: 2, kind: input, shape index: {}]   ;;  %s6246_s3 = inlined_call_operand.vmem [shape: bf16[2,128,128], index: 3, kind: input, shape index: {}]   ;;  %s6247_s4 = inlined_call_operand.vmem [shape: f32[2,8,1], index: 4, kind: input, shape index: {}]   ;;  %s6248_s5 = inlined_call_operand.vmem [shape: f32[2,1,8], index: 5, kind: input, shape index: {}]   ;;  %s6249_s6 = inlined_call_operand.vmem [shape: f32[2,4,1], index: 6, kind: input, shape index: {}]   ;;  %s6250_s7 = inlined_call_operand.vmem [shape: f32[2,1,4], index: 7, kind: input, shape index: {}]   ;;  %s6251_s8 = inlined_call_operand.vmem [shape: f32[4,4], index: 8, kind: input, shape index: {}]   ;;  %s6252_s9 = inlined_call_operand.vmem [shape: f32[1,4], index: 9, kind: input, shape index: {}]   ;;  %s6253_s10 = inlined_call_operand.vmem [shape: f32[4,32], index: 10, kind: input, shape index: {}]   ;;  %s6254_s11 = inlined_call_operand.vmem [shape: f32[2,15,32], index: 11, kind: input, shape index: {}]   ;;  %s6255_s12 = inlined_call_operand.vmem [shape: f32[2,3,3,32], index: 12, kind: input, shape index: {}]   ;;  %s6256_s13 = inlined_call_operand.vmem [shape: bf16[2,4,32,32], index: 13, kind: input, shape index: {}]   ;;  %s6257_s14 = inlined_call_operand.vmem [shape: bf16[2,32,128], index: 14, kind: input, shape index: {}]   ;;  %s6258_s15 = inlined_call_operand.vmem [shape: f32[2,1,128], index: 15, kind: input, shape index: {}]   ;;  %s6259_s16 = inlined_call_operand.vmem [shape: bf16[2,128,32], index: 16, kind: input, shape index: {}]   ;;  %s6260_s17 = inlined_call_operand.hbm [shape: f32[2,16,32], index: 17, kind: output, shape index: {0}]   ;;  %s6261_s18 = inlined_call_operand.hbm [shape: f32[2,8,32], index: 18, kind: output, shape index: {1}]   ;;  %s6262_s19 = inlined_call_operand.hbm [shape: f32[2,4,32], index: 19, kind: output, shape index: {2}]  }
   0x1   :  { %6276 = sst [smem:[#allocation15_spill]] %s6243_s0 }
   0x2   :  { %6277 = sst [smem:[#allocation16_spill]] %s6244_s1 }
   0x3   :  { %6278 = sst [smem:[#allocation17_spill]] %s6245_s2 }
   0x4   :  { %6279 = sst [smem:[#allocation18_spill]] %s6246_s3 }
   0x5   :  { %6280 = sst [smem:[#allocation19_spill]] %s6251_s8 }
   0x6   :  { %6281 = sst [smem:[#allocation20_spill]] %s6262_s19 }
   0x7   :  { %25 = vsyncpa [#allocation3], 0 }
   0x8   :  { %27 = vsyncpa [#allocation3 + $0x1], 0 }
   0x9   :  { %28 = vsyncpa [#allocation5], 0 }
   0xa   :  { %30 = vsyncpa [#allocation5 + $0x1], 0  ;;  %s5299_s0 = smov 0   ;;  %s5301_s30 = smov 0  }
   0xb   :  { %s5303_s20 = smov 0   ;;  %s5305_s21 = smov 0  }
   0xc LB: > { %6282 = sst [smem:[#allocation9_spill]] %s5175_s0  ;;  %s5320_s1 = sadd.s32 4294967295, %s5187_s21   ;;  %s5187_s21 = sphi %s5305_s21, %s6310_s21   ;;  %s5183_s20 = sphi %s5303_s20, %s6312_s20   ;;  %s5179_s30 = sphi %s5301_s30, %s6314_s30   ;;  %s5175_s0 = sphi %s5299_s0, %s6313_s0  }
   0xd   : > { %6283 = sst [smem:[#allocation10_spill]] %s5183_s20  ;;  %s6263_s22 = sadd.s32 4294967294, %s5187_s21  }
   0xe   : > { %6284 = sst [smem:[#allocation11_spill]] %s5187_s21  ;;  %s5324_s2 = sadd.s32 1, %s5187_s21  }
   0xf   : > { %6285 = sst [smem:[#allocation12_spill]] %s5324_s2  ;;  %s440_s23 = sadd.s32 1, %s5183_s20 }
  0x10   : > { %s437_s24 = ssub.s32 %s5187_s21, %s5324_s2  ;;  %p450_p0 = scmp.ne.s32.totalorder %s5183_s20, %s5179_s30 }
  0x11   : > { %p438_p1 = scmp.eq.s32.totalorder %s437_s24, 0  ;;  %p451_p2 = scmp.eq.s32.totalorder %s5320_s1, 1 }
  0x12   : > { %p456_p3 = scmp.ne.s32.totalorder %s5179_s30, %s5175_s0  ;;  %p457_p4 = scmp.eq.s32.totalorder %s6263_s22, 1 }
  0x13   : > { %s5337_s25 = scalar_select %p438_p1, %s5183_s20, %s440_s23  }
  0x14   : > { %p5339_p5 = por %p451_p2, %p450_p0  ;;  %p5343_p6 = por %p457_p4, %p456_p3 }
  0x15   : > { %6286 = sst [smem:[#allocation13_spill]] %s5337_s25  ;;  %p4151_p7 = scmp.ge.s32.totalorder %s5187_s21, 1 }
  0x16   : > { %s6288_s26 = scalar_select %p5343_p6, 1, 0 }
  0x17   : > { %p612_p8 = scmp.lt.s32.totalorder %s5187_s21, 3 }
  0x18   : > { %6289 = sst [smem:[#allocation14_spill]] %s6288_s26 }
  0x19   : > { %p613_p9 = pnand %p4151_p7, %p612_p8 }
  0x1a   : > { %s6290_s8 = sld [smem:[#allocation19_spill]] (!%p613_p9)  ;;  %vm815_vm0 = vcmask (!%p613_p9), 1043456   ;;  %p707_p10 = scmp.lt.s32.totalorder (!%p613_p9), %s5320_s1, 1  ;;  %vm6273_vm1 = vcmask (!%p613_p9), 31744   ;;  %v5415_v18 = vld [vmem:[%s6252_s9] ss:$0 sm:$0xff] (!%p613_p9) }
  0x1b   : > { %616 = sbr.rel (%p613_p9) target bundleno = 6827 (0x1aab), region = 88  ;;  %s6291_s25 = sld [smem:[#allocation16_spill]] (!%p613_p9)  ;;  %vm5191_vm8 = vmmov (!%p613_p9), 0   ;;  %vm1476_vm9 = vcmask (!%p613_p9), 261120   ;;  %vm1595_vm11 = vcmask (!%p613_p9), 130048  }
  0x1c   : > { %s6292_s24 = sld [smem:[#allocation18_spill]] (!%p613_p9)  ;;  %s6294_s26 = sld [smem:[#allocation17_spill]] (!%p613_p9) }
  0x1d   : > { %s5501_s20 = sand.u32 (!%p613_p9), 1, %s5179_s30  }
  0x20   : > { %v758_v0 = vld [vmem:[%s6290_s8] sm:$0xf] (!%p613_p9) }
  0x21   : > { %4508 = vmatprep.subr.msk.mxu1 (!%p613_p9), %vm815_vm0, %v758_v0 }
  0x22   : > { %4509 = vmatpush3.msk.msra.mxu1 %vm815_vm0, %v758_v0  ;;  %s5356_s29 = scalar_select %p707_p10, %s5320_s1, 1 }
  0x24   : > { %s6264_s23 = sshll.u32 %s5356_s29, 7  ;;  %s4359_s22 = sshll.u32 %s5356_s29, 6 }
  0x25   : > { %s5364_s27 = scalar_lea.vmem %s6291_s25, %s6264_s23  ;;  %s5402_s23 = scalar_lea.vmem %s6292_s24, %s4359_s22 }
  0x26   : > { %v742_v1 = vld [vmem:[%s5364_s27] sm:$0xff]  ;;  %v743_v2 = vld [vmem:[%s5364_s27 + $0x8] sm:$0xff]  ;;  %v744_v3 = vld [vmem:[%s5364_s27 + $0x10] sm:$0xff]  ;;  %s6293_s8 = sshll.u32 %s5356_s29, 7  ;;  %s4163_s25 = sshll.u32 %s5356_s29, 3 }
  0x27   : > { %4510 = vmatprep.mubr.msk.f32.mxu1 %vm6273_vm1, %v742_v1  ;;  %v745_v4 = vld [vmem:[%s5364_s27 + $0x18] sm:$0xff]  ;;  %v746_v5 = vld [vmem:[%s5364_s27 + $0x20] sm:$0xff]  ;;  %v747_v6 = vld [vmem:[%s5364_s27 + $0x28] sm:$0xff]  ;;  %s5410_s0 = scalar_lea.vmem %s6294_s26, %s6293_s8  ;;  %s6295_s26 = sld [smem:[#allocation15_spill]] }
  0x28   : > { %4511 = vmatmul.mubr.msk.f32.vlgmr.msra.gmra.mrb[0].mxu1 %vm6273_vm1, %v743_v2  ;;  %v748_v7 = vld [vmem:[%s5364_s27 + $0x30] sm:$0xff]  ;;  %v749_v8 = vld [vmem:[%s5364_s27 + $0x38] sm:$0xff]  ;;  %v750_v9 = vld [vmem:[%s5364_s27 + $0x40] sm:$0xff]  ;;  %s730_s8 = scalar_lea.vmem %s6247_s4, %s4163_s25  ;;  %s733_s21 = scalar_lea.vmem %s6248_s5, %s5356_s29 }
  0x29   : > { %4513 = vmatprep.mubr.msk.f32.mxu1 %vm6273_vm1, %v744_v3  ;;  %v751_v10 = vld [vmem:[%s5364_s27 + $0x48] sm:$0xff]  ;;  %v752_v11 = vld [vmem:[%s5364_s27 + $0x50] sm:$0xff]  ;;  %v753_v12 = vld [vmem:[%s5364_s27 + $0x58] sm:$0xff]  ;;  %s4153_s25 = sshll.u32 %s5501_s20, 3  ;;  %s4164_s24 = sshll.u32 %s5356_s29, 2 }
  0x2a   : > { %v754_v13 = vld [vmem:[%s5364_s27 + $0x60] sm:$0xff]  ;;  %v755_v14 = vld [vmem:[%s5364_s27 + $0x68] sm:$0xff]  ;;  %v756_v15 = vld [vmem:[%s5364_s27 + $0x70] sm:$0xff]  ;;  %s5839_s28 = scalar_lea.vmem [#allocation4], %s4153_s25 }
  0x2b   : > { %v757_v16 = vld [vmem:[%s5364_s27 + $0x78] sm:$0xff]  ;;  %v4925_v17 = vld [vmem:[%s5402_s23] sm:$0xff]   ;;  %v965_v20 = vld [vmem:[%s5410_s0 + $0x8] sm:$0xff]  ;;  %s4152_s27 = sshll.u32 %s5501_s20, 4 }
  0x2c   : > { %4514 = vmatmul.mubr.msk.f32.gmra.mrb[2].mxu1 %vm6273_vm1, %v745_v4  ;;  %v964_v23 = vld [vmem:[%s5410_s0] sm:$0xff]  ;;  %v967_v28 = vld [vmem:[%s5410_s0 + $0x18] sm:$0xff]  ;;  %v966_v31 = vld [vmem:[%s5410_s0 + $0x10] sm:$0xff]  ;;  %s5510_s22 = scalar_lea.vmem [#allocation2], %s4152_s27  ;;  %s740_s27 = scalar_lea.vmem %s6250_s7, %s5356_s29 }
  0x2d   : > { %4516 = vmatprep.mubr.msk.f32.mxu1 %vm6273_vm1, %v746_v5  ;;  %v969_v37 = vld [vmem:[%s5410_s0 + $0x28] sm:$0xff]  ;;  %v968_v40 = vld [vmem:[%s5410_s0 + $0x20] sm:$0xff]  ;;  %v971_v46 = vld [vmem:[%s5410_s0 + $0x38] sm:$0xff]  ;;  %s3921_s19 = sshll.u32 %s5510_s22, 4  ;;  %s6126_s19 = int_to_ptr.vmem [resolvable:$true] %s3921_s19 }
  0x2e   : > { %v970_v49 = vld [vmem:[%s5410_s0 + $0x30] sm:$0xff]  ;;  %v973_v55 = vld [vmem:[%s5410_s0 + $0x48] sm:$0xff]  ;;  %v972_v58 = vld [vmem:[%s5410_s0 + $0x40] sm:$0xff] }
  0x2f   : > { %v975_v0 = vld [vmem:[%s5410_s0 + $0x58] sm:$0xff]  ;;  %v974_v3 = vld [vmem:[%s5410_s0 + $0x50] sm:$0xff] }
  0x30   : > { %4517 = vmatmul.mubr.msk.f32.gmra.mrb[4].mxu1 %vm6273_vm1, %v747_v6 }
  0x31   : > { %4519 = vmatprep.mubr.msk.f32.mxu1 %vm6273_vm1, %v748_v7 }
  0x34   : > { %4520 = vmatmul.mubr.msk.f32.gmra.mrb[6].mxu1 %vm6273_vm1, %v749_v8 }
  0x35   : > { %4522 = vmatprep.mubr.msk.f32.mxu1 %vm6273_vm1, %v750_v9  ;;  %v977_v9 = vld [vmem:[%s5410_s0 + $0x68] sm:$0xff] }
  0x38   : > { %4523 = vmatmul.mubr.msk.f32.gmra.mrb[8].mxu1 %vm6273_vm1, %v751_v10 }
  0x39   : > { %4525 = vmatprep.mubr.msk.f32.mxu1 %vm6273_vm1, %v752_v11 }
  0x3c   : > { %4526 = vmatmul.mubr.msk.f32.gmra.mrb[10].mxu1 %vm6273_vm1, %v753_v12  ;;  %v976_v12 = vld [vmem:[%s5410_s0 + $0x60] sm:$0xff] }
  0x3d   : > { %4528 = vmatprep.mubr.msk.f32.mxu1 %vm6273_vm1, %v754_v13 }
  0x40   : > { %4529 = vmatmul.mubr.msk.f32.gmra.mrb[12].mxu1 %vm6273_vm1, %v755_v14 }
  0x41   : > { %4531 = vmatprep.mubr.msk.f32.mxu1 %vm6273_vm1, %v756_v15 }
  0x44   : > { %4532 = vmatmul.mubr.msk.f32.gmra.mrb[14].mxu1 %vm6273_vm1, %v757_v16 }
  0x45   : > { %4550 = vmatprep.mubr.bf16.mxu1 %v4925_v17 }
  0xfb   : > { %v4512_v19 = vpop.f32.mrb[0].mxu1 }
  0xfc   : > { %v891_v21 = vadd.f32 %v4512_v19, %v5415_v18  ;;  %v885_v22 = vpop.f32.mrb[1].mxu1  ;;  %v979_v19 = vld [vmem:[%s5410_s0 + $0x78] sm:$0xff] }
  0xfd   : > { %v886_v24 = vadd.f32 %v5415_v18, %v885_v22  ;;  %v978_v22 = vld [vmem:[%s5410_s0 + $0x70] sm:$0xff]  ;;  %s4356_s0 = sshll.u32 %s5356_s29, 4  ;;  %s4360_s29 = sshll.u32 %s5320_s1, 8 }
  0xfe   : > { %v981_v25 = vadd.f32 %v965_v20, %v891_v21 }
  0xff   : > { %v980_v26 = vadd.f32 %v964_v23, %v886_v24  ;;  %v4515_v27 = vpop.f32.mrb[2].mxu1 }
 0x100   : > { %v901_v29 = vadd.f32 %v4515_v27, %v5415_v18  ;;  %v895_v30 = vpop.f32.mrb[3].mxu1 }
 0x101   : > { %v896_v32 = vadd.f32 %v5415_v18, %v895_v30  ;;  %v1012_v33 = vpack.c.bf16 %v981_v25, %v980_v26  ;;  %v4928_v30 = vld [vmem:[%s5402_s23 + $0x18] sm:$0xff]  }
 0x102   : > { %v983_v34 = vadd.f32 %v967_v28, %v901_v29  ;;  %v4926_v28 = vld [vmem:[%s5402_s23 + $0x8] sm:$0xff]   ;;  %v4927_v29 = vld [vmem:[%s5402_s23 + $0x10] sm:$0xff]  }
 0x103   : > { %v982_v35 = vadd.f32 %v966_v31, %v896_v32  ;;  %v4518_v36 = vpop.f32.mrb[4].mxu1  ;;  %4534 = vmatprep.subr.bf16.mxu1 %v1012_v33  ;;  %v4929_v31 = vld [vmem:[%s5402_s23 + $0x20] sm:$0xff]   ;;  %v4931_v32 = vld [vmem:[%s5402_s23 + $0x30] sm:$0xff]  }
 0x104   : > { %v911_v38 = vadd.f32 %v4518_v36, %v5415_v18  ;;  %v905_v39 = vpop.f32.mrb[5].mxu1  ;;  %4535 = vmatpush3.bf16.msra.mxu1 %v1012_v33  ;;  %v4932_v33 = vld [vmem:[%s5402_s23 + $0x38] sm:$0xff]  }
 0x105   : > { %v906_v41 = vadd.f32 %v5415_v18, %v905_v39  ;;  %v1013_v42 = vpack.c.bf16 %v983_v34, %v982_v35  ;;  %v1165_v34 = vld [vmem:[%s6253_s10] sm:$0xf] }
 0x106   : > { %v985_v43 = vadd.f32 %v969_v37, %v911_v38  ;;  %4566 = vmatprep.subr.msk.mxu0 %vm815_vm0, %v1165_v34 }
 0x107   : > { %v984_v44 = vadd.f32 %v968_v40, %v906_v41  ;;  %v4521_v45 = vpop.f32.mrb[6].mxu1  ;;  %4536 = vmatprep.subr.bf16.mxu1 %v1013_v42  ;;  %4567 = vmatpush3.msk.msra.mxu0 %vm815_vm0, %v1165_v34 }
 0x108   : > { %v921_v47 = vadd.f32 %v4521_v45, %v5415_v18  ;;  %v915_v48 = vpop.f32.mrb[7].mxu1  ;;  %4537 = vmatpush3.bf16.msra.mxu1 %v1013_v42 }
 0x109   : > { %v916_v50 = vadd.f32 %v5415_v18, %v915_v48  ;;  %v1014_v51 = vpack.c.bf16 %v985_v43, %v984_v44 }
 0x10a   : > { %v987_v52 = vadd.f32 %v971_v46, %v921_v47 }
 0x10b   : > { %v986_v53 = vadd.f32 %v970_v49, %v916_v50  ;;  %v4524_v54 = vpop.f32.mrb[8].mxu1  ;;  %4538 = vmatprep.subr.bf16.mxu1 %v1014_v51 }
 0x10c   : > { %v931_v56 = vadd.f32 %v4524_v54, %v5415_v18  ;;  %v925_v57 = vpop.f32.mrb[9].mxu1  ;;  %4539 = vmatpush3.bf16.msra.mxu1 %v1014_v51  ;;  %v1378_v51 = vlaneseq }
 0x10d   : > { %v926_v59 = vadd.f32 %v5415_v18, %v925_v57  ;;  %v1015_v60 = vpack.c.bf16 %v987_v52, %v986_v53  ;;  %v5189_v57 = vmov 0.125  }
 0x10e   : > { %v989_v61 = vadd.f32 %v973_v55, %v931_v56  ;;  %v5477_v52 = vshrl.u32 %v1378_v51, 7  ;;  %v5480_v54 = vand.u32 127, %v1378_v51 }
 0x10f   : > { %v988_v62 = vadd.f32 %v972_v58, %v926_v59  ;;  %v4527_v63 = vpop.f32.mrb[10].mxu1  ;;  %4540 = vmatprep.subr.bf16.mxu1 %v1015_v60 }
 0x110   : > { %v941_v1 = vadd.f32 %v4527_v63, %v5415_v18  ;;  %v935_v2 = vpop.f32.mrb[11].mxu1  ;;  %4541 = vmatpush3.bf16.msra.mxu1 %v1015_v60  ;;  %v1387_v53 = vadd.s32 1, %v5477_v52  ;;  %v1383_v55 = vmul.u32 8, %v5477_v52 }
 0x111   : > { %v936_v4 = vadd.f32 %v5415_v18, %v935_v2  ;;  %v1016_v5 = vpack.c.bf16 %v989_v61, %v988_v62 }
 0x112   : > { %v991_v6 = vadd.f32 %v975_v0, %v941_v1  ;;  %v1389_v56 = vmul.u32 8, %v1387_v53  ;;  %vm1385_vm2 = vcmp.ge.s32.totalorder %v5480_v54, %v1383_v55 }
 0x113   : > { %v990_v7 = vadd.f32 %v974_v3, %v936_v4  ;;  %v4530_v8 = vpop.f32.mrb[12].mxu1  ;;  %4542 = vmatprep.subr.bf16.mxu1 %v1016_v5 }
 0x114   : > { %v951_v10 = vadd.f32 %v4530_v8, %v5415_v18  ;;  %v945_v11 = vpop.f32.mrb[13].mxu1  ;;  %4543 = vmatpush3.bf16.msra.mxu1 %v1016_v5  ;;  %vm1391_vm3 = vcmp.lt.s32.totalorder %v5480_v54, %v1389_v56 }
 0x115   : > { %v946_v13 = vadd.f32 %v5415_v18, %v945_v11  ;;  %v1017_v14 = vpack.c.bf16 %v991_v6, %v990_v7  ;;  %vm1393_vm4 = vmand %vm1385_vm2, %vm1391_vm3  ;;  %vm6274_vm2 = vcmp.ge.s32.totalorder %v5477_v52, 1 }
 0x116   : > { %v993_v15 = vadd.f32 %v977_v9, %v951_v10 }
 0x117   : > { %v992_v16 = vadd.f32 %v976_v12, %v946_v13  ;;  %v4533_v17 = vpop.f32.mrb[14].mxu1  ;;  %4544 = vmatprep.subr.bf16.mxu1 %v1017_v14 }
 0x118   : > { %v961_v20 = vadd.f32 %v4533_v17, %v5415_v18  ;;  %v955_v21 = vpop.f32.mrb[15].mxu1  ;;  %4545 = vmatpush3.bf16.msra.mxu1 %v1017_v14 }
 0x119   : > { %v956_v23 = vadd.f32 %v5415_v18, %v955_v21  ;;  %v1018_v24 = vpack.c.bf16 %v993_v15, %v992_v16  ;;  %v4930_v18 = vld [vmem:[%s5402_s23 + $0x28] sm:$0xff]   ;;  %v5487_v21 = vadd.s32 8, %v5477_v52  ;;  %s711_s23 = scalar_lea.vmem %s6295_s26, %s4356_s0  ;;  %s737_s0 = scalar_lea.vmem %s6249_s6, %s4164_s24 }
 0x11a   : > { %v995_v25 = vadd.f32 %v979_v19, %v961_v20 }
 0x11b   : > { %v994_v26 = vadd.f32 %v978_v22, %v956_v23  ;;  %4546 = vmatprep.subr.bf16.mxu1 %v1018_v24 }
 0x11c   : > { %4547 = vmatpush3.bf16.msra.mxu1 %v1018_v24 }
 0x11d   : > { %v1019_v27 = vpack.c.bf16 %v995_v25, %v994_v26 }
 0x11f   : > { %4548 = vmatprep.subr.bf16.mxu1 %v1019_v27 }
 0x120   : > { %4549 = vmatpush3.bf16.msra.mxu1 %v1019_v27  ;;  %v1388_v27 = vadd.s32 1, %v5487_v21 }
 0x123   : > { %4551 = vmatmul.mubr.bf16.vlgmr.msra.gmra.mrb[16].mxu1 %v4926_v28 }
 0x124   : > { %4554 = vmatprep.mubr.bf16.mxu1 %v4927_v29 }
 0x12b   : > { %4555 = vmatmul.mubr.bf16.gmra.mrb[20].mxu1 %v4928_v30 }
 0x12c   : > { %4558 = vmatprep.mubr.bf16.mxu1 %v4929_v31 }
 0x133   : > { %4559 = vmatmul.mubr.bf16.gmra.mrb[24].mxu1 %v4930_v18 }
 0x134   : > { %4562 = vmatprep.mubr.bf16.mxu1 %v4931_v32  ;;  %v1384_v32 = vmul.u32 8, %v5487_v21 }
 0x136   : > { %vm1386_vm5 = vcmp.ge.s32.totalorder %v5480_v54, %v1384_v32 }
 0x13b   : > { %4563 = vmatmul.mubr.bf16.gmra.mrb[28].mxu1 %v4932_v33  ;;  %v1390_v33 = vmul.u32 8, %v1388_v27 }
 0x13d   : > { %vm1392_vm6 = vcmp.lt.s32.totalorder %v5480_v54, %v1390_v33 }
 0x13e   : > { %vm1394_vm7 = vmand %vm1386_vm5, %vm1392_vm6 }
 0x1f6   : > { %v4552_v35 = vpop.f32.mrb[16].mxu1 }
 0x1f7   : > { %v1102_v36 = vpop.f32.mrb[17].mxu1 }
 0x1f8   : > { %v4553_v37 = vpop.f32.mrb[18].mxu1  ;;  %4568 = vmatprep.mubr.msk.f32.mxu0 %vm6273_vm1, %v1102_v36 }
 0x1f9   : > { %v1105_v38 = vpop.f32.mrb[19].mxu1 }
 0x1fa   : > { %4569 = vmatmul.mubr.msk.f32.vlgmr.msra.gmra.mrb[0].mxu0 %vm6273_vm1, %v1105_v38  ;;  %v5190_v38 = vmov 0.0|0.0  }
 0x1fb   : > { %4571 = vmatprep.mubr.msk.f32.mxu0 %vm6273_vm1, %v4552_v35 }
 0x1fe   : > { %v4556_v39 = vpop.f32.mrb[20].mxu1  ;;  %4572 = vmatmul.mubr.msk.f32.gmra.mrb[2].mxu0 %vm6273_vm1, %v4553_v37 }
 0x1ff   : > { %v1118_v40 = vpop.f32.mrb[21].mxu1 }
 0x200   : > { %v4557_v41 = vpop.f32.mrb[22].mxu1  ;;  %4574 = vmatprep.mubr.msk.f32.mxu0 %vm6273_vm1, %v1118_v40  ;;  %v1398_v40 = vld [vmem:[%s711_s23 + $0x8] sm:$0xff] }
 0x201   : > { %v1121_v42 = vpop.f32.mrb[23].mxu1 }
 0x202   : > { %4575 = vmatmul.mubr.msk.f32.gmra.mrb[4].mxu0 %vm6273_vm1, %v1121_v42  ;;  %v5508_v42 = vmul.u32 2, %v5477_v52 }
 0x203   : > { %4577 = vmatprep.mubr.msk.f32.mxu0 %vm6273_vm1, %v4556_v39  ;;  %v5192_v39 = vmov 0.0  }
 0x204   : > { %4640 = vmatprep.subr.bf16.mxu1 %v5192_v39  ;;  %4644 = vmatprep.mubr.msk.bf16.mxu1 %vm5191_vm8, %v5192_v39  ;;  %vm1533_vm10 = vcmp.eq.s32.totalorder %v5480_v54, %v5508_v42 }
 0x205   : > { %v4229_v51 = vsel %vm1533_vm10, 1.0, %v5192_v39 }
 0x206   : > { %v4560_v43 = vpop.f32.mrb[24].mxu1  ;;  %4578 = vmatmul.mubr.msk.f32.gmra.mrb[6].mxu0 %vm6273_vm1, %v4557_v41  ;;  %v1397_v41 = vld [vmem:[%s711_s23] sm:$0xff] }
 0x207   : > { %v1134_v44 = vpop.f32.mrb[25].mxu1 }
 0x208   : > { %v4561_v45 = vpop.f32.mrb[26].mxu1  ;;  %4580 = vmatprep.mubr.msk.f32.mxu0 %vm6273_vm1, %v1134_v44 }
 0x209   : > { %v1137_v46 = vpop.f32.mrb[27].mxu1 }
 0x20a   : > { %4581 = vmatmul.mubr.msk.f32.gmra.mrb[8].mxu0 %vm6273_vm1, %v1137_v46 }
 0x20b   : > { %4583 = vmatprep.mubr.msk.f32.mxu0 %vm6273_vm1, %v4560_v43 }
 0x20e   : > { %v4564_v47 = vpop.f32.mrb[28].mxu1  ;;  %4584 = vmatmul.mubr.msk.f32.gmra.mrb[10].mxu0 %vm6273_vm1, %v4561_v45 }
 0x20f   : > { %v1150_v48 = vpop.f32.mrb[29].mxu1 }
 0x210   : > { %v4565_v49 = vpop.f32.mrb[30].mxu1  ;;  %4586 = vmatprep.mubr.msk.f32.mxu0 %vm6273_vm1, %v1150_v48 }
 0x211   : > { %v1153_v50 = vpop.f32.mrb[31].mxu1 }
 0x212   : > { %4587 = vmatmul.mubr.msk.f32.gmra.mrb[12].mxu0 %vm6273_vm1, %v1153_v50  ;;  %v5525_v50 = vadd.s32 4294967295, %v5508_v42 }
 0x213   : > { %4589 = vmatprep.mubr.msk.f32.mxu0 %vm6273_vm1, %v4564_v47  ;;  %v5517_v47 = vadd.s32 1, %v5508_v42 }
 0x214   : > { %vm6275_vm14 = vcmp.eq.s32.totalorder %v5480_v54, %v5525_v50 }
 0x215   : > { %vm1556_vm12 = vcmp.eq.s32.totalorder %v5480_v54, %v5517_v47 }
 0x216   : > { %4590 = vmatmul.mubr.msk.f32.gmra.mrb[14].mxu0 %vm6273_vm1, %v4565_v49  ;;  %v5522_v49 = vadd.s32 16, %v5477_v52  ;;  %v4230_v53 = vsel %vm1556_vm12, 1.0, %v5192_v39 }
 0x217   : > { %4624 = vmatprep.mubr.msk.f32.mxu0 %vm1393_vm4, %v5189_v57 }
 0x218   : > { %vm1563_vm13 = vcmp.ge.s32.totalorder %v5522_v49, 17 }
 0x219   : > { %vm1582_vm15 = vmand %vm1563_vm13, %vm6275_vm14 }
 0x21a   : > { %v4231_v55 = vsel %vm1582_vm15, 1.0, %v5192_v39 }
 0x2cd   : > { %v4570_v58 = vpop.f32.mrb[0].mxu0 }
 0x2ce   : > { %v1363_v59 = vmax.f32 %v4570_v58, 0.0  ;;  %v1283_v60 = vpop.f32.mrb[1].mxu0 }
 0x2cf   : > { %v1362_v61 = vmax.f32 %v1283_v60, 0.0 }
 0x2d1   : > { %v4831_v62 = vpack.c.bf16 %v1363_v59, %v1362_v61  ;;  %v4573_v63 = vpop.f32.mrb[2].mxu0 }
 0x2d2   : > { %v1365_v0 = vmax.f32 %v4573_v63, 0.0  ;;  %v1293_v1 = vpop.f32.mrb[3].mxu0 }
 0x2d3   : > { %v1364_v2 = vmax.f32 %v1293_v1, 0.0  ;;  %4832 = vmatprep.subr.bf16.mxu0 %v4831_v62 }
 0x2d4   : > { %4834 = vmatpush3.bf16.msra.mxu0 %v4831_v62 }
 0x2d5   : > { %v4835_v3 = vpack.c.bf16 %v1365_v0, %v1364_v2  ;;  %v4576_v4 = vpop.f32.mrb[4].mxu0 }
 0x2d6   : > { %v1367_v5 = vmax.f32 %v4576_v4, 0.0  ;;  %v1303_v6 = vpop.f32.mrb[5].mxu0  ;;  %v5193_v4 = vmov 0  }
 0x2d7   : > { %v1366_v7 = vmax.f32 %v1303_v6, 0.0  ;;  %4836 = vmatprep.subr.bf16.mxu0 %v4835_v3  ;;  %4924 = vset.pattern.permute.xlu0 %v5193_v4 }
 0x2d8   : > { %4838 = vmatpush3.bf16.msra.mxu0 %v4835_v3 }
 0x2d9   : > { %v4839_v8 = vpack.c.bf16 %v1367_v5, %v1366_v7  ;;  %v4579_v9 = vpop.f32.mrb[6].mxu0 }
 0x2da   : > { %v1369_v10 = vmax.f32 %v4579_v9, 0.0  ;;  %v1313_v11 = vpop.f32.mrb[7].mxu0 }
 0x2db   : > { %v1368_v12 = vmax.f32 %v1313_v11, 0.0  ;;  %4840 = vmatprep.subr.bf16.mxu0 %v4839_v8 }
 0x2dc   : > { %4842 = vmatpush3.bf16.msra.mxu0 %v4839_v8 }
 0x2dd   : > { %v4843_v13 = vpack.c.bf16 %v1369_v10, %v1368_v12  ;;  %v4582_v14 = vpop.f32.mrb[8].mxu0 }
 0x2de   : > { %v1371_v15 = vmax.f32 %v4582_v14, 0.0  ;;  %v1323_v16 = vpop.f32.mrb[9].mxu0 }
 0x2df   : > { %v1370_v17 = vmax.f32 %v1323_v16, 0.0  ;;  %4844 = vmatprep.subr.bf16.mxu0 %v4843_v13 }
 0x2e0   : > { %4846 = vmatpush3.bf16.msra.mxu0 %v4843_v13 }
 0x2e1   : > { %v4847_v19 = vpack.c.bf16 %v1371_v15, %v1370_v17  ;;  %v4585_v20 = vpop.f32.mrb[10].mxu0 }
 0x2e2   : > { %v1373_v22 = vmax.f32 %v4585_v20, 0.0  ;;  %v1333_v23 = vpop.f32.mrb[11].mxu0 }
 0x2e3   : > { %v1372_v24 = vmax.f32 %v1333_v23, 0.0  ;;  %4848 = vmatprep.subr.bf16.mxu0 %v4847_v19 }
 0x2e4   : > { %4850 = vmatpush3.bf16.msra.mxu0 %v4847_v19 }
 0x2e5   : > { %v4851_v25 = vpack.c.bf16 %v1373_v22, %v1372_v24  ;;  %v4588_v26 = vpop.f32.mrb[12].mxu0  ;;  %v1479_v22 = vld [vmem:[%s730_s8] sm:$0xff] }
 0x2e6   : > { %v1375_v28 = vmax.f32 %v4588_v26, 0.0  ;;  %v1343_v29 = vpop.f32.mrb[13].mxu0 }
 0x2e7   : > { %v1374_v30 = vmax.f32 %v1343_v29, 0.0  ;;  %4852 = vmatprep.subr.bf16.mxu0 %v4851_v25 }
 0x2e8   : > { %4854 = vmatpush3.bf16.msra.mxu0 %v4851_v25 }
 0x2e9   : > { %v4855_v31 = vpack.c.bf16 %v1375_v28, %v1374_v30  ;;  %v4591_v18 = vpop.f32.mrb[14].mxu0 }
 0x2ea   : > { %v1377_v34 = vmax.f32 %v4591_v18, 0.0  ;;  %v1353_v35 = vpop.f32.mrb[15].mxu0 }
 0x2eb   : > { %v1376_v36 = vmax.f32 %v1353_v35, 0.0  ;;  %4856 = vmatprep.subr.bf16.mxu0 %v4855_v31 }
 0x2ec   : > { %4858 = vmatpush3.bf16.msra.mxu0 %v4855_v31 }
 0x2ed   : > { %v4859_v37 = vpack.c.bf16 %v1377_v34, %v1376_v36 }
 0x2ef   : > { %4860 = vmatprep.subr.bf16.mxu0 %v4859_v37 }
 0x2f0   : > { %4862 = vmatpush3.bf16.msra.mxu0 %v4859_v37 }
 0x2f1   : > { %4863 = vmatprep.subr.bf16.mxu0 %v5190_v38 }
 0x2f3   : > { %4625 = vmatmul.mubr.msk.f32.vlgmr.msra.gmra.mrb[16].mxu0 %vm1394_vm7, %v5189_v57 }
 0x2f4   : > { %4631 = vmatprep.mubr.msk.f32.mxu0 %vm5191_vm8, %v5192_v39 }
 0x3c6   : > { %v4626_v43 = vpop.f32.mrb[16].mxu0 }
 0x3c7   : > { %v1475_v44 = vadd.f32 %v4626_v43, %v1398_v40  ;;  %v1465_v45 = vpop.f32.mrb[17].mxu0 }
 0x3c8   : > { %v1474_v46 = vadd.f32 %v1465_v45, %v1397_v41 }
 0x3c9   : > { %1478 = vst.msk [vmem:[%s5510_s22 + $0x8] sm:$0xff] %vm1476_vm9, %v1475_v44 }
 0x3ca   : > { %1477 = vst.msk [vmem:[%s5510_s22] sm:$0xff] %vm1476_vm9, %v1474_v46  ;;  %v4864_v48 = vpack.c.bf16 %v1475_v44, %v1474_v46  ;;  %s5194_s22 = smov [#allocation4]  }
 0x3cb   : > { %s5069_s8 = sshll.u32 %s5194_s22, 4  ;;  %s5070_s8 = int_to_ptr.vmem [resolvable:$false] %s5069_s8 }
 0x3cc   : > { %4865 = vmatpush3.bf16.msra.mxu0 %v4864_v48  ;;  %v5578_v48 = vsub.s32 0, %v5477_v52  ;;  %s5071_s2 = scalar_lea.vmem %s5070_s8, 256 }
 0x3cd   : > { %4648 = vmatprep.subr.bf16.mxu0 %v5192_v39 }
 0x3cf   : > { %4632 = vmatmul.mubr.msk.f32.vlgmr.msra.gmra.mrb[18].mxu0 %vm1595_vm11, %v4229_v51 }
 0x3d0   : > { %4634 = vmatprep.mubr.msk.f32.mxu0 %vm5191_vm8, %v5192_v39 }
 0x3d3   : > { %4635 = vmatmul.mubr.msk.f32.gmra.mrb[20].mxu0 %vm1595_vm11, %v4230_v53  ;;  %v5583_v53 = vld [vmem:[%s6254_s11] sm:$0xff] }
 0x3d4   : > { %4637 = vmatprep.mubr.msk.f32.mxu0 %vm5191_vm8, %v5192_v39 }
 0x3d7   : > { %4638 = vmatmul.mubr.msk.f32.gmra.mrb[22].mxu0 %vm1595_vm11, %v4231_v55  ;;  %v5586_v55 = vsub.s32 1, %v5477_v52 }
 0x3d8   : > { %4652 = vmatprep.mubr.msk.bf16.mxu0 %vm5191_vm8, %v5192_v39 }
 0x4a2   : > { %v1671_v56 = vpop.f32.mrb[18].mxu0 }
 0x4a3   : > { %v4633_v57 = vpop.f32.mrb[19].mxu0  ;;  %v1685_v3 = vsel %vm1476_vm9, %v1671_v56, 0.0 }
 0x4a6   : > { %v1676_v58 = vpop.f32.mrb[20].mxu0 }
 0x4a7   : > { %v4636_v59 = vpop.f32.mrb[21].mxu0  ;;  %v1716_v60 = vsel %vm1476_vm9, %v1676_v58, 0.0 }
 0x4a8   : > { %1717 = vadd.xlane.f32.xlu1 %v1716_v60 }
 0x4aa   : > { %v1681_v61 = vpop.f32.mrb[22].mxu0 }
 0x4ab   : > { %v1762_v62 = vsel %vm6274_vm2, %v1681_v61, -1e+30  ;;  %v4639_v63 = vpop.f32.mrb[23].mxu0  ;;  %v1739_v0 = vsel %vm1476_vm9, %v1681_v61, 0.0 }
 0x4ac   : > { %v1763_v1 = vmax.f32 %v1762_v62, %v1671_v56  ;;  %1740 = vadd.xlane.f32.xlu0 %v1739_v0  ;;  %v1483_v0 = vld [vmem:[%s6255_s12] sm:$0x7] }
 0x4ae   : > { %v5558_v2 = vmax.f32 %v1763_v1, %v1676_v58  ;;  %v1485_v1 = vld [vmem:[%s6255_s12 + $0x8] sm:$0x7] }
 0x4b0   : > { %1686 = vadd.xlane.f32.xlu0 %v1685_v3 }
 0x535   : > { %v1718_v5 = vpop.xlane.xlu1 %1717 }
 0x536   : > { %v1719_v6 = vmul.f32 0.03125, %v1718_v5 }
 0x538   : > { %v5562_v9 = vsub.f32 %v1676_v58, %v1719_v6  ;;  %v1714_v58 = vrot.slane %v5583_v53, %v5586_v55  ;;  %v5603_v6 = vsub.s32 2, %v5477_v52 }
 0x539   : > { %v1741_v7 = vpop.xlane.xlu0 %1740 }
 0x53a   : > { %v1742_v8 = vmul.f32 0.03125, %v1741_v7  ;;  %v1721_v16 = vmul.f32 %v5562_v9, %v5562_v9 }
 0x53c   : > { %v1743_v10 = vsub.f32 %v1681_v61, %v1742_v8  ;;  %v1722_v19 = vsel %vm1476_vm9, %v1721_v16, 0.0  ;;  %v1484_v61 = vld [vmem:[%s6255_s12 + $0x4] sm:$0x7] }
 0x53d   : > { %v1687_v11 = vpop.xlane.xlu0 %1686  ;;  %v1881_v8 = vrot.slane %v1484_v61, %v5578_v48 }
 0x53e   : > { %v1689_v12 = vmul.f32 0.03125, %v1687_v11  ;;  %v1744_v13 = vmul.f32 %v1743_v10, %v1743_v10  ;;  %v1886_v11 = vrot.slane %v1484_v61, %v5586_v55 }
 0x540   : > { %v5564_v14 = vsub.f32 %v1671_v56, %v1689_v12  ;;  %v1745_v15 = vsel %vm1476_vm9, %v1744_v13, 0.0  ;;  %v1709_v56 = vrot.slane %v5583_v53, %v5578_v48  ;;  %v1768_v12 = vrot.slane %v1483_v0, %v5578_v48 }
 0x541   : > { %1746 = vadd.xlane.f32.xlu1 %v1745_v15  ;;  %v1989_v13 = vrot.slane %v1485_v1, %v5578_v48 }
 0x542   : > { %v1691_v17 = vmul.f32 %v5564_v14, %v5564_v14 }
 0x544   : > { %v1692_v20 = vsel %vm1476_vm9, %v1691_v17, 0.0  ;;  %v1994_v17 = vrot.slane %v1485_v1, %v5586_v55 }
 0x545   : > { %1723 = vadd.xlane.f32.xlu1 %v1722_v19  ;;  %1693 = vadd.xlane.f32.xlu0 %v1692_v20  ;;  %v1779_v20 = vrot.slane %v1483_v0, %v5603_v6 }
 0x55b   : > { %1784 = vperm.xlu0 %4924, %v1479_v22  }
 0x5ce   : > { %v1747_v23 = vpop.xlane.xlu1 %1746 }
 0x5cf   : > { %v1748_v24 = vmul.f32 0.03125, %v1747_v23  ;;  %v2000_v23 = vrot.slane %v1485_v1, %v5603_v6  ;;  %v4933_v1 = vld [vmem:[%s6256_s13] sm:$0xff]  }
 0x5d0   : > { %4641 = vmatpush3.bf16.msra.mxu1 %v4933_v1 }
 0x5d1   : > { %v1749_v25 = vadd.f32 1e-05, %v1748_v24  ;;  %4642 = vmatprep.subr.bf16.mxu1 %v5192_v39 }
 0x5d2   : > { %v1724_v26 = vpop.xlane.xlu1 %1723  ;;  %v1694_v27 = vpop.xlane.xlu0 %1693 }
 0x5d3   : > { %4969 = vrsqrt.f32 %v1749_v25  ;;  %v1725_v28 = vmul.f32 0.03125, %v1724_v26  ;;  %v1695_v29 = vmul.f32 0.03125, %v1694_v27  ;;  %vm1752_vm3 = vcmp.eq.f32.partialorder %v1749_v25, inf }
 0x5d4   : > { %v1755_v33 = vand.u32 2147483648, %v1749_v25  ;;  %vm1754_vm4 = vcmp.eq.f32.partialorder %v1749_v25, 0.0 }
 0x5d5   : > { %v1726_v30 = vadd.f32 1e-05, %v1725_v28  ;;  %v1696_v31 = vadd.f32 1e-05, %v1695_v29 }
 0x5d7   : > { %4971 = vrsqrt.f32 %v1726_v30  ;;  %vm1729_vm5 = vcmp.eq.f32.partialorder %v1726_v30, inf  ;;  %v1732_v40 = vand.u32 2147483648, %v1726_v30  ;;  %vm1731_vm6 = vcmp.eq.f32.partialorder %v1726_v30, 0.0 }
 0x5d8   : > { %4973 = vrsqrt.f32 %v1696_v31  ;;  %vm1699_vm7 = vcmp.eq.f32.partialorder %v1696_v31, inf  ;;  %v1702_v44 = vand.u32 2147483648, %v1696_v31  ;;  %vm1701_vm11 = vcmp.eq.f32.partialorder %v1696_v31, 0.0 }
 0x5dd   : > { %v4970_v18 = vpop.eup %4969 }
 0x5de   : > { %v1751_v32 = vmul.f32 %v4970_v18, %v1749_v25 }
 0x5e0   : > { %v1753_v34 = vsel %vm1752_vm3, %v1749_v25, %v1751_v32 }
 0x5e1   : > { %v1756_v35 = vsel %vm1754_vm4, %v1755_v33, %v1753_v34  ;;  %v4972_v36 = vpop.eup %4971 }
 0x5e2   : > { %4975 = vrcp.f32 %v1756_v35  ;;  %v4974_v37 = vpop.eup %4973  ;;  %v1728_v38 = vmul.f32 %v4972_v36, %v1726_v30 }
 0x5e3   : > { %v1698_v41 = vmul.f32 %v4974_v37, %v1696_v31 }
 0x5e4   : > { %v1730_v43 = vsel %vm1729_vm5, %v1726_v30, %v1728_v38  ;;  %v5617_v38 = vpop.permute.xlu0 %1784 }
 0x5e5   : > { %v1733_v45 = vsel %vm1731_vm6, %v1732_v40, %v1730_v43  ;;  %v1700_v46 = vsel %vm1699_vm7, %v1696_v31, %v1698_v41 }
 0x5e6   : > { %4977 = vrcp.f32 %v1733_v45  ;;  %v1703_v51 = vsel %vm1701_vm11, %v1702_v44, %v1700_v46  ;;  %vm2100_vm11 = vcmp.ge.s32.totalorder %v5480_v54, 8 }
 0x5e7   : > { %4979 = vrcp.f32 %v1703_v51 }
 0x5ec   : > { %v4976_v57 = vpop.eup %4975 }
 0x5ed   : > { %v1758_v59 = vmul.f32 %v4976_v57, %v1743_v10 }
 0x5ef   : > { %v1759_v60 = vmul.f32 %v1758_v59, %v1709_v56 }
 0x5f0   : > { %v4978_v62 = vpop.eup %4977 }
 0x5f1   : > { %v1760_v63 = vadd.f32 %v1759_v60, %v1714_v58  ;;  %v4980_v3 = vpop.eup %4979  ;;  %v1735_v5 = vmul.f32 %v4978_v62, %v5562_v9  ;;  %v1773_v9 = vrot.slane %v1483_v0, %v5586_v55 }
 0x5f2   : > { %v1705_v7 = vmul.f32 %v4980_v3, %v5564_v14  ;;  %v1892_v14 = vrot.slane %v1484_v61, %v5603_v6  ;;  %v4934_v3 = vld [vmem:[%s6256_s13 + $0x10] sm:$0xff]  }
 0x5f3   : > { %v1736_v10 = vmul.f32 %v1735_v5, %v1709_v56  ;;  %v1761_v16 = vsel %vm6274_vm2, %v1760_v63, 0.0  ;;  %4649 = vmatpush3.bf16.msra.mxu0 %v4934_v3  ;;  %v4935_v5 = vld [vmem:[%s6256_s13 + $0x8] sm:$0xff]   ;;  %vm2096_vm2 = vcmp.lt.s32.totalorder %v5480_v54, 8 }
 0x5f4   : > { %v1710_v15 = vmul.f32 %v1709_v56, %v1705_v7  ;;  %v1882_v24 = vmul.f32 %v1881_v8, %v1761_v16  ;;  %v1769_v25 = vmul.f32 %v1768_v12, %v1761_v16  ;;  %v1990_v28 = vmul.f32 %v1989_v13, %v1761_v16  ;;  %v4936_v7 = vld [vmem:[%s6256_s13 + $0x18] sm:$0xff]   ;;  %4650 = vmatprep.subr.bf16.mxu0 %v5192_v39 }
 0x5f5   : > { %v1737_v19 = vadd.f32 %v1736_v10, %v1714_v58  ;;  %4643 = vmatpush3.bf16.msra.mxu1 %v4935_v5 }
 0x5f6   : > { %v1715_v22 = vadd.f32 %v1714_v58, %v1710_v15  ;;  %4656 = vmatprep.subr.bf16.mxu1 %v5192_v39 }
 0x5f7   : > { %v1893_v30 = vmul.f32 %v1892_v14, %v1737_v19  ;;  %v1780_v31 = vmul.f32 %v1779_v20, %v1737_v19  ;;  %v2001_v34 = vmul.f32 %v2000_v23, %v1737_v19  ;;  %4651 = vmatpush3.bf16.msra.mxu0 %v4936_v7  ;;  %v5672_v7 = vsub.s32 6, %v5477_v52 }
 0x5f8   : > { %v1887_v26 = vmul.f32 %v1886_v11, %v1715_v22  ;;  %v1774_v27 = vmul.f32 %v1773_v9, %v1715_v22  ;;  %v1995_v29 = vmul.f32 %v1994_v17, %v1715_v22 }
 0x5fa   : > { %v1888_v18 = vadd.f32 %v1887_v26, %v1882_v24  ;;  %v1775_v32 = vadd.f32 %v1774_v27, %v1769_v25  ;;  %v1996_v33 = vadd.f32 %v1995_v29, %v1990_v28 }
 0x5fc   : > { %v1894_v35 = vadd.f32 %v1893_v30, %v1888_v18  ;;  %v1781_v36 = vadd.f32 %v1780_v31, %v1775_v32  ;;  %v2002_v37 = vadd.f32 %v2001_v34, %v1996_v33  ;;  %v5644_v31 = vsub.s32 4, %v5477_v52 }
 0x5fd   : > { %v5647_v18 = vsub.s32 5, %v5477_v52 }
 0x5fe   : > { %v1895_v40 = vmul.f32 %v1894_v35, %v5617_v38  ;;  %v1787_v43 = vmul.f32 %v5617_v38, %v1781_v36  ;;  %v2003_v63 = vmul.f32 %v2002_v37, %v5617_v38  ;;  %v1919_v32 = vrot.slane %v5583_v53, %v5644_v31 }
 0x5ff   : > { %v1924_v35 = vrot.slane %v5583_v53, %v5647_v18  ;;  %v5654_v36 = vsub.s32 3, %v5477_v52 }
 0x600   : > { %v1896_v41 = vsel %vm1476_vm9, %v1895_v40, 0.0  ;;  %v1788_v44 = vsel %vm1476_vm9, %v1787_v43, 0.0  ;;  %v2004_v0 = vsel %vm1476_vm9, %v2003_v63, 0.0 }
 0x601   : > { %1897 = vadd.xlane.f32.xlu1 %v1896_v41 }
 0x605   : > { %1789 = vadd.xlane.f32.xlu1 %v1788_v44 }
 0x68e   : > { %v1898_v45 = vpop.xlane.xlu1 %1897 }
 0x68f   : > { %v1899_v46 = vmul.f32 0.03125, %v1898_v45  ;;  %v1816_v45 = vrot.slane %v5583_v53, %v5654_v36 }
 0x691   : > { %v1900_v51 = vsub.f32 %v1895_v40, %v1899_v46  ;;  %v1811_v40 = vrot.slane %v5583_v53, %v5603_v6 }
 0x692   : > { %v1790_v56 = vpop.xlane.xlu1 %1789 }
 0x693   : > { %v1791_v57 = vmul.f32 0.03125, %v1790_v56  ;;  %v1901_v58 = vmul.f32 %v1900_v51, %v1900_v51 }
 0x695   : > { %v1792_v59 = vsub.f32 %v1787_v43, %v1791_v57  ;;  %v1902_v60 = vsel %vm1476_vm9, %v1901_v58, 0.0  ;;  %v4937_v58 = vld [vmem:[%s6256_s13 + $0x20] sm:$0xff]  }
 0x696   : > { %1903 = vadd.xlane.f32.xlu1 %v1902_v60 }
 0x697   : > { %v1793_v61 = vmul.f32 %v1792_v59, %v1792_v59 }
 0x699   : > { %v1794_v62 = vsel %vm1476_vm9, %v1793_v61, 0.0 }
 0x69a   : > { %1795 = vadd.xlane.f32.xlu1 %v1794_v62 }
 0x69e   : > { %2005 = vadd.xlane.f32.xlu1 %v2004_v0 }
 0x723   : > { %v1904_v8 = vpop.xlane.xlu1 %1903 }
 0x724   : > { %v1905_v10 = vmul.f32 0.03125, %v1904_v8  ;;  %v2031_v8 = vsub.s32 7, %v5477_v52 }
 0x726   : > { %v1906_v11 = vadd.f32 1e-05, %v1905_v10  ;;  %v2027_v10 = vrot.slane %v5583_v53, %v5672_v7 }
 0x727   : > { %v1796_v12 = vpop.xlane.xlu1 %1795 }
 0x728   : > { %4981 = vrsqrt.f32 %v1906_v11  ;;  %v1797_v13 = vmul.f32 0.03125, %v1796_v12  ;;  %vm1909_vm15 = vcmp.eq.f32.partialorder %v1906_v11, inf  ;;  %v1912_v23 = vand.u32 2147483648, %v1906_v11 }
 0x729   : > { %vm1911_vm3 = vcmp.eq.f32.partialorder %v1906_v11, 0.0 }
 0x72a   : > { %v1798_v15 = vadd.f32 1e-05, %v1797_v13  ;;  %v2032_v13 = vrot.slane %v5583_v53, %v2031_v8 }
 0x72b   : > { %v2006_v16 = vpop.xlane.xlu1 %2005 }
 0x72c   : > { %v2007_v9 = vmul.f32 0.03125, %v2006_v16  ;;  %4983 = vrsqrt.f32 %v1798_v15  ;;  %vm1801_vm4 = vcmp.eq.f32.partialorder %v1798_v15, inf  ;;  %v1804_v28 = vand.u32 2147483648, %v1798_v15 }
 0x72d   : > { %vm1803_vm5 = vcmp.eq.f32.partialorder %v1798_v15, 0.0 }
 0x72e   : > { %v2008_v17 = vsub.f32 %v2003_v63, %v2007_v9 }
 0x730   : > { %v2009_v19 = vmul.f32 %v2008_v17, %v2008_v17 }
 0x732   : > { %v4982_v14 = vpop.eup %4981  ;;  %v2010_v20 = vsel %vm1476_vm9, %v2009_v19, 0.0  ;;  %v5684_v19 = vld [vmem:[%s6254_s11 + $0x8] sm:$0x7f] }
 0x733   : > { %v1908_v22 = vmul.f32 %v4982_v14, %v1906_v11  ;;  %2011 = vadd.xlane.f32.xlu1 %v2010_v20  ;;  %v1930_v14 = vrot.slane %v5684_v19, %v5586_v55 }
 0x735   : > { %v1910_v24 = vsel %vm1909_vm15, %v1906_v11, %v1908_v22  ;;  %vm2101_vm15 = vcmp.lt.s32.totalorder %v5480_v54, 16 }
 0x736   : > { %v1913_v25 = vsel %vm1911_vm3, %v1912_v23, %v1910_v24  ;;  %v4984_v26 = vpop.eup %4983  ;;  %vm2105_vm3 = vcmp.ge.s32.totalorder %v5480_v54, 16  ;;  %v1822_v23 = vrot.slane %v5684_v19, %v5578_v48 }
 0x737   : > { %4985 = vrcp.f32 %v1913_v25  ;;  %v1800_v27 = vmul.f32 %v4984_v26, %v1798_v15 }
 0x739   : > { %v1802_v29 = vsel %vm1801_vm4, %v1798_v15, %v1800_v27  ;;  %vm2106_vm4 = vcmp.lt.s32.totalorder %v5480_v54, 24 }
 0x73a   : > { %v1805_v30 = vsel %vm1803_vm5, %v1804_v28, %v1802_v29  ;;  %vm2110_vm5 = vcmp.ge.s32.totalorder %v5480_v54, 24  ;;  %vm2107_vm1 = vmand %vm2105_vm3, %vm2106_vm4  ;;  %vm2646_vm3 = vcmp.lt.s32.totalorder %v5477_v52, 4 }
 0x73b   : > { %4987 = vrcp.f32 %v1805_v30  ;;  %v5700_v30 = vsel %vm2096_vm2, 1.0, %v5192_v39  ;;  %vm2191_vm2 = vcmask 64512   ;;  %vm2649_vm4 = vmand %vm2646_vm3, %vm1533_vm10  ;;  %vm6296_vm10 = vcmp.eq.s32.totalorder %v5480_v54, %v5525_v50 }
 0x741   : > { %v4986_v33 = vpop.eup %4985 }
 0x742   : > { %v1915_v34 = vmul.f32 %v4986_v33, %v1900_v51  ;;  %v5706_v33 = vsel %vm2107_vm1, 1.0, %v5192_v39 }
 0x744   : > { %v1920_v37 = vmul.f32 %v1919_v32, %v1915_v34 }
 0x745   : > { %v4988_v41 = vpop.eup %4987 }
 0x746   : > { %v1925_v43 = vadd.f32 %v1924_v35, %v1920_v37  ;;  %v1807_v44 = vmul.f32 %v4988_v41, %v1792_v59  ;;  %v4938_v59 = vld [vmem:[%s6256_s13 + $0x28] sm:$0xff]  }
 0x748   : > { %v1926_v46 = vpack.c.bf16 %v1925_v43, %v1925_v43  ;;  %v1812_v56 = vmul.f32 %v1811_v40, %v1807_v44 }
 0x74a   : > { %4653 = vmatmul.mubr.msk.bf16.vlgmr.msra.gmra.mrb[24].mxu0 %vm1476_vm9, %v1926_v46  ;;  %v1817_v51 = vadd.f32 %v1816_v45, %v1812_v56 }
 0x74c   : > { %v1818_v57 = vpack.c.bf16 %v1817_v51, %v1817_v51  ;;  %v2038_v51 = vrot.slane %v5684_v19, %v5603_v6 }
 0x74e   : > { %4645 = vmatmul.mubr.msk.bf16.vlgmr.msra.gmra.mrb[32].mxu1 %vm1476_vm9, %v1818_v57 }
 0x74f   : > { %4660 = vmatprep.mubr.msk.bf16.mxu1 %vm5191_vm8, %v5192_v39  ;;  %4657 = vmatpush3.bf16.msra.mxu1 %v4937_v58 }
 0x750   : > { %4658 = vmatprep.subr.bf16.mxu1 %v5192_v39 }
 0x753   : > { %4659 = vmatpush3.bf16.msra.mxu1 %v4938_v59 }
 0x7c0   : > { %v2012_v60 = vpop.xlane.xlu1 %2011 }
 0x7c1   : > { %v2013_v61 = vmul.f32 0.03125, %v2012_v60 }
 0x7c3   : > { %v2014_v62 = vadd.f32 1e-05, %v2013_v61 }
 0x7c5   : > { %4989 = vrsqrt.f32 %v2014_v62  ;;  %vm2017_vm6 = vcmp.eq.f32.partialorder %v2014_v62, inf  ;;  %v2020_v1 = vand.u32 2147483648, %v2014_v62  ;;  %vm2019_vm7 = vcmp.eq.f32.partialorder %v2014_v62, 0.0 }
 0x7cf   : > { %v4990_v63 = vpop.eup %4989 }
 0x7d0   : > { %v2016_v0 = vmul.f32 %v4990_v63, %v2014_v62 }
 0x7d2   : > { %v2018_v3 = vsel %vm2017_vm6, %v2014_v62, %v2016_v0  ;;  %vm2111_vm6 = vcmp.lt.s32.totalorder %v5480_v54, 32  ;;  %v1480_v0 = vld [vmem:[%s733_s21] sm:$0x1]  ;;  %s4352_s21 = sshll.u32 %s5320_s1, 7 }
 0x7d3   : > { %v2021_v5 = vsel %vm2019_vm7, %v2020_v1, %v2018_v3  ;;  %vm2102_vm7 = vmand %vm2100_vm11, %vm2101_vm15  ;;  %vm2180_vm1 = vcmp.gt.f32.partialorder %v1480_v0, 0.0  ;;  %s6133_s23 = scalar_lea.hbm %s6261_s18, %s4352_s21 }
 0x7d4   : > { %4991 = vrcp.f32 %v2021_v5  ;;  %vm2112_vm14 = vmand %vm2110_vm5, %vm2111_vm6  ;;  %v5703_v32 = vsel %vm2102_vm7, 1.0, %v5192_v39  ;;  %v2181_v1 = vsel %vm2180_vm1, 1, %v5193_v4  ;;  %vm2653_vm5 = vcmp.lt.s32.totalorder %v5487_v21, 12 }
 0x7d5   : > { %v5709_v34 = vsel %vm2112_vm14, 1.0, %v5192_v39  ;;  %v2185_v3 = vrot.slane %v2181_v1, %v5578_v48  ;;  %v2240_v1 = vrot.slane %v1480_v0, %v5578_v48  ;;  %v4939_v0 = vld [vmem:[%s6256_s13 + $0x30] sm:$0xff]   ;;  %vm2663_vm6 = vcmp.lt.s32.totalorder %v5522_v49, 20  ;;  %vm2659_vm7 = vmand %vm2653_vm5, %vm1556_vm12 }
 0x7d6   : > { %vm2666_vm1 = vmand %vm1563_vm13, %vm2663_vm6  ;;  %v4310_v21 = vsel %vm2659_vm7, 1.0, %v5192_v39  ;;  %vm2771_vm13 = vcmask 257024  }
 0x7d7   : > { %vm2186_vm14 = vcmp.eq.s32.totalorder %v2185_v3, 1  ;;  %vm2669_vm12 = vmand %vm2666_vm1, %vm6296_vm10 }
 0x7d8   : > { %v4311_v42 = vsel %vm2669_vm12, 1.0, %v5192_v39 }
 0x7de   : > { %v4992_v11 = vpop.eup %4991 }
 0x7df   : > { %v2023_v12 = vmul.f32 %v4992_v11, %v2008_v17 }
 0x7e1   : > { %v2028_v15 = vmul.f32 %v2027_v10, %v2023_v12 }
 0x7e3   : > { %v2033_v16 = vadd.f32 %v2032_v13, %v2028_v15 }
 0x7e5   : > { %v2034_v9 = vpack.c.bf16 %v2033_v16, %v2033_v16 }
 0x7e7   : > { %4661 = vmatmul.mubr.msk.bf16.vlgmr.msra.gmra.mrb[36].mxu1 %vm1476_vm9, %v2034_v9 }
 0x81d   : > { %v1980_v17 = vpop.f32.mrb[24].mxu0 }
 0x81e   : > { %v1981_v53 = vadd.f32 %v1980_v17, %v1930_v14  ;;  %v4654_v20 = vpop.f32.mrb[25].mxu0 }
 0x81f   : > { %v1983_v22 = vpop.f32.mrb[26].mxu0 }
 0x820   : > { %v2121_v24 = vpack.c.bf16 %v1981_v53, %v1981_v53  ;;  %v4655_v25 = vpop.f32.mrb[27].mxu0 }
 0x821   : > { %v1872_v27 = vpop.f32.mrb[32].mxu1 }
 0x822   : > { %v2129_v26 = vsel %vm1476_vm9, %v2121_v24, 0  ;;  %4866 = vmatprep.subr.msk.bf16.mxu0 %vm1476_vm9, %v2121_v24  ;;  %v1873_v28 = vadd.f32 %v1872_v27, %v1822_v23  ;;  %v4646_v29 = vpop.f32.mrb[33].mxu1 }
 0x823   : > { %4665 = vmatpush3.bf16.xpose.msra.mxu0 %v2129_v26  ;;  %v1875_v35 = vpop.f32.mrb[34].mxu1 }
 0x824   : > { %4676 = vmatprep.subr.bf16.mxu0 %v5192_v39  ;;  %v2094_v37 = vmul.f32 0.35355338, %v1873_v28  ;;  %v4647_v40 = vpop.f32.mrb[35].mxu1 }
 0x826   : > { %v2115_v41 = vmul.f32 %v5700_v30, %v2094_v37  ;;  %v2116_v43 = vmul.f32 %v5703_v32, %v2094_v37  ;;  %v2117_v44 = vmul.f32 %v5706_v33, %v2094_v37  ;;  %v2118_v45 = vmul.f32 %v5709_v34, %v2094_v37 }
 0x828   : > { %v2120_v46 = vpack.c.bf16 %v2118_v45, %v2117_v44  ;;  %v2119_v56 = vpack.c.bf16 %v2116_v43, %v2115_v41 }
 0x82a   : > { %4666 = vmatprep.mubr.msk.bf16.mxu0 %vm1476_vm9, %v2119_v56 }
 0x82b   : > { %4667 = vmatmul.mubr.msk.bf16.vlgmr.msra.gmra.mrb[28].mxu0 %vm1476_vm9, %v2120_v46 }
 0x82c   : > { %4680 = vmatprep.mubr.msk.bf16.mxu0 %vm5191_vm8, %v5192_v39  ;;  %4677 = vmatpush3.bf16.msra.mxu0 %v4939_v0 }
 0x82d   : > { %4678 = vmatprep.subr.bf16.mxu0 %v5192_v39 }
 0x8ba   : > { %v2088_v57 = vpop.f32.mrb[36].mxu1 }
 0x8bb   : > { %v2089_v58 = vadd.f32 %v2088_v57, %v2038_v51  ;;  %v4662_v59 = vpop.f32.mrb[37].mxu1 }
 0x8bc   : > { %v2091_v60 = vpop.f32.mrb[38].mxu1 }
 0x8bd   : > { %v2248_v61 = vpack.c.bf16 %v2089_v58, %v2089_v58  ;;  %v4663_v62 = vpop.f32.mrb[39].mxu1 }
 0x8bf   : > { %v2256_v63 = vsel %vm815_vm0, %v2248_v61, 0  ;;  %4867 = vmatprep.subr.msk.bf16.mxu1 %vm815_vm0, %v2248_v61 }
 0x8c0   : > { %4671 = vmatpush3.bf16.msra.mxu1 %v2256_v63 }
 0x8c1   : > { %4684 = vmatprep.subr.bf16.mxu1 %v5192_v39 }
 0x8fe   : > { %v4668_v5 = vpop.f32.mrb[28].mxu0 }
 0x8ff   : > { %v2189_v10 = vsel %vm2186_vm14, %v4668_v5, -1e+30  ;;  %v2165_v11 = vpop.f32.mrb[29].mxu0 }
 0x900   : > { %v2187_v12 = vsel %vm2186_vm14, %v2165_v11, -1e+30  ;;  %v4669_v13 = vpop.f32.mrb[30].mxu0  ;;  %v2198_v15 = vsel %vm2191_vm2, %v2189_v10, -inf }
 0x901   : > { %v2190_v16 = vsel %vm2186_vm14, %v4669_v13, -1e+30  ;;  %2199 = vmax.xlane.f32.xlu1 %v2198_v15  ;;  %v2168_v9 = vpop.f32.mrb[31].mxu0  ;;  %v2192_v17 = vsel %vm2191_vm2, %v2187_v12, -inf }
 0x902   : > { %v2188_v14 = vsel %vm2186_vm14, %v2168_v9, -1e+30  ;;  %v2201_v20 = vsel %vm2191_vm2, %v2190_v16, -inf  ;;  %vm6297_vm14 = vcmp.ge.s32.totalorder %v5477_v52, 1 }
 0x903   : > { %v2195_v53 = vsel %vm2191_vm2, %v2188_v14, -inf  ;;  %vm6298_vm5 = vmmov %vm6297_vm14 }
 0x905   : > { %2193 = vmax.xlane.f32.xlu1 %v2192_v17 }
 0x909   : > { %2196 = vmax.xlane.f32.xlu1 %v2195_v53 }
 0x90d   : > { %2202 = vmax.xlane.f32.xlu1 %v2201_v20 }
 0x98e   : > { %v2200_v22 = vpop.xlane.xlu1 %2199 }
 0x98f   : > { %v2206_v23 = vsub.f32 %v2189_v10, %v2200_v22  ;;  %v4940_v22 = vld [vmem:[%s6256_s13 + $0x38] sm:$0xff]  }
 0x990   : > { %4679 = vmatpush3.bf16.msra.mxu0 %v4940_v22  ;;  %v2406_v22 = vrot.slane %v5684_v19, %v5647_v18 }
 0x991   : > { %v2212_v26 = vmul.f32 1.442695, %v2206_v23  ;;  %4692 = vmatprep.subr.bf16.mxu0 %v5192_v39 }
 0x992   : > { %v2194_v24 = vpop.xlane.xlu1 %2193 }
 0x993   : > { %v2204_v25 = vsub.f32 %v2187_v12, %v2194_v24 }
 0x995   : > { %v2208_v27 = vmul.f32 1.442695, %v2204_v25 }
 0x996   : > { %v2197_v28 = vpop.xlane.xlu1 %2196 }
 0x997   : > { %4993 = vpow2.f32 %v2208_v27  ;;  %v2205_v29 = vsub.f32 %v2188_v14, %v2197_v28 }
 0x998   : > { %4995 = vpow2.f32 %v2212_v26 }
 0x999   : > { %v2210_v35 = vmul.f32 1.442695, %v2205_v29 }
 0x99a   : > { %v2203_v37 = vpop.xlane.xlu1 %2202 }
 0x99b   : > { %4997 = vpow2.f32 %v2210_v35  ;;  %v2207_v40 = vsub.f32 %v2190_v16, %v2203_v37 }
 0x99d   : > { %v2214_v41 = vmul.f32 1.442695, %v2207_v40 }
 0x99f   : > { %4999 = vpow2.f32 %v2214_v41 }
 0x9a1   : > { %v4994_v43 = vpop.eup %4993 }
 0x9a2   : > { %v2216_v44 = vsel %vm2191_vm2, %v4994_v43, 0.0  ;;  %v4996_v45 = vpop.eup %4995 }
 0x9a3   : > { %2217 = vadd.xlane.f32.xlu1 %v2216_v44  ;;  %v2222_v56 = vsel %vm2191_vm2, %v4996_v45, 0.0  ;;  %v2319_v44 = vrot.slane %v5684_v19, %v5654_v36 }
 0x9a5   : > { %v4998_v46 = vpop.eup %4997 }
 0x9a6   : > { %v2219_v51 = vsel %vm2191_vm2, %v4998_v46, 0.0 }
 0x9a7   : > { %2223 = vadd.xlane.f32.xlu1 %v2222_v56  ;;  %2220 = vadd.xlane.f32.xlu0 %v2219_v51 }
 0x9a9   : > { %v5000_v57 = vpop.eup %4999 }
 0x9aa   : > { %v2225_v58 = vsel %vm2191_vm2, %v5000_v57, 0.0 }
 0x9ab   : > { %2226 = vadd.xlane.f32.xlu1 %v2225_v58  ;;  %v2376_v58 = vmul.f32 %v5617_v38, %v5558_v2  ;;  %v4942_v2 = vld [vmem:[%s6257_s14 + $0x8] sm:$0xff]  }
 0xa30   : > { %v2218_v59 = vpop.xlane.xlu1 %2217 }
 0xa31   : > { %5001 = vrcp.f32 %v2218_v59 }
 0xa34   : > { %v2221_v60 = vpop.xlane.xlu0 %2220  ;;  %v2224_v61 = vpop.xlane.xlu1 %2223 }
 0xa35   : > { %5003 = vrcp.f32 %v2221_v60 }
 0xa36   : > { %5005 = vrcp.f32 %v2224_v61 }
 0xa38   : > { %v2227_v62 = vpop.xlane.xlu1 %2226 }
 0xa39   : > { %5007 = vrcp.f32 %v2227_v62 }
 0xa3b   : > { %v5002_v63 = vpop.eup %5001 }
 0xa3c   : > { %v2232_v3 = vmul.f32 %v5002_v63, %v4994_v43 }
 0xa3e   : > { %v2242_v13 = vmul.f32 %v2240_v1, %v2232_v3 }
 0xa3f   : > { %v5004_v5 = vpop.eup %5003 }
 0xa40   : > { %v5006_v10 = vpop.eup %5005  ;;  %v2233_v11 = vmul.f32 %v5004_v5, %v4998_v46 }
 0xa41   : > { %v2234_v12 = vmul.f32 %v5006_v10, %v4996_v45  ;;  %v4941_v10 = vld [vmem:[%s6257_s14] sm:$0xff]  }
 0xa42   : > { %v2243_v15 = vmul.f32 %v2240_v1, %v2233_v11 }
 0xa43   : > { %v5008_v16 = vpop.eup %5007  ;;  %v2244_v17 = vmul.f32 %v2240_v1, %v2234_v12 }
 0xa44   : > { %v2235_v9 = vmul.f32 %v5008_v16, %v5000_v57  ;;  %v2246_v14 = vpack.c.bf16 %v2243_v15, %v2242_v13 }
 0xa46   : > { %v2245_v53 = vmul.f32 %v2240_v1, %v2235_v9  ;;  %4672 = vmatprep.mubr.msk.bf16.mxu1 %vm2191_vm2, %v2246_v14 }
 0xa48   : > { %v2247_v20 = vpack.c.bf16 %v2245_v53, %v2244_v17  ;;  %v2401_v53 = vrot.slane %v5684_v19, %v5644_v31 }
 0xa4a   : > { %4673 = vmatmul.mubr.msk.bf16.vlgmr.msra.gmra.mrb[40].mxu1 %vm2191_vm2, %v2247_v20 }
 0xa4b   : > { %4688 = vmatprep.mubr.msk.bf16.mxu1 %vm5191_vm8, %v5192_v39  ;;  %4685 = vmatpush3.bf16.msra.mxu1 %v4941_v10 }
 0xa4c   : > { %4686 = vmatprep.subr.bf16.mxu1 %v5192_v39 }
 0xa4f   : > { %4687 = vmatpush3.bf16.msra.mxu1 %v4942_v2 }
 0xa50   : > { %4712 = vmatprep.subr.mxu1 %v5192_v39 }
 0xb1d   : > { %v4674_v23 = vpop.f32.mrb[40].mxu1 }
 0xb1e   : > { %v2292_v24 = vpop.f32.mrb[41].mxu1  ;;  %v2311_v29 = vmul.f32 %v4674_v23, %v5706_v33 }
 0xb1f   : > { %v4675_v25 = vpop.f32.mrb[42].mxu1  ;;  %v2307_v27 = vmul.f32 %v5700_v30, %v2292_v24 }
 0xb20   : > { %v2295_v26 = vpop.f32.mrb[43].mxu1  ;;  %v2313_v37 = vmul.f32 %v4675_v25, %v5709_v34 }
 0xb21   : > { %v2309_v28 = vmul.f32 %v5703_v32, %v2295_v26  ;;  %v4943_v26 = vld [vmem:[%s6259_s16] sm:$0xff]  }
 0xb23   : > { %v2310_v35 = vadd.f32 %v2309_v28, %v2307_v27  ;;  %v4944_v27 = vld [vmem:[%s6259_s16 + $0x8] sm:$0xff]   ;;  %v4945_v28 = vld [vmem:[%s6259_s16 + $0x10] sm:$0xff]  }
 0xb25   : > { %v2312_v40 = vadd.f32 %v2311_v29, %v2310_v35  ;;  %v4946_v29 = vld [vmem:[%s6259_s16 + $0x18] sm:$0xff]   ;;  %v4947_v35 = vld [vmem:[%s6259_s16 + $0x20] sm:$0xff]  }
 0xb27   : > { %v2314_v41 = vadd.f32 %v2313_v37, %v2312_v40  ;;  %v4948_v37 = vld [vmem:[%s6259_s16 + $0x28] sm:$0xff]   ;;  %v4949_v40 = vld [vmem:[%s6259_s16 + $0x30] sm:$0xff]  }
 0xb29   : > { %v2315_v43 = vpack.c.bf16 %v2314_v41, %v2314_v41  ;;  %v4950_v41 = vld [vmem:[%s6259_s16 + $0x38] sm:$0xff]  }
 0xb2b   : > { %4681 = vmatmul.mubr.msk.bf16.vlgmr.msra.gmra.mrb[32].mxu0 %vm1476_vm9, %v2315_v43  ;;  %v4255_v43 = vld [vmem:[%s6258_s15] ss:$0 sm:$0xff] }
 0xb2c   : > { %4708 = vmatprep.mubr.msk.bf16.mxu0 %vm5191_vm8, %v5192_v39  ;;  %4693 = vmatpush3.bf16.msra.mxu0 %v4943_v26  ;;  %v2501_v26 = vrot.slane %v5684_v19, %v5672_v7 }
 0xb2d   : > { %4694 = vmatprep.subr.bf16.mxu0 %v5192_v39 }
 0xb30   : > { %4695 = vmatpush3.bf16.msra.mxu0 %v4944_v27 }
 0xb31   : > { %4696 = vmatprep.subr.bf16.mxu0 %v5192_v39 }
 0xb34   : > { %4697 = vmatpush3.bf16.msra.mxu0 %v4945_v28 }
 0xb35   : > { %4698 = vmatprep.subr.bf16.mxu0 %v5192_v39 }
 0xb38   : > { %4699 = vmatpush3.bf16.msra.mxu0 %v4946_v29 }
 0xb39   : > { %4700 = vmatprep.subr.bf16.mxu0 %v5192_v39 }
 0xb3c   : > { %4701 = vmatpush3.bf16.msra.mxu0 %v4947_v35 }
 0xb3d   : > { %4702 = vmatprep.subr.bf16.mxu0 %v5192_v39 }
 0xb40   : > { %4703 = vmatpush3.bf16.msra.mxu0 %v4948_v37 }
 0xb41   : > { %4704 = vmatprep.subr.bf16.mxu0 %v5192_v39 }
 0xb44   : > { %4705 = vmatpush3.bf16.msra.mxu0 %v4949_v40 }
 0xb45   : > { %4706 = vmatprep.subr.bf16.mxu0 %v5192_v39 }
 0xb48   : > { %4707 = vmatpush3.bf16.msra.mxu0 %v4950_v41  ;;  %v4309_v41 = vsel %vm2649_vm4, 1.0, %v5192_v39 }
 0xb49   : > { %4747 = vmatprep.subr.bf16.mxu0 %v5192_v39 }
 0xbfe   : > { %v2369_v45 = vpop.f32.mrb[32].mxu0 }
 0xbff   : > { %v2370_v46 = vadd.f32 %v2369_v45, %v2319_v44  ;;  %v4682_v56 = vpop.f32.mrb[33].mxu0 }
 0xc00   : > { %v2372_v51 = vpop.f32.mrb[34].mxu0 }
 0xc01   : > { %v2375_v57 = vmul.f32 %v2370_v46, %v5617_v38  ;;  %v4683_v59 = vpop.f32.mrb[35].mxu0 }
 0xc03   : > { %v5764_v60 = vadd.f32 %v2376_v58, %v2375_v57 }
 0xc05   : > { %v2378_v61 = vsel %vm1476_vm9, %v5764_v60, 0.0 }
 0xc06   : > { %2379 = vadd.xlane.f32.xlu1 %v2378_v61 }
 0xc93   : > { %v2380_v62 = vpop.xlane.xlu1 %2379 }
 0xc94   : > { %v2381_v63 = vmul.f32 0.03125, %v2380_v62 }
 0xc96   : > { %v2382_v1 = vsub.f32 %v5764_v60, %v2381_v63 }
 0xc98   : > { %v2383_v3 = vmul.f32 %v2382_v1, %v2382_v1 }
 0xc9a   : > { %v2384_v5 = vsel %vm1476_vm9, %v2383_v3, 0.0 }
 0xc9b   : > { %2385 = vadd.xlane.f32.xlu1 %v2384_v5 }
 0xd28   : > { %v2386_v11 = vpop.xlane.xlu1 %2385 }
 0xd29   : > { %v2387_v12 = vmul.f32 0.03125, %v2386_v11 }
 0xd2b   : > { %v2388_v13 = vadd.f32 1e-05, %v2387_v12 }
 0xd2d   : > { %5009 = vrsqrt.f32 %v2388_v13  ;;  %vm2391_vm0 = vcmp.eq.f32.partialorder %v2388_v13, inf  ;;  %v2394_v9 = vand.u32 2147483648, %v2388_v13  ;;  %vm2393_vm11 = vcmp.eq.f32.partialorder %v2388_v13, 0.0 }
 0xd37   : > { %v5010_v15 = vpop.eup %5009 }
 0xd38   : > { %v2390_v16 = vmul.f32 %v5010_v15, %v2388_v13 }
 0xd3a   : > { %v2392_v14 = vsel %vm2391_vm0, %v2388_v13, %v2390_v16 }
 0xd3b   : > { %v2395_v17 = vsel %vm2393_vm11, %v2394_v9, %v2392_v14 }
 0xd3c   : > { %5011 = vrcp.f32 %v2395_v17 }
 0xd46   : > { %v5012_v20 = vpop.eup %5011 }
 0xd47   : > { %v2397_v0 = vmul.f32 %v5012_v20, %v2382_v1 }
 0xd49   : > { %v2402_v23 = vmul.f32 %v2401_v53, %v2397_v0 }
 0xd4b   : > { %v2407_v24 = vadd.f32 %v2406_v22, %v2402_v23 }
 0xd4d   : > { %v2408_v25 = vpack.c.bf16 %v2407_v24, %v2407_v24 }
 0xd4f   : > { %4689 = vmatmul.mubr.msk.bf16.vlgmr.msra.gmra.mrb[44].mxu1 %vm1476_vm9, %v2408_v25 }
 0xd50   : > { %4714 = vmatprep.mubr.msk.f32.mxu1 %vm5191_vm8, %v5192_v39 }
 0xe22   : > { %v2464_v44 = vpop.f32.mrb[44].mxu1 }
 0xe23   : > { %v2465_v45 = vadd.f32 %v4255_v43, %v2464_v44  ;;  %v4690_v46 = vpop.f32.mrb[45].mxu1 }
 0xe24   : > { %v2467_v56 = vpop.f32.mrb[46].mxu1 }
 0xe25   : > { %v2470_v51 = vmul.f32 0.70710677, %v2465_v45  ;;  %v4691_v57 = vpop.f32.mrb[47].mxu1  ;;  %v2494_v22 = vmul.f32 0.5, %v2465_v45 }
 0xe27   : > { %v2471_v58 = vand.u32 2147483647, %v2470_v51  ;;  %vm2491_vm15 = vcmp.ge.f32.partialorder %v2470_v51, 0.0 }
 0xe29   : > { %v2472_v59 = vmul.f32 0.3275911, %v2471_v58  ;;  %v2485_v62 = vsub.f32 0.0, %v2471_v58 }
 0xe2b   : > { %v2473_v61 = vadd.f32 1.0, %v2472_v59  ;;  %v2486_v1 = vmul.f32 %v2485_v62, %v2471_v58 }
 0xe2d   : > { %5013 = vrcp.f32 %v2473_v61  ;;  %v2487_v10 = vmul.f32 1.442695, %v2486_v1 }
 0xe2f   : > { %5015 = vpow2.f32 %v2487_v10 }
 0xe37   : > { %v5014_v63 = vpop.eup %5013 }
 0xe38   : > { %v2476_v3 = vmul.f32 1.0614054, %v5014_v63 }
 0xe39   : > { %v5016_v14 = vpop.eup %5015 }
 0xe3a   : > { %v2477_v5 = vadd.f32 -1.4531521, %v2476_v3 }
 0xe3c   : > { %v2478_v2 = vmul.f32 %v5014_v63, %v2477_v5 }
 0xe3e   : > { %v2479_v11 = vadd.f32 1.4214138, %v2478_v2 }
 0xe40   : > { %v2480_v12 = vmul.f32 %v5014_v63, %v2479_v11 }
 0xe42   : > { %v2481_v13 = vadd.f32 -0.28449672, %v2480_v12 }
 0xe44   : > { %v2482_v15 = vmul.f32 %v5014_v63, %v2481_v13 }
 0xe46   : > { %v2483_v16 = vadd.f32 0.2548296, %v2482_v15 }
 0xe48   : > { %v2484_v9 = vmul.f32 %v5014_v63, %v2483_v16  ;;  %v2593_v16 = vld [vmem:[%s737_s0] sm:$0xf]  ;;  %s3902_s0 = sand.u32 1, %s5320_s1  }
 0xe49   : > { %s6139_s25 = scalar_lea.sflag [#allocation5], %s3902_s0 }
 0xe4a   : > { %v2489_v17 = vmul.f32 %v5016_v14, %v2484_v9 }
 0xe4c   : > { %v2490_v53 = vsub.f32 1.0, %v2489_v17 }
 0xe4e   : > { %v2492_v20 = vsub.f32 0.0, %v2490_v53 }
 0xe50   : > { %v2493_v0 = vsel %vm2491_vm15, %v2490_v53, %v2492_v20 }
 0xe51   : > { %v2495_v23 = vadd.f32 1.0, %v2493_v0 }
 0xe53   : > { %v2496_v24 = vmul.f32 %v2495_v23, %v2494_v22 }
 0xe55   : > { %v2497_v25 = vpack.c.bf16 %v2496_v24, %v2496_v24 }
 0xe57   : > { %4709 = vmatmul.mubr.bf16.vlgmr.msra.gmra.mrb[36].mxu0 %v2497_v25 }
 0xe58   : > { %4749 = vmatprep.mubr.msk.bf16.mxu0 %vm5191_vm8, %v5192_v39 }
 0xf2a   : > { %v2584_v27 = vpop.f32.mrb[36].mxu0 }
 0xf2b   : > { %v2585_v28 = vadd.f32 %v2584_v27, %v2501_v26  ;;  %v4710_v29 = vpop.f32.mrb[37].mxu0 }
 0xf2c   : > { %v2587_v35 = vpop.f32.mrb[38].mxu0 }
 0xf2d   : > { %v2590_v37 = vmul.f32 %v2585_v28, %v5617_v38  ;;  %v4711_v40 = vpop.f32.mrb[39].mxu0 }
 0xf2f   : > { %v2591_v19 = vadd.f32 %v2590_v37, %v5764_v60 }
 0xf31   : > { %4713 = vmatpush3.msra.mxu1 %v2591_v19  ;;  %2592 = vst.msk [vmem:[%s5839_s28] sm:$0xff] %vm1476_vm9, %v2591_v19 }
 0xf32   : > { %4715 = vmatmul.mubr.msk.f32.vlgmr.msra.gmra.mrb[48].mxu1 %vm2191_vm2, %v4309_v41  ;;  %4723 = vmatprep.subr.bf16.mxu1 %v5192_v39 }
 0xf33   : > { %4717 = vmatprep.mubr.msk.f32.mxu1 %vm5191_vm8, %v5192_v39 }
 0xf36   : > { %4718 = vmatmul.mubr.msk.f32.gmra.mrb[50].mxu1 %vm2191_vm2, %v4310_v21 }
 0xf37   : > { %4720 = vmatprep.mubr.msk.f32.mxu1 %vm5191_vm8, %v5192_v39 }
 0xf3a   : > { %4721 = vmatmul.mubr.msk.f32.gmra.mrb[52].mxu1 %vm2191_vm2, %v4311_v42 }
 0xf3b   : > { %4727 = vmatprep.mubr.msk.bf16.mxu1 %vm5191_vm8, %v5192_v39 }
0x1005   : > { %v2757_v47 = vpop.f32.mrb[48].mxu1 }
0x1006   : > { %v2772_v49 = vsel %vm2771_vm13, %v2757_v47, 0.0  ;;  %v4716_v38 = vpop.f32.mrb[49].mxu1 }
0x1007   : > { %2773 = vadd.xlane.f32.xlu1 %v2772_v49  ;;  %v5879_v38 = vld [vmem:[%s6254_s11 + $0x10] sm:$0xff] }
0x1009   : > { %v2762_v54 = vpop.f32.mrb[50].mxu1 }
0x100a   : > { %v4719_v50 = vpop.f32.mrb[51].mxu1  ;;  %v2802_v51 = vsel %vm2771_vm13, %v2762_v54, 0.0 }
0x100d   : > { %v2767_v60 = vpop.f32.mrb[52].mxu1 }
0x100e   : > { %v2847_v43 = vsel %vm6297_vm14, %v2767_v60, -1e+30  ;;  %v2824_v44 = vsel %vm2771_vm13, %v2767_v60, 0.0  ;;  %v4722_v45 = vpop.f32.mrb[53].mxu1 }
0x100f   : > { %v2848_v46 = vmax.f32 %v2847_v43, %v2757_v47  ;;  %2825 = vadd.xlane.f32.xlu1 %v2824_v44  ;;  %v2795_v43 = vrot.slane %v5879_v38, %v5578_v48  ;;  %v4269_v44 = vld [vmem:[%s6255_s12 + $0xc] sm:$0x7] }
0x1011   : > { %v5862_v56 = vmax.f32 %v2848_v46, %v2762_v54  ;;  %v2800_v46 = vrot.slane %v5879_v38, %v5586_v55 }
0x1013   : > { %2803 = vadd.xlane.f32.xlu1 %v2802_v51 }
0x1094   : > { %v2774_v57 = vpop.xlane.xlu1 %2773 }
0x1095   : > { %v2775_v58 = vmul.f32 0.03125, %v2774_v57  ;;  %v4270_v57 = vld [vmem:[%s6255_s12 + $0x10] sm:$0x7] }
0x1097   : > { %v2776_v59 = vsub.f32 %v2757_v47, %v2775_v58  ;;  %v4271_v58 = vld [vmem:[%s6255_s12 + $0x14] sm:$0x7] }
0x1099   : > { %v2777_v61 = vmul.f32 %v2776_v59, %v2776_v59 }
0x109b   : > { %v2778_v62 = vsel %vm2771_vm13, %v2777_v61, 0.0  ;;  %v2858_v61 = vrot.slane %v4269_v44, %v5586_v55 }
0x109c   : > { %2779 = vadd.xlane.f32.xlu0 %v2778_v62  ;;  %v2826_v63 = vpop.xlane.xlu1 %2825 }
0x109d   : > { %v2827_v1 = vmul.f32 0.03125, %v2826_v63 }
0x109f   : > { %v2828_v3 = vsub.f32 %v2767_v60, %v2827_v1  ;;  %v2971_v1 = vrot.slane %v4270_v57, %v5586_v55 }
0x10a0   : > { %v2804_v5 = vpop.xlane.xlu1 %2803 }
0x10a1   : > { %v2805_v10 = vmul.f32 0.03125, %v2804_v5  ;;  %v2829_v2 = vmul.f32 %v2828_v3, %v2828_v3  ;;  %v3079_v5 = vrot.slane %v4271_v58, %v5586_v55 }
0x10a3   : > { %v5866_v11 = vsub.f32 %v2762_v54, %v2805_v10  ;;  %v2830_v12 = vsel %vm2771_vm13, %v2829_v2, 0.0  ;;  %v2853_v10 = vrot.slane %v4269_v44, %v5578_v48  ;;  %v2966_v2 = vrot.slane %v4270_v57, %v5578_v48 }
0x10a4   : > { %2831 = vadd.xlane.f32.xlu1 %v2830_v12  ;;  %v3074_v12 = vrot.slane %v4271_v58, %v5578_v48 }
0x10a5   : > { %v2807_v13 = vmul.f32 %v5866_v11, %v5866_v11 }
0x10a7   : > { %v2808_v15 = vsel %vm2771_vm13, %v2807_v13, 0.0 }
0x10a8   : > { %2809 = vadd.xlane.f32.xlu1 %v2808_v15 }
0x10b2   : > { %2869 = vperm.xlu0 %4924, %v2593_v16  }
0x1129   : > { %v2780_v9 = vpop.xlane.xlu0 %2779 }
0x112a   : > { %v2781_v14 = vmul.f32 0.03125, %v2780_v9  ;;  %v2977_v9 = vrot.slane %v4270_v57, %v5603_v6 }
0x112c   : > { %v2782_v17 = vadd.f32 1e-05, %v2781_v14  ;;  %v3085_v14 = vrot.slane %v4271_v58, %v5603_v6 }
0x112e   : > { %5017 = vrsqrt.f32 %v2782_v17  ;;  %vm2785_vm2 = vcmp.eq.f32.partialorder %v2782_v17, inf  ;;  %v2788_v27 = vand.u32 2147483648, %v2782_v17  ;;  %vm2787_vm0 = vcmp.eq.f32.partialorder %v2782_v17, 0.0 }
0x1131   : > { %v2832_v53 = vpop.xlane.xlu1 %2831 }
0x1132   : > { %v2833_v20 = vmul.f32 0.03125, %v2832_v53 }
0x1134   : > { %v2834_v0 = vadd.f32 1e-05, %v2833_v20 }
0x1135   : > { %v2810_v22 = vpop.xlane.xlu1 %2809 }
0x1136   : > { %5019 = vrsqrt.f32 %v2834_v0  ;;  %v2811_v23 = vmul.f32 0.03125, %v2810_v22  ;;  %vm2837_vm11 = vcmp.eq.f32.partialorder %v2834_v0, inf  ;;  %v2840_v40 = vand.u32 2147483648, %v2834_v0 }
0x1137   : > { %vm2839_vm15 = vcmp.eq.f32.partialorder %v2834_v0, 0.0 }
0x1138   : > { %v5018_v24 = vpop.eup %5017  ;;  %v2812_v26 = vadd.f32 1e-05, %v2811_v23 }
0x1139   : > { %v2784_v25 = vmul.f32 %v5018_v24, %v2782_v17 }
0x113a   : > { %5021 = vrsqrt.f32 %v2812_v26  ;;  %vm2815_vm3 = vcmp.eq.f32.partialorder %v2812_v26, inf  ;;  %v2818_v49 = vand.u32 2147483648, %v2812_v26  ;;  %vm2817_vm4 = vcmp.eq.f32.partialorder %v2812_v26, 0.0 }
0x113b   : > { %v2786_v28 = vsel %vm2785_vm2, %v2782_v17, %v2784_v25  ;;  %vm3261_vm2 = vcmask 1041408  }
0x113c   : > { %v2789_v29 = vsel %vm2787_vm0, %v2788_v27, %v2786_v28 }
0x113d   : > { %5023 = vrcp.f32 %v2789_v29 }
0x1140   : > { %v5020_v35 = vpop.eup %5019 }
0x1141   : > { %v2836_v37 = vmul.f32 %v5020_v35, %v2834_v0 }
0x1143   : > { %v2838_v19 = vsel %vm2837_vm11, %v2834_v0, %v2836_v37 }
0x1144   : > { %v2841_v41 = vsel %vm2839_vm15, %v2840_v40, %v2838_v19  ;;  %v5022_v21 = vpop.eup %5021  ;;  %vm3237_vm15 = vcmask 27648  }
0x1145   : > { %5025 = vrcp.f32 %v2841_v41  ;;  %v2814_v42 = vmul.f32 %v5022_v21, %v2812_v26  ;;  %v5906_v21 = vpop.permute.xlu0 %2869 }
0x1147   : > { %v5024_v47 = vpop.eup %5023  ;;  %v2816_v54 = vsel %vm2815_vm3, %v2812_v26, %v2814_v42  ;;  %vm6301_vm3 = vcmask 31744  }
0x1148   : > { %v2819_v50 = vsel %vm2817_vm4, %v2818_v49, %v2816_v54  ;;  %v2791_v60 = vmul.f32 %v5024_v47, %v2776_v59  ;;  %vm6302_vm4 = vmmov %vm6301_vm3 }
0x1149   : > { %5027 = vrcp.f32 %v2819_v50 }
0x114a   : > { %v2796_v45 = vmul.f32 %v2795_v43, %v2791_v60 }
0x114c   : > { %v2801_v62 = vadd.f32 %v2800_v46, %v2796_v45 }
0x114e   : > { %v2859_v53 = vmul.f32 %v2858_v61, %v2801_v62  ;;  %v2972_v20 = vmul.f32 %v2971_v1, %v2801_v62  ;;  %v3080_v0 = vmul.f32 %v3079_v5, %v2801_v62  ;;  %v4952_v1 = vld [vmem:[%s6256_s13 + $0x48] sm:$0xff]  }
0x114f   : > { %v5026_v51 = vpop.eup %5025 }
0x1150   : > { %v2843_v59 = vmul.f32 %v5026_v51, %v2828_v3  ;;  %v2864_v3 = vrot.slane %v4269_v44, %v5603_v6 }
0x1152   : > { %v2844_v63 = vmul.f32 %v2843_v59, %v2795_v43 }
0x1153   : > { %v5028_v13 = vpop.eup %5027 }
0x1154   : > { %v2845_v15 = vadd.f32 %v2844_v63, %v2800_v46  ;;  %v2821_v16 = vmul.f32 %v5028_v13, %v5866_v11  ;;  %v4951_v63 = vld [vmem:[%s6256_s13 + $0x40] sm:$0xff]  }
0x1155   : > { %4724 = vmatpush3.bf16.msra.mxu1 %v4951_v63 }
0x1156   : > { %v2846_v17 = vsel %vm6298_vm5, %v2845_v15, 0.0  ;;  %v2822_v22 = vmul.f32 %v2821_v16, %v2795_v43  ;;  %4725 = vmatprep.subr.bf16.mxu1 %v5192_v39  ;;  %vm6303_vm5 = vmmov %vm6301_vm3 }
0x1157   : > { %v2854_v23 = vmul.f32 %v2853_v10, %v2846_v17  ;;  %v2967_v24 = vmul.f32 %v2966_v2, %v2846_v17  ;;  %v3075_v25 = vmul.f32 %v3074_v12, %v2846_v17 }
0x1158   : > { %v2823_v26 = vadd.f32 %v2822_v22, %v2800_v46 }
0x1159   : > { %v2860_v27 = vadd.f32 %v2859_v53, %v2854_v23  ;;  %v2973_v28 = vadd.f32 %v2972_v20, %v2967_v24  ;;  %v3081_v11 = vadd.f32 %v3080_v0, %v3075_v25  ;;  %4726 = vmatpush3.bf16.msra.mxu1 %v4952_v1 }
0x115a   : > { %v2865_v29 = vmul.f32 %v2864_v3, %v2823_v26  ;;  %v2978_v35 = vmul.f32 %v2977_v9, %v2823_v26  ;;  %v3086_v37 = vmul.f32 %v3085_v14, %v2823_v26  ;;  %4731 = vmatprep.subr.bf16.mxu1 %v5192_v39 }
0x115c   : > { %v2866_v40 = vadd.f32 %v2865_v29, %v2860_v27  ;;  %v2979_v19 = vadd.f32 %v2978_v35, %v2973_v28  ;;  %v3087_v41 = vadd.f32 %v3086_v37, %v3081_v11  ;;  %v2896_v11 = vrot.slane %v5879_v38, %v5603_v6 }
0x115d   : > { %v2901_v37 = vrot.slane %v5879_v38, %v5654_v36 }
0x115e   : > { %v2872_v42 = vmul.f32 %v5906_v21, %v2866_v40  ;;  %v2980_v49 = vmul.f32 %v2979_v19, %v5906_v21  ;;  %v3088_v61 = vmul.f32 %v3087_v41, %v5906_v21  ;;  %v3004_v19 = vrot.slane %v5879_v38, %v5644_v31 }
0x1160   : > { %v2873_v47 = vsel %vm2771_vm13, %v2872_v42, 0.0  ;;  %v2981_v54 = vsel %vm2771_vm13, %v2980_v49, 0.0  ;;  %v3089_v62 = vsel %vm2771_vm13, %v3088_v61, 0.0 }
0x1161   : > { %2874 = vadd.xlane.f32.xlu1 %v2873_v47  ;;  %v4953_v47 = vld [vmem:[%s6256_s13 + $0x50] sm:$0xff]  }
0x1165   : > { %2982 = vadd.xlane.f32.xlu1 %v2981_v54 }
0x11ee   : > { %v2875_v50 = vpop.xlane.xlu1 %2874 }
0x11ef   : > { %v2876_v60 = vmul.f32 0.03125, %v2875_v50  ;;  %v3009_v50 = vrot.slane %v5879_v38, %v5647_v18 }
0x11f1   : > { %v2877_v43 = vsub.f32 %v2872_v42, %v2876_v60 }
0x11f2   : > { %v2983_v44 = vpop.xlane.xlu1 %2982 }
0x11f3   : > { %v2984_v45 = vmul.f32 0.03125, %v2983_v44  ;;  %v2878_v46 = vmul.f32 %v2877_v43, %v2877_v43 }
0x11f5   : > { %v2985_v51 = vsub.f32 %v2980_v49, %v2984_v45  ;;  %v2879_v57 = vsel %vm2771_vm13, %v2878_v46, 0.0  ;;  %v4955_v46 = vld [vmem:[%s6256_s13 + $0x60] sm:$0xff]  }
0x11f6   : > { %2880 = vadd.xlane.f32.xlu1 %v2879_v57 }
0x11f7   : > { %v2986_v58 = vmul.f32 %v2985_v51, %v2985_v51 }
0x11f9   : > { %v2987_v59 = vsel %vm2771_vm13, %v2986_v58, 0.0 }
0x11fa   : > { %2988 = vadd.xlane.f32.xlu1 %v2987_v59 }
0x11fe   : > { %3090 = vadd.xlane.f32.xlu1 %v3089_v62 }
0x1283   : > { %v2881_v5 = vpop.xlane.xlu1 %2880 }
0x1284   : > { %v2882_v10 = vmul.f32 0.03125, %v2881_v5 }
0x1286   : > { %v2883_v2 = vadd.f32 1e-05, %v2882_v10  ;;  %v3112_v10 = vrot.slane %v5879_v38, %v5672_v7 }
0x1287   : > { %v2989_v12 = vpop.xlane.xlu1 %2988 }
0x1288   : > { %5029 = vrsqrt.f32 %v2883_v2  ;;  %v2990_v13 = vmul.f32 0.03125, %v2989_v12  ;;  %vm2886_vm6 = vcmp.eq.f32.partialorder %v2883_v2, inf  ;;  %v2889_v0 = vand.u32 2147483648, %v2883_v2 }
0x1289   : > { %vm2888_vm7 = vcmp.eq.f32.partialorder %v2883_v2, 0.0 }
0x128a   : > { %v2991_v15 = vadd.f32 1e-05, %v2990_v13  ;;  %v3117_v13 = vrot.slane %v5879_v38, %v2031_v8 }
0x128b   : > { %v3091_v16 = vpop.xlane.xlu1 %3090 }
0x128c   : > { %v3092_v3 = vmul.f32 0.03125, %v3091_v16  ;;  %5031 = vrsqrt.f32 %v2991_v15  ;;  %vm2994_vm1 = vcmp.eq.f32.partialorder %v2991_v15, inf  ;;  %v2997_v26 = vand.u32 2147483648, %v2991_v15 }
0x128d   : > { %vm2996_vm10 = vcmp.eq.f32.partialorder %v2991_v15, 0.0 }
0x128e   : > { %v5924_v9 = vsub.f32 %v3088_v61, %v3092_v3 }
0x1290   : > { %v3094_v14 = vmul.f32 %v5924_v9, %v5924_v9 }
0x1292   : > { %v5030_v17 = vpop.eup %5029  ;;  %v3095_v53 = vsel %vm2771_vm13, %v3094_v14, 0.0  ;;  %v5971_v14 = vld [vmem:[%s6254_s11 + $0x18] sm:$0x7f] }
0x1293   : > { %v2885_v20 = vmul.f32 %v5030_v17, %v2883_v2  ;;  %3096 = vadd.xlane.f32.xlu1 %v3095_v53  ;;  %v2907_v52 = vrot.slane %v5971_v14, %v5578_v48  ;;  %v3015_v38 = vrot.slane %v5971_v14, %v5586_v55 }
0x1295   : > { %v2887_v22 = vsel %vm2886_vm6, %v2883_v2, %v2885_v20  ;;  %vm6304_vm6 = vmmov %vm6301_vm3 }
0x1296   : > { %v2890_v23 = vsel %vm2888_vm7, %v2889_v0, %v2887_v22  ;;  %v5032_v24 = vpop.eup %5031 }
0x1297   : > { %5033 = vrcp.f32 %v2890_v23  ;;  %v2993_v25 = vmul.f32 %v5032_v24, %v2991_v15 }
0x1299   : > { %v2995_v27 = vsel %vm2994_vm1, %v2991_v15, %v2993_v25 }
0x129a   : > { %v2998_v28 = vsel %vm2996_vm10, %v2997_v26, %v2995_v27 }
0x129b   : > { %5035 = vrcp.f32 %v2998_v28 }
0x12a1   : > { %v5034_v29 = vpop.eup %5033 }
0x12a2   : > { %v2892_v35 = vmul.f32 %v5034_v29, %v2877_v43  ;;  %v4954_v43 = vld [vmem:[%s6256_s13 + $0x58] sm:$0xff]  }
0x12a4   : > { %v2897_v40 = vmul.f32 %v2896_v11, %v2892_v35 }
0x12a5   : > { %v5036_v41 = vpop.eup %5035 }
0x12a6   : > { %v2902_v42 = vadd.f32 %v2901_v37, %v2897_v40  ;;  %v3000_v49 = vmul.f32 %v5036_v41, %v2985_v51  ;;  %v4956_v51 = vld [vmem:[%s6256_s13 + $0x68] sm:$0xff]  }
0x12a8   : > { %v2903_v54 = vpack.c.bf16 %v2902_v42, %v2902_v42  ;;  %v3005_v60 = vmul.f32 %v3004_v19, %v3000_v49  ;;  %v3123_v42 = vrot.slane %v5971_v14, %v5603_v6 }
0x12aa   : > { %4728 = vmatmul.mubr.msk.bf16.vlgmr.msra.gmra.mrb[56].mxu1 %vm1476_vm9, %v2903_v54  ;;  %v3010_v44 = vadd.f32 %v3009_v50, %v3005_v60 }
0x12ab   : > { %4732 = vmatpush3.bf16.msra.mxu1 %v4953_v47  ;;  %4735 = vmatprep.mubr.msk.bf16.mxu1 %vm5191_vm8, %v5192_v39 }
0x12ac   : > { %4733 = vmatprep.subr.bf16.mxu1 %v5192_v39  ;;  %v3011_v45 = vpack.c.bf16 %v3010_v44, %v3010_v44 }
0x12af   : > { %4734 = vmatpush3.bf16.msra.mxu1 %v4954_v43 }
0x12b0   : > { %4739 = vmatprep.subr.bf16.mxu1 %v5192_v39 }
0x12b2   : > { %4736 = vmatmul.mubr.msk.bf16.vlgmr.msra.gmra.mrb[60].mxu1 %vm1476_vm9, %v3011_v45  ;;  %v6008_v45 = vld [vmem:[%s740_s27] sm:$0x1]  ;;  %s3937_s27 = sshll.u32 %s5839_s28, 4  ;;  %s6136_s27 = int_to_ptr.vmem [resolvable:$true] %s3937_s27 }
0x12b3   : > { %4743 = vmatprep.mubr.msk.bf16.mxu1 %vm5191_vm8, %v5192_v39  ;;  %4740 = vmatpush3.bf16.msra.mxu1 %v4955_v46  ;;  %vm3229_vm0 = vcmp.gt.f32.partialorder %v6008_v45, 0.0  ;;  %s5065_s24 = scalar_lea.vmem %s6136_s27, 128  ;;  %p5072_p0 = scmp.lt.s32.totalorder %s6136_s27, %s5070_s8 }
0x12b4   : > { %4741 = vmatprep.subr.bf16.mxu1 %v5192_v39  ;;  %v3230_v6 = vsel %vm3229_vm0, 1, %v5193_v4  ;;  %p5066_p11 = scmp.ne.s32.totalorder %s6136_s27, %s5065_s24  ;;  %p5073_p1 = scmp.lt.s32.totalorder %s5071_s2, %s5065_s24 }
0x12b5   : > { %v3234_v46 = vrot.slane %v3230_v6, %v5578_v48  ;;  %v3253_v6 = vrot.slane %v6008_v45, %v5578_v48 }
0x12b6   : > { %p5067_p12 = pnand %p5066_p11, %p5339_p5  ;;  %p5074_p2 = por %p5073_p1, %p5072_p0 }
0x12b7   : > { %4742 = vmatpush3.bf16.msra.mxu1 %v4956_v51  ;;  %vm6013_vm11 = vcmp.eq.s32.totalorder %v3234_v46, 1 }
0x12b8   : > { %4753 = vmatprep.subr.bf16.mxu1 %v5192_v39  ;;  %p5068_p13 = pneg %p5067_p12 }
0x12ba   : > { %p5075_p3 = pnand %p5074_p2, %p5068_p13 }
0x1320   : > { %v3097_v57 = vpop.xlane.xlu1 %3096 }
0x1321   : > { %v3098_v58 = vmul.f32 0.03125, %v3097_v57 }
0x1323   : > { %v3099_v59 = vadd.f32 1e-05, %v3098_v58 }
0x1325   : > { %5037 = vrsqrt.f32 %v3099_v59  ;;  %vm3102_vm12 = vcmp.eq.f32.partialorder %v3099_v59, inf  ;;  %v3105_v63 = vand.u32 2147483648, %v3099_v59  ;;  %vm3104_vm14 = vcmp.eq.f32.partialorder %v3099_v59, 0.0 }
0x132f   : > { %v5038_v61 = vpop.eup %5037 }
0x1330   : > { %v3101_v62 = vmul.f32 %v5038_v61, %v3099_v59 }
0x1332   : > { %v3103_v1 = vsel %vm3102_vm12, %v3099_v59, %v3101_v62 }
0x1333   : > { %v3106_v5 = vsel %vm3104_vm14, %v3105_v63, %v3103_v1 }
0x1334   : > { %5039 = vrcp.f32 %v3106_v5 }
0x133e   : > { %v5040_v2 = vpop.eup %5039 }
0x133f   : > { %v3108_v12 = vmul.f32 %v5040_v2, %v5924_v9 }
0x1341   : > { %v3113_v15 = vmul.f32 %v3112_v10, %v3108_v12 }
0x1343   : > { %v3118_v16 = vadd.f32 %v3117_v13, %v3113_v15 }
0x1345   : > { %v3119_v3 = vpack.c.bf16 %v3118_v16, %v3118_v16 }
0x1347   : > { %4744 = vmatmul.mubr.msk.bf16.vlgmr.msra.gmra.mrb[64].mxu1 %vm1476_vm9, %v3119_v3 }
0x1348   : > { %4755 = vmatprep.mubr.msk.bf16.mxu1 %vm5191_vm8, %v5192_v39 }
0x137d   : > { %v2957_v17 = vpop.f32.mrb[56].mxu1 }
0x137e   : > { %v4729_v53 = vpop.f32.mrb[57].mxu1  ;;  %v2958_v20 = vadd.f32 %v2957_v17, %v2907_v52 }
0x137f   : > { %v2960_v9 = vpop.f32.mrb[58].mxu1 }
0x1380   : > { %v4730_v8 = vpop.f32.mrb[59].mxu1  ;;  %v3179_v25 = vmul.f32 0.35355338, %v2958_v20 }
0x1382   : > { %v3180_v11 = vmul.f32 %v5700_v30, %v3179_v25  ;;  %v3307_v55 = vmul.f32 %v5703_v32, %v3179_v25  ;;  %v3411_v37 = vmul.f32 %v5706_v33, %v3179_v25  ;;  %v3515_v19 = vmul.f32 %v5709_v34, %v3179_v25 }
0x1384   : > { %v3181_v29 = vpack.c.bf16 %v3180_v11, %v3180_v11  ;;  %v3308_v35 = vpack.c.bf16 %v3307_v55, %v3307_v55  ;;  %v3412_v40 = vpack.c.bf16 %v3411_v37, %v3411_v37  ;;  %v3516_v41 = vpack.c.bf16 %v3515_v19, %v3515_v19 }
0x1385   : > { %v3065_v0 = vpop.f32.mrb[60].mxu1 }
0x1386   : > { %v3066_v22 = vadd.f32 %v3065_v0, %v3015_v38  ;;  %v4737_v23 = vpop.f32.mrb[61].mxu1 }
0x1387   : > { %v3068_v24 = vpop.f32.mrb[62].mxu1 }
0x1388   : > { %v3182_v26 = vpack.c.bf16 %v3066_v22, %v3066_v22  ;;  %v4738_v27 = vpop.f32.mrb[63].mxu1 }
0x138a   : > { %v3187_v28 = vsel %vm1476_vm9, %v3182_v26, 0 }
0x138b   : > { %4748 = vmatpush3.bf16.xpose.msra.mxu0 %v3187_v28 }
0x138c   : > { %4759 = vmatprep.subr.bf16.mxu0 %v5192_v39 }
0x1392   : > { %4750 = vmatmul.mubr.msk.bf16.vlgmr.msra.gmra.mrb[40].mxu0 %vm1476_vm9, %v3181_v29 }
0x1393   : > { %4760 = vmatpush3.bf16.xpose.msra.mxu0 %v3187_v28  ;;  %4761 = vmatprep.mubr.msk.bf16.mxu0 %vm5191_vm8, %v5192_v39 }
0x1394   : > { %4771 = vmatprep.subr.bf16.mxu0 %v5192_v39 }
0x139a   : > { %4762 = vmatmul.mubr.msk.bf16.vlgmr.msra.gmra.mrb[44].mxu0 %vm1476_vm9, %v3308_v35 }
0x139b   : > { %4772 = vmatpush3.bf16.xpose.msra.mxu0 %v3187_v28  ;;  %4773 = vmatprep.mubr.msk.bf16.mxu0 %vm5191_vm8, %v5192_v39 }
0x139c   : > { %4783 = vmatprep.subr.bf16.mxu0 %v5192_v39 }
0x13a2   : > { %4774 = vmatmul.mubr.msk.bf16.vlgmr.msra.gmra.mrb[48].mxu0 %vm1476_vm9, %v3412_v40 }
0x13a3   : > { %4784 = vmatpush3.bf16.xpose.msra.mxu0 %v3187_v28  ;;  %4785 = vmatprep.mubr.msk.bf16.mxu0 %vm5191_vm8, %v5192_v39 }
0x13a4   : > { %4795 = vmatprep.subr.bf16.mxu0 %v5192_v39 }
0x13aa   : > { %4786 = vmatmul.mubr.msk.bf16.vlgmr.msra.gmra.mrb[52].mxu0 %vm1476_vm9, %v3516_v41 }
0x13ab   : > { %4799 = vmatprep.mubr.msk.bf16.mxu0 %vm5191_vm8, %v5192_v39 }
0x141a   : > { %v3173_v47 = vpop.f32.mrb[64].mxu1 }
0x141b   : > { %v3174_v49 = vadd.f32 %v3173_v47, %v3123_v42  ;;  %v4745_v54 = vpop.f32.mrb[65].mxu1 }
0x141c   : > { %v3176_v50 = vpop.f32.mrb[66].mxu1 }
0x141d   : > { %v3257_v60 = vpack.c.bf16 %v3174_v49, %v3174_v49  ;;  %v4746_v43 = vpop.f32.mrb[67].mxu1 }
0x141f   : > { %v6000_v44 = vsel %vm3261_vm2, %v3257_v60, 0 }
0x1420   : > { %4754 = vmatpush3.bf16.msra.mxu1 %v6000_v44 }
0x1421   : > { %4765 = vmatprep.subr.bf16.mxu1 %v5192_v39 }
0x1465   : > { %v3223_v57 = vpop.f32.mrb[40].mxu0 }
0x1466   : > { %v3236_v58 = vsel %vm6013_vm11, %v3223_v57, -1e+30  ;;  %v4751_v59 = vpop.f32.mrb[41].mxu0 }
0x1467   : > { %v3226_v61 = vpop.f32.mrb[42].mxu0  ;;  %v3238_v62 = vsel %vm3237_vm15, %v3236_v58, -inf }
0x1468   : > { %3239 = vmax.xlane.f32.xlu0 %v3238_v62  ;;  %v4752_v63 = vpop.f32.mrb[43].mxu0 }
0x146d   : > { %v3346_v1 = vpop.f32.mrb[44].mxu0 }
0x146e   : > { %v3352_v4 = vsel %vm6013_vm11, %v3346_v1, -1e+30  ;;  %v4763_v5 = vpop.f32.mrb[45].mxu0 }
0x146f   : > { %v3349_v10 = vpop.f32.mrb[46].mxu0  ;;  %v3353_v2 = vsel %vm3237_vm15, %v3352_v4, -inf }
0x1470   : > { %3354 = vmax.xlane.f32.xlu1 %v3353_v2  ;;  %v4764_v12 = vpop.f32.mrb[47].mxu0 }
0x1475   : > { %v3450_v13 = vpop.f32.mrb[48].mxu0 }
0x1476   : > { %v3456_v15 = vsel %vm6013_vm11, %v3450_v13, -1e+30  ;;  %v4775_v16 = vpop.f32.mrb[49].mxu0 }
0x1477   : > { %v3453_v3 = vpop.f32.mrb[50].mxu0  ;;  %v3457_v17 = vsel %vm3237_vm15, %v3456_v15, -inf  ;;  %v4957_v16 = vld [vmem:[%s6256_s13 + $0x70] sm:$0xff]  }
0x1478   : > { %3458 = vmax.xlane.f32.xlu1 %v3457_v17  ;;  %v4776_v53 = vpop.f32.mrb[51].mxu0  ;;  %4796 = vmatpush3.bf16.msra.mxu0 %v4957_v16  ;;  %v4961_v16 = vld [vmem:[%s6259_s16 + $0x40] sm:$0xff]  }
0x1479   : > { %4797 = vmatprep.subr.bf16.mxu0 %v5192_v39 }
0x147d   : > { %v3554_v9 = vpop.f32.mrb[52].mxu0 }
0x147e   : > { %v3560_v52 = vsel %vm6013_vm11, %v3554_v9, -1e+30  ;;  %v4787_v8 = vpop.f32.mrb[53].mxu0 }
0x147f   : > { %v3557_v38 = vpop.f32.mrb[54].mxu0  ;;  %v3561_v20 = vsel %vm3237_vm15, %v3560_v52, -inf }
0x1480   : > { %3562 = vmax.xlane.f32.xlu1 %v3561_v20  ;;  %v4788_v0 = vpop.f32.mrb[55].mxu0 }
0x14f5   : > { %v3240_v22 = vpop.xlane.xlu0 %3239 }
0x14f6   : > { %v3241_v23 = vsub.f32 %v3236_v58, %v3240_v22 }
0x14f8   : > { %v3242_v24 = vmul.f32 1.442695, %v3241_v23 }
0x14fa   : > { %5041 = vpow2.f32 %v3242_v24 }
0x14fd   : > { %v3355_v25 = vpop.xlane.xlu1 %3354 }
0x14fe   : > { %v3356_v26 = vsub.f32 %v3352_v4, %v3355_v25 }
0x1500   : > { %v3357_v27 = vmul.f32 1.442695, %v3356_v26 }
0x1502   : > { %5043 = vpow2.f32 %v3357_v27 }
0x1504   : > { %v5042_v28 = vpop.eup %5041 }
0x1505   : > { %v3459_v11 = vpop.xlane.xlu1 %3458  ;;  %v3244_v29 = vsel %vm3237_vm15, %v5042_v28, 0.0 }
0x1506   : > { %v3460_v55 = vsub.f32 %v3456_v15, %v3459_v11  ;;  %3245 = vadd.xlane.f32.xlu1 %v3244_v29 }
0x1508   : > { %v3461_v35 = vmul.f32 1.442695, %v3460_v55 }
0x150a   : > { %5045 = vpow2.f32 %v3461_v35 }
0x150c   : > { %v5044_v37 = vpop.eup %5043 }
0x150d   : > { %v3563_v40 = vpop.xlane.xlu1 %3562  ;;  %v3359_v19 = vsel %vm3237_vm15, %v5044_v37, 0.0 }
0x150e   : > { %v3564_v41 = vsub.f32 %v3560_v52, %v3563_v40  ;;  %3360 = vadd.xlane.f32.xlu1 %v3359_v19 }
0x1510   : > { %v3565_v42 = vmul.f32 1.442695, %v3564_v41 }
0x1512   : > { %5047 = vpow2.f32 %v3565_v42 }
0x1514   : > { %v5046_v47 = vpop.eup %5045 }
0x1515   : > { %v3463_v49 = vsel %vm3237_vm15, %v5046_v47, 0.0 }
0x1516   : > { %3464 = vadd.xlane.f32.xlu1 %v3463_v49 }
0x151c   : > { %v5048_v54 = vpop.eup %5047 }
0x151d   : > { %v3567_v50 = vsel %vm3237_vm15, %v5048_v54, 0.0 }
0x151e   : > { %3568 = vadd.xlane.f32.xlu1 %v3567_v50 }
0x1593   : > { %v3246_v60 = vpop.xlane.xlu1 %3245 }
0x1594   : > { %5049 = vrcp.f32 %v3246_v60 }
0x159b   : > { %v3361_v43 = vpop.xlane.xlu1 %3360 }
0x159c   : > { %5051 = vrcp.f32 %v3361_v43 }
0x159e   : > { %v5050_v46 = vpop.eup %5049 }
0x159f   : > { %v3248_v51 = vmul.f32 %v5050_v46, %v5042_v28 }
0x15a1   : > { %v3255_v57 = vmul.f32 %v3253_v6, %v3248_v51 }
0x15a3   : > { %v3465_v58 = vpop.xlane.xlu1 %3464  ;;  %v3256_v59 = vpack.c.bf16 %v3255_v57, %v3255_v57  ;;  %v4959_v57 = vld [vmem:[%s6257_s14 + $0x10] sm:$0xff]  }
0x15a4   : > { %5053 = vrcp.f32 %v3465_v58 }
0x15a5   : > { %4756 = vmatmul.mubr.msk.bf16.vlgmr.msra.gmra.mrb[68].mxu1 %vm6301_vm3, %v3256_v59 }
0x15a6   : > { %v5052_v61 = vpop.eup %5051  ;;  %4766 = vmatpush3.bf16.msra.mxu1 %v6000_v44  ;;  %4767 = vmatprep.mubr.msk.bf16.mxu1 %vm5191_vm8, %v5192_v39 }
0x15a7   : > { %v3363_v62 = vmul.f32 %v5052_v61, %v5044_v37  ;;  %4777 = vmatprep.subr.bf16.mxu1 %v5192_v39 }
0x15a9   : > { %v3364_v63 = vmul.f32 %v3363_v62, %v3253_v6 }
0x15ab   : > { %v3569_v1 = vpop.xlane.xlu1 %3568  ;;  %v3365_v48 = vpack.c.bf16 %v3364_v63, %v3364_v63 }
0x15ac   : > { %5055 = vrcp.f32 %v3569_v1 }
0x15ad   : > { %4768 = vmatmul.mubr.msk.bf16.vlgmr.msra.gmra.mrb[72].mxu1 %vm6302_vm4, %v3365_v48 }
0x15ae   : > { %v5054_v45 = vpop.eup %5053  ;;  %4778 = vmatpush3.bf16.msra.mxu1 %v6000_v44  ;;  %4779 = vmatprep.mubr.msk.bf16.mxu1 %vm5191_vm8, %v5192_v39 }
0x15af   : > { %v3467_v4 = vmul.f32 %v5054_v45, %v5046_v47  ;;  %4789 = vmatprep.subr.bf16.mxu1 %v5192_v39 }
0x15b1   : > { %v3468_v5 = vmul.f32 %v3467_v4, %v3253_v6  ;;  %v3705_v4 = vrot.slane %v5971_v14, %v5644_v31  ;;  %v4962_v31 = vld [vmem:[%s6259_s16 + $0x48] sm:$0xff]  }
0x15b3   : > { %v3469_v10 = vpack.c.bf16 %v3468_v5, %v3468_v5 }
0x15b5   : > { %4780 = vmatmul.mubr.msk.bf16.vlgmr.msra.gmra.mrb[76].mxu1 %vm6303_vm5, %v3469_v10 }
0x15b6   : > { %v5056_v2 = vpop.eup %5055  ;;  %4790 = vmatpush3.bf16.msra.mxu1 %v6000_v44  ;;  %4791 = vmatprep.mubr.msk.bf16.mxu1 %vm5191_vm8, %v5192_v39  ;;  %v4958_v44 = vld [vmem:[%s6256_s13 + $0x78] sm:$0xff]  }
0x15b7   : > { %v3571_v12 = vmul.f32 %v5056_v2, %v5048_v54  ;;  %4803 = vmatprep.subr.bf16.mxu1 %v5192_v39  ;;  %4798 = vmatpush3.bf16.msra.mxu0 %v4958_v44  ;;  %v3710_v2 = vrot.slane %v5971_v14, %v5647_v18  ;;  %v4963_v18 = vld [vmem:[%s6259_s16 + $0x50] sm:$0xff]   ;;  %v4964_v44 = vld [vmem:[%s6259_s16 + $0x58] sm:$0xff]  }
0x15b8   : > { %4811 = vmatprep.subr.bf16.mxu0 %v5192_v39 }
0x15b9   : > { %v3572_v13 = vmul.f32 %v3571_v12, %v3253_v6 }
0x15bb   : > { %v3573_v15 = vpack.c.bf16 %v3572_v13, %v3572_v13 }
0x15bd   : > { %4792 = vmatmul.mubr.msk.bf16.vlgmr.msra.gmra.mrb[80].mxu1 %vm6304_vm6, %v3573_v15 }
0x15be   : > { %4807 = vmatprep.mubr.msk.bf16.mxu1 %vm5191_vm8, %v5192_v39  ;;  %4804 = vmatpush3.bf16.msra.mxu1 %v4959_v57 }
0x15bf   : > { %4805 = vmatprep.subr.bf16.mxu1 %v5192_v39 }
0x1678   : > { %v3299_v3 = vpop.f32.mrb[68].mxu1 }
0x1679   : > { %v4757_v17 = vpop.f32.mrb[69].mxu1  ;;  %v3305_v8 = vmul.f32 %v5700_v30, %v3299_v3  ;;  %v4965_v3 = vld [vmem:[%s6259_s16 + $0x60] sm:$0xff]  }
0x167a   : > { %v3302_v53 = vpop.f32.mrb[70].mxu1  ;;  %v4966_v17 = vld [vmem:[%s6259_s16 + $0x68] sm:$0xff]  }
0x167b   : > { %v4758_v9 = vpop.f32.mrb[71].mxu1  ;;  %v4967_v53 = vld [vmem:[%s6259_s16 + $0x70] sm:$0xff]  }
0x167c   : > { %v4968_v9 = vld [vmem:[%s6259_s16 + $0x78] sm:$0xff]  }
0x1680   : > { %v3403_v52 = vpop.f32.mrb[72].mxu1 }
0x1681   : > { %v3409_v38 = vmul.f32 %v5703_v32, %v3403_v52  ;;  %v4769_v20 = vpop.f32.mrb[73].mxu1  ;;  %v3623_v32 = vrot.slane %v5971_v14, %v5654_v36  ;;  %v4335_v52 = vld [vmem:[%s6258_s15 + $0x1] ss:$0 sm:$0xff] }
0x1682   : > { %v3406_v0 = vpop.f32.mrb[74].mxu1 }
0x1683   : > { %v3410_v22 = vadd.f32 %v3409_v38, %v3305_v8  ;;  %v4770_v23 = vpop.f32.mrb[75].mxu1 }
0x1688   : > { %v3507_v24 = vpop.f32.mrb[76].mxu1 }
0x1689   : > { %v3513_v25 = vmul.f32 %v5706_v33, %v3507_v24  ;;  %v4781_v26 = vpop.f32.mrb[77].mxu1 }
0x168a   : > { %v3510_v27 = vpop.f32.mrb[78].mxu1 }
0x168b   : > { %v3514_v28 = vadd.f32 %v3513_v25, %v3410_v22  ;;  %v4782_v11 = vpop.f32.mrb[79].mxu1 }
0x1690   : > { %v3611_v29 = vpop.f32.mrb[80].mxu1 }
0x1691   : > { %v3617_v55 = vmul.f32 %v5709_v34, %v3611_v29  ;;  %v4793_v35 = vpop.f32.mrb[81].mxu1  ;;  %v3680_v34 = vmul.f32 %v5906_v21, %v5862_v56  ;;  %v4960_v56 = vld [vmem:[%s6257_s14 + $0x18] sm:$0xff]  }
0x1692   : > { %v3614_v37 = vpop.f32.mrb[82].mxu1  ;;  %4806 = vmatpush3.bf16.msra.mxu1 %v4960_v56 }
0x1693   : > { %v3618_v40 = vadd.f32 %v3617_v55, %v3514_v28  ;;  %v4794_v30 = vpop.f32.mrb[83].mxu1 }
0x1695   : > { %v3619_v19 = vpack.c.bf16 %v3618_v40, %v3618_v40 }
0x1697   : > { %4800 = vmatmul.mubr.msk.bf16.vlgmr.msra.gmra.mrb[56].mxu0 %vm1476_vm9, %v3619_v19 }
0x1698   : > { %4827 = vmatprep.mubr.msk.bf16.mxu0 %vm5191_vm8, %v5192_v39  ;;  %4812 = vmatpush3.bf16.msra.mxu0 %v4961_v16 }
0x1699   : > { %4813 = vmatprep.subr.bf16.mxu0 %v5192_v39 }
0x169c   : > { %4814 = vmatpush3.bf16.msra.mxu0 %v4962_v31 }
0x169d   : > { %4815 = vmatprep.subr.bf16.mxu0 %v5192_v39 }
0x16a0   : > { %4816 = vmatpush3.bf16.msra.mxu0 %v4963_v18 }
0x16a1   : > { %4817 = vmatprep.subr.bf16.mxu0 %v5192_v39 }
0x16a4   : > { %4818 = vmatpush3.bf16.msra.mxu0 %v4964_v44 }
0x16a5   : > { %4819 = vmatprep.subr.bf16.mxu0 %v5192_v39 }
0x16a8   : > { %4820 = vmatpush3.bf16.msra.mxu0 %v4965_v3 }
0x16a9   : > { %4821 = vmatprep.subr.bf16.mxu0 %v5192_v39 }
0x16ac   : > { %4822 = vmatpush3.bf16.msra.mxu0 %v4966_v17 }
0x16ad   : > { %4823 = vmatprep.subr.bf16.mxu0 %v5192_v39 }
0x16b0   : > { %4824 = vmatpush3.bf16.msra.mxu0 %v4967_v53 }
0x16b1   : > { %4825 = vmatprep.subr.bf16.mxu0 %v5192_v39 }
0x16b4   : > { %4826 = vmatpush3.bf16.msra.mxu0 %v4968_v9 }
0x176a   : > { %v3673_v33 = vpop.f32.mrb[56].mxu0 }
0x176b   : > { %v3674_v41 = vadd.f32 %v3673_v33, %v3623_v32  ;;  %v4801_v42 = vpop.f32.mrb[57].mxu0 }
0x176c   : > { %v3676_v47 = vpop.f32.mrb[58].mxu0 }
0x176d   : > { %v3679_v49 = vmul.f32 %v3674_v41, %v5906_v21  ;;  %v4802_v54 = vpop.f32.mrb[59].mxu0 }
0x176f   : > { %v6073_v50 = vadd.f32 %v3680_v34, %v3679_v49 }
0x1771   : > { %v3682_v60 = vsel %vm2771_vm13, %v6073_v50, 0.0 }
0x1772   : > { %3683 = vadd.xlane.f32.xlu0 %v3682_v60 }
0x17ff   : > { %v3684_v43 = vpop.xlane.xlu0 %3683 }
0x1800   : > { %v3685_v6 = vmul.f32 0.03125, %v3684_v43 }
0x1802   : > { %v3686_v36 = vsub.f32 %v6073_v50, %v3685_v6 }
0x1804   : > { %v3687_v46 = vmul.f32 %v3686_v36, %v3686_v36 }
0x1806   : > { %v3688_v51 = vsel %vm2771_vm13, %v3687_v46, 0.0 }
0x1807   : > { %3689 = vadd.xlane.f32.xlu1 %v3688_v51 }
0x1894   : > { %v3690_v58 = vpop.xlane.xlu1 %3689 }
0x1895   : > { %v3691_v59 = vmul.f32 0.03125, %v3690_v58 }
0x1897   : > { %v3692_v61 = vadd.f32 1e-05, %v3691_v59 }
0x1899   : > { %5057 = vrsqrt.f32 %v3692_v61  ;;  %vm3695_vm8 = vcmp.eq.f32.partialorder %v3692_v61, inf  ;;  %v3698_v1 = vand.u32 2147483648, %v3692_v61  ;;  %vm3697_vm7 = vcmp.eq.f32.partialorder %v3692_v61, 0.0 }
0x18a3   : > { %v5058_v62 = vpop.eup %5057 }
0x18a4   : > { %v3694_v63 = vmul.f32 %v5058_v62, %v3692_v61 }
0x18a6   : > { %v3696_v48 = vsel %vm3695_vm8, %v3692_v61, %v3694_v63 }
0x18a7   : > { %v3699_v45 = vsel %vm3697_vm7, %v3698_v1, %v3696_v48 }
0x18a8   : > { %5059 = vrcp.f32 %v3699_v45 }
0x18b2   : > { %v5060_v5 = vpop.eup %5059 }
0x18b3   : > { %v3701_v10 = vmul.f32 %v5060_v5, %v3686_v36 }
0x18b5   : > { %v3706_v12 = vmul.f32 %v3705_v4, %v3701_v10 }
0x18b7   : > { %v3711_v13 = vadd.f32 %v3710_v2, %v3706_v12 }
0x18b9   : > { %v3712_v15 = vpack.c.bf16 %v3711_v13, %v3711_v13 }
0x18bb   : > { %4808 = vmatmul.mubr.msk.bf16.vlgmr.msra.gmra.mrb[84].mxu1 %vm1476_vm9, %v3712_v15 }
0x198e   : > { %v3768_v8 = vpop.f32.mrb[84].mxu1 }
0x198f   : > { %v3769_v38 = vadd.f32 %v4335_v52, %v3768_v8  ;;  %v4809_v20 = vpop.f32.mrb[85].mxu1 }
0x1990   : > { %v3771_v0 = vpop.f32.mrb[86].mxu1 }
0x1991   : > { %v3774_v22 = vmul.f32 0.70710677, %v3769_v38  ;;  %v4810_v23 = vpop.f32.mrb[87].mxu1  ;;  %v3798_v54 = vmul.f32 0.5, %v3769_v38 }
0x1993   : > { %v3775_v24 = vand.u32 2147483647, %v3774_v22  ;;  %vm3795_vm9 = vcmp.ge.f32.partialorder %v3774_v22, 0.0 }
0x1995   : > { %v3776_v25 = vmul.f32 0.3275911, %v3775_v24  ;;  %v3789_v39 = vsub.f32 0.0, %v3775_v24 }
0x1997   : > { %v3777_v26 = vadd.f32 1.0, %v3776_v25  ;;  %v3790_v28 = vmul.f32 %v3789_v39, %v3775_v24 }
0x1999   : > { %5061 = vrcp.f32 %v3777_v26  ;;  %v3791_v55 = vmul.f32 1.442695, %v3790_v28 }
0x199b   : > { %5063 = vpow2.f32 %v3791_v55 }
0x19a3   : > { %v5062_v27 = vpop.eup %5061 }
0x19a4   : > { %v3780_v11 = vmul.f32 1.0614054, %v5062_v27 }
0x19a5   : > { %v5064_v41 = vpop.eup %5063 }
0x19a6   : > { %v3781_v29 = vadd.f32 -1.4531521, %v3780_v11 }
0x19a8   : > { %v3782_v35 = vmul.f32 %v5062_v27, %v3781_v29 }
0x19aa   : > { %v3783_v37 = vadd.f32 1.4214138, %v3782_v35 }
0x19ac   : > { %v3784_v40 = vmul.f32 %v5062_v27, %v3783_v37 }
0x19ae   : > { %v3785_v30 = vadd.f32 -0.28449672, %v3784_v40 }
0x19b0   : > { %v3786_v19 = vmul.f32 %v5062_v27, %v3785_v30 }
0x19b2   : > { %v3787_v32 = vadd.f32 0.2548296, %v3786_v19 }
0x19b4   : > { %v3788_v33 = vmul.f32 %v5062_v27, %v3787_v32 }
0x19b6   : > { %v3793_v42 = vmul.f32 %v5064_v41, %v3788_v33 }
0x19b8   : > { %v3794_v47 = vsub.f32 1.0, %v3793_v42 }
0x19ba   : > { %v3796_v49 = vsub.f32 0.0, %v3794_v47 }
0x19bc   : > { %v3797_v34 = vsel %vm3795_vm9, %v3794_v47, %v3796_v49 }
0x19bd   : > { %v3799_v60 = vadd.f32 1.0, %v3797_v34 }
0x19bf   : > { %v3800_v43 = vmul.f32 %v3799_v60, %v3798_v54 }
0x19c1   : > { %v3801_v6 = vpack.c.bf16 %v3800_v43, %v3800_v43 }
0x19c3   : > { %4828 = vmatmul.mubr.bf16.vlgmr.msra.gmra.mrb[60].mxu0 %v3801_v6 }
0x19c4   : > { %5078 = shalt.err (!%p5075_p3)
}
0x19c5   : > { %s5079_s28 = scalar_lea.hbm %s6133_s23, 128  ;;  %s5083_s26 = scalar_lea.hbm %s6261_s18, 256 }
0x19c6   : > { %p5080_p4 = scmp.ne.s32.totalorder %s6133_s23, %s5079_s28  ;;  %p5084_p9 = scmp.lt.u32.totalorder %s6133_s23, %s6261_s18 }
0x19c7   : > { %p5085_p10 = scmp.lt.u32.totalorder %s5083_s26, %s5079_s28  ;;  %p5087_p12 = scmp.lt.u32.totalorder %s5079_s28, %s6133_s23 }
0x19c8   : > { %p5081_p7 = pnand %p5080_p4, %p5339_p5 }
0x19c9   : > { %p5086_p11 = por %p5085_p10, %p5084_p9 }
0x19ca   : > { %p5082_p8 = pneg %p5081_p7 }
0x19cb   : > { %p5088_p13 = por %p5087_p12, %p5086_p11 }
0x19cd   : > { %p5089_p0 = pnand %p5088_p13, %p5082_p8 }
0x19cf   : > { %5092 = shalt.err (!%p5089_p0)
}
0x19d0   : > { %4869 = dma.vmem_to_hbm [thread:$0]  (%p5339_p5), %s6136_s27, 128, %s6133_s23, %s6139_s25  }
0x19d1   : > { %s6168_s28 = scalar_lea.hbm %s6260_s17, %s4360_s29  ;;  %s3898_s0 = scalar_lea.sflag [#allocation3], %s5501_s20 }
0x19d2   : > { %s5093_s21 = scalar_lea.vmem %s6126_s19, 256  ;;  %s5195_s26 = smov [#allocation2]  }
0x19d3   : > { %p5094_p1 = scmp.ne.s32.totalorder %s6126_s19, %s5093_s21  ;;  %s5097_s22 = sshll.u32 %s5195_s26, 4  ;;  %s5098_s22 = int_to_ptr.vmem [resolvable:$false] %s5097_s22 }
0x19d4   : > { %s5099_s8 = scalar_lea.vmem %s5098_s22, 512  ;;  %p5100_p4 = scmp.lt.s32.totalorder %s6126_s19, %s5098_s22 }
0x19d5   : > { %p5095_p2 = pnand %p5094_p1, %p5339_p5  ;;  %p5101_p7 = scmp.lt.s32.totalorder %s5099_s8, %s5093_s21 }
0x19d7   : > { %p5096_p3 = pneg %p5095_p2  ;;  %p5102_p8 = por %p5101_p7, %p5100_p4 }
0x19d9   : > { %p5103_p9 = pnand %p5102_p8, %p5096_p3 }
0x19db   : > { %5106 = shalt.err (!%p5103_p9)
}
0x19dc   : > { %s5107_s23 = scalar_lea.hbm %s6168_s28, 256  ;;  %s5111_s24 = scalar_lea.hbm %s6260_s17, 512 }
0x19dd   : > { %p5108_p10 = scmp.ne.s32.totalorder %s6168_s28, %s5107_s23  ;;  %p5112_p13 = scmp.lt.u32.totalorder %s6168_s28, %s6260_s17 }
0x19de   : > { %p5113_p0 = scmp.lt.u32.totalorder %s5111_s24, %s5107_s23  ;;  %p5115_p2 = scmp.lt.u32.totalorder %s5107_s23, %s6168_s28 }
0x19df   : > { %p5109_p11 = pnand %p5108_p10, %p5339_p5 }
0x19e0   : > { %p5114_p1 = por %p5113_p0, %p5112_p13 }
0x19e1   : > { %p5110_p12 = pneg %p5109_p11 }
0x19e2   : > { %p5116_p3 = por %p5115_p2, %p5114_p1 }
0x19e4   : > { %p5117_p4 = pnand %p5116_p3, %p5110_p12 }
0x19e6   : > { %5120 = shalt.err (!%p5117_p4)
}
0x19e7   : > { %s5196_s21 = smov 128   ;;  %s5197_s22 = smov 8   ;;  %v3805_v36 = vrot.slane %v5971_v14, %v5672_v7 }
0x19e8   : > { %4868 = dma.vmem_to_hbm [thread:$0]  (%p5339_p5), %s6126_s19, 256, %s6168_s28, %s3898_s0, %s5196_s21, %s5196_s21, %s5197_s22  }
0x19e9   : > { %s4154_s8 = sshll.u32 %s5501_s20, 2  ;;  %s4353_s23 = sshll.u32 %s5320_s1, 6 }
0x19ea   : > { %s706_s27 = scalar_lea.vmem [#allocation6], %s4154_s8  ;;  %s6305_s19 = sld [smem:[#allocation20_spill]] }
0x19eb   : > { %s3950_s29 = sshll.u32 %s706_s27, 4  ;;  %s5198_s1 = smov [#allocation6]   ;;  %s3951_s29 = int_to_ptr.vmem [resolvable:$true] %s3950_s29 }
0x19ec   : > { %s5121_s28 = scalar_lea.vmem %s3951_s29, 64  ;;  %s5125_s0 = sshll.u32 %s5198_s1, 4  ;;  %s5126_s0 = int_to_ptr.vmem [resolvable:$false] %s5125_s0 }
0x19ed   : > { %p5122_p7 = scmp.ne.s32.totalorder %s3951_s29, %s5121_s28  ;;  %s5127_s26 = scalar_lea.vmem %s5126_s0, 128 }
0x19ee   : > { %p5128_p10 = scmp.lt.s32.totalorder %s3951_s29, %s5126_s0  ;;  %p5129_p11 = scmp.lt.s32.totalorder %s5127_s26, %s5121_s28 }
0x19ef   : > { %p5123_p8 = pnand %p5122_p7, %p5339_p5 }
0x19f0   : > { %s6203_s20 = scalar_lea.hbm %s6305_s19, %s4353_s23  ;;  %p5130_p12 = por %p5129_p11, %p5128_p10 }
0x19f1   : > { %p5124_p9 = pneg %p5123_p8 }
0x19f3   : > { %p5131_p13 = pnand %p5130_p12, %p5124_p9 }
0x1a96   : > { %v3888_v46 = vpop.f32.mrb[60].mxu0 }
0x1a97   : > { %v3889_v51 = vadd.f32 %v3888_v46, %v3805_v36  ;;  %v4829_v57 = vpop.f32.mrb[61].mxu0 }
0x1a98   : > { %v3891_v56 = vpop.f32.mrb[62].mxu0 }
0x1a99   : > { %v3894_v58 = vmul.f32 %v3889_v51, %v5906_v21  ;;  %v4830_v59 = vpop.f32.mrb[63].mxu0 }
0x1a9b   : > { %v3895_v61 = vadd.f32 %v3894_v58, %v6073_v50 }
0x1a9d   : > { %3896 = vst.msk [vmem:[%s706_s27] sm:$0xf] %vm2771_vm13, %v3895_v61 }
0x1a9e   : > { %5134 = shalt.err (!%p5131_p13)
}
0x1a9f   : > { %s5135_s21 = scalar_lea.hbm %s6203_s20, 64  ;;  %s5139_s23 = scalar_lea.hbm %s6305_s19, 128 }
0x1aa0   : > { %p5136_p0 = scmp.ne.s32.totalorder %s6203_s20, %s5135_s21  ;;  %p5140_p3 = scmp.lt.u32.totalorder %s6203_s20, %s6305_s19 }
0x1aa1   : > { %p5141_p4 = scmp.lt.u32.totalorder %s5139_s23, %s5135_s21  ;;  %p5143_p8 = scmp.lt.u32.totalorder %s5135_s21, %s6203_s20 }
0x1aa2   : > { %p5137_p1 = pnand %p5136_p0, %p5339_p5 }
0x1aa3   : > { %p5142_p7 = por %p5141_p4, %p5140_p3 }
0x1aa4   : > { %p5138_p2 = pneg %p5137_p1 }
0x1aa5   : > { %p5144_p9 = por %p5143_p8, %p5142_p7 }
0x1aa7   : > { %p5145_p10 = pnand %p5144_p9, %p5138_p2 }
0x1aa9   : > { %5148 = shalt.err (!%p5145_p10)
}
0x1aaa   : > { %4870 = dma.vmem_to_hbm [thread:$0]  (%p5339_p5), %s3951_s29, 64, %s6203_s20, %s6139_s25  }
0x1aab PF: > { %s6306_s2 = sld [smem:[#allocation11_spill]]  ;;  %s6307_s28 = sld [smem:[#allocation9_spill]] }
0x1ab1   : > { %p4884_p11 = scmp.ge.s32.totalorder %s6306_s2, 2  ;;  %s3962_s0 = sand.u32 1, %s6307_s28  }
0x1ab2   : > { %s3963_s26 = scalar_lea.sflag [#allocation3], %s3962_s0 }
0x1ab3   : > { %p4875_p12 = pnand %p4884_p11, %p5343_p6 }
0x1ab5   : > { %5166 = dma.done.wait (!%p4875_p12), %s3963_s26, 256  }
0x1ab6   : > { %5168 = vsyncadd (!%p4875_p12), %s3963_s26, 4294967040  ;;  %s6309_s21 = sadd.s32 4294967294, %s6306_s2  }
0x1ab7   : > { %s3971_s22 = sand.u32 1, %s6309_s21  }
0x1ab8   : > { %s3972_s8 = scalar_lea.sflag [#allocation5], %s3971_s22 }
0x1ab9   : > { %5170 = dma.done.wait (!%p4875_p12), %s3972_s8, 192  }
0x1aba   : > { %5172 = vsyncadd (!%p4875_p12), %s3972_s8, 4294967104  ;;  %s6310_s21 = sld [smem:[#allocation12_spill]]  ;;  %s6311_s3 = sld [smem:[#allocation10_spill]] }
0x1abb   : > { %s6312_s20 = sld [smem:[#allocation13_spill]]  ;;  %s6313_s0 = smov %s5179_s30 }
0x1ac0   : > { %p33_p5 = scmp.ge.s32.totalorder %s6310_s21, 4   ;;  %s6314_s30 = smov %s6311_s3 }
0x1ac2   :  { %35 = sbr.rel (!%p33_p5) target bundleno = 12 (0xc), region = 188 }
0x1ac9   :  { %3986 = vsyncpa [#allocation3], 1 }
0x1aca   :  { %3988 = vsyncpa [#allocation3 + $0x1], 1 }
0x1acb   :  { %3989 = vsyncpa [#allocation5], 1 }
0x1acc   :  { %3991 = vsyncpa [#allocation5 + $0x1], 1 }

</bundles_post_ra>
